<compile_context>
chip_gen: v7x
topology: tpu7x:2x2x1
jax: 0.10.0
libtpu: 0.0.40
codegen_flags: <defaults>
</compile_context>

<pallas_src>
import functools

import jax
import jax.numpy as jnp
from jax.experimental import pallas as pl
from jax.experimental.pallas import tpu as pltpu


def disp_kernel(x_ref, w_ref, o_ref, *, D, H, W):
    # x_ref: (1, C, Npad)   padded volume for one batch element, flattened as
    #                       flat index p = dp*(Hp*Wp) + hp*Wp + wp, zero-padded
    #                       past Np up to Npad (multiple of 128).
    # w_ref: (32, C)        3x3x3 conv weight, row t = kd*9 + kh*3 + kw for
    #                       t < 27; rows 27..31 are zero padding (MXU-friendly).
    # o_ref: (1, 1, H*Wp)   regressed disparity, flat rows of length Wp = W+2
    #                       (last two columns of each row are junk, stripped
    #                       by the wrapper).
    Hp, Wp = H + 2, W + 2
    hpwp = Hp * Wp
    row_len = H * Wp

    xf = x_ref[0]                         # (C, Npad)
    w = w_ref[...]                        # (32, C)

    # --- Channel contraction on the MXU: Y[t, p] = sum_c w[t, c] * x[c, p] ---
    y = jnp.dot(w, xf,
                preferred_element_type=jnp.float32,
                precision=jax.lax.Precision.HIGHEST)       # (32, Npad)

    # --- Conv3d(32 -> 1, 3x3x3, pad 1): 27 shifted flat slice-adds per depth ---
    # For output (d, h, w'):  cost = sum_t Y[t, (d+kd)*Hp*Wp + (h+kh)*Wp + (w'+kw)]
    #                              = sum_t Y[t, off_t(d) + (h*Wp + w')]
    # with off_t(d) = (d+kd)*Hp*Wp + kh*Wp + kw, so each tap contributes one
    # contiguous slice of length H*Wp.
    neg_costs = []
    for d in range(D):
        acc = None
        for kd in range(3):
            for kh in range(3):
                for kw in range(3):
                    t = kd * 9 + kh * 3 + kw
                    off = (d + kd) * hpwp + kh * Wp + kw
                    sl = y[t:t + 1, off:off + row_len]      # (1, H*Wp)
                    acc = sl if acc is None else acc + sl
        neg_costs.append(-acc)                              # softmin -> negate

    # --- Softmin over disparity fused with DisparityRegression ---
    m = neg_costs[0]
    for c in neg_costs[1:]:
        m = jnp.maximum(m, c)
    den = jnp.zeros_like(m)
    num = jnp.zeros_like(m)
    for d, c in enumerate(neg_costs):
        e = jnp.exp(c - m)
        den = den + e
        num = num + e * jnp.float32(d)
    disp = num * pl.reciprocal(den, approx=False)           # (1, H*Wp)

    o_ref[...] = disp[None].astype(o_ref.dtype)              # (1, 1, H*Wp)


def disp_forward(x, w_conv):
    """x: (B, 32, D, H, W) float32; w_conv: (1, 32, 3, 3, 3) float32 -> (B, H, W)."""
    B, C, D, H, W = x.shape
    Dp, Hp, Wp = D + 2, H + 2, W + 2
    hpwp = Hp * Wp
    Np = Dp * hpwp
    # Flat axis padded so the largest shifted tap slice (max index Np + 1)
    # stays in bounds and the lane dim is a multiple of 128.
    Npad = ((Np + 2 + 127) // 128) * 128
    row_len = H * Wp

    # Glue: conv padding=1 on (D, H, W), flatten spatial dims lane-dense,
    # zero-pad the flat axis; flatten + zero-pad the weight to (32, C).
    x_pad = jnp.pad(x, ((0, 0), (0, 0), (1, 1), (1, 1), (1, 1)))
    x_flat = x_pad.reshape(B, C, Np)
    x_flat = jnp.pad(x_flat, ((0, 0), (0, 0), (0, Npad - Np)))
    # (1, C, 3, 3, 3) -> (3, 3, 3, C) -> (27, C); row index = kd*9 + kh*3 + kw
    w_flat = jnp.transpose(w_conv[0], (1, 2, 3, 0)).reshape(27, C)
    w_flat = jnp.pad(w_flat, ((0, 32 - 27), (0, 0)))          # (32, C)

    kern = functools.partial(disp_kernel, D=D, H=H, W=W)
    out = pl.pallas_call(
        kern,
        out_shape=jax.ShapeDtypeStruct((B, 1, row_len), jnp.float32),
        grid=(B,),
        in_specs=[
            pl.BlockSpec((1, C, Npad), lambda b: (b, 0, 0)),
            pl.BlockSpec((32, C), lambda b: (0, 0)),
        ],
        out_specs=pl.BlockSpec((1, 1, row_len), lambda b: (b, 0, 0)),
        compiler_params=pltpu.CompilerParams(
            dimension_semantics=("parallel",),
            vmem_limit_bytes=32 * 1024 * 1024),
    )(x_flat, w_flat)

    # Strip the 2 right-pad junk columns per row.
    return out.reshape(B, H, Wp)[:, :, :W]


def disp_reference(x, w_conv):
    """Pure-JAX reference matching the PyTorch forward exactly."""
    cost = jax.lax.conv_general_dilated(
        x, w_conv, window_strides=(1, 1, 1),
        padding=((1, 1), (1, 1), (1, 1)),
        dimension_numbers=("NCDHW", "OIDHW", "NCDHW"),
        precision=jax.lax.Precision.HIGHEST)          # (B, 1, D, H, W)
    cost = cost[:, 0]                                  # squeeze channel
    p = jax.nn.softmax(-cost, axis=1)                  # Softmin over disparity
    dvals = jnp.arange(cost.shape[1], dtype=jnp.float32)[None, :, None, None]
    return jnp.sum(p * dvals, axis=1)                  # (B, H, W)


if __name__ == "__main__":
    # Small, module-consistent shapes: in-channels must be 32 (conv32x1),
    # disparity axis D == maxdisp.
    B, C, maxdisp, H, W = 2, 32, 8, 16, 16

    key = jax.random.PRNGKey(0)
    k_x, k_w = jax.random.split(key)
    x = jax.random.normal(k_x, (B, C, maxdisp, H, W), dtype=jnp.float32)

    # Deterministic Kaiming-uniform-style init for Conv3d(32, 1, 3, 3, 3), no bias.
    fan_in = C * 3 * 3 * 3
    bound = 1.0 / jnp.sqrt(jnp.float32(fan_in))
    w_conv = jax.random.uniform(
        k_w, (1, C, 3, 3, 3), dtype=jnp.float32, minval=-bound, maxval=bound)

    out = disp_forward(x, w_conv)
    out = jax.block_until_ready(out)

    ref = disp_reference(x, w_conv)
    assert out.shape == (B, H, W), out.shape
    assert jnp.allclose(out, ref, atol=1e-3, rtol=1e-3), (
        float(jnp.max(jnp.abs(out - ref))))

    print("KERNEL_OK")
</pallas_src>

<mosaic_0001>
module attributes {stable_mosaic.version = 11 : i64} {
  func.func @disp_kernel(%arg0: i32, %arg1: memref<1x32x3328xf32, #tpu.memory_space<vmem>>, %arg2: memref<32x32xf32, #tpu.memory_space<vmem>>, %arg3: memref<1x1x288xf32, #tpu.memory_space<vmem>>) attributes {dimension_semantics = [#tpu.dimension_semantics<parallel>], iteration_bounds = array<i64: 2>, scalar_prefetch = 0 : i64, scratch_operands = 0 : i64, tpu.core_type = #tpu.core_type<tc>, window_params = [{transform_indices = @transform_0, window_bounds = array<i64: 1, 32, 3328>}, {pipeline_mode = #tpu.pipeline_mode<synchronous>, transform_indices = @transform_1, window_bounds = array<i64: 32, 32>}, {transform_indices = @transform_2, window_bounds = array<i64: 1, 1, 288>}]} {
    %c0 = arith.constant 0 : index
    %c0_0 = arith.constant 0 : index
    %c0_1 = arith.constant 0 : index
    %0 = vector.load %arg1[%c0, %c0_0, %c0_1] : memref<1x32x3328xf32, #tpu.memory_space<vmem>>, vector<1x32x3328xf32>
    %1 = vector.shape_cast %0 : vector<1x32x3328xf32> to vector<32x3328xf32>
    %c0_2 = arith.constant 0 : index
    %c0_3 = arith.constant 0 : index
    %2 = vector.load %arg2[%c0_2, %c0_3] : memref<32x32xf32, #tpu.memory_space<vmem>>, vector<32x32xf32>
    %cst = arith.constant dense<0.000000e+00> : vector<32x3328xf32>
    %3 = tpu.matmul %2, %1, %cst {dimension_numbers = #tpu.dot_dimension_numbers<[1], [0], [0], [1], [0, 0, 1, 1], [], []>, precision = #tpu.contract_precision<fp32>} : vector<32x32xf32>, vector<32x3328xf32>, vector<32x3328xf32> -> vector<32x3328xf32>
    %4 = vector.extract_strided_slice %3 {offsets = [0, 0], sizes = [1, 288], strides = [1, 1]} : vector<32x3328xf32> to vector<1x288xf32>
    %5 = vector.extract_strided_slice %3 {offsets = [1, 1], sizes = [1, 288], strides = [1, 1]} : vector<32x3328xf32> to vector<1x288xf32>
    %6 = arith.addf %4, %5 : vector<1x288xf32>
    %7 = vector.extract_strided_slice %3 {offsets = [2, 2], sizes = [1, 288], strides = [1, 1]} : vector<32x3328xf32> to vector<1x288xf32>
    %8 = arith.addf %6, %7 : vector<1x288xf32>
    %9 = vector.extract_strided_slice %3 {offsets = [3, 18], sizes = [1, 288], strides = [1, 1]} : vector<32x3328xf32> to vector<1x288xf32>
    %10 = arith.addf %8, %9 : vector<1x288xf32>
    %11 = vector.extract_strided_slice %3 {offsets = [4, 19], sizes = [1, 288], strides = [1, 1]} : vector<32x3328xf32> to vector<1x288xf32>
    %12 = arith.addf %10, %11 : vector<1x288xf32>
    %13 = vector.extract_strided_slice %3 {offsets = [5, 20], sizes = [1, 288], strides = [1, 1]} : vector<32x3328xf32> to vector<1x288xf32>
    %14 = arith.addf %12, %13 : vector<1x288xf32>
    %15 = vector.extract_strided_slice %3 {offsets = [6, 36], sizes = [1, 288], strides = [1, 1]} : vector<32x3328xf32> to vector<1x288xf32>
    %16 = arith.addf %14, %15 : vector<1x288xf32>
    %17 = vector.extract_strided_slice %3 {offsets = [7, 37], sizes = [1, 288], strides = [1, 1]} : vector<32x3328xf32> to vector<1x288xf32>
    %18 = arith.addf %16, %17 : vector<1x288xf32>
    %19 = vector.extract_strided_slice %3 {offsets = [8, 38], sizes = [1, 288], strides = [1, 1]} : vector<32x3328xf32> to vector<1x288xf32>
    %20 = arith.addf %18, %19 : vector<1x288xf32>
    %21 = vector.extract_strided_slice %3 {offsets = [9, 324], sizes = [1, 288], strides = [1, 1]} : vector<32x3328xf32> to vector<1x288xf32>
    %22 = arith.addf %20, %21 : vector<1x288xf32>
    %23 = vector.extract_strided_slice %3 {offsets = [10, 325], sizes = [1, 288], strides = [1, 1]} : vector<32x3328xf32> to vector<1x288xf32>
    %24 = arith.addf %22, %23 : vector<1x288xf32>
    %25 = vector.extract_strided_slice %3 {offsets = [11, 326], sizes = [1, 288], strides = [1, 1]} : vector<32x3328xf32> to vector<1x288xf32>
    %26 = arith.addf %24, %25 : vector<1x288xf32>
    %27 = vector.extract_strided_slice %3 {offsets = [12, 342], sizes = [1, 288], strides = [1, 1]} : vector<32x3328xf32> to vector<1x288xf32>
    %28 = arith.addf %26, %27 : vector<1x288xf32>
    %29 = vector.extract_strided_slice %3 {offsets = [13, 343], sizes = [1, 288], strides = [1, 1]} : vector<32x3328xf32> to vector<1x288xf32>
    %30 = arith.addf %28, %29 : vector<1x288xf32>
    %31 = vector.extract_strided_slice %3 {offsets = [14, 344], sizes = [1, 288], strides = [1, 1]} : vector<32x3328xf32> to vector<1x288xf32>
    %32 = arith.addf %30, %31 : vector<1x288xf32>
    %33 = vector.extract_strided_slice %3 {offsets = [15, 360], sizes = [1, 288], strides = [1, 1]} : vector<32x3328xf32> to vector<1x288xf32>
    %34 = arith.addf %32, %33 : vector<1x288xf32>
    %35 = vector.extract_strided_slice %3 {offsets = [16, 361], sizes = [1, 288], strides = [1, 1]} : vector<32x3328xf32> to vector<1x288xf32>
    %36 = arith.addf %34, %35 : vector<1x288xf32>
    %37 = vector.extract_strided_slice %3 {offsets = [17, 362], sizes = [1, 288], strides = [1, 1]} : vector<32x3328xf32> to vector<1x288xf32>
    %38 = arith.addf %36, %37 : vector<1x288xf32>
    %39 = vector.extract_strided_slice %3 {offsets = [18, 648], sizes = [1, 288], strides = [1, 1]} : vector<32x3328xf32> to vector<1x288xf32>
    %40 = arith.addf %38, %39 : vector<1x288xf32>
    %41 = vector.extract_strided_slice %3 {offsets = [19, 649], sizes = [1, 288], strides = [1, 1]} : vector<32x3328xf32> to vector<1x288xf32>
    %42 = arith.addf %40, %41 : vector<1x288xf32>
    %43 = vector.extract_strided_slice %3 {offsets = [20, 650], sizes = [1, 288], strides = [1, 1]} : vector<32x3328xf32> to vector<1x288xf32>
    %44 = arith.addf %42, %43 : vector<1x288xf32>
    %45 = vector.extract_strided_slice %3 {offsets = [21, 666], sizes = [1, 288], strides = [1, 1]} : vector<32x3328xf32> to vector<1x288xf32>
    %46 = arith.addf %44, %45 : vector<1x288xf32>
    %47 = vector.extract_strided_slice %3 {offsets = [22, 667], sizes = [1, 288], strides = [1, 1]} : vector<32x3328xf32> to vector<1x288xf32>
    %48 = arith.addf %46, %47 : vector<1x288xf32>
    %49 = vector.extract_strided_slice %3 {offsets = [23, 668], sizes = [1, 288], strides = [1, 1]} : vector<32x3328xf32> to vector<1x288xf32>
    %50 = arith.addf %48, %49 : vector<1x288xf32>
    %51 = vector.extract_strided_slice %3 {offsets = [24, 684], sizes = [1, 288], strides = [1, 1]} : vector<32x3328xf32> to vector<1x288xf32>
    %52 = arith.addf %50, %51 : vector<1x288xf32>
    %53 = vector.extract_strided_slice %3 {offsets = [25, 685], sizes = [1, 288], strides = [1, 1]} : vector<32x3328xf32> to vector<1x288xf32>
    %54 = arith.addf %52, %53 : vector<1x288xf32>
    %55 = vector.extract_strided_slice %3 {offsets = [26, 686], sizes = [1, 288], strides = [1, 1]} : vector<32x3328xf32> to vector<1x288xf32>
    %56 = arith.addf %54, %55 : vector<1x288xf32>
    %cst_4 = arith.constant 0.000000e+00 : f32
    %57 = vector.broadcast %cst_4 : f32 to vector<1x288xf32>
    %58 = arith.subf %57, %56 : vector<1x288xf32>
    %59 = vector.extract_strided_slice %3 {offsets = [0, 324], sizes = [1, 288], strides = [1, 1]} : vector<32x3328xf32> to vector<1x288xf32>
    %60 = vector.extract_strided_slice %3 {offsets = [1, 325], sizes = [1, 288], strides = [1, 1]} : vector<32x3328xf32> to vector<1x288xf32>
    %61 = arith.addf %59, %60 : vector<1x288xf32>
    %62 = vector.extract_strided_slice %3 {offsets = [2, 326], sizes = [1, 288], strides = [1, 1]} : vector<32x3328xf32> to vector<1x288xf32>
    %63 = arith.addf %61, %62 : vector<1x288xf32>
    %64 = vector.extract_strided_slice %3 {offsets = [3, 342], sizes = [1, 288], strides = [1, 1]} : vector<32x3328xf32> to vector<1x288xf32>
    %65 = arith.addf %63, %64 : vector<1x288xf32>
    %66 = vector.extract_strided_slice %3 {offsets = [4, 343], sizes = [1, 288], strides = [1, 1]} : vector<32x3328xf32> to vector<1x288xf32>
    %67 = arith.addf %65, %66 : vector<1x288xf32>
    %68 = vector.extract_strided_slice %3 {offsets = [5, 344], sizes = [1, 288], strides = [1, 1]} : vector<32x3328xf32> to vector<1x288xf32>
    %69 = arith.addf %67, %68 : vector<1x288xf32>
    %70 = vector.extract_strided_slice %3 {offsets = [6, 360], sizes = [1, 288], strides = [1, 1]} : vector<32x3328xf32> to vector<1x288xf32>
    %71 = arith.addf %69, %70 : vector<1x288xf32>
    %72 = vector.extract_strided_slice %3 {offsets = [7, 361], sizes = [1, 288], strides = [1, 1]} : vector<32x3328xf32> to vector<1x288xf32>
    %73 = arith.addf %71, %72 : vector<1x288xf32>
    %74 = vector.extract_strided_slice %3 {offsets = [8, 362], sizes = [1, 288], strides = [1, 1]} : vector<32x3328xf32> to vector<1x288xf32>
    %75 = arith.addf %73, %74 : vector<1x288xf32>
    %76 = vector.extract_strided_slice %3 {offsets = [9, 648], sizes = [1, 288], strides = [1, 1]} : vector<32x3328xf32> to vector<1x288xf32>
    %77 = arith.addf %75, %76 : vector<1x288xf32>
    %78 = vector.extract_strided_slice %3 {offsets = [10, 649], sizes = [1, 288], strides = [1, 1]} : vector<32x3328xf32> to vector<1x288xf32>
    %79 = arith.addf %77, %78 : vector<1x288xf32>
    %80 = vector.extract_strided_slice %3 {offsets = [11, 650], sizes = [1, 288], strides = [1, 1]} : vector<32x3328xf32> to vector<1x288xf32>
    %81 = arith.addf %79, %80 : vector<1x288xf32>
    %82 = vector.extract_strided_slice %3 {offsets = [12, 666], sizes = [1, 288], strides = [1, 1]} : vector<32x3328xf32> to vector<1x288xf32>
    %83 = arith.addf %81, %82 : vector<1x288xf32>
    %84 = vector.extract_strided_slice %3 {offsets = [13, 667], sizes = [1, 288], strides = [1, 1]} : vector<32x3328xf32> to vector<1x288xf32>
    %85 = arith.addf %83, %84 : vector<1x288xf32>
    %86 = vector.extract_strided_slice %3 {offsets = [14, 668], sizes = [1, 288], strides = [1, 1]} : vector<32x3328xf32> to vector<1x288xf32>
    %87 = arith.addf %85, %86 : vector<1x288xf32>
    %88 = vector.extract_strided_slice %3 {offsets = [15, 684], sizes = [1, 288], strides = [1, 1]} : vector<32x3328xf32> to vector<1x288xf32>
    %89 = arith.addf %87, %88 : vector<1x288xf32>
    %90 = vector.extract_strided_slice %3 {offsets = [16, 685], sizes = [1, 288], strides = [1, 1]} : vector<32x3328xf32> to vector<1x288xf32>
    %91 = arith.addf %89, %90 : vector<1x288xf32>
    %92 = vector.extract_strided_slice %3 {offsets = [17, 686], sizes = [1, 288], strides = [1, 1]} : vector<32x3328xf32> to vector<1x288xf32>
    %93 = arith.addf %91, %92 : vector<1x288xf32>
    %94 = vector.extract_strided_slice %3 {offsets = [18, 972], sizes = [1, 288], strides = [1, 1]} : vector<32x3328xf32> to vector<1x288xf32>
    %95 = arith.addf %93, %94 : vector<1x288xf32>
    %96 = vector.extract_strided_slice %3 {offsets = [19, 973], sizes = [1, 288], strides = [1, 1]} : vector<32x3328xf32> to vector<1x288xf32>
    %97 = arith.addf %95, %96 : vector<1x288xf32>
    %98 = vector.extract_strided_slice %3 {offsets = [20, 974], sizes = [1, 288], strides = [1, 1]} : vector<32x3328xf32> to vector<1x288xf32>
    %99 = arith.addf %97, %98 : vector<1x288xf32>
    %100 = vector.extract_strided_slice %3 {offsets = [21, 990], sizes = [1, 288], strides = [1, 1]} : vector<32x3328xf32> to vector<1x288xf32>
    %101 = arith.addf %99, %100 : vector<1x288xf32>
    %102 = vector.extract_strided_slice %3 {offsets = [22, 991], sizes = [1, 288], strides = [1, 1]} : vector<32x3328xf32> to vector<1x288xf32>
    %103 = arith.addf %101, %102 : vector<1x288xf32>
    %104 = vector.extract_strided_slice %3 {offsets = [23, 992], sizes = [1, 288], strides = [1, 1]} : vector<32x3328xf32> to vector<1x288xf32>
    %105 = arith.addf %103, %104 : vector<1x288xf32>
    %106 = vector.extract_strided_slice %3 {offsets = [24, 1008], sizes = [1, 288], strides = [1, 1]} : vector<32x3328xf32> to vector<1x288xf32>
    %107 = arith.addf %105, %106 : vector<1x288xf32>
    %108 = vector.extract_strided_slice %3 {offsets = [25, 1009], sizes = [1, 288], strides = [1, 1]} : vector<32x3328xf32> to vector<1x288xf32>
    %109 = arith.addf %107, %108 : vector<1x288xf32>
    %110 = vector.extract_strided_slice %3 {offsets = [26, 1010], sizes = [1, 288], strides = [1, 1]} : vector<32x3328xf32> to vector<1x288xf32>
    %111 = arith.addf %109, %110 : vector<1x288xf32>
    %cst_5 = arith.constant 0.000000e+00 : f32
    %112 = vector.broadcast %cst_5 : f32 to vector<1x288xf32>
    %113 = arith.subf %112, %111 : vector<1x288xf32>
    %114 = vector.extract_strided_slice %3 {offsets = [0, 648], sizes = [1, 288], strides = [1, 1]} : vector<32x3328xf32> to vector<1x288xf32>
    %115 = vector.extract_strided_slice %3 {offsets = [1, 649], sizes = [1, 288], strides = [1, 1]} : vector<32x3328xf32> to vector<1x288xf32>
    %116 = arith.addf %114, %115 : vector<1x288xf32>
    %117 = vector.extract_strided_slice %3 {offsets = [2, 650], sizes = [1, 288], strides = [1, 1]} : vector<32x3328xf32> to vector<1x288xf32>
    %118 = arith.addf %116, %117 : vector<1x288xf32>
    %119 = vector.extract_strided_slice %3 {offsets = [3, 666], sizes = [1, 288], strides = [1, 1]} : vector<32x3328xf32> to vector<1x288xf32>
    %120 = arith.addf %118, %119 : vector<1x288xf32>
    %121 = vector.extract_strided_slice %3 {offsets = [4, 667], sizes = [1, 288], strides = [1, 1]} : vector<32x3328xf32> to vector<1x288xf32>
    %122 = arith.addf %120, %121 : vector<1x288xf32>
    %123 = vector.extract_strided_slice %3 {offsets = [5, 668], sizes = [1, 288], strides = [1, 1]} : vector<32x3328xf32> to vector<1x288xf32>
    %124 = arith.addf %122, %123 : vector<1x288xf32>
    %125 = vector.extract_strided_slice %3 {offsets = [6, 684], sizes = [1, 288], strides = [1, 1]} : vector<32x3328xf32> to vector<1x288xf32>
    %126 = arith.addf %124, %125 : vector<1x288xf32>
    %127 = vector.extract_strided_slice %3 {offsets = [7, 685], sizes = [1, 288], strides = [1, 1]} : vector<32x3328xf32> to vector<1x288xf32>
    %128 = arith.addf %126, %127 : vector<1x288xf32>
    %129 = vector.extract_strided_slice %3 {offsets = [8, 686], sizes = [1, 288], strides = [1, 1]} : vector<32x3328xf32> to vector<1x288xf32>
    %130 = arith.addf %128, %129 : vector<1x288xf32>
    %131 = vector.extract_strided_slice %3 {offsets = [9, 972], sizes = [1, 288], strides = [1, 1]} : vector<32x3328xf32> to vector<1x288xf32>
    %132 = arith.addf %130, %131 : vector<1x288xf32>
    %133 = vector.extract_strided_slice %3 {offsets = [10, 973], sizes = [1, 288], strides = [1, 1]} : vector<32x3328xf32> to vector<1x288xf32>
    %134 = arith.addf %132, %133 : vector<1x288xf32>
    %135 = vector.extract_strided_slice %3 {offsets = [11, 974], sizes = [1, 288], strides = [1, 1]} : vector<32x3328xf32> to vector<1x288xf32>
    %136 = arith.addf %134, %135 : vector<1x288xf32>
    %137 = vector.extract_strided_slice %3 {offsets = [12, 990], sizes = [1, 288], strides = [1, 1]} : vector<32x3328xf32> to vector<1x288xf32>
    %138 = arith.addf %136, %137 : vector<1x288xf32>
    %139 = vector.extract_strided_slice %3 {offsets = [13, 991], sizes = [1, 288], strides = [1, 1]} : vector<32x3328xf32> to vector<1x288xf32>
    %140 = arith.addf %138, %139 : vector<1x288xf32>
    %141 = vector.extract_strided_slice %3 {offsets = [14, 992], sizes = [1, 288], strides = [1, 1]} : vector<32x3328xf32> to vector<1x288xf32>
    %142 = arith.addf %140, %141 : vector<1x288xf32>
    %143 = vector.extract_strided_slice %3 {offsets = [15, 1008], sizes = [1, 288], strides = [1, 1]} : vector<32x3328xf32> to vector<1x288xf32>
    %144 = arith.addf %142, %143 : vector<1x288xf32>
    %145 = vector.extract_strided_slice %3 {offsets = [16, 1009], sizes = [1, 288], strides = [1, 1]} : vector<32x3328xf32> to vector<1x288xf32>
    %146 = arith.addf %144, %145 : vector<1x288xf32>
    %147 = vector.extract_strided_slice %3 {offsets = [17, 1010], sizes = [1, 288], strides = [1, 1]} : vector<32x3328xf32> to vector<1x288xf32>
    %148 = arith.addf %146, %147 : vector<1x288xf32>
    %149 = vector.extract_strided_slice %3 {offsets = [18, 1296], sizes = [1, 288], strides = [1, 1]} : vector<32x3328xf32> to vector<1x288xf32>
    %150 = arith.addf %148, %149 : vector<1x288xf32>
    %151 = vector.extract_strided_slice %3 {offsets = [19, 1297], sizes = [1, 288], strides = [1, 1]} : vector<32x3328xf32> to vector<1x288xf32>
    %152 = arith.addf %150, %151 : vector<1x288xf32>
    %153 = vector.extract_strided_slice %3 {offsets = [20, 1298], sizes = [1, 288], strides = [1, 1]} : vector<32x3328xf32> to vector<1x288xf32>
    %154 = arith.addf %152, %153 : vector<1x288xf32>
    %155 = vector.extract_strided_slice %3 {offsets = [21, 1314], sizes = [1, 288], strides = [1, 1]} : vector<32x3328xf32> to vector<1x288xf32>
    %156 = arith.addf %154, %155 : vector<1x288xf32>
    %157 = vector.extract_strided_slice %3 {offsets = [22, 1315], sizes = [1, 288], strides = [1, 1]} : vector<32x3328xf32> to vector<1x288xf32>
    %158 = arith.addf %156, %157 : vector<1x288xf32>
    %159 = vector.extract_strided_slice %3 {offsets = [23, 1316], sizes = [1, 288], strides = [1, 1]} : vector<32x3328xf32> to vector<1x288xf32>
    %160 = arith.addf %158, %159 : vector<1x288xf32>
    %161 = vector.extract_strided_slice %3 {offsets = [24, 1332], sizes = [1, 288], strides = [1, 1]} : vector<32x3328xf32> to vector<1x288xf32>
    %162 = arith.addf %160, %161 : vector<1x288xf32>
    %163 = vector.extract_strided_slice %3 {offsets = [25, 1333], sizes = [1, 288], strides = [1, 1]} : vector<32x3328xf32> to vector<1x288xf32>
    %164 = arith.addf %162, %163 : vector<1x288xf32>
    %165 = vector.extract_strided_slice %3 {offsets = [26, 1334], sizes = [1, 288], strides = [1, 1]} : vector<32x3328xf32> to vector<1x288xf32>
    %166 = arith.addf %164, %165 : vector<1x288xf32>
    %cst_6 = arith.constant 0.000000e+00 : f32
    %167 = vector.broadcast %cst_6 : f32 to vector<1x288xf32>
    %168 = arith.subf %167, %166 : vector<1x288xf32>
    %169 = vector.extract_strided_slice %3 {offsets = [0, 972], sizes = [1, 288], strides = [1, 1]} : vector<32x3328xf32> to vector<1x288xf32>
    %170 = vector.extract_strided_slice %3 {offsets = [1, 973], sizes = [1, 288], strides = [1, 1]} : vector<32x3328xf32> to vector<1x288xf32>
    %171 = arith.addf %169, %170 : vector<1x288xf32>
    %172 = vector.extract_strided_slice %3 {offsets = [2, 974], sizes = [1, 288], strides = [1, 1]} : vector<32x3328xf32> to vector<1x288xf32>
    %173 = arith.addf %171, %172 : vector<1x288xf32>
    %174 = vector.extract_strided_slice %3 {offsets = [3, 990], sizes = [1, 288], strides = [1, 1]} : vector<32x3328xf32> to vector<1x288xf32>
    %175 = arith.addf %173, %174 : vector<1x288xf32>
    %176 = vector.extract_strided_slice %3 {offsets = [4, 991], sizes = [1, 288], strides = [1, 1]} : vector<32x3328xf32> to vector<1x288xf32>
    %177 = arith.addf %175, %176 : vector<1x288xf32>
    %178 = vector.extract_strided_slice %3 {offsets = [5, 992], sizes = [1, 288], strides = [1, 1]} : vector<32x3328xf32> to vector<1x288xf32>
    %179 = arith.addf %177, %178 : vector<1x288xf32>
    %180 = vector.extract_strided_slice %3 {offsets = [6, 1008], sizes = [1, 288], strides = [1, 1]} : vector<32x3328xf32> to vector<1x288xf32>
    %181 = arith.addf %179, %180 : vector<1x288xf32>
    %182 = vector.extract_strided_slice %3 {offsets = [7, 1009], sizes = [1, 288], strides = [1, 1]} : vector<32x3328xf32> to vector<1x288xf32>
    %183 = arith.addf %181, %182 : vector<1x288xf32>
    %184 = vector.extract_strided_slice %3 {offsets = [8, 1010], sizes = [1, 288], strides = [1, 1]} : vector<32x3328xf32> to vector<1x288xf32>
    %185 = arith.addf %183, %184 : vector<1x288xf32>
    %186 = vector.extract_strided_slice %3 {offsets = [9, 1296], sizes = [1, 288], strides = [1, 1]} : vector<32x3328xf32> to vector<1x288xf32>
    %187 = arith.addf %185, %186 : vector<1x288xf32>
    %188 = vector.extract_strided_slice %3 {offsets = [10, 1297], sizes = [1, 288], strides = [1, 1]} : vector<32x3328xf32> to vector<1x288xf32>
    %189 = arith.addf %187, %188 : vector<1x288xf32>
    %190 = vector.extract_strided_slice %3 {offsets = [11, 1298], sizes = [1, 288], strides = [1, 1]} : vector<32x3328xf32> to vector<1x288xf32>
    %191 = arith.addf %189, %190 : vector<1x288xf32>
    %192 = vector.extract_strided_slice %3 {offsets = [12, 1314], sizes = [1, 288], strides = [1, 1]} : vector<32x3328xf32> to vector<1x288xf32>
    %193 = arith.addf %191, %192 : vector<1x288xf32>
    %194 = vector.extract_strided_slice %3 {offsets = [13, 1315], sizes = [1, 288], strides = [1, 1]} : vector<32x3328xf32> to vector<1x288xf32>
    %195 = arith.addf %193, %194 : vector<1x288xf32>
    %196 = vector.extract_strided_slice %3 {offsets = [14, 1316], sizes = [1, 288], strides = [1, 1]} : vector<32x3328xf32> to vector<1x288xf32>
    %197 = arith.addf %195, %196 : vector<1x288xf32>
    %198 = vector.extract_strided_slice %3 {offsets = [15, 1332], sizes = [1, 288], strides = [1, 1]} : vector<32x3328xf32> to vector<1x288xf32>
    %199 = arith.addf %197, %198 : vector<1x288xf32>
    %200 = vector.extract_strided_slice %3 {offsets = [16, 1333], sizes = [1, 288], strides = [1, 1]} : vector<32x3328xf32> to vector<1x288xf32>
    %201 = arith.addf %199, %200 : vector<1x288xf32>
    %202 = vector.extract_strided_slice %3 {offsets = [17, 1334], sizes = [1, 288], strides = [1, 1]} : vector<32x3328xf32> to vector<1x288xf32>
    %203 = arith.addf %201, %202 : vector<1x288xf32>
    %204 = vector.extract_strided_slice %3 {offsets = [18, 1620], sizes = [1, 288], strides = [1, 1]} : vector<32x3328xf32> to vector<1x288xf32>
    %205 = arith.addf %203, %204 : vector<1x288xf32>
    %206 = vector.extract_strided_slice %3 {offsets = [19, 1621], sizes = [1, 288], strides = [1, 1]} : vector<32x3328xf32> to vector<1x288xf32>
    %207 = arith.addf %205, %206 : vector<1x288xf32>
    %208 = vector.extract_strided_slice %3 {offsets = [20, 1622], sizes = [1, 288], strides = [1, 1]} : vector<32x3328xf32> to vector<1x288xf32>
    %209 = arith.addf %207, %208 : vector<1x288xf32>
    %210 = vector.extract_strided_slice %3 {offsets = [21, 1638], sizes = [1, 288], strides = [1, 1]} : vector<32x3328xf32> to vector<1x288xf32>
    %211 = arith.addf %209, %210 : vector<1x288xf32>
    %212 = vector.extract_strided_slice %3 {offsets = [22, 1639], sizes = [1, 288], strides = [1, 1]} : vector<32x3328xf32> to vector<1x288xf32>
    %213 = arith.addf %211, %212 : vector<1x288xf32>
    %214 = vector.extract_strided_slice %3 {offsets = [23, 1640], sizes = [1, 288], strides = [1, 1]} : vector<32x3328xf32> to vector<1x288xf32>
    %215 = arith.addf %213, %214 : vector<1x288xf32>
    %216 = vector.extract_strided_slice %3 {offsets = [24, 1656], sizes = [1, 288], strides = [1, 1]} : vector<32x3328xf32> to vector<1x288xf32>
    %217 = arith.addf %215, %216 : vector<1x288xf32>
    %218 = vector.extract_strided_slice %3 {offsets = [25, 1657], sizes = [1, 288], strides = [1, 1]} : vector<32x3328xf32> to vector<1x288xf32>
    %219 = arith.addf %217, %218 : vector<1x288xf32>
    %220 = vector.extract_strided_slice %3 {offsets = [26, 1658], sizes = [1, 288], strides = [1, 1]} : vector<32x3328xf32> to vector<1x288xf32>
    %221 = arith.addf %219, %220 : vector<1x288xf32>
    %cst_7 = arith.constant 0.000000e+00 : f32
    %222 = vector.broadcast %cst_7 : f32 to vector<1x288xf32>
    %223 = arith.subf %222, %221 : vector<1x288xf32>
    %224 = vector.extract_strided_slice %3 {offsets = [0, 1296], sizes = [1, 288], strides = [1, 1]} : vector<32x3328xf32> to vector<1x288xf32>
    %225 = vector.extract_strided_slice %3 {offsets = [1, 1297], sizes = [1, 288], strides = [1, 1]} : vector<32x3328xf32> to vector<1x288xf32>
    %226 = arith.addf %224, %225 : vector<1x288xf32>
    %227 = vector.extract_strided_slice %3 {offsets = [2, 1298], sizes = [1, 288], strides = [1, 1]} : vector<32x3328xf32> to vector<1x288xf32>
    %228 = arith.addf %226, %227 : vector<1x288xf32>
    %229 = vector.extract_strided_slice %3 {offsets = [3, 1314], sizes = [1, 288], strides = [1, 1]} : vector<32x3328xf32> to vector<1x288xf32>
    %230 = arith.addf %228, %229 : vector<1x288xf32>
    %231 = vector.extract_strided_slice %3 {offsets = [4, 1315], sizes = [1, 288], strides = [1, 1]} : vector<32x3328xf32> to vector<1x288xf32>
    %232 = arith.addf %230, %231 : vector<1x288xf32>
    %233 = vector.extract_strided_slice %3 {offsets = [5, 1316], sizes = [1, 288], strides = [1, 1]} : vector<32x3328xf32> to vector<1x288xf32>
    %234 = arith.addf %232, %233 : vector<1x288xf32>
    %235 = vector.extract_strided_slice %3 {offsets = [6, 1332], sizes = [1, 288], strides = [1, 1]} : vector<32x3328xf32> to vector<1x288xf32>
    %236 = arith.addf %234, %235 : vector<1x288xf32>
    %237 = vector.extract_strided_slice %3 {offsets = [7, 1333], sizes = [1, 288], strides = [1, 1]} : vector<32x3328xf32> to vector<1x288xf32>
    %238 = arith.addf %236, %237 : vector<1x288xf32>
    %239 = vector.extract_strided_slice %3 {offsets = [8, 1334], sizes = [1, 288], strides = [1, 1]} : vector<32x3328xf32> to vector<1x288xf32>
    %240 = arith.addf %238, %239 : vector<1x288xf32>
    %241 = vector.extract_strided_slice %3 {offsets = [9, 1620], sizes = [1, 288], strides = [1, 1]} : vector<32x3328xf32> to vector<1x288xf32>
    %242 = arith.addf %240, %241 : vector<1x288xf32>
    %243 = vector.extract_strided_slice %3 {offsets = [10, 1621], sizes = [1, 288], strides = [1, 1]} : vector<32x3328xf32> to vector<1x288xf32>
    %244 = arith.addf %242, %243 : vector<1x288xf32>
    %245 = vector.extract_strided_slice %3 {offsets = [11, 1622], sizes = [1, 288], strides = [1, 1]} : vector<32x3328xf32> to vector<1x288xf32>
    %246 = arith.addf %244, %245 : vector<1x288xf32>
    %247 = vector.extract_strided_slice %3 {offsets = [12, 1638], sizes = [1, 288], strides = [1, 1]} : vector<32x3328xf32> to vector<1x288xf32>
    %248 = arith.addf %246, %247 : vector<1x288xf32>
    %249 = vector.extract_strided_slice %3 {offsets = [13, 1639], sizes = [1, 288], strides = [1, 1]} : vector<32x3328xf32> to vector<1x288xf32>
    %250 = arith.addf %248, %249 : vector<1x288xf32>
    %251 = vector.extract_strided_slice %3 {offsets = [14, 1640], sizes = [1, 288], strides = [1, 1]} : vector<32x3328xf32> to vector<1x288xf32>
    %252 = arith.addf %250, %251 : vector<1x288xf32>
    %253 = vector.extract_strided_slice %3 {offsets = [15, 1656], sizes = [1, 288], strides = [1, 1]} : vector<32x3328xf32> to vector<1x288xf32>
    %254 = arith.addf %252, %253 : vector<1x288xf32>
    %255 = vector.extract_strided_slice %3 {offsets = [16, 1657], sizes = [1, 288], strides = [1, 1]} : vector<32x3328xf32> to vector<1x288xf32>
    %256 = arith.addf %254, %255 : vector<1x288xf32>
    %257 = vector.extract_strided_slice %3 {offsets = [17, 1658], sizes = [1, 288], strides = [1, 1]} : vector<32x3328xf32> to vector<1x288xf32>
    %258 = arith.addf %256, %257 : vector<1x288xf32>
    %259 = vector.extract_strided_slice %3 {offsets = [18, 1944], sizes = [1, 288], strides = [1, 1]} : vector<32x3328xf32> to vector<1x288xf32>
    %260 = arith.addf %258, %259 : vector<1x288xf32>
    %261 = vector.extract_strided_slice %3 {offsets = [19, 1945], sizes = [1, 288], strides = [1, 1]} : vector<32x3328xf32> to vector<1x288xf32>
    %262 = arith.addf %260, %261 : vector<1x288xf32>
    %263 = vector.extract_strided_slice %3 {offsets = [20, 1946], sizes = [1, 288], strides = [1, 1]} : vector<32x3328xf32> to vector<1x288xf32>
    %264 = arith.addf %262, %263 : vector<1x288xf32>
    %265 = vector.extract_strided_slice %3 {offsets = [21, 1962], sizes = [1, 288], strides = [1, 1]} : vector<32x3328xf32> to vector<1x288xf32>
    %266 = arith.addf %264, %265 : vector<1x288xf32>
    %267 = vector.extract_strided_slice %3 {offsets = [22, 1963], sizes = [1, 288], strides = [1, 1]} : vector<32x3328xf32> to vector<1x288xf32>
    %268 = arith.addf %266, %267 : vector<1x288xf32>
    %269 = vector.extract_strided_slice %3 {offsets = [23, 1964], sizes = [1, 288], strides = [1, 1]} : vector<32x3328xf32> to vector<1x288xf32>
    %270 = arith.addf %268, %269 : vector<1x288xf32>
    %271 = vector.extract_strided_slice %3 {offsets = [24, 1980], sizes = [1, 288], strides = [1, 1]} : vector<32x3328xf32> to vector<1x288xf32>
    %272 = arith.addf %270, %271 : vector<1x288xf32>
    %273 = vector.extract_strided_slice %3 {offsets = [25, 1981], sizes = [1, 288], strides = [1, 1]} : vector<32x3328xf32> to vector<1x288xf32>
    %274 = arith.addf %272, %273 : vector<1x288xf32>
    %275 = vector.extract_strided_slice %3 {offsets = [26, 1982], sizes = [1, 288], strides = [1, 1]} : vector<32x3328xf32> to vector<1x288xf32>
    %276 = arith.addf %274, %275 : vector<1x288xf32>
    %cst_8 = arith.constant 0.000000e+00 : f32
    %277 = vector.broadcast %cst_8 : f32 to vector<1x288xf32>
    %278 = arith.subf %277, %276 : vector<1x288xf32>
    %279 = vector.extract_strided_slice %3 {offsets = [0, 1620], sizes = [1, 288], strides = [1, 1]} : vector<32x3328xf32> to vector<1x288xf32>
    %280 = vector.extract_strided_slice %3 {offsets = [1, 1621], sizes = [1, 288], strides = [1, 1]} : vector<32x3328xf32> to vector<1x288xf32>
    %281 = arith.addf %279, %280 : vector<1x288xf32>
    %282 = vector.extract_strided_slice %3 {offsets = [2, 1622], sizes = [1, 288], strides = [1, 1]} : vector<32x3328xf32> to vector<1x288xf32>
    %283 = arith.addf %281, %282 : vector<1x288xf32>
    %284 = vector.extract_strided_slice %3 {offsets = [3, 1638], sizes = [1, 288], strides = [1, 1]} : vector<32x3328xf32> to vector<1x288xf32>
    %285 = arith.addf %283, %284 : vector<1x288xf32>
    %286 = vector.extract_strided_slice %3 {offsets = [4, 1639], sizes = [1, 288], strides = [1, 1]} : vector<32x3328xf32> to vector<1x288xf32>
    %287 = arith.addf %285, %286 : vector<1x288xf32>
    %288 = vector.extract_strided_slice %3 {offsets = [5, 1640], sizes = [1, 288], strides = [1, 1]} : vector<32x3328xf32> to vector<1x288xf32>
    %289 = arith.addf %287, %288 : vector<1x288xf32>
    %290 = vector.extract_strided_slice %3 {offsets = [6, 1656], sizes = [1, 288], strides = [1, 1]} : vector<32x3328xf32> to vector<1x288xf32>
    %291 = arith.addf %289, %290 : vector<1x288xf32>
    %292 = vector.extract_strided_slice %3 {offsets = [7, 1657], sizes = [1, 288], strides = [1, 1]} : vector<32x3328xf32> to vector<1x288xf32>
    %293 = arith.addf %291, %292 : vector<1x288xf32>
    %294 = vector.extract_strided_slice %3 {offsets = [8, 1658], sizes = [1, 288], strides = [1, 1]} : vector<32x3328xf32> to vector<1x288xf32>
    %295 = arith.addf %293, %294 : vector<1x288xf32>
    %296 = vector.extract_strided_slice %3 {offsets = [9, 1944], sizes = [1, 288], strides = [1, 1]} : vector<32x3328xf32> to vector<1x288xf32>
    %297 = arith.addf %295, %296 : vector<1x288xf32>
    %298 = vector.extract_strided_slice %3 {offsets = [10, 1945], sizes = [1, 288], strides = [1, 1]} : vector<32x3328xf32> to vector<1x288xf32>
    %299 = arith.addf %297, %298 : vector<1x288xf32>
    %300 = vector.extract_strided_slice %3 {offsets = [11, 1946], sizes = [1, 288], strides = [1, 1]} : vector<32x3328xf32> to vector<1x288xf32>
    %301 = arith.addf %299, %300 : vector<1x288xf32>
    %302 = vector.extract_strided_slice %3 {offsets = [12, 1962], sizes = [1, 288], strides = [1, 1]} : vector<32x3328xf32> to vector<1x288xf32>
    %303 = arith.addf %301, %302 : vector<1x288xf32>
    %304 = vector.extract_strided_slice %3 {offsets = [13, 1963], sizes = [1, 288], strides = [1, 1]} : vector<32x3328xf32> to vector<1x288xf32>
    %305 = arith.addf %303, %304 : vector<1x288xf32>
    %306 = vector.extract_strided_slice %3 {offsets = [14, 1964], sizes = [1, 288], strides = [1, 1]} : vector<32x3328xf32> to vector<1x288xf32>
    %307 = arith.addf %305, %306 : vector<1x288xf32>
    %308 = vector.extract_strided_slice %3 {offsets = [15, 1980], sizes = [1, 288], strides = [1, 1]} : vector<32x3328xf32> to vector<1x288xf32>
    %309 = arith.addf %307, %308 : vector<1x288xf32>
    %310 = vector.extract_strided_slice %3 {offsets = [16, 1981], sizes = [1, 288], strides = [1, 1]} : vector<32x3328xf32> to vector<1x288xf32>
    %311 = arith.addf %309, %310 : vector<1x288xf32>
    %312 = vector.extract_strided_slice %3 {offsets = [17, 1982], sizes = [1, 288], strides = [1, 1]} : vector<32x3328xf32> to vector<1x288xf32>
    %313 = arith.addf %311, %312 : vector<1x288xf32>
    %314 = vector.extract_strided_slice %3 {offsets = [18, 2268], sizes = [1, 288], strides = [1, 1]} : vector<32x3328xf32> to vector<1x288xf32>
    %315 = arith.addf %313, %314 : vector<1x288xf32>
    %316 = vector.extract_strided_slice %3 {offsets = [19, 2269], sizes = [1, 288], strides = [1, 1]} : vector<32x3328xf32> to vector<1x288xf32>
    %317 = arith.addf %315, %316 : vector<1x288xf32>
    %318 = vector.extract_strided_slice %3 {offsets = [20, 2270], sizes = [1, 288], strides = [1, 1]} : vector<32x3328xf32> to vector<1x288xf32>
    %319 = arith.addf %317, %318 : vector<1x288xf32>
    %320 = vector.extract_strided_slice %3 {offsets = [21, 2286], sizes = [1, 288], strides = [1, 1]} : vector<32x3328xf32> to vector<1x288xf32>
    %321 = arith.addf %319, %320 : vector<1x288xf32>
    %322 = vector.extract_strided_slice %3 {offsets = [22, 2287], sizes = [1, 288], strides = [1, 1]} : vector<32x3328xf32> to vector<1x288xf32>
    %323 = arith.addf %321, %322 : vector<1x288xf32>
    %324 = vector.extract_strided_slice %3 {offsets = [23, 2288], sizes = [1, 288], strides = [1, 1]} : vector<32x3328xf32> to vector<1x288xf32>
    %325 = arith.addf %323, %324 : vector<1x288xf32>
    %326 = vector.extract_strided_slice %3 {offsets = [24, 2304], sizes = [1, 288], strides = [1, 1]} : vector<32x3328xf32> to vector<1x288xf32>
    %327 = arith.addf %325, %326 : vector<1x288xf32>
    %328 = vector.extract_strided_slice %3 {offsets = [25, 2305], sizes = [1, 288], strides = [1, 1]} : vector<32x3328xf32> to vector<1x288xf32>
    %329 = arith.addf %327, %328 : vector<1x288xf32>
    %330 = vector.extract_strided_slice %3 {offsets = [26, 2306], sizes = [1, 288], strides = [1, 1]} : vector<32x3328xf32> to vector<1x288xf32>
    %331 = arith.addf %329, %330 : vector<1x288xf32>
    %cst_9 = arith.constant 0.000000e+00 : f32
    %332 = vector.broadcast %cst_9 : f32 to vector<1x288xf32>
    %333 = arith.subf %332, %331 : vector<1x288xf32>
    %334 = vector.extract_strided_slice %3 {offsets = [0, 1944], sizes = [1, 288], strides = [1, 1]} : vector<32x3328xf32> to vector<1x288xf32>
    %335 = vector.extract_strided_slice %3 {offsets = [1, 1945], sizes = [1, 288], strides = [1, 1]} : vector<32x3328xf32> to vector<1x288xf32>
    %336 = arith.addf %334, %335 : vector<1x288xf32>
    %337 = vector.extract_strided_slice %3 {offsets = [2, 1946], sizes = [1, 288], strides = [1, 1]} : vector<32x3328xf32> to vector<1x288xf32>
    %338 = arith.addf %336, %337 : vector<1x288xf32>
    %339 = vector.extract_strided_slice %3 {offsets = [3, 1962], sizes = [1, 288], strides = [1, 1]} : vector<32x3328xf32> to vector<1x288xf32>
    %340 = arith.addf %338, %339 : vector<1x288xf32>
    %341 = vector.extract_strided_slice %3 {offsets = [4, 1963], sizes = [1, 288], strides = [1, 1]} : vector<32x3328xf32> to vector<1x288xf32>
    %342 = arith.addf %340, %341 : vector<1x288xf32>
    %343 = vector.extract_strided_slice %3 {offsets = [5, 1964], sizes = [1, 288], strides = [1, 1]} : vector<32x3328xf32> to vector<1x288xf32>
    %344 = arith.addf %342, %343 : vector<1x288xf32>
    %345 = vector.extract_strided_slice %3 {offsets = [6, 1980], sizes = [1, 288], strides = [1, 1]} : vector<32x3328xf32> to vector<1x288xf32>
    %346 = arith.addf %344, %345 : vector<1x288xf32>
    %347 = vector.extract_strided_slice %3 {offsets = [7, 1981], sizes = [1, 288], strides = [1, 1]} : vector<32x3328xf32> to vector<1x288xf32>
    %348 = arith.addf %346, %347 : vector<1x288xf32>
    %349 = vector.extract_strided_slice %3 {offsets = [8, 1982], sizes = [1, 288], strides = [1, 1]} : vector<32x3328xf32> to vector<1x288xf32>
    %350 = arith.addf %348, %349 : vector<1x288xf32>
    %351 = vector.extract_strided_slice %3 {offsets = [9, 2268], sizes = [1, 288], strides = [1, 1]} : vector<32x3328xf32> to vector<1x288xf32>
    %352 = arith.addf %350, %351 : vector<1x288xf32>
    %353 = vector.extract_strided_slice %3 {offsets = [10, 2269], sizes = [1, 288], strides = [1, 1]} : vector<32x3328xf32> to vector<1x288xf32>
    %354 = arith.addf %352, %353 : vector<1x288xf32>
    %355 = vector.extract_strided_slice %3 {offsets = [11, 2270], sizes = [1, 288], strides = [1, 1]} : vector<32x3328xf32> to vector<1x288xf32>
    %356 = arith.addf %354, %355 : vector<1x288xf32>
    %357 = vector.extract_strided_slice %3 {offsets = [12, 2286], sizes = [1, 288], strides = [1, 1]} : vector<32x3328xf32> to vector<1x288xf32>
    %358 = arith.addf %356, %357 : vector<1x288xf32>
    %359 = vector.extract_strided_slice %3 {offsets = [13, 2287], sizes = [1, 288], strides = [1, 1]} : vector<32x3328xf32> to vector<1x288xf32>
    %360 = arith.addf %358, %359 : vector<1x288xf32>
    %361 = vector.extract_strided_slice %3 {offsets = [14, 2288], sizes = [1, 288], strides = [1, 1]} : vector<32x3328xf32> to vector<1x288xf32>
    %362 = arith.addf %360, %361 : vector<1x288xf32>
    %363 = vector.extract_strided_slice %3 {offsets = [15, 2304], sizes = [1, 288], strides = [1, 1]} : vector<32x3328xf32> to vector<1x288xf32>
    %364 = arith.addf %362, %363 : vector<1x288xf32>
    %365 = vector.extract_strided_slice %3 {offsets = [16, 2305], sizes = [1, 288], strides = [1, 1]} : vector<32x3328xf32> to vector<1x288xf32>
    %366 = arith.addf %364, %365 : vector<1x288xf32>
    %367 = vector.extract_strided_slice %3 {offsets = [17, 2306], sizes = [1, 288], strides = [1, 1]} : vector<32x3328xf32> to vector<1x288xf32>
    %368 = arith.addf %366, %367 : vector<1x288xf32>
    %369 = vector.extract_strided_slice %3 {offsets = [18, 2592], sizes = [1, 288], strides = [1, 1]} : vector<32x3328xf32> to vector<1x288xf32>
    %370 = arith.addf %368, %369 : vector<1x288xf32>
    %371 = vector.extract_strided_slice %3 {offsets = [19, 2593], sizes = [1, 288], strides = [1, 1]} : vector<32x3328xf32> to vector<1x288xf32>
    %372 = arith.addf %370, %371 : vector<1x288xf32>
    %373 = vector.extract_strided_slice %3 {offsets = [20, 2594], sizes = [1, 288], strides = [1, 1]} : vector<32x3328xf32> to vector<1x288xf32>
    %374 = arith.addf %372, %373 : vector<1x288xf32>
    %375 = vector.extract_strided_slice %3 {offsets = [21, 2610], sizes = [1, 288], strides = [1, 1]} : vector<32x3328xf32> to vector<1x288xf32>
    %376 = arith.addf %374, %375 : vector<1x288xf32>
    %377 = vector.extract_strided_slice %3 {offsets = [22, 2611], sizes = [1, 288], strides = [1, 1]} : vector<32x3328xf32> to vector<1x288xf32>
    %378 = arith.addf %376, %377 : vector<1x288xf32>
    %379 = vector.extract_strided_slice %3 {offsets = [23, 2612], sizes = [1, 288], strides = [1, 1]} : vector<32x3328xf32> to vector<1x288xf32>
    %380 = arith.addf %378, %379 : vector<1x288xf32>
    %381 = vector.extract_strided_slice %3 {offsets = [24, 2628], sizes = [1, 288], strides = [1, 1]} : vector<32x3328xf32> to vector<1x288xf32>
    %382 = arith.addf %380, %381 : vector<1x288xf32>
    %383 = vector.extract_strided_slice %3 {offsets = [25, 2629], sizes = [1, 288], strides = [1, 1]} : vector<32x3328xf32> to vector<1x288xf32>
    %384 = arith.addf %382, %383 : vector<1x288xf32>
    %385 = vector.extract_strided_slice %3 {offsets = [26, 2630], sizes = [1, 288], strides = [1, 1]} : vector<32x3328xf32> to vector<1x288xf32>
    %386 = arith.addf %384, %385 : vector<1x288xf32>
    %cst_10 = arith.constant 0.000000e+00 : f32
    %387 = vector.broadcast %cst_10 : f32 to vector<1x288xf32>
    %388 = arith.subf %387, %386 : vector<1x288xf32>
    %389 = vector.extract_strided_slice %3 {offsets = [0, 2268], sizes = [1, 288], strides = [1, 1]} : vector<32x3328xf32> to vector<1x288xf32>
    %390 = vector.extract_strided_slice %3 {offsets = [1, 2269], sizes = [1, 288], strides = [1, 1]} : vector<32x3328xf32> to vector<1x288xf32>
    %391 = arith.addf %389, %390 : vector<1x288xf32>
    %392 = vector.extract_strided_slice %3 {offsets = [2, 2270], sizes = [1, 288], strides = [1, 1]} : vector<32x3328xf32> to vector<1x288xf32>
    %393 = arith.addf %391, %392 : vector<1x288xf32>
    %394 = vector.extract_strided_slice %3 {offsets = [3, 2286], sizes = [1, 288], strides = [1, 1]} : vector<32x3328xf32> to vector<1x288xf32>
    %395 = arith.addf %393, %394 : vector<1x288xf32>
    %396 = vector.extract_strided_slice %3 {offsets = [4, 2287], sizes = [1, 288], strides = [1, 1]} : vector<32x3328xf32> to vector<1x288xf32>
    %397 = arith.addf %395, %396 : vector<1x288xf32>
    %398 = vector.extract_strided_slice %3 {offsets = [5, 2288], sizes = [1, 288], strides = [1, 1]} : vector<32x3328xf32> to vector<1x288xf32>
    %399 = arith.addf %397, %398 : vector<1x288xf32>
    %400 = vector.extract_strided_slice %3 {offsets = [6, 2304], sizes = [1, 288], strides = [1, 1]} : vector<32x3328xf32> to vector<1x288xf32>
    %401 = arith.addf %399, %400 : vector<1x288xf32>
    %402 = vector.extract_strided_slice %3 {offsets = [7, 2305], sizes = [1, 288], strides = [1, 1]} : vector<32x3328xf32> to vector<1x288xf32>
    %403 = arith.addf %401, %402 : vector<1x288xf32>
    %404 = vector.extract_strided_slice %3 {offsets = [8, 2306], sizes = [1, 288], strides = [1, 1]} : vector<32x3328xf32> to vector<1x288xf32>
    %405 = arith.addf %403, %404 : vector<1x288xf32>
    %406 = vector.extract_strided_slice %3 {offsets = [9, 2592], sizes = [1, 288], strides = [1, 1]} : vector<32x3328xf32> to vector<1x288xf32>
    %407 = arith.addf %405, %406 : vector<1x288xf32>
    %408 = vector.extract_strided_slice %3 {offsets = [10, 2593], sizes = [1, 288], strides = [1, 1]} : vector<32x3328xf32> to vector<1x288xf32>
    %409 = arith.addf %407, %408 : vector<1x288xf32>
    %410 = vector.extract_strided_slice %3 {offsets = [11, 2594], sizes = [1, 288], strides = [1, 1]} : vector<32x3328xf32> to vector<1x288xf32>
    %411 = arith.addf %409, %410 : vector<1x288xf32>
    %412 = vector.extract_strided_slice %3 {offsets = [12, 2610], sizes = [1, 288], strides = [1, 1]} : vector<32x3328xf32> to vector<1x288xf32>
    %413 = arith.addf %411, %412 : vector<1x288xf32>
    %414 = vector.extract_strided_slice %3 {offsets = [13, 2611], sizes = [1, 288], strides = [1, 1]} : vector<32x3328xf32> to vector<1x288xf32>
    %415 = arith.addf %413, %414 : vector<1x288xf32>
    %416 = vector.extract_strided_slice %3 {offsets = [14, 2612], sizes = [1, 288], strides = [1, 1]} : vector<32x3328xf32> to vector<1x288xf32>
    %417 = arith.addf %415, %416 : vector<1x288xf32>
    %418 = vector.extract_strided_slice %3 {offsets = [15, 2628], sizes = [1, 288], strides = [1, 1]} : vector<32x3328xf32> to vector<1x288xf32>
    %419 = arith.addf %417, %418 : vector<1x288xf32>
    %420 = vector.extract_strided_slice %3 {offsets = [16, 2629], sizes = [1, 288], strides = [1, 1]} : vector<32x3328xf32> to vector<1x288xf32>
    %421 = arith.addf %419, %420 : vector<1x288xf32>
    %422 = vector.extract_strided_slice %3 {offsets = [17, 2630], sizes = [1, 288], strides = [1, 1]} : vector<32x3328xf32> to vector<1x288xf32>
    %423 = arith.addf %421, %422 : vector<1x288xf32>
    %424 = vector.extract_strided_slice %3 {offsets = [18, 2916], sizes = [1, 288], strides = [1, 1]} : vector<32x3328xf32> to vector<1x288xf32>
    %425 = arith.addf %423, %424 : vector<1x288xf32>
    %426 = vector.extract_strided_slice %3 {offsets = [19, 2917], sizes = [1, 288], strides = [1, 1]} : vector<32x3328xf32> to vector<1x288xf32>
    %427 = arith.addf %425, %426 : vector<1x288xf32>
    %428 = vector.extract_strided_slice %3 {offsets = [20, 2918], sizes = [1, 288], strides = [1, 1]} : vector<32x3328xf32> to vector<1x288xf32>
    %429 = arith.addf %427, %428 : vector<1x288xf32>
    %430 = vector.extract_strided_slice %3 {offsets = [21, 2934], sizes = [1, 288], strides = [1, 1]} : vector<32x3328xf32> to vector<1x288xf32>
    %431 = arith.addf %429, %430 : vector<1x288xf32>
    %432 = vector.extract_strided_slice %3 {offsets = [22, 2935], sizes = [1, 288], strides = [1, 1]} : vector<32x3328xf32> to vector<1x288xf32>
    %433 = arith.addf %431, %432 : vector<1x288xf32>
    %434 = vector.extract_strided_slice %3 {offsets = [23, 2936], sizes = [1, 288], strides = [1, 1]} : vector<32x3328xf32> to vector<1x288xf32>
    %435 = arith.addf %433, %434 : vector<1x288xf32>
    %436 = vector.extract_strided_slice %3 {offsets = [24, 2952], sizes = [1, 288], strides = [1, 1]} : vector<32x3328xf32> to vector<1x288xf32>
    %437 = arith.addf %435, %436 : vector<1x288xf32>
    %438 = vector.extract_strided_slice %3 {offsets = [25, 2953], sizes = [1, 288], strides = [1, 1]} : vector<32x3328xf32> to vector<1x288xf32>
    %439 = arith.addf %437, %438 : vector<1x288xf32>
    %440 = vector.extract_strided_slice %3 {offsets = [26, 2954], sizes = [1, 288], strides = [1, 1]} : vector<32x3328xf32> to vector<1x288xf32>
    %441 = arith.addf %439, %440 : vector<1x288xf32>
    %cst_11 = arith.constant 0.000000e+00 : f32
    %442 = vector.broadcast %cst_11 : f32 to vector<1x288xf32>
    %443 = arith.subf %442, %441 : vector<1x288xf32>
    %444 = arith.maximumf %58, %113 : vector<1x288xf32>
    %445 = arith.maximumf %444, %168 : vector<1x288xf32>
    %446 = arith.maximumf %445, %223 : vector<1x288xf32>
    %447 = arith.maximumf %446, %278 : vector<1x288xf32>
    %448 = arith.maximumf %447, %333 : vector<1x288xf32>
    %449 = arith.maximumf %448, %388 : vector<1x288xf32>
    %450 = arith.maximumf %449, %443 : vector<1x288xf32>
    %cst_12 = arith.constant 0.000000e+00 : f32
    %451 = vector.broadcast %cst_12 : f32 to vector<1x288xf32>
    %cst_13 = arith.constant 0.000000e+00 : f32
    %452 = vector.broadcast %cst_13 : f32 to vector<1x288xf32>
    %453 = arith.subf %58, %450 : vector<1x288xf32>
    %454 = math.exp %453 : vector<1x288xf32>
    %455 = arith.addf %451, %454 : vector<1x288xf32>
    %cst_14 = arith.constant 0.000000e+00 : f32
    %456 = vector.broadcast %cst_14 : f32 to vector<1x288xf32>
    %457 = arith.mulf %454, %456 : vector<1x288xf32>
    %458 = arith.addf %452, %457 : vector<1x288xf32>
    %459 = arith.subf %113, %450 : vector<1x288xf32>
    %460 = math.exp %459 : vector<1x288xf32>
    %461 = arith.addf %455, %460 : vector<1x288xf32>
    %cst_15 = arith.constant 1.000000e+00 : f32
    %462 = vector.broadcast %cst_15 : f32 to vector<1x288xf32>
    %463 = arith.mulf %460, %462 : vector<1x288xf32>
    %464 = arith.addf %458, %463 : vector<1x288xf32>
    %465 = arith.subf %168, %450 : vector<1x288xf32>
    %466 = math.exp %465 : vector<1x288xf32>
    %467 = arith.addf %461, %466 : vector<1x288xf32>
    %cst_16 = arith.constant 2.000000e+00 : f32
    %468 = vector.broadcast %cst_16 : f32 to vector<1x288xf32>
    %469 = arith.mulf %466, %468 : vector<1x288xf32>
    %470 = arith.addf %464, %469 : vector<1x288xf32>
    %471 = arith.subf %223, %450 : vector<1x288xf32>
    %472 = math.exp %471 : vector<1x288xf32>
    %473 = arith.addf %467, %472 : vector<1x288xf32>
    %cst_17 = arith.constant 3.000000e+00 : f32
    %474 = vector.broadcast %cst_17 : f32 to vector<1x288xf32>
    %475 = arith.mulf %472, %474 : vector<1x288xf32>
    %476 = arith.addf %470, %475 : vector<1x288xf32>
    %477 = arith.subf %278, %450 : vector<1x288xf32>
    %478 = math.exp %477 : vector<1x288xf32>
    %479 = arith.addf %473, %478 : vector<1x288xf32>
    %cst_18 = arith.constant 4.000000e+00 : f32
    %480 = vector.broadcast %cst_18 : f32 to vector<1x288xf32>
    %481 = arith.mulf %478, %480 : vector<1x288xf32>
    %482 = arith.addf %476, %481 : vector<1x288xf32>
    %483 = arith.subf %333, %450 : vector<1x288xf32>
    %484 = math.exp %483 : vector<1x288xf32>
    %485 = arith.addf %479, %484 : vector<1x288xf32>
    %cst_19 = arith.constant 5.000000e+00 : f32
    %486 = vector.broadcast %cst_19 : f32 to vector<1x288xf32>
    %487 = arith.mulf %484, %486 : vector<1x288xf32>
    %488 = arith.addf %482, %487 : vector<1x288xf32>
    %489 = arith.subf %388, %450 : vector<1x288xf32>
    %490 = math.exp %489 : vector<1x288xf32>
    %491 = arith.addf %485, %490 : vector<1x288xf32>
    %cst_20 = arith.constant 6.000000e+00 : f32
    %492 = vector.broadcast %cst_20 : f32 to vector<1x288xf32>
    %493 = arith.mulf %490, %492 : vector<1x288xf32>
    %494 = arith.addf %488, %493 : vector<1x288xf32>
    %495 = arith.subf %443, %450 : vector<1x288xf32>
    %496 = math.exp %495 : vector<1x288xf32>
    %497 = arith.addf %491, %496 : vector<1x288xf32>
    %cst_21 = arith.constant 7.000000e+00 : f32
    %498 = vector.broadcast %cst_21 : f32 to vector<1x288xf32>
    %499 = arith.mulf %496, %498 : vector<1x288xf32>
    %500 = arith.addf %494, %499 : vector<1x288xf32>
    %501 = tpu.reciprocal %497 : vector<1x288xf32> -> vector<1x288xf32>
    %502 = arith.mulf %500, %501 : vector<1x288xf32>
    %503 = vector.shape_cast %502 : vector<1x288xf32> to vector<1x1x288xf32>
    %c0_22 = arith.constant 0 : index
    %c0_23 = arith.constant 0 : index
    %c0_24 = arith.constant 0 : index
    %504 = vector.load %arg3[%c0_22, %c0_23, %c0_24] : memref<1x1x288xf32, #tpu.memory_space<vmem>>, vector<1x1x288xf32>
    tpu.vector_store %arg3[%c0_22, %c0_23, %c0_24], %503 {strides = array<i32>} : memref<1x1x288xf32, #tpu.memory_space<vmem>>, vector<1x1x288xf32>,
    return
  }
  func.func @transform_0(%arg0: i32) -> (i32, i32, i32) {
    %c0_i32 = arith.constant 0 : i32
    %c0_i32_0 = arith.constant 0 : i32
    %c0_i32_1 = arith.constant 0 : i32
    return %arg0, %c0_i32, %c0_i32_0 : i32, i32, i32
  }
  func.func @transform_1(%arg0: i32) -> (i32, i32) {
    %c0_i32 = arith.constant 0 : i32
    %c0_i32_0 = arith.constant 0 : i32
    %c0_i32_1 = arith.constant 0 : i32
    return %c0_i32, %c0_i32_0 : i32, i32
  }
  func.func @transform_2(%arg0: i32) -> (i32, i32, i32) {
    %c0_i32 = arith.constant 0 : i32
    %c0_i32_0 = arith.constant 0 : i32
    %c0_i32_1 = arith.constant 0 : i32
    return %arg0, %c0_i32, %c0_i32_0 : i32, i32, i32
  }
}

</mosaic_0001>

<bundles_post_ra>
// kernel: tpu_custom_call.1
= control target key start
LH: loop header
LB: loop body
LE: loop exit
PB: predicated region body
PF: predicated region fallthrough
CT: control target
= control target key end

     0   :  { %s21272_s0 = inlined_call_operand.hbm [shape: f32[2,32,3328], index: 0, kind: input, shape index: {}]   ;;  %s21273_s1 = inlined_call_operand.hbm [shape: f32[32,32], index: 1, kind: input, shape index: {}]   ;;  %s21274_s2 = inlined_call_operand.hbm [shape: f32[2,1,288], index: 2, kind: output, shape index: {}]  }
   0x1   :  { %21975 = sst [smem:[#allocation426_spill]] %s21272_s0 }
   0x2   :  { %21976 = sst [smem:[#allocation427_spill]] %s21273_s1 }
   0x3   :  { %7 = vsyncpa [#allocation3], 0 }
   0x4   :  { %9 = vsyncpa [#allocation3 + $0x1], 0 }
   0x5   :  { %10 = vsyncpa [#allocation6], 0 }
   0x6   :  { %11 = vsyncpa [#allocation4], 0 }
   0x7   :  { %13 = vsyncpa [#allocation4 + $0x1], 0  ;;  %s14702_s9 = smov 0   ;;  %s14704_s10 = smov 0  }
   0x8   :  { %s14706_s11 = smov 0   ;;  %s14708_s12 = smov 0  }
   0x9 LB: > { %21977 = sst [smem:[#allocation11_spill]] %s14633_s10  ;;  %s14723_s13 = sadd.s32 4294967295, %s14641_s12   ;;  %s14641_s12 = sphi %s14708_s12, %s23523_s12   ;;  %s14637_s11 = sphi %s14706_s11, %s23526_s11   ;;  %s14633_s10 = sphi %s14704_s10, %s23525_s10   ;;  %s14629_s9 = sphi %s14702_s9, %s23524_s9  }
   0xa   : > { %21978 = sst [smem:[#allocation12_spill]] %s14637_s11  ;;  %s13262_s14 = sadd.s32 4294967294, %s14641_s12  }
   0xb   : > { %21979 = sst [smem:[#allocation13_spill]] %s14641_s12  ;;  %p39_p0 = scmp.ne.s32.totalorder %s14633_s10, %s14629_s9 }
   0xc   : > { %p21275_p1 = scmp.eq.s32.totalorder %s14723_s13, 0  ;;  %p90_p3 = scmp.eq.s32.totalorder %s13262_s14, 1 }
   0xd   : > { %p13263_p5 = scmp.ge.s32.totalorder %s14641_s12, 1  ;;  %p97_p7 = scmp.lt.s32.totalorder %s14641_s12, 3 }
   0xe   : > { %p14732_p4 = por %p21275_p1, %p39_p0  ;;  %p14737_p6 = por %p90_p3, %p39_p0 }
   0xf   : > { %p14742_p8 = pnand %p13263_p5, %p97_p7  ;;  %s14643_s18 = smov [#allocation5]  }
  0x10   : > { %s21980_s15 = scalar_select %p14732_p4, 1, 0 }
  0x11   : > { %s21981_s16 = scalar_select %p14737_p6, 1, 0 }
  0x12   : > { %s21983_s17 = scalar_select %p14742_p8, 1, 0 }
  0x13   : > { %21982 = sst [smem:[#allocation14_spill]] %s21981_s16  ;;  %s109_s19 = sshll.u32 %s14643_s18, 4  ;;  %s14746_s19 = int_to_ptr.vmem [resolvable:$true] %s109_s19 }
  0x14   : > { %p14369_p9 = pneg %p14742_p8  ;;  %s14758_s21 = sadd.s32 1, %s14641_s12  }
  0x15   : > { %21985 = sst [smem:[#allocation15_spill]] %s14758_s21  ;;  %s26_s22 = sadd.s32 1, %s14637_s11 }
  0x16   : > { %p14753_p11 = pnand %p14369_p9, %p21275_p1  ;;  %s23_s23 = ssub.s32 %s14641_s12, %s14758_s21 }
  0x17   : > { %s21986_s1 = sld [smem:[#allocation427_spill]] }
  0x18   : > { %p14515_p13 = pneg %p14753_p11 }
  0x1d   : > { %s14513_s26 = scalar_lea.hbm %s21986_s1, 512 }
  0x1e   : > { %p14514_p12 = scmp.ne.s32.totalorder %s21986_s1, %s14513_s26  ;;  %p14520_p5 = scmp.lt.u32.totalorder %s14513_s26, %s21986_s1 }
  0x20   : > { %p14516_p0 = pnand %p14515_p13, %p14514_p12 }
  0x22   : > { %p14517_p3 = pneg %p14516_p0 }
  0x24   : > { %p14522_p7 = pnand %p14520_p5, %p14517_p3 }
  0x26   : > { %14525 = shalt.err (!%p14522_p7)
}
  0x27   : > { %s14526_s3 = scalar_lea.vmem %s14746_s19, 512  ;;  %p14534_p2 = scmp.lt.s32.totalorder %s14746_s19, %s14746_s19 }
  0x28   : > { %p14527_p9 = scmp.ne.s32.totalorder %s14746_s19, %s14526_s3  ;;  %p14535_p6 = scmp.lt.s32.totalorder %s14526_s3, %s14526_s3 }
  0x2a   : > { %p14529_p10 = pnand %p14527_p9, %p14515_p13  ;;  %p14536_p4 = por %p14535_p6, %p14534_p2 }
  0x2c   : > { %p14530_p1 = pneg %p14529_p10 }
  0x2e   : > { %p14537_p8 = pnand %p14536_p4, %p14530_p1 }
  0x30   : > { %14540 = shalt.err (!%p14537_p8)
}
  0x31   : > { %s14644_s4 = smov 128   ;;  %s14645_s5 = smov 8  }
  0x32   : > { %14372 = dma.hbm_to_vmem [thread:$0]  (!%p14753_p11), %s21986_s1, 512, %s14746_s19, [#allocation6], %s14644_s4, %s14644_s4, %s14645_s5  }
  0x33   : > { %p24_p2 = scmp.eq.s32.totalorder %s23_s23, 0  ;;  %p33_p1 = scmp.ne.s32.totalorder %s14637_s11, %s14633_s10 }
  0x34   : > { %p34_p4 = scmp.eq.s32.totalorder %s14641_s12, 0  ;;  %p14382_p6 = scmp.lt.s32.totalorder %s14641_s12, 2 }
  0x35   : > { %s14789_s8 = scalar_select %p24_p2, %s14637_s11, %s26_s22  }
  0x36   : > { %p35_p8 = por %p34_p4, %p33_p1  ;;  %p21988_p10 = scmp.eq.s32.totalorder %s14723_s13, 1 }
  0x37   : > { %21987 = sst [smem:[#allocation16_spill]] %s14789_s8  ;;  %s123_s18 = sand.u32 1, %s14637_s11  }
  0x38   : > { %p14793_p12 = por %p21988_p10, %p33_p1  ;;  %s14357_s24 = smul.u32 13312, %s14641_s12 }
  0x39   : > { %s14356_s25 = smul.u32 832, %s123_s18  ;;  %s21990_s0 = sld [smem:[#allocation426_spill]] }
  0x3a   : > { %p14804_p11 = pnand %p14382_p6, %p35_p8  ;;  %s14810_s28 = scalar_lea.sflag [#allocation3], %s123_s18 }
  0x3b   : > { %s127_s22 = scalar_lea.vmem [#allocation2], %s14356_s25 }
  0x3c   : > { %s134_s23 = sshll.u32 %s127_s22, 4  ;;  %p14543_p0 = pneg %p14804_p11  ;;  %s14808_s23 = int_to_ptr.vmem [resolvable:$true] %s134_s23 }
  0x3f   : > { %s14802_s27 = scalar_lea.hbm %s21990_s0, %s14357_s24  ;;  %s14546_s4 = scalar_lea.hbm %s21990_s0, 26624 }
  0x40   : > { %s14541_s29 = scalar_lea.hbm %s14802_s27, 13312  ;;  %p14547_p7 = scmp.lt.u32.totalorder %s14802_s27, %s21990_s0 }
  0x41   : > { %p14542_p13 = scmp.ne.s32.totalorder %s14802_s27, %s14541_s29  ;;  %p14548_p9 = scmp.lt.u32.totalorder %s14546_s4, %s14541_s29 }
  0x42   : > { %p14550_p1 = scmp.lt.u32.totalorder %s14541_s29, %s14802_s27 }
  0x43   : > { %p14544_p3 = pnand %p14543_p0, %p14542_p13  ;;  %p14549_p2 = por %p14548_p9, %p14547_p7 }
  0x45   : > { %p14545_p5 = pneg %p14544_p3  ;;  %p14551_p4 = por %p14550_p1, %p14549_p2 }
  0x47   : > { %p14552_p6 = pnand %p14551_p4, %p14545_p5 }
  0x49   : > { %14555 = shalt.err (!%p14552_p6)
}
  0x4a   : > { %s14556_s7 = scalar_lea.vmem %s14808_s23, 13312  ;;  %s14646_s18 = smov [#allocation2]  }
  0x4b   : > { %p14557_p8 = scmp.ne.s32.totalorder %s14808_s23, %s14556_s7  ;;  %s14561_s24 = sshll.u32 %s14646_s18, 4  ;;  %s14562_s24 = int_to_ptr.vmem [resolvable:$false] %s14561_s24 }
  0x4c   : > { %s14563_s25 = scalar_lea.vmem %s14562_s24, 26624  ;;  %p14564_p3 = scmp.lt.s32.totalorder %s14808_s23, %s14562_s24 }
  0x4d   : > { %p14559_p10 = pnand %p14557_p8, %p14543_p0  ;;  %p14565_p7 = scmp.lt.s32.totalorder %s14563_s25, %s14556_s7 }
  0x4f   : > { %p14560_p13 = pneg %p14559_p10  ;;  %p14566_p9 = por %p14565_p7, %p14564_p3 }
  0x51   : > { %p14567_p2 = pnand %p14566_p9, %p14560_p13 }
  0x53   : > { %14570 = shalt.err (!%p14567_p2)
}
  0x54   : > { %s14647_s20 = smov 3328   ;;  %s14648_s26 = smov 208  }
  0x55   : > { %14376 = dma.hbm_to_vmem [thread:$0]  (!%p14804_p11), %s14802_s27, 13312, %s14808_s23, %s14810_s28, %s14647_s20, %s14647_s20, %s14648_s26  }
  0x56   : > { %p21992_p0 = scmp.ne.s32.totalorder %s21983_s17, 0 }
  0x58   : > { %146 = sbr.rel (%p21992_p0) target bundleno = 2140 (0x85c), region = 28 }
  0x5f   : > { %s14841_s22 = sand.u32 1, %s14633_s10   ;;  %p21993_p5 = scmp.ne.s32.totalorder %s21980_s15, 0 }
  0x60   : > { %s14358_s29 = smul.u32 832, %s14841_s22  ;;  %s149_s30 = scalar_lea.sflag [#allocation3], %s14841_s22 }
  0x62   : > { %s14845_s3 = scalar_lea.vmem [#allocation2], %s14358_s29 }
  0x63   : > { %14616 = dma.done.wait (%p21993_p5), %s149_s30, 13312  }
  0x64   : > { %14618 = vsyncadd (%p21993_p5), %s149_s30, 4294953984  ;;  %p21994_p11 = scmp.eq.s32.totalorder %s14723_s13, 0 }
  0x66   : > { %14620 = dma.done.wait (%p21994_p11), [#allocation6], 512   ;;  %p21995_p1 = pmov %p21994_p11 }
  0x67   : > { %v21338_v0 = vmov 0.0   ;;  %v178_v1 = vld [vmem:[%s14845_s3 + $0x8] sm:$0xff]  ;;  %v204_v2 = vld [vmem:[%s14845_s3 + $0xd8] sm:$0xff]  ;;  %v177_v3 = vld [vmem:[%s14845_s3] sm:$0xff]  ;;  %vm285_vm0 = vcmask 261120   ;;  %s21538_s15 = smov 126  }
  0x68   : > { %14622 = vsyncadd (%p21995_p1), [#allocation6], 4294966784  ;;  %370 = vmatprep.mubr.f32.mxu1 %v21338_v0  ;;  %721 = vmatprep.mubr.f32.mxu0 %v21338_v0  ;;  %v298_v4 = vand.u32 4294901760, %v178_v1  ;;  %v302_v5 = vand.u32 4294901760, %v204_v2  ;;  %v203_v6 = vld [vmem:[%s14845_s3 + $0xd0] sm:$0xff]  ;;  %v300_v7 = vand.u32 4294901760, %v177_v3 }
  0x69   : > { %v230_v8 = vld [vmem:[%s14845_s3 + $0x1a8] sm:$0xff]  ;;  %v256_v9 = vld [vmem:[%s14845_s3 + $0x278] sm:$0xff]  ;;  %v304_v10 = vand.u32 4294901760, %v203_v6  ;;  %v229_v13 = vld [vmem:[%s14845_s3 + $0x1a0] sm:$0xff]  ;;  %s21585_s17 = smov 127   ;;  %s21544_s27 = smov 109  }
  0x6a   : > { %v306_v11 = vand.u32 4294901760, %v230_v8  ;;  %v310_v12 = vand.u32 4294901760, %v256_v9  ;;  %v255_v14 = vld [vmem:[%s14845_s3 + $0x270] sm:$0xff]  ;;  %v281_v15 = vld [vmem:[#allocation5] sm:$0xff]  ;;  %v14865_v16 = vpack.c.bf16 %v302_v5, %v298_v4  ;;  %v14867_v17 = vsub.f32 %v178_v1, %v298_v4  ;;  %v282_v32 = vld [vmem:[#allocation5 + $0x8] sm:$0xff]  ;;  %s21566_s19 = smov 110  }
  0x6b   : > { %v14869_v18 = vsub.f32 %v204_v2, %v302_v5  ;;  %v14871_v19 = vsub.f32 %v177_v3, %v300_v7  ;;  %v14873_v20 = vpack.c.bf16 %v304_v10, %v300_v7  ;;  %v14875_v21 = vsub.f32 %v203_v6, %v304_v10  ;;  %v283_v33 = vld [vmem:[#allocation5 + $0x10] sm:$0xff]  ;;  %v284_v58 = vld [vmem:[#allocation5 + $0x18] sm:$0xff]  ;;  %s21554_s23 = smov 92   ;;  %s21556_s28 = smov 108  }
  0x6c   : > { %v14877_v22 = vpack.c.bf16 %v310_v12, %v306_v11  ;;  %v14879_v23 = vsub.f32 %v230_v8, %v306_v11  ;;  %13273 = vmatprep.subr.bf16.mxu1 %v14865_v16  ;;  %13297 = vmatprep.subr.bf16.mxu0 %v14865_v16  ;;  %v14883_v24 = vsub.f32 %v256_v9, %v310_v12  ;;  %v308_v25 = vand.u32 4294901760, %v229_v13  ;;  %s21596_s4 = smov 91   ;;  %s21444_s5 = smov 90  }
  0x6d   : > { %v312_v26 = vand.u32 4294901760, %v255_v14  ;;  %v287_v27 = vsel %vm285_vm0, %v281_v15, 0  ;;  %13275 = vmatpush1.bf16.msra.mxu1 %v14873_v20  ;;  %13299 = vmatpush1.bf16.msra.mxu0 %v14873_v20  ;;  %v413_v29 = vand.u32 4294901760, %v14867_v17  ;;  %v425_v30 = vand.u32 4294901760, %v14869_v18  ;;  %s21499_s6 = smov 60   ;;  %s21492_s7 = smov 58  }
  0x6e   : > { %v14888_v28 = vand.u32 4294901760, %v287_v27  ;;  %v419_v31 = vand.u32 4294901760, %v14871_v19  ;;  %13277 = vmatprep.subr.bf16.mxu1 %v14877_v22  ;;  %13301 = vmatprep.subr.bf16.mxu0 %v14877_v22  ;;  %v14897_v35 = vsub.f32 %v229_v13, %v308_v25  ;;  %v431_v37 = vand.u32 4294901760, %v14875_v21  ;;  %s21381_s18 = smov 41   ;;  %s21490_s24 = smov 59  }
  0x6f   : > { %v14895_v34 = vpack.c.bf16 %v312_v26, %v308_v25  ;;  %v14899_v36 = vsub.f32 %v255_v14, %v312_v26  ;;  %v414_v39 = vsub.f32 %v14867_v17, %v413_v29  ;;  %v426_v40 = vsub.f32 %v14869_v18, %v425_v30  ;;  %s21501_s25 = smov 24   ;;  %s21483_s20 = smov 42  }
  0x70   : > { %v14903_v38 = vsub.f32 %v287_v27, %v14888_v28  ;;  %v420_v41 = vsub.f32 %v14871_v19, %v419_v31  ;;  %v432_v42 = vsub.f32 %v14875_v21, %v431_v37  ;;  %v290_v43 = vsel %vm285_vm0, %v282_v32, 0  ;;  %s21487_s26 = smov 40   ;;  %s21389_s29 = smov 23  }
  0x71   : > { %v293_v44 = vsel %vm285_vm0, %v283_v33, 0  ;;  %v437_v45 = vand.u32 4294901760, %v14879_v23  ;;  %13279 = vmatpush1.bf16.msra.mxu1 %v14895_v34  ;;  %13303 = vmatpush1.bf16.msra.mxu0 %v14895_v34  ;;  %v415_v47 = vand.u32 4294901760, %v414_v39  ;;  %v427_v48 = vand.u32 4294901760, %v426_v40  ;;  %v208_v40 = vld [vmem:[%s14845_s3 + $0xf8] sm:$0xff]  ;;  %s21395_s30 = smov 22  }
  0x72   : > { %v14915_v46 = vand.u32 4294901760, %v14903_v38  ;;  %v421_v49 = vand.u32 4294901760, %v420_v41  ;;  %v433_v50 = vand.u32 4294901760, %v432_v42  ;;  %v14917_v51 = vand.u32 4294901760, %v290_v43  ;;  %v180_v41 = vld [vmem:[%s14845_s3 + $0x18] sm:$0xff]  ;;  %v206_v42 = vld [vmem:[%s14845_s3 + $0xe8] sm:$0xff] }
  0x73   : > { %v14919_v52 = vand.u32 4294901760, %v293_v44  ;;  %v438_v53 = vsub.f32 %v14879_v23, %v437_v45  ;;  %v13280_v55 = vpack.c.bf16 %v427_v48, %v415_v47  ;;  %v449_v56 = vand.u32 4294901760, %v14883_v24  ;;  %s22386_s0 = smov 102   ;;  %s22442_s1 = smov 91  }
  0x74   : > { %v374_v54 = vsub.f32 %v14903_v38, %v14915_v46  ;;  %v13304_v57 = vpack.c.bf16 %v425_v30, %v413_v29  ;;  %725 = vmatmul.mubr.f32.vlgmr.msra.gmra.mrb[0].mxu0 %v14915_v46  ;;  %v13282_v59 = vpack.c.bf16 %v433_v50, %v421_v49  ;;  %v14927_v60 = vsub.f32 %v290_v43, %v14917_v51  ;;  %s22518_s8 = smov 127   ;;  %s22521_s11 = smov 126  }
  0x75   : > { %v14930_v61 = vsub.f32 %v293_v44, %v14919_v52  ;;  %v439_v62 = vand.u32 4294901760, %v438_v53  ;;  %13281 = vmatprep.subr.bf16.mxu1 %v13280_v55  ;;  %730 = vmatprep.mubr.f32.mxu0 %v21338_v0  ;;  %v450_v1 = vsub.f32 %v14883_v24, %v449_v56  ;;  %v443_v2 = vand.u32 4294901760, %v14897_v35  ;;  %v181_v53 = vld [vmem:[%s14845_s3 + $0x20] sm:$0xff]  ;;  %s22525_s10 = smov 110   ;;  %s22531_s21 = smov 109  }
  0x76   : > { %v14932_v63 = vand.u32 4294901760, %v374_v54  ;;  %v455_v3 = vand.u32 4294901760, %v14899_v36  ;;  %v14939_v4 = vand.u32 4294901760, %v14927_v60  ;;  %13305 = vmatprep.subr.bf16.mxu0 %v13304_v57  ;;  %v13306_v6 = vpack.c.bf16 %v431_v37, %v419_v31  ;;  %v260_v54 = vld [vmem:[%s14845_s3 + $0x298] sm:$0xff]  ;;  %s22534_s12 = smov 108   ;;  %s22539_s16 = smov 92  }
  0x77   : > { %v14942_v5 = vand.u32 4294901760, %v14930_v61  ;;  %v296_v7 = vsel %vm285_vm0, %v284_v58, 0  ;;  %v451_v8 = vand.u32 4294901760, %v450_v1  ;;  %v444_v9 = vsub.f32 %v14897_v35, %v443_v2  ;;  %v232_v57 = vld [vmem:[%s14845_s3 + $0x1b8] sm:$0xff]  ;;  %v257_v1 = vld [vmem:[%s14845_s3 + $0x280] sm:$0xff] }
  0x78   : > { %21996 = vst [vmem:[#allocation17_spill] sm:$0xff] %v14932_v63  ;;  %21997 = vst [vmem:[#allocation18_spill] sm:$0xff] %v14939_v4  ;;  %376 = vmatmul.mubr.f32.vlgmr.msra.gmra.mrb[0].mxu1 %v14932_v63  ;;  %v456_v10 = vsub.f32 %v14899_v36, %v455_v3  ;;  %v14948_v11 = vand.u32 4294901760, %v296_v7  ;;  %v385_v12 = vsub.f32 %v14927_v60, %v14939_v4  ;;  %734 = vmatmul.mubr.f32.gmra.mrb[2].mxu0 %v14939_v4  ;;  %vm21886_vm1 = vcmask 1039360  }
  0x79   : > { %21998 = vst [vmem:[#allocation19_spill] sm:$0xff] %v14942_v5  ;;  %13283 = vmatpush1.bf16.msra.mxu1 %v13282_v59  ;;  %381 = vmatprep.mubr.f32.mxu1 %v21338_v0  ;;  %v396_v13 = vsub.f32 %v14930_v61, %v14942_v5  ;;  %v13308_v14 = vpack.c.bf16 %v449_v56, %v437_v45  ;;  %v445_v25 = vand.u32 4294901760, %v444_v9  ;;  %v1646_v44 = vand.u32 4294901760, %v208_v40  ;;  %v258_v59 = vld [vmem:[%s14845_s3 + $0x288] sm:$0xff] }
  0x7a   : > { %v13284_v15 = vpack.c.bf16 %v451_v8, %v439_v62  ;;  %v457_v26 = vand.u32 4294901760, %v456_v10  ;;  %v14957_v27 = vsub.f32 %v296_v7, %v14948_v11  ;;  %v14959_v29 = vand.u32 4294901760, %v385_v12  ;;  %739 = vmatprep.mubr.f32.mxu0 %v21338_v0  ;;  %13307 = vmatpush1.bf16.msra.mxu0 %v13306_v6  ;;  %v231_v62 = vld [vmem:[%s14845_s3 + $0x1b0] sm:$0xff]  ;;  %v233_v10 = vld [vmem:[%s14845_s3 + $0x1c0] sm:$0xff] }
  0x7b   : > { %13309 = vmatprep.subr.bf16.mxu0 %v13308_v14  ;;  %v13310_v32 = vpack.c.bf16 %v455_v3, %v443_v2  ;;  %v13288_v33 = vpack.c.bf16 %v14869_v18, %v14867_v17  ;;  %v14968_v37 = vand.u32 4294901760, %v396_v13  ;;  %v182_v18 = vld [vmem:[%s14845_s3 + $0x28] sm:$0xff]  ;;  %v13292_v45 = vpack.c.bf16 %v14883_v24, %v14879_v23  ;;  %v179_v24 = vld [vmem:[%s14845_s3 + $0x10] sm:$0xff] }
  0x7c   : > { %21999 = vst [vmem:[#allocation20_spill] sm:$0xff] %v14959_v29  ;;  %13285 = vmatprep.subr.bf16.mxu1 %v13284_v15  ;;  %v13286_v30 = vpack.c.bf16 %v457_v26, %v445_v25  ;;  %v14963_v31 = vand.u32 4294901760, %v14957_v27  ;;  %387 = vmatmul.mubr.f32.gmra.mrb[2].mxu1 %v14959_v29  ;;  %v1642_v43 = vand.u32 4294901760, %v182_v18  ;;  %v964_v47 = vand.u32 4294901760, %v180_v41  ;;  %v259_v12 = vld [vmem:[%s14845_s3 + $0x290] sm:$0xff] }
  0x7d   : > { %22001 = vst [vmem:[#allocation22_spill] sm:$0xff] %v14968_v37  ;;  %392 = vmatprep.mubr.f32.mxu1 %v21338_v0  ;;  %743 = vmatmul.mubr.f32.gmra.mrb[4].mxu0 %v14942_v5  ;;  %v968_v48 = vand.u32 4294901760, %v206_v42  ;;  %v966_v58 = vand.u32 4294901760, %v179_v24  ;;  %v1644_v6 = vand.u32 4294901760, %v181_v53  ;;  %v1654_v9 = vand.u32 4294901760, %v260_v54 }
  0x7e   : > { %22000 = vst [vmem:[#allocation21_spill] sm:$0xff] %v14963_v31  ;;  %v405_v39 = vsub.f32 %v14957_v27, %v14963_v31  ;;  %13287 = vmatpush1.bf16.msra.mxu1 %v13286_v30  ;;  %746 = vmatprep.mubr.f32.mxu0 %v21338_v0  ;;  %v14997_v49 = vpack.c.bf16 %v1646_v44, %v1642_v43  ;;  %v972_v14 = vand.u32 4294901760, %v232_v57  ;;  %v976_v30 = vand.u32 4294901760, %v258_v59 }
  0x7f   : > { %13311 = vmatpush1.bf16.msra.mxu0 %v13310_v32  ;;  %13289 = vmatprep.subr.bf16.mxu1 %v13288_v33  ;;  %v14999_v50 = vsub.f32 %v182_v18, %v1642_v43  ;;  %v15011_v23 = vsub.f32 %v206_v42, %v968_v48  ;;  %v15045_v26 = vsub.f32 %v179_v24, %v966_v58  ;;  %v974_v32 = vand.u32 4294901760, %v231_v62 }
  0x80   : > { %398 = vmatmul.mubr.f32.gmra.mrb[4].mxu1 %v14968_v37  ;;  %v14976_v17 = vand.u32 4294901760, %v405_v39  ;;  %13313 = vmatprep.subr.bf16.mxu0 %v14865_v16  ;;  %v13290_v16 = vpack.c.bf16 %v14875_v21, %v14871_v19  ;;  %v15001_v19 = vsub.f32 %v208_v40, %v1646_v44  ;;  %v15007_v21 = vpack.c.bf16 %v968_v48, %v964_v47 }
  0x81   : > { %401 = vmatprep.mubr.f32.mxu1 %v21338_v0  ;;  %750 = vmatmul.mubr.f32.gmra.mrb[6].mxu0 %v14963_v31  ;;  %v1760_v55 = vand.u32 4294901760, %v14999_v50  ;;  %v21278_v3 = vand.u32 4294901760, %v15011_v23  ;;  %v978_v33 = vand.u32 4294901760, %v257_v1  ;;  %v1652_v39 = vand.u32 4294901760, %v233_v10 }
  0x82   : > { %22002 = vst [vmem:[#allocation23_spill] sm:$0xff] %v14976_v17  ;;  %842 = vmatprep.mubr.f32.mxu0 %v21338_v0  ;;  %v21291_v56 = vand.u32 4294901760, %v15001_v19  ;;  %v1656_v18 = vand.u32 4294901760, %v259_v12  ;;  %v15057_v43 = vsub.f32 %v181_v53, %v1644_v6  ;;  %v15073_v53 = vpack.c.bf16 %v976_v30, %v972_v14 }
  0x83   : > { %v1761_v15 = vsub.f32 %v14999_v50, %v1760_v55  ;;  %vm21868_vm2 = vcmask 1031168   ;;  %vm21867_vm3 = vcmask 900096   ;;  %vm21866_vm4 = vcmask 891904  }
  0x84   : > { %407 = vmatmul.mubr.f32.gmra.mrb[6].mxu1 %v14976_v17  ;;  %v1773_v25 = vsub.f32 %v15001_v19, %v21291_v56  ;;  %vm21865_vm5 = vcmask 883712   ;;  %vm9280_vm6 = vcmask 752640   ;;  %vm9298_vm7 = vcmask 744448  }
  0x85   : > { %515 = vmatprep.mubr.f32.mxu1 %v21338_v0  ;;  %844 = vmatmul.mubr.f32.vlgmr.msra.gmra.mrb[0].mxu0 %v14888_v28  ;;  %v1762_v48 = vand.u32 4294901760, %v1761_v15  ;;  %v21280_v15 = vand.u32 4294901760, %v15045_v26  ;;  %vm9316_vm8 = vcmask 736256   ;;  %vm21872_vm9 = vcmask 482304  }
  0x86   : > { %849 = vmatprep.mubr.f32.mxu0 %v21338_v0  ;;  %13315 = vmatpush1.bf16.msra.mxu0 %v14873_v20  ;;  %v13294_v20 = vpack.c.bf16 %v14899_v36, %v14897_v35  ;;  %v207_v35 = vld [vmem:[%s14845_s3 + $0xf0] sm:$0xff]  ;;  %v234_v36 = vld [vmem:[%s14845_s3 + $0x1c8] sm:$0xff]  ;;  %vm21871_vm10 = vcmask 490496   ;;  %vm21882_vm11 = vcmask 474112   ;;  %vm21881_vm12 = vcmask 343040  }
  0x87   : > { %13317 = vmatprep.subr.bf16.mxu0 %v14877_v22  ;;  %v15009_v22 = vsub.f32 %v180_v41, %v964_v47  ;;  %v1648_v7 = vand.u32 4294901760, %v207_v35  ;;  %v1650_v8 = vand.u32 4294901760, %v234_v36  ;;  %v1094_v41 = vsub.f32 %v15011_v23, %v21278_v3 }
  0x88   : > { %517 = vmatmul.mubr.f32.vlgmr.msra.gmra.mrb[0].mxu1 %v14888_v28  ;;  %v15066_v47 = vsub.f32 %v260_v54, %v1654_v9  ;;  %vm9408_vm13 = vcmask 334848   ;;  %vm9426_vm14 = vcmask 326656   ;;  %vm9513_vm15 = vcmask 982016  }
  0x89   : > { %13291 = vmatpush1.bf16.msra.mxu1 %v13290_v16  ;;  %522 = vmatprep.mubr.f32.mxu1 %v21338_v0  ;;  %v21289_v2 = vand.u32 4294901760, %v15009_v22  ;;  %v15055_v42 = vpack.c.bf16 %v1648_v7, %v1644_v6  ;;  %v15059_v44 = vsub.f32 %v207_v35, %v1648_v7  ;;  %v15061_v16 = vpack.c.bf16 %v1654_v9, %v1650_v8 }
  0x8a   : > { %851 = vmatmul.mubr.f32.gmra.mrb[2].mxu0 %v14917_v51  ;;  %13293 = vmatprep.subr.bf16.mxu1 %v13292_v45  ;;  %v15064_v45 = vsub.f32 %v234_v36, %v1650_v8  ;;  %v15075_v35 = vsub.f32 %v232_v57, %v972_v14  ;;  %v15078_v6 = vsub.f32 %v258_v59, %v976_v30  ;;  %v1095_v7 = vand.u32 4294901760, %v1094_v41 }
  0x8b   : > { %856 = vmatprep.mubr.f32.mxu0 %v21338_v0  ;;  %13319 = vmatpush1.bf16.msra.mxu0 %v14895_v34  ;;  %v205_v34 = vld [vmem:[%s14845_s3 + $0xe0] sm:$0xff]  ;;  %v1082_v40 = vsub.f32 %v15009_v22, %v21289_v2  ;;  %v15080_v36 = vpack.c.bf16 %v1656_v18, %v1652_v39  ;;  %v21285_v8 = vand.u32 4294901760, %v15057_v43  ;;  %v21283_v57 = vand.u32 4294901760, %v15059_v44 }
  0x8c   : > { %524 = vmatmul.mubr.f32.gmra.mrb[2].mxu1 %v14917_v51  ;;  %13369 = vmatprep.subr.bf16.mxu0 %v14997_v49  ;;  %v970_v13 = vand.u32 4294901760, %v205_v34  ;;  %v15091_v59 = vpack.c.bf16 %v978_v33, %v974_v32  ;;  %v21279_v14 = vand.u32 4294901760, %v15066_v47  ;;  %vm9448_vm0 = vcmask 195584  }
  0x8d   : > { %529 = vmatprep.mubr.f32.mxu1 %v21338_v0  ;;  %13295 = vmatpush1.bf16.msra.mxu1 %v13294_v20  ;;  %v1774_v20 = vand.u32 4294901760, %v1773_v25  ;;  %v1083_v54 = vand.u32 4294901760, %v1082_v40 }
  0x8e   : > { %858 = vmatmul.mubr.f32.gmra.mrb[8].mxu0 %v14919_v52  ;;  %13321 = vmatprep.subr.bf16.mxu1 %v15007_v21  ;;  %v15069_v24 = vpack.c.bf16 %v970_v13, %v966_v58  ;;  %v15071_v3 = vsub.f32 %v205_v34, %v970_v13  ;;  %v15084_v58 = vsub.f32 %v233_v10, %v1652_v39  ;;  %v21281_v13 = vand.u32 4294901760, %v15064_v45 }
  0x8f   : > { %861 = vmatprep.mubr.f32.mxu0 %v21338_v0  ;;  %v15086_v34 = vsub.f32 %v259_v12, %v1656_v18  ;;  %v13376_v9 = vpack.c.bf16 %v1774_v20, %v1762_v48  ;;  %v15098_v10 = vsub.f32 %v231_v62, %v974_v32  ;;  %v15100_v12 = vsub.f32 %v257_v1, %v978_v33 }
  0x90   : > { %531 = vmatmul.mubr.f32.gmra.mrb[8].mxu1 %v14919_v52  ;;  %v21282_v25 = vand.u32 4294901760, %v15071_v3  ;;  %v13328_v30 = vpack.c.bf16 %v1095_v7, %v1083_v54  ;;  %v21284_v39 = vand.u32 4294901760, %v15075_v35  ;;  %v21286_v18 = vand.u32 4294901760, %v15078_v6 }
  0x91   : > { %534 = vmatprep.mubr.f32.mxu1 %v21338_v0  ;;  %v1767_v62 = vsub.f32 %v15057_v43, %v21285_v8  ;;  %v1779_v1 = vsub.f32 %v15059_v44, %v21283_v57  ;;  %v21287_v32 = vand.u32 4294901760, %v15084_v58  ;;  %v21288_v33 = vand.u32 4294901760, %v15086_v34 }
  0x92   : > { %863 = vmatmul.mubr.f32.gmra.mrb[10].mxu0 %v14948_v11  ;;  %v1785_v40 = vsub.f32 %v15064_v45, %v21281_v13  ;;  %v1797_v41 = vsub.f32 %v15066_v47, %v21279_v14  ;;  %v1088_v48 = vsub.f32 %v15045_v26, %v21280_v15  ;;  %v1100_v20 = vsub.f32 %v15071_v3, %v21282_v25 }
  0x93   : > { %939 = vmatprep.mubr.f32.mxu0 %v21338_v0  ;;  %v21290_v54 = vand.u32 4294901760, %v15098_v10  ;;  %v21292_v7 = vand.u32 4294901760, %v15100_v12  ;;  %v1118_v14 = vsub.f32 %v15078_v6, %v21286_v18  ;;  %v1768_v15 = vand.u32 4294901760, %v1767_v62 }
  0x94   : > { %536 = vmatmul.mubr.f32.gmra.mrb[10].mxu1 %v14948_v11  ;;  %v1780_v13 = vand.u32 4294901760, %v1779_v1  ;;  %v1791_v25 = vsub.f32 %v15084_v58, %v21287_v32  ;;  %v1786_v57 = vand.u32 4294901760, %v1785_v40  ;;  %v1089_v8 = vand.u32 4294901760, %v1088_v48 }
  0x95   : > { %620 = vmatprep.mubr.f32.mxu1 %v21338_v0  ;;  %v1101_v18 = vand.u32 4294901760, %v1100_v20  ;;  %v1112_v62 = vsub.f32 %v15098_v10, %v21290_v54  ;;  %v1124_v1 = vsub.f32 %v15100_v12, %v21292_v7 }
  0x96   : > { %941 = vmatmul.mubr.f32.vlgmr.msra.gmra.mrb[0].mxu0 %v14888_v28  ;;  %v13378_v40 = vpack.c.bf16 %v1780_v13, %v1768_v15  ;;  %v13384_v13 = vpack.c.bf16 %v15001_v19, %v14999_v50  ;;  %v13338_v15 = vpack.c.bf16 %v15071_v3, %v15045_v26  ;;  %v22006_v50 = vand.u32 4294901760, %v15057_v43 }
  0x97   : > { %946 = vmatprep.mubr.f32.mxu0 %v21338_v0  ;;  %13371 = vmatpush1.bf16.msra.mxu0 %v15055_v42  ;;  %v13330_v20 = vpack.c.bf16 %v1101_v18, %v1089_v8  ;;  %v1113_v54 = vand.u32 4294901760, %v1112_v62  ;;  %v1125_v56 = vand.u32 4294901760, %v1124_v1  ;;  %v13336_v8 = vpack.c.bf16 %v15011_v23, %v15009_v22 }
  0x98   : > { %623 = vmatmul.mubr.f32.vlgmr.msra.gmra.mrb[0].mxu1 %v14903_v38  ;;  %13373 = vmatprep.subr.bf16.mxu0 %v15061_v16  ;;  %v13342_v18 = vpack.c.bf16 %v15100_v12, %v15098_v10  ;;  %v22010_v62 = vand.u32 4294901760, %v15045_v26  ;;  %v22011_v1 = vand.u32 4294901760, %v15071_v3  ;;  %v22016_v3 = vand.u32 4294901760, %v15098_v10 }
  0x99   : > { %13323 = vmatpush1.bf16.msra.mxu1 %v15069_v24  ;;  %628 = vmatprep.mubr.f32.mxu1 %v21338_v0  ;;  %v22017_v26 = vand.u32 4294901760, %v15100_v12 }
  0x9a   : > { %948 = vmatmul.mubr.f32.gmra.mrb[2].mxu0 %v14917_v51  ;;  %13325 = vmatprep.subr.bf16.mxu1 %v15073_v53 }
  0x9b   : > { %953 = vmatprep.mubr.f32.mxu0 %v21338_v0  ;;  %13375 = vmatpush1.bf16.msra.mxu0 %v15080_v36 }
  0x9c   : > { %631 = vmatmul.mubr.f32.gmra.mrb[2].mxu1 %v14927_v60  ;;  %13377 = vmatprep.subr.bf16.mxu0 %v13376_v9  ;;  %v1106_v9 = vsub.f32 %v15075_v35, %v21284_v39  ;;  %v1798_v39 = vand.u32 4294901760, %v1797_v41  ;;  %v1792_v41 = vand.u32 4294901760, %v1791_v25  ;;  %v13340_v25 = vpack.c.bf16 %v15078_v6, %v15075_v35 }
  0x9d   : > { %636 = vmatprep.mubr.f32.mxu1 %v21338_v0  ;;  %13327 = vmatpush1.bf16.msra.mxu1 %v15091_v59 }
  0x9e   : > { %955 = vmatmul.mubr.f32.gmra.mrb[12].mxu0 %v14919_v52  ;;  %13329 = vmatprep.subr.bf16.mxu1 %v13328_v30  ;;  %v1803_v30 = vsub.f32 %v15086_v34, %v21288_v33  ;;  %v1107_v32 = vand.u32 4294901760, %v1106_v9  ;;  %v1119_v33 = vand.u32 4294901760, %v1118_v14  ;;  %v13380_v48 = vpack.c.bf16 %v1798_v39, %v1786_v57 }
  0x9f   : > { %958 = vmatprep.mubr.f32.mxu0 %v21338_v0  ;;  %v13334_v57 = vpack.c.bf16 %v1125_v56, %v1113_v54  ;;  %v13386_v56 = vpack.c.bf16 %v15059_v44, %v15057_v43  ;;  %v13390_v39 = vpack.c.bf16 %v15086_v34, %v15084_v58  ;;  %v22004_v54 = vand.u32 4294901760, %v15009_v22 }
  0xa0   : > { %639 = vmatmul.mubr.f32.gmra.mrb[12].mxu1 %v14930_v61  ;;  %v1804_v2 = vand.u32 4294901760, %v1803_v30  ;;  %v13332_v7 = vpack.c.bf16 %v1119_v33, %v1107_v32  ;;  %v22003_v32 = vand.u32 4294901760, %v15001_v19  ;;  %v22007_v19 = vand.u32 4294901760, %v15059_v44 }
  0xa1   : > { %642 = vmatprep.mubr.f32.mxu1 %v21338_v0  ;;  %v22012_v43 = vand.u32 4294901760, %v15075_v35  ;;  %v22013_v44 = vand.u32 4294901760, %v15078_v6  ;;  %v13358_v35 = vpack.c.bf16 %v22017_v26, %v22016_v3  ;;  %v186_v6 = vld [vmem:[%s14845_s3 + $0x48] sm:$0xff]  ;;  %v261_v3 = vld [vmem:[%s14845_s3 + $0x2a0] sm:$0xff] }
  0xa2   : > { %960 = vmatmul.mubr.f32.gmra.mrb[14].mxu0 %v14948_v11  ;;  %v13382_v14 = vpack.c.bf16 %v1804_v2, %v1792_v41  ;;  %v13388_v2 = vpack.c.bf16 %v15066_v47, %v15064_v45  ;;  %v13400_v33 = vpack.c.bf16 %v22003_v32, %v1760_v55  ;;  %v13402_v22 = vpack.c.bf16 %v22007_v19, %v22006_v50 }
  0xa3   : > { %1714 = vmatprep.mubr.f32.mxu0 %v21338_v0  ;;  %v22009_v55 = vand.u32 4294901760, %v15066_v47  ;;  %v13356_v41 = vpack.c.bf16 %v22013_v44, %v22012_v43  ;;  %v22015_v47 = vand.u32 4294901760, %v15086_v34  ;;  %v210_v34 = vld [vmem:[%s14845_s3 + $0x108] sm:$0xff]  ;;  %v3016_v10 = vand.u32 4294901760, %v186_v6 }
  0xa4   : > { %645 = vmatmul.mubr.f32.gmra.mrb[14].mxu1 %v14957_v27 }
  0xa5   : > { %1036 = vmatprep.mubr.f32.mxu1 %v21338_v0 }
  0xa6   : > { %1720 = vmatmul.mubr.f32.vlgmr.msra.gmra.mrb[16].mxu0 %v14932_v63 }
  0xa7   : > { %1725 = vmatprep.mubr.f32.mxu0 %v21338_v0  ;;  %13379 = vmatpush1.bf16.msra.mxu0 %v13378_v40  ;;  %v13354_v40 = vpack.c.bf16 %v22011_v1, %v22010_v62 }
  0xa8   : > { %1042 = vmatmul.mubr.f32.vlgmr.msra.gmra.mrb[16].mxu1 %v14932_v63  ;;  %13381 = vmatprep.subr.bf16.mxu0 %v13380_v48 }
  0xa9   : > { %13331 = vmatpush1.bf16.msra.mxu1 %v13330_v20  ;;  %1047 = vmatprep.mubr.f32.mxu1 %v21338_v0  ;;  %v2330_v20 = vand.u32 4294901760, %v210_v34 }
  0xaa   : > { %1731 = vmatmul.mubr.f32.gmra.mrb[18].mxu0 %v14959_v29  ;;  %13333 = vmatprep.subr.bf16.mxu1 %v13332_v7  ;;  %v22005_v7 = vand.u32 4294901760, %v15011_v23  ;;  %v22008_v23 = vand.u32 4294901760, %v15064_v45  ;;  %v22014_v45 = vand.u32 4294901760, %v15084_v58  ;;  %v212_v58 = vld [vmem:[%s14845_s3 + $0x118] sm:$0xff] }
  0xab   : > { %1736 = vmatprep.mubr.f32.mxu0 %v21338_v0  ;;  %13383 = vmatpush1.bf16.msra.mxu0 %v13382_v14 }
  0xac   : > { %1053 = vmatmul.mubr.f32.gmra.mrb[18].mxu1 %v14959_v29  ;;  %13385 = vmatprep.subr.bf16.mxu0 %v13384_v13  ;;  %v13352_v9 = vpack.c.bf16 %v22005_v7, %v22004_v54  ;;  %v13404_v30 = vpack.c.bf16 %v22009_v55, %v22008_v23  ;;  %v13406_v48 = vpack.c.bf16 %v22015_v47, %v22014_v45  ;;  %v236_v7 = vld [vmem:[%s14845_s3 + $0x1d8] sm:$0xff]  ;;  %v237_v55 = vld [vmem:[%s14845_s3 + $0x1e0] sm:$0xff] }
  0xad   : > { %1058 = vmatprep.mubr.f32.mxu1 %v21338_v0  ;;  %13335 = vmatpush1.bf16.msra.mxu1 %v13334_v57  ;;  %v15294_v13 = vsub.f32 %v186_v6, %v3016_v10  ;;  %v2334_v44 = vand.u32 4294901760, %v236_v7 }
  0xae   : > { %1742 = vmatmul.mubr.f32.gmra.mrb[20].mxu0 %v14968_v37  ;;  %13337 = vmatprep.subr.bf16.mxu1 %v13336_v8  ;;  %v183_v8 = vld [vmem:[%s14845_s3 + $0x30] sm:$0xff] }
  0xaf   : > { %1747 = vmatprep.mubr.f32.mxu0 %v21338_v0  ;;  %v3135_v32 = vand.u32 4294901760, %v15294_v13 }
  0xb0   : > { %1064 = vmatmul.mubr.f32.gmra.mrb[20].mxu1 %v14968_v37 }
  0xb1   : > { %1069 = vmatprep.mubr.f32.mxu1 %v21338_v0  ;;  %v3136_v62 = vsub.f32 %v15294_v13, %v3135_v32 }
  0xb2   : > { %1753 = vmatmul.mubr.f32.gmra.mrb[22].mxu0 %v14976_v17 }
  0xb3   : > { %1862 = vmatprep.mubr.f32.mxu0 %v21338_v0 }
  0xb4   : > { %1075 = vmatmul.mubr.f32.gmra.mrb[22].mxu1 %v14976_v17 }
  0xb5   : > { %1183 = vmatprep.mubr.f32.mxu1 %v21338_v0 }
  0xb6   : > { %1864 = vmatmul.mubr.f32.vlgmr.msra.gmra.mrb[16].mxu0 %v14888_v28 }
  0xb7   : > { %1869 = vmatprep.mubr.f32.mxu0 %v21338_v0  ;;  %13387 = vmatpush1.bf16.msra.mxu0 %v13386_v56 }
  0xb8   : > { %1185 = vmatmul.mubr.f32.vlgmr.msra.gmra.mrb[16].mxu1 %v14888_v28  ;;  %13389 = vmatprep.subr.bf16.mxu0 %v13388_v2  ;;  %v15308_v2 = vsub.f32 %v210_v34, %v2330_v20 }
  0xb9   : > { %13339 = vmatpush1.bf16.msra.mxu1 %v13338_v15  ;;  %1190 = vmatprep.mubr.f32.mxu1 %v21338_v0  ;;  %v211_v15 = vld [vmem:[%s14845_s3 + $0x110] sm:$0xff] }
  0xba   : > { %1871 = vmatmul.mubr.f32.gmra.mrb[18].mxu0 %v14917_v51  ;;  %13341 = vmatprep.subr.bf16.mxu1 %v13340_v25  ;;  %v2328_v25 = vand.u32 4294901760, %v183_v8  ;;  %v3022_v54 = vand.u32 4294901760, %v211_v15  ;;  %v21300_v19 = vand.u32 4294901760, %v15308_v2 }
  0xbb   : > { %1876 = vmatprep.mubr.f32.mxu0 %v21338_v0  ;;  %13391 = vmatpush1.bf16.msra.mxu0 %v13390_v39  ;;  %v238_v39 = vld [vmem:[%s14845_s3 + $0x1e8] sm:$0xff] }
  0xbc   : > { %1192 = vmatmul.mubr.f32.gmra.mrb[18].mxu1 %v14917_v51  ;;  %13393 = vmatprep.subr.bf16.mxu0 %v14997_v49  ;;  %v15359_v6 = vsub.f32 %v211_v15, %v3022_v54  ;;  %v2340_v15 = vand.u32 4294901760, %v261_v3 }
  0xbd   : > { %1197 = vmatprep.mubr.f32.mxu1 %v21338_v0  ;;  %13343 = vmatpush1.bf16.msra.mxu1 %v13342_v18  ;;  %v264_v18 = vld [vmem:[%s14845_s3 + $0x2b8] sm:$0xff] }
  0xbe   : > { %1878 = vmatmul.mubr.f32.gmra.mrb[20].mxu0 %v14919_v52  ;;  %13345 = vmatprep.subr.bf16.mxu1 %v15007_v21  ;;  %v3028_v23 = vand.u32 4294901760, %v264_v18 }
  0xbf   : > { %1883 = vmatprep.mubr.f32.mxu0 %v21338_v0 }
  0xc0   : > { %1199 = vmatmul.mubr.f32.gmra.mrb[20].mxu1 %v14919_v52 }
  0xc1   : > { %1204 = vmatprep.mubr.f32.mxu1 %v21338_v0 }
  0xc2   : > { %1885 = vmatmul.mubr.f32.gmra.mrb[22].mxu0 %v14948_v11 }
  0xc3   : > { %1970 = vmatprep.mubr.f32.mxu0 %v21338_v0 }
  0xc4   : > { %1206 = vmatmul.mubr.f32.gmra.mrb[24].mxu1 %v14948_v11 }
  0xc5   : > { %1290 = vmatprep.mubr.f32.mxu1 %v21338_v0 }
  0xc6   : > { %1973 = vmatmul.mubr.f32.vlgmr.msra.gmra.mrb[16].mxu0 %v14903_v38 }
  0xc7   : > { %1978 = vmatprep.mubr.f32.mxu0 %v21338_v0  ;;  %13395 = vmatpush1.bf16.msra.mxu0 %v15055_v42 }
  0xc8   : > { %1293 = vmatmul.mubr.f32.vlgmr.msra.gmra.mrb[16].mxu1 %v14903_v38  ;;  %13397 = vmatprep.subr.bf16.mxu0 %v15061_v16 }
  0xc9   : > { %13347 = vmatpush1.bf16.msra.mxu1 %v15069_v24  ;;  %1298 = vmatprep.mubr.f32.mxu1 %v21338_v0 }
  0xca   : > { %1981 = vmatmul.mubr.f32.gmra.mrb[18].mxu0 %v14927_v60  ;;  %13349 = vmatprep.subr.bf16.mxu1 %v15073_v53 }
  0xcb   : > { %1986 = vmatprep.mubr.f32.mxu0 %v21338_v0  ;;  %13399 = vmatpush1.bf16.msra.mxu0 %v15080_v36 }
  0xcc   : > { %1301 = vmatmul.mubr.f32.gmra.mrb[18].mxu1 %v14927_v60  ;;  %13401 = vmatprep.subr.bf16.mxu0 %v13400_v33 }
  0xcd   : > { %1306 = vmatprep.mubr.f32.mxu1 %v21338_v0  ;;  %13351 = vmatpush1.bf16.msra.mxu1 %v15091_v59 }
  0xce   : > { %1989 = vmatmul.mubr.f32.gmra.mrb[20].mxu0 %v14930_v61  ;;  %13353 = vmatprep.subr.bf16.mxu1 %v13352_v9  ;;  %v262_v9 = vld [vmem:[%s14845_s3 + $0x2a8] sm:$0xff] }
  0xcf   : > { %1994 = vmatprep.mubr.f32.mxu0 %v21338_v0 }
  0xd0   : > { %1309 = vmatmul.mubr.f32.gmra.mrb[20].mxu1 %v14930_v61 }
  0xd1   : > { %1314 = vmatprep.mubr.f32.mxu1 %v21338_v0 }
  0xd2   : > { %1997 = vmatmul.mubr.f32.gmra.mrb[22].mxu0 %v14957_v27 }
  0xd3   : > { %2074 = vmatprep.mubr.f32.mxu0 %v21338_v0 }
  0xd4   : > { %1317 = vmatmul.mubr.f32.gmra.mrb[26].mxu1 %v14957_v27 }
  0xd5   : > { %1393 = vmatprep.mubr.f32.mxu1 %v21338_v0 }
  0xd6   : > { %2078 = vmatmul.mubr.f32.vlgmr.msra.gmra.mrb[16].mxu0 %v14915_v46 }
  0xd7   : > { %2083 = vmatprep.mubr.f32.mxu0 %v21338_v0  ;;  %13403 = vmatpush1.bf16.msra.mxu0 %v13402_v22  ;;  %v3024_v22 = vand.u32 4294901760, %v238_v39 }
  0xd8   : > { %1397 = vmatmul.mubr.f32.vlgmr.msra.gmra.mrb[16].mxu1 %v14915_v46  ;;  %13405 = vmatprep.subr.bf16.mxu0 %v13404_v30  ;;  %v263_v30 = vld [vmem:[%s14845_s3 + $0x2b0] sm:$0xff] }
  0xd9   : > { %13355 = vmatpush1.bf16.msra.mxu1 %v13354_v40  ;;  %1402 = vmatprep.mubr.f32.mxu1 %v21338_v0  ;;  %v15341_v40 = vsub.f32 %v183_v8, %v2328_v25  ;;  %v3030_v34 = vand.u32 4294901760, %v263_v30 }
  0xda   : > { %2087 = vmatmul.mubr.f32.gmra.mrb[18].mxu0 %v14939_v4  ;;  %13357 = vmatprep.subr.bf16.mxu1 %v13356_v41  ;;  %v2338_v41 = vand.u32 4294901760, %v262_v9 }
  0xdb   : > { %2092 = vmatprep.mubr.f32.mxu0 %v21338_v0  ;;  %13407 = vmatpush1.bf16.msra.mxu0 %v13406_v48  ;;  %v235_v48 = vld [vmem:[%s14845_s3 + $0x1d0] sm:$0xff] }
  0xdc   : > { %1406 = vmatmul.mubr.f32.gmra.mrb[18].mxu1 %v14939_v4  ;;  %13409 = vmatprep.subr.bf16.mxu0 %v14997_v49  ;;  %v184_v49 = vld [vmem:[%s14845_s3 + $0x38] sm:$0xff]  ;;  %v15369_v8 = vpack.c.bf16 %v2338_v41, %v2334_v44 }
  0xdd   : > { %1411 = vmatprep.mubr.f32.mxu1 %v21338_v0  ;;  %13359 = vmatpush1.bf16.msra.mxu1 %v13358_v35  ;;  %v2326_v12 = vand.u32 4294901760, %v184_v49  ;;  %v2458_v35 = vsub.f32 %v15308_v2, %v21300_v19 }
  0xde   : > { %2096 = vmatmul.mubr.f32.gmra.mrb[20].mxu0 %v14942_v5  ;;  %13361 = vmatprep.subr.bf16.mxu1 %v15007_v21  ;;  %v3020_v21 = vand.u32 4294901760, %v212_v58 }
  0xdf   : > { %2101 = vmatprep.mubr.f32.mxu0 %v21338_v0  ;;  %v15306_v56 = vsub.f32 %v184_v49, %v2326_v12  ;;  %v3026_v49 = vand.u32 4294901760, %v237_v55 }
  0xe0   : > { %1415 = vmatmul.mubr.f32.gmra.mrb[20].mxu1 %v14942_v5  ;;  %v15292_v14 = vpack.c.bf16 %v3020_v21, %v3016_v10  ;;  %v15296_v57 = vsub.f32 %v212_v58, %v3020_v21  ;;  %v15361_v58 = vpack.c.bf16 %v3028_v23, %v3024_v22  ;;  %v15364_v10 = vsub.f32 %v238_v39, %v3024_v22 }
  0xe1   : > { %1420 = vmatprep.mubr.f32.mxu1 %v21338_v0  ;;  %v21304_v50 = vand.u32 4294901760, %v15306_v56  ;;  %v15366_v21 = vsub.f32 %v264_v18, %v3028_v23  ;;  %v15380_v18 = vpack.c.bf16 %v3030_v34, %v3026_v49  ;;  %v21296_v22 = vand.u32 4294901760, %v15359_v6 }
  0xe2   : > { %2105 = vmatmul.mubr.f32.gmra.mrb[22].mxu0 %v14963_v31  ;;  %v21306_v33 = vand.u32 4294901760, %v15296_v57 }
  0xe3   : > { %2198 = vmatprep.mubr.f32.mxu0 %v21338_v0  ;;  %v2446_v26 = vsub.f32 %v15306_v56, %v21304_v50 }
  0xe4   : > { %1424 = vmatmul.mubr.f32.gmra.mrb[28].mxu1 %v14963_v31  ;;  %v3148_v1 = vsub.f32 %v15296_v57, %v21306_v33 }
  0xe5   : > { %1516 = vmatprep.mubr.f32.mxu1 %v21338_v0  ;;  %v2447_v39 = vand.u32 4294901760, %v2446_v26 }
  0xe6   : > { %2200 = vmatmul.mubr.f32.vlgmr.msra.gmra.mrb[16].mxu0 %v14888_v28 }
  0xe7   : > { %2205 = vmatprep.mubr.f32.mxu0 %v21338_v0  ;;  %13411 = vmatpush1.bf16.msra.mxu0 %v15055_v42  ;;  %v209_v42 = vld [vmem:[%s14845_s3 + $0x100] sm:$0xff] }
  0xe8   : > { %1518 = vmatmul.mubr.f32.vlgmr.msra.gmra.mrb[16].mxu1 %v14888_v28  ;;  %13413 = vmatprep.subr.bf16.mxu0 %v15061_v16  ;;  %v15304_v16 = vpack.c.bf16 %v2330_v20, %v2326_v12  ;;  %v3137_v12 = vand.u32 4294901760, %v3136_v62  ;;  %v3149_v20 = vand.u32 4294901760, %v3148_v1  ;;  %v21293_v62 = vand.u32 4294901760, %v15366_v21 }
  0xe9   : > { %13363 = vmatpush1.bf16.msra.mxu1 %v15069_v24  ;;  %1523 = vmatprep.mubr.f32.mxu1 %v21338_v0  ;;  %v185_v24 = vld [vmem:[%s14845_s3 + $0x40] sm:$0xff]  ;;  %v15396_v1 = vsub.f32 %v261_v3, %v2340_v15 }
  0xea   : > { %2207 = vmatmul.mubr.f32.gmra.mrb[18].mxu0 %v14917_v51  ;;  %13365 = vmatprep.subr.bf16.mxu1 %v15073_v53  ;;  %v2332_v53 = vand.u32 4294901760, %v209_v42  ;;  %v13472_v23 = vpack.c.bf16 %v3149_v20, %v3137_v12 }
  0xeb   : > { %2212 = vmatprep.mubr.f32.mxu0 %v21338_v0  ;;  %13415 = vmatpush1.bf16.msra.mxu0 %v15080_v36  ;;  %v3018_v36 = vand.u32 4294901760, %v185_v24 }
  0xec   : > { %1525 = vmatmul.mubr.f32.gmra.mrb[18].mxu1 %v14917_v51  ;;  %13465 = vmatprep.subr.bf16.mxu0 %v15292_v14  ;;  %v15343_v43 = vsub.f32 %v209_v42, %v2332_v53  ;;  %v15371_v42 = vsub.f32 %v236_v7, %v2334_v44  ;;  %v21295_v44 = vand.u32 4294901760, %v15341_v40 }
  0xed   : > { %1530 = vmatprep.mubr.f32.mxu1 %v21338_v0  ;;  %13367 = vmatpush1.bf16.msra.mxu1 %v15091_v59  ;;  %v15330_v59 = vpack.c.bf16 %v2332_v53, %v2328_v25  ;;  %v15346_v45 = vpack.c.bf16 %v3022_v54, %v3018_v36  ;;  %v15348_v47 = vsub.f32 %v185_v24, %v3018_v36  ;;  %v2336_v24 = vand.u32 4294901760, %v235_v48 }
  0xee   : > { %2214 = vmatmul.mubr.f32.gmra.mrb[20].mxu0 %v14919_v52  ;;  %13417 = vmatprep.subr.bf16.mxu1 %v15304_v16  ;;  %v15374_v25 = vsub.f32 %v262_v9, %v2338_v41  ;;  %v15376_v53 = vsub.f32 %v237_v55, %v3026_v49  ;;  %v2459_v36 = vand.u32 4294901760, %v2458_v35  ;;  %v15382_v54 = vsub.f32 %v263_v30, %v3030_v34 }
  0xef   : > { %2219 = vmatprep.mubr.f32.mxu0 %v21338_v0  ;;  %v21298_v7 = vand.u32 4294901760, %v15348_v47  ;;  %v15388_v9 = vsub.f32 %v235_v48, %v2336_v24  ;;  %v21294_v55 = vand.u32 4294901760, %v15364_v10  ;;  %v15394_v30 = vpack.c.bf16 %v2340_v15, %v2336_v24 }
  0xf0   : > { %1532 = vmatmul.mubr.f32.gmra.mrb[20].mxu1 %v14919_v52  ;;  %v21297_v41 = vand.u32 4294901760, %v15343_v43  ;;  %v13424_v48 = vpack.c.bf16 %v2459_v36, %v2447_v39  ;;  %v21299_v26 = vand.u32 4294901760, %v15371_v42  ;;  %v21301_v35 = vand.u32 4294901760, %v15374_v25 }
  0xf1   : > { %1537 = vmatprep.mubr.f32.mxu1 %v21338_v0  ;;  %v3142_v3 = vsub.f32 %v15348_v47, %v21298_v7  ;;  %v3154_v49 = vsub.f32 %v15359_v6, %v21296_v22  ;;  %v21302_v34 = vand.u32 4294901760, %v15376_v53  ;;  %v21303_v12 = vand.u32 4294901760, %v15382_v54 }
  0xf2   : > { %2221 = vmatmul.mubr.f32.gmra.mrb[22].mxu0 %v14948_v11  ;;  %v3160_v20 = vsub.f32 %v15364_v10, %v21294_v55  ;;  %v3172_v24 = vsub.f32 %v15366_v21, %v21293_v62  ;;  %v2452_v15 = vsub.f32 %v15341_v40, %v21295_v44  ;;  %v2464_v39 = vsub.f32 %v15343_v43, %v21297_v41 }
  0xf3   : > { %2298 = vmatprep.mubr.f32.mxu0 %v21338_v0  ;;  %v21305_v36 = vand.u32 4294901760, %v15388_v9  ;;  %v2470_v62 = vsub.f32 %v15371_v42, %v21299_v26  ;;  %v2482_v55 = vsub.f32 %v15374_v25, %v21301_v35  ;;  %v3143_v44 = vand.u32 4294901760, %v3142_v3 }
  0xf4   : > { %1539 = vmatmul.mubr.f32.gmra.mrb[30].mxu1 %v14948_v11  ;;  %v3155_v22 = vand.u32 4294901760, %v3154_v49  ;;  %v3166_v41 = vsub.f32 %v15376_v53, %v21302_v34  ;;  %v3161_v7 = vand.u32 4294901760, %v3160_v20  ;;  %v3173_v26 = vand.u32 4294901760, %v3172_v24 }
  0xf5   : > { %1615 = vmatprep.mubr.f32.mxu1 %v21338_v0  ;;  %v2453_v19 = vand.u32 4294901760, %v2452_v15  ;;  %v2465_v35 = vand.u32 4294901760, %v2464_v39  ;;  %v2476_v3 = vsub.f32 %v15388_v9, %v21305_v36  ;;  %v2471_v34 = vand.u32 4294901760, %v2470_v62 }
  0xf6   : > { %2300 = vmatmul.mubr.f32.vlgmr.msra.gmra.mrb[16].mxu0 %v14888_v28  ;;  %v13474_v20 = vpack.c.bf16 %v3155_v22, %v3143_v44  ;;  %v3167_v24 = vand.u32 4294901760, %v3166_v41  ;;  %v13476_v15 = vpack.c.bf16 %v3173_v26, %v3161_v7  ;;  %v13480_v22 = vpack.c.bf16 %v15296_v57, %v15294_v13 }
  0xf7   : > { %2305 = vmatprep.mubr.f32.mxu0 %v21338_v0  ;;  %13467 = vmatpush1.bf16.msra.mxu0 %v15346_v45  ;;  %v13426_v39 = vpack.c.bf16 %v2465_v35, %v2453_v19  ;;  %v2477_v36 = vand.u32 4294901760, %v2476_v3  ;;  %v13432_v19 = vpack.c.bf16 %v15308_v2, %v15306_v56  ;;  %v13434_v62 = vpack.c.bf16 %v15343_v43, %v15341_v40 }
  0xf8   : > { %1617 = vmatmul.mubr.f32.vlgmr.msra.gmra.mrb[16].mxu1 %v14888_v28  ;;  %13469 = vmatprep.subr.bf16.mxu0 %v15361_v58  ;;  %v13436_v44 = vpack.c.bf16 %v15374_v25, %v15371_v42  ;;  %v13486_v41 = vpack.c.bf16 %v15382_v54, %v15376_v53  ;;  %v13438_v26 = vpack.c.bf16 %v15396_v1, %v15388_v9  ;;  %v22018_v35 = vand.u32 4294901760, %v15296_v57 }
  0xf9   : > { %1622 = vmatprep.mubr.f32.mxu1 %v21338_v0  ;;  %13419 = vmatpush1.bf16.msra.mxu1 %v15330_v59  ;;  %v22021_v13 = vand.u32 4294901760, %v15348_v47  ;;  %v22022_v57 = vand.u32 4294901760, %v15359_v6  ;;  %v22025_v3 = vand.u32 4294901760, %v15341_v40  ;;  %v22031_v40 = vand.u32 4294901760, %v15388_v9 }
  0xfa   : > { %2307 = vmatmul.mubr.f32.gmra.mrb[18].mxu0 %v14917_v51  ;;  %13421 = vmatprep.subr.bf16.mxu1 %v15369_v8 }
  0xfb   : > { %2312 = vmatprep.mubr.f32.mxu0 %v21338_v0  ;;  %13471 = vmatpush1.bf16.msra.mxu0 %v15380_v18 }
  0xfc   : > { %1624 = vmatmul.mubr.f32.gmra.mrb[18].mxu1 %v14917_v51  ;;  %13473 = vmatprep.subr.bf16.mxu0 %v13472_v23  ;;  %v21307_v23 = vand.u32 4294901760, %v15396_v1 }
  0xfd   : > { %1629 = vmatprep.mubr.f32.mxu1 %v21338_v0  ;;  %13423 = vmatpush1.bf16.msra.mxu1 %v15394_v30 }
  0xfe   : > { %2314 = vmatmul.mubr.f32.gmra.mrb[20].mxu0 %v14919_v52  ;;  %13425 = vmatprep.subr.bf16.mxu1 %v13424_v48  ;;  %v3178_v48 = vsub.f32 %v15382_v54, %v21303_v12  ;;  %v2488_v49 = vsub.f32 %v15396_v1, %v21307_v23  ;;  %v2483_v12 = vand.u32 4294901760, %v2482_v55 }
  0xff   : > { %2319 = vmatprep.mubr.f32.mxu0 %v21338_v0 }
 0x100   : > { %1631 = vmatmul.mubr.f32.gmra.mrb[20].mxu1 %v14919_v52  ;;  %v3179_v50 = vand.u32 4294901760, %v3178_v48  ;;  %v2489_v33 = vand.u32 4294901760, %v2488_v49  ;;  %v13428_v23 = vpack.c.bf16 %v2483_v12, %v2471_v34  ;;  %v13496_v34 = vpack.c.bf16 %v22018_v35, %v3135_v32  ;;  %v242_v35 = vld [vmem:[%s14845_s3 + $0x208] sm:$0xff] }
 0x101   : > { %1636 = vmatprep.mubr.f32.mxu1 %v21338_v0  ;;  %v22019_v12 = vand.u32 4294901760, %v15306_v56  ;;  %v13498_v56 = vpack.c.bf16 %v22022_v57, %v22021_v13  ;;  %v22024_v32 = vand.u32 4294901760, %v15366_v21  ;;  %v22026_v49 = vand.u32 4294901760, %v15343_v43 }
 0x102   : > { %2321 = vmatmul.mubr.f32.gmra.mrb[22].mxu0 %v14948_v11  ;;  %v13478_v55 = vpack.c.bf16 %v3179_v50, %v3167_v24  ;;  %v13430_v7 = vpack.c.bf16 %v2489_v33, %v2477_v36  ;;  %v13482_v33 = vpack.c.bf16 %v15359_v6, %v15348_v47  ;;  %v13484_v50 = vpack.c.bf16 %v15366_v21, %v15364_v10 }
 0x103   : > { %3088 = vmatprep.mubr.f32.mxu0 %v21338_v0  ;;  %v22020_v36 = vand.u32 4294901760, %v15308_v2  ;;  %v22023_v2 = vand.u32 4294901760, %v15364_v10  ;;  %v22027_v47 = vand.u32 4294901760, %v15371_v42  ;;  %v22028_v6 = vand.u32 4294901760, %v15374_v25  ;;  %v190_v25 = vld [vmem:[%s14845_s3 + $0x68] sm:$0xff] }
 0x104   : > { %1638 = vmatmul.mubr.f32.gmra.mrb[32].mxu1 %v14948_v11  ;;  %v22029_v10 = vand.u32 4294901760, %v15376_v53  ;;  %v22030_v21 = vand.u32 4294901760, %v15382_v54  ;;  %v22032_v43 = vand.u32 4294901760, %v15396_v1  ;;  %v216_v53 = vld [vmem:[%s14845_s3 + $0x138] sm:$0xff]  ;;  %v214_v54 = vld [vmem:[%s14845_s3 + $0x128] sm:$0xff]  ;;  %v4396_v9 = vand.u32 4294901760, %v190_v25 }
 0x105   : > { %2398 = vmatprep.mubr.f32.mxu1 %v21338_v0  ;;  %v13500_v48 = vpack.c.bf16 %v22024_v32, %v22023_v2  ;;  %v13452_v24 = vpack.c.bf16 %v22028_v6, %v22027_v47  ;;  %v241_v32 = vld [vmem:[%s14845_s3 + $0x200] sm:$0xff] }
 0x106   : > { %3094 = vmatmul.mubr.f32.vlgmr.msra.gmra.mrb[24].mxu0 %v14932_v63  ;;  %v13454_v42 = vpack.c.bf16 %v22032_v43, %v22031_v40  ;;  %v4406_v43 = vand.u32 4294901760, %v241_v32 }
 0x107   : > { %3099 = vmatprep.mubr.f32.mxu0 %v21338_v0  ;;  %13475 = vmatpush1.bf16.msra.mxu0 %v13474_v20  ;;  %v13450_v20 = vpack.c.bf16 %v22026_v49, %v22025_v3  ;;  %v4404_v49 = vand.u32 4294901760, %v242_v35 }
 0x108   : > { %2404 = vmatmul.mubr.f32.vlgmr.msra.gmra.mrb[34].mxu1 %v14932_v63  ;;  %13477 = vmatprep.subr.bf16.mxu0 %v13476_v15  ;;  %v13502_v15 = vpack.c.bf16 %v22030_v21, %v22029_v10 }
 0x109   : > { %2409 = vmatprep.mubr.f32.mxu1 %v21338_v0  ;;  %13427 = vmatpush1.bf16.msra.mxu1 %v13426_v39  ;;  %v3710_v39 = vand.u32 4294901760, %v214_v54 }
 0x10a   : > { %3105 = vmatmul.mubr.f32.gmra.mrb[26].mxu0 %v14959_v29  ;;  %13429 = vmatprep.subr.bf16.mxu1 %v13428_v23  ;;  %v13448_v23 = vpack.c.bf16 %v22020_v36, %v22019_v12  ;;  %v266_v12 = vld [vmem:[%s14845_s3 + $0x2c8] sm:$0xff]  ;;  %v15629_v36 = vld [vmem:[%s14845_s3 + $0x1f0] sm:$0xff] }
 0x10b   : > { %3110 = vmatprep.mubr.f32.mxu0 %v21338_v0  ;;  %13479 = vmatpush1.bf16.msra.mxu0 %v13478_v55  ;;  %v15589_v55 = vld [vmem:[%s14845_s3 + $0x50] sm:$0xff]  ;;  %v3718_v21 = vand.u32 4294901760, %v266_v12 }
 0x10c   : > { %2415 = vmatmul.mubr.f32.gmra.mrb[36].mxu1 %v14959_v29  ;;  %13481 = vmatprep.subr.bf16.mxu0 %v13480_v22  ;;  %v15592_v22 = vld [vmem:[%s14845_s3 + $0x120] sm:$0xff] }
 0x10d   : > { %2420 = vmatprep.mubr.f32.mxu1 %v21338_v0  ;;  %13431 = vmatpush1.bf16.msra.mxu1 %v13430_v7 }
 0x10e   : > { %3116 = vmatmul.mubr.f32.gmra.mrb[28].mxu0 %v14968_v37  ;;  %13433 = vmatprep.subr.bf16.mxu1 %v13432_v19  ;;  %v15596_v19 = vsub.f32 %v190_v25, %v4396_v9 }
 0x10f   : > { %3121 = vmatprep.mubr.f32.mxu0 %v21338_v0 }
 0x110   : > { %2426 = vmatmul.mubr.f32.gmra.mrb[38].mxu1 %v14968_v37 }
 0x111   : > { %2431 = vmatprep.mubr.f32.mxu1 %v21338_v0 }
 0x112   : > { %3127 = vmatmul.mubr.f32.gmra.mrb[30].mxu0 %v14976_v17 }
 0x113   : > { %3237 = vmatprep.mubr.f32.mxu0 %v21338_v0 }
 0x114   : > { %2437 = vmatmul.mubr.f32.gmra.mrb[40].mxu1 %v14976_v17 }
 0x115   : > { %2547 = vmatprep.mubr.f32.mxu1 %v21338_v0 }
 0x116   : > { %3239 = vmatmul.mubr.f32.vlgmr.msra.gmra.mrb[24].mxu0 %v14888_v28 }
 0x117   : > { %3244 = vmatprep.mubr.f32.mxu0 %v21338_v0  ;;  %13483 = vmatpush1.bf16.msra.mxu0 %v13482_v33 }
 0x118   : > { %2549 = vmatmul.mubr.f32.vlgmr.msra.gmra.mrb[34].mxu1 %v14888_v28  ;;  %13485 = vmatprep.subr.bf16.mxu0 %v13484_v50  ;;  %v15608_v50 = vsub.f32 %v214_v54, %v3710_v39 }
 0x119   : > { %2554 = vmatprep.mubr.f32.mxu1 %v21338_v0  ;;  %13435 = vmatpush1.bf16.msra.mxu1 %v13434_v62  ;;  %v3712_v62 = vand.u32 4294901760, %v15592_v22 }
 0x11a   : > { %3246 = vmatmul.mubr.f32.gmra.mrb[26].mxu0 %v14917_v51  ;;  %13437 = vmatprep.subr.bf16.mxu1 %v13436_v44  ;;  %v215_v44 = vld [vmem:[%s14845_s3 + $0x130] sm:$0xff]  ;;  %v21310_v57 = vand.u32 4294901760, %v15608_v50 }
 0x11b   : > { %3251 = vmatprep.mubr.f32.mxu0 %v21338_v0  ;;  %13487 = vmatpush1.bf16.msra.mxu0 %v13486_v41  ;;  %v21309_v41 = vand.u32 4294901760, %v15596_v19  ;;  %v4402_v2 = vand.u32 4294901760, %v215_v44 }
 0x11c   : > { %2556 = vmatmul.mubr.f32.gmra.mrb[36].mxu1 %v14917_v51  ;;  %13489 = vmatprep.subr.bf16.mxu0 %v15292_v14 }
 0x11d   : > { %2561 = vmatprep.mubr.f32.mxu1 %v21338_v0  ;;  %13439 = vmatpush1.bf16.msra.mxu1 %v13438_v26  ;;  %v4516_v47 = vsub.f32 %v15596_v19, %v21309_v41 }
 0x11e   : > { %3253 = vmatmul.mubr.f32.gmra.mrb[28].mxu0 %v14919_v52  ;;  %13441 = vmatprep.subr.bf16.mxu1 %v15304_v16 }
 0x11f   : > { %3258 = vmatprep.mubr.f32.mxu0 %v21338_v0  ;;  %v4517_v41 = vand.u32 4294901760, %v4516_v47 }
 0x120   : > { %2563 = vmatmul.mubr.f32.gmra.mrb[38].mxu1 %v14919_v52 }
 0x121   : > { %2568 = vmatprep.mubr.f32.mxu1 %v21338_v0 }
 0x122   : > { %3260 = vmatmul.mubr.f32.gmra.mrb[30].mxu0 %v14948_v11 }
 0x123   : > { %3346 = vmatprep.mubr.f32.mxu0 %v21338_v0 }
 0x124   : > { %2570 = vmatmul.mubr.f32.gmra.mrb[40].mxu1 %v14948_v11 }
 0x125   : > { %2656 = vmatprep.mubr.f32.mxu1 %v21338_v0 }
 0x126   : > { %3349 = vmatmul.mubr.f32.vlgmr.msra.gmra.mrb[24].mxu0 %v14903_v38 }
 0x127   : > { %3354 = vmatprep.mubr.f32.mxu0 %v21338_v0  ;;  %13491 = vmatpush1.bf16.msra.mxu0 %v15346_v45 }
 0x128   : > { %2659 = vmatmul.mubr.f32.vlgmr.msra.gmra.mrb[34].mxu1 %v14903_v38  ;;  %13493 = vmatprep.subr.bf16.mxu0 %v15361_v58 }
 0x129   : > { %2664 = vmatprep.mubr.f32.mxu1 %v21338_v0  ;;  %13443 = vmatpush1.bf16.msra.mxu1 %v15330_v59 }
 0x12a   : > { %3357 = vmatmul.mubr.f32.gmra.mrb[26].mxu0 %v14927_v60  ;;  %13445 = vmatprep.subr.bf16.mxu1 %v15369_v8 }
 0x12b   : > { %3362 = vmatprep.mubr.f32.mxu0 %v21338_v0  ;;  %13495 = vmatpush1.bf16.msra.mxu0 %v15380_v18 }
 0x12c   : > { %2667 = vmatmul.mubr.f32.gmra.mrb[36].mxu1 %v14927_v60  ;;  %13497 = vmatprep.subr.bf16.mxu0 %v13496_v34  ;;  %v268_v34 = vld [vmem:[%s14845_s3 + $0x2d8] sm:$0xff] }
 0x12d   : > { %2672 = vmatprep.mubr.f32.mxu1 %v21338_v0  ;;  %13447 = vmatpush1.bf16.msra.mxu1 %v15394_v30 }
 0x12e   : > { %3365 = vmatmul.mubr.f32.gmra.mrb[28].mxu0 %v14930_v61  ;;  %13449 = vmatprep.subr.bf16.mxu1 %v13448_v23  ;;  %v15632_v23 = vld [vmem:[%s14845_s3 + $0x2c0] sm:$0xff] }
 0x12f   : > { %3370 = vmatprep.mubr.f32.mxu0 %v21338_v0  ;;  %v3720_v40 = vand.u32 4294901760, %v15632_v23 }
 0x130   : > { %2675 = vmatmul.mubr.f32.gmra.mrb[38].mxu1 %v14930_v61 }
 0x131   : > { %2680 = vmatprep.mubr.f32.mxu1 %v21338_v0 }
 0x132   : > { %3373 = vmatmul.mubr.f32.gmra.mrb[30].mxu0 %v14957_v27 }
 0x133   : > { %3451 = vmatprep.mubr.f32.mxu0 %v21338_v0 }
 0x134   : > { %2683 = vmatmul.mubr.f32.gmra.mrb[40].mxu1 %v14957_v27 }
 0x135   : > { %2761 = vmatprep.mubr.f32.mxu1 %v21338_v0 }
 0x136   : > { %3455 = vmatmul.mubr.f32.vlgmr.msra.gmra.mrb[24].mxu0 %v14915_v46 }
 0x137   : > { %3460 = vmatprep.mubr.f32.mxu0 %v21338_v0  ;;  %13499 = vmatpush1.bf16.msra.mxu0 %v13498_v56 }
 0x138   : > { %2765 = vmatmul.mubr.f32.vlgmr.msra.gmra.mrb[34].mxu1 %v14915_v46  ;;  %13501 = vmatprep.subr.bf16.mxu0 %v13500_v48  ;;  %v267_v48 = vld [vmem:[%s14845_s3 + $0x2d0] sm:$0xff] }
 0x139   : > { %2770 = vmatprep.mubr.f32.mxu1 %v21338_v0  ;;  %13451 = vmatpush1.bf16.msra.mxu1 %v13450_v20  ;;  %v4408_v20 = vand.u32 4294901760, %v268_v34 }
 0x13a   : > { %3464 = vmatmul.mubr.f32.gmra.mrb[26].mxu0 %v14939_v4  ;;  %13453 = vmatprep.subr.bf16.mxu1 %v13452_v24 }
 0x13b   : > { %3469 = vmatprep.mubr.f32.mxu0 %v21338_v0  ;;  %13503 = vmatpush1.bf16.msra.mxu0 %v13502_v15  ;;  %v3716_v15 = vand.u32 4294901760, %v15629_v36 }
 0x13c   : > { %2774 = vmatmul.mubr.f32.gmra.mrb[36].mxu1 %v14939_v4  ;;  %13505 = vmatprep.subr.bf16.mxu0 %v15292_v14  ;;  %v188_v14 = vld [vmem:[%s14845_s3 + $0x58] sm:$0xff] }
 0x13d   : > { %2779 = vmatprep.mubr.f32.mxu1 %v21338_v0  ;;  %13455 = vmatpush1.bf16.msra.mxu1 %v13454_v42  ;;  %v3706_v1 = vand.u32 4294901760, %v188_v14  ;;  %v4410_v42 = vand.u32 4294901760, %v267_v48 }
 0x13e   : > { %3473 = vmatmul.mubr.f32.gmra.mrb[28].mxu0 %v14942_v5  ;;  %13457 = vmatprep.subr.bf16.mxu1 %v15304_v16  ;;  %v4400_v16 = vand.u32 4294901760, %v216_v53 }
 0x13f   : > { %3478 = vmatprep.mubr.f32.mxu0 %v21338_v0 }
 0x140   : > { %2783 = vmatmul.mubr.f32.gmra.mrb[38].mxu1 %v14942_v5  ;;  %v15594_v7 = vpack.c.bf16 %v4400_v16, %v4396_v9  ;;  %v15598_v33 = vsub.f32 %v216_v53, %v4400_v16  ;;  %v3838_v53 = vsub.f32 %v15608_v50, %v21310_v57  ;;  %v15663_v16 = vsub.f32 %v215_v44, %v4402_v2 }
 0x141   : > { %2788 = vmatprep.mubr.f32.mxu1 %v21338_v0  ;;  %v15677_v44 = vsub.f32 %v15592_v22, %v3712_v62  ;;  %v15692_v22 = vsub.f32 %v267_v48, %v4410_v42  ;;  %v15708_v48 = vsub.f32 %v15632_v23, %v3720_v40 }
 0x142   : > { %3482 = vmatmul.mubr.f32.gmra.mrb[30].mxu0 %v14963_v31  ;;  %v21308_v26 = vand.u32 4294901760, %v15598_v33 }
 0x143   : > { %3576 = vmatprep.mubr.f32.mxu0 %v21338_v0 }
 0x144   : > { %2792 = vmatmul.mubr.f32.gmra.mrb[40].mxu1 %v14963_v31  ;;  %v4528_v6 = vsub.f32 %v15598_v33, %v21308_v26  ;;  %v15670_v26 = vsub.f32 %v268_v34, %v4408_v20  ;;  %v15686_v34 = vpack.c.bf16 %v4410_v42, %v4406_v43 }
 0x145   : > { %2886 = vmatprep.mubr.f32.mxu1 %v21338_v0 }
 0x146   : > { %3578 = vmatmul.mubr.f32.vlgmr.msra.gmra.mrb[24].mxu0 %v14888_v28 }
 0x147   : > { %3583 = vmatprep.mubr.f32.mxu0 %v21338_v0  ;;  %13507 = vmatpush1.bf16.msra.mxu0 %v15346_v45  ;;  %v15604_v45 = vpack.c.bf16 %v3710_v39, %v3706_v1 }
 0x148   : > { %2888 = vmatmul.mubr.f32.vlgmr.msra.gmra.mrb[34].mxu1 %v14888_v28  ;;  %13509 = vmatprep.subr.bf16.mxu0 %v15361_v58  ;;  %v15606_v58 = vsub.f32 %v188_v14, %v3706_v1  ;;  %v15665_v1 = vsub.f32 %v242_v35, %v4404_v49 }
 0x149   : > { %2893 = vmatprep.mubr.f32.mxu1 %v21338_v0  ;;  %13459 = vmatpush1.bf16.msra.mxu1 %v15330_v59  ;;  %v3708_v59 = vand.u32 4294901760, %v15589_v55 }
 0x14a   : > { %3585 = vmatmul.mubr.f32.gmra.mrb[26].mxu0 %v14917_v51  ;;  %13461 = vmatprep.subr.bf16.mxu1 %v15369_v8  ;;  %v189_v8 = vld [vmem:[%s14845_s3 + $0x60] sm:$0xff]  ;;  %v21321_v13 = vand.u32 4294901760, %v15606_v58 }
 0x14b   : > { %3590 = vmatprep.mubr.f32.mxu0 %v21338_v0  ;;  %13511 = vmatpush1.bf16.msra.mxu0 %v15380_v18  ;;  %v240_v18 = vld [vmem:[%s14845_s3 + $0x1f8] sm:$0xff]  ;;  %v4398_v56 = vand.u32 4294901760, %v189_v8 }
 0x14c   : > { %2895 = vmatmul.mubr.f32.gmra.mrb[36].mxu1 %v14917_v51  ;;  %13561 = vmatprep.subr.bf16.mxu0 %v15594_v7  ;;  %v3714_v10 = vand.u32 4294901760, %v240_v18  ;;  %v3826_v25 = vsub.f32 %v15606_v58, %v21321_v13 }
 0x14d   : > { %2900 = vmatprep.mubr.f32.mxu1 %v21338_v0  ;;  %13463 = vmatpush1.bf16.msra.mxu1 %v15394_v30  ;;  %v15637_v30 = vpack.c.bf16 %v3712_v62, %v3708_v59  ;;  %v15659_v54 = vpack.c.bf16 %v4402_v2, %v4398_v56  ;;  %v15661_v9 = vsub.f32 %v189_v8, %v4398_v56  ;;  %v21317_v62 = vand.u32 4294901760, %v15663_v16 }
 0x14e   : > { %3592 = vmatmul.mubr.f32.gmra.mrb[28].mxu0 %v14919_v52  ;;  %13513 = vmatprep.subr.bf16.mxu1 %v15604_v45  ;;  %v15674_v8 = vsub.f32 %v15589_v55, %v3708_v59  ;;  %v15679_v35 = vpack.c.bf16 %v3718_v21, %v3714_v10  ;;  %v15681_v56 = vsub.f32 %v240_v18, %v3714_v10  ;;  %v21313_v10 = vand.u32 4294901760, %v15670_v26 }
 0x14f   : > { %3597 = vmatprep.mubr.f32.mxu0 %v21338_v0  ;;  %v15684_v2 = vsub.f32 %v266_v12, %v3718_v21  ;;  %v15690_v55 = vsub.f32 %v241_v32, %v4406_v43  ;;  %v21320_v59 = vand.u32 4294901760, %v15661_v9  ;;  %v15697_v12 = vpack.c.bf16 %v3720_v40, %v3716_v15 }
 0x150   : > { %2902 = vmatmul.mubr.f32.gmra.mrb[38].mxu1 %v14919_v52  ;;  %v744_v3 = vpop.f32.mrb[4].mxu0  ;;  %v15705_v32 = vsub.f32 %v15629_v36, %v3716_v15  ;;  %v21311_v21 = vand.u32 4294901760, %v15674_v8  ;;  %v21312_v43 = vand.u32 4294901760, %v15677_v44  ;;  %v21314_v42 = vand.u32 4294901760, %v15681_v56 }
 0x151   : > { %2907 = vmatprep.mubr.f32.mxu1 %v21338_v0  ;;  %v745_v24 = vpop.f32.mrb[5].mxu0  ;;  %v4522_v36 = vsub.f32 %v15661_v9, %v21320_v59  ;;  %v4534_v23 = vsub.f32 %v15663_v16, %v21317_v62  ;;  %v21319_v15 = vand.u32 4294901760, %v15690_v55  ;;  %v21318_v40 = vand.u32 4294901760, %v15692_v22 }
 0x152   : > { %3599 = vmatmul.mubr.f32.gmra.mrb[30].mxu0 %v14948_v11  ;;  %v15668_v24 = vpack.c.bf16 %v4408_v20, %v4404_v49  ;;  %v3827_v49 = vand.u32 4294901760, %v3826_v25  ;;  %v3839_v20 = vand.u32 4294901760, %v3838_v53  ;;  %v21316_v25 = vand.u32 4294901760, %v15684_v2 }
 0x153   : > { %v399_v14 = vpop.f32.mrb[4].mxu1  ;;  %3677 = vmatprep.mubr.f32.mxu0 %v21338_v0 }
 0x154   : > { %v400_v39 = vpop.f32.mrb[5].mxu1  ;;  %2909 = vmatmul.mubr.f32.gmra.mrb[40].mxu1 %v14948_v11  ;;  %v751_v3 = vpop.f32.mrb[6].mxu0  ;;  %v4529_v14 = vand.u32 4294901760, %v4528_v6  ;;  %v21315_v6 = vand.u32 4294901760, %v15665_v1 }
 0x155   : > { %2987 = vmatprep.mubr.f32.mxu1 %v21338_v0  ;;  %v752_v57 = vpop.f32.mrb[7].mxu0  ;;  %v4552_v39 = vsub.f32 %v15670_v26, %v21313_v10  ;;  %v3832_v3 = vsub.f32 %v15674_v8, %v21311_v21  ;;  %v4535_v21 = vand.u32 4294901760, %v4534_v23 }
 0x156   : > { %3679 = vmatmul.mubr.f32.vlgmr.msra.gmra.mrb[24].mxu0 %v14888_v28  ;;  %v13568_v57 = vpack.c.bf16 %v4529_v14, %v4517_v41  ;;  %v13520_v41 = vpack.c.bf16 %v3839_v20, %v3827_v49  ;;  %v4540_v53 = vsub.f32 %v15665_v1, %v21315_v6  ;;  %v3844_v14 = vsub.f32 %v15677_v44, %v21312_v43 }
 0x157   : > { %v408_v47 = vpop.f32.mrb[6].mxu1  ;;  %3684 = vmatprep.mubr.f32.mxu0 %v21338_v0  ;;  %13563 = vmatpush1.bf16.msra.mxu0 %v15659_v54  ;;  %v21322_v49 = vand.u32 4294901760, %v15705_v32  ;;  %v21325_v20 = vand.u32 4294901760, %v15708_v48  ;;  %v4546_v43 = vsub.f32 %v15690_v55, %v21319_v15 }
 0x158   : > { %v409_v18 = vpop.f32.mrb[7].mxu1  ;;  %2989 = vmatmul.mubr.f32.vlgmr.msra.gmra.mrb[34].mxu1 %v14888_v28  ;;  %13565 = vmatprep.subr.bf16.mxu0 %v15668_v24  ;;  %v3850_v47 = vsub.f32 %v15681_v56, %v21314_v42  ;;  %v4541_v10 = vand.u32 4294901760, %v4540_v53  ;;  %v4553_v42 = vand.u32 4294901760, %v4552_v39  ;;  %v3845_v62 = vand.u32 4294901760, %v3844_v14 }
 0x159   : > { %2994 = vmatprep.mubr.f32.mxu1 %v21338_v0  ;;  %13515 = vmatpush1.bf16.msra.mxu1 %v15637_v30  ;;  %v3862_v18 = vsub.f32 %v15684_v2, %v21316_v25  ;;  %v3833_v25 = vand.u32 4294901760, %v3832_v3  ;;  %v3868_v23 = vsub.f32 %v15708_v48, %v21325_v20 }
 0x15a   : > { %3686 = vmatmul.mubr.f32.gmra.mrb[26].mxu0 %v14917_v51  ;;  %13517 = vmatprep.subr.bf16.mxu1 %v15679_v35  ;;  %v3851_v15 = vand.u32 4294901760, %v3850_v47  ;;  %v13572_v13 = vpack.c.bf16 %v4553_v42, %v4541_v10  ;;  %v13576_v10 = vpack.c.bf16 %v15598_v33, %v15596_v19 }
 0x15b   : > { %3691 = vmatprep.mubr.f32.mxu0 %v21338_v0  ;;  %13567 = vmatpush1.bf16.msra.mxu0 %v15686_v34  ;;  %v3863_v59 = vand.u32 4294901760, %v3862_v18  ;;  %v13522_v31 = vpack.c.bf16 %v3845_v62, %v3833_v25  ;;  %v3869_v5 = vand.u32 4294901760, %v3868_v23 }
 0x15c   : > { %2996 = vmatmul.mubr.f32.gmra.mrb[36].mxu1 %v14917_v51  ;;  %13569 = vmatprep.subr.bf16.mxu0 %v13568_v57  ;;  %v4523_v57 = vand.u32 4294901760, %v4522_v36  ;;  %v3856_v36 = vsub.f32 %v15705_v32, %v21322_v49 }
 0x15d   : > { %3001 = vmatprep.mubr.f32.mxu1 %v21338_v0  ;;  %13519 = vmatpush1.bf16.msra.mxu1 %v15697_v12 }
 0x15e   : > { %3693 = vmatmul.mubr.f32.gmra.mrb[28].mxu0 %v14919_v52  ;;  %13521 = vmatprep.subr.bf16.mxu1 %v13520_v41  ;;  %v4558_v41 = vsub.f32 %v15692_v22, %v21318_v40  ;;  %v13570_v39 = vpack.c.bf16 %v4535_v21, %v4523_v57  ;;  %v3857_v20 = vand.u32 4294901760, %v3856_v36 }
 0x15f   : > { %3698 = vmatprep.mubr.f32.mxu0 %v21338_v0 }
 0x160   : > { %3003 = vmatmul.mubr.f32.gmra.mrb[38].mxu1 %v14919_v52  ;;  %v4559_v3 = vand.u32 4294901760, %v4558_v41 }
 0x161   : > { %3008 = vmatprep.mubr.f32.mxu1 %v21338_v0  ;;  %v859_v6 = vpop.f32.mrb[8].mxu0 }
 0x162   : > { %3700 = vmatmul.mubr.f32.gmra.mrb[30].mxu0 %v14948_v11  ;;  %v860_v40 = vpop.f32.mrb[9].mxu0  ;;  %v4547_v6 = vand.u32 4294901760, %v4546_v43 }
 0x163   : > { %v532_v53 = vpop.f32.mrb[8].mxu1  ;;  %4468 = vmatprep.mubr.f32.mxu0 %v21338_v0  ;;  %v13524_v40 = vpack.c.bf16 %v3863_v59, %v3851_v15  ;;  %v13528_v59 = vpack.c.bf16 %v15608_v50, %v15606_v58 }
 0x164   : > { %v533_v14 = vpop.f32.mrb[9].mxu1  ;;  %3010 = vmatmul.mubr.f32.gmra.mrb[40].mxu1 %v14948_v11  ;;  %v13574_v21 = vpack.c.bf16 %v4559_v3, %v4547_v6 }
 0x165   : > { %v864_v49 = vpop.f32.mrb[10].mxu0  ;;  %3778 = vmatprep.mubr.f32.mxu1 %v21338_v0 }
 0x166   : > { %v865_v4 = vpop.f32.mrb[11].mxu0  ;;  %4474 = vmatmul.mubr.f32.vlgmr.msra.gmra.mrb[32].mxu0 %v14932_v63 }
 0x167   : > { %v537_v47 = vpop.f32.mrb[10].mxu1  ;;  %4479 = vmatprep.mubr.f32.mxu0 %v21338_v0  ;;  %13571 = vmatpush1.bf16.msra.mxu0 %v13570_v39  ;;  %v13526_v4 = vpack.c.bf16 %v3869_v5, %v3857_v20 }
 0x168   : > { %v538_v43 = vpop.f32.mrb[11].mxu1  ;;  %3784 = vmatmul.mubr.f32.vlgmr.msra.gmra.mrb[42].mxu1 %v14932_v63  ;;  %13573 = vmatprep.subr.bf16.mxu0 %v13572_v13 }
 0x169   : > { %v942_v42 = vpop.f32.mrb[0].mxu0  ;;  %3789 = vmatprep.mubr.f32.mxu1 %v21338_v0  ;;  %13523 = vmatpush1.bf16.msra.mxu1 %v13522_v31  ;;  %v13580_v43 = vpack.c.bf16 %v15670_v26, %v15665_v1 }
 0x16a   : > { %v944_v62 = vpop.f32.mrb[1].mxu0  ;;  %13525 = vmatprep.subr.bf16.mxu1 %v13524_v40  ;;  %4485 = vmatmul.mubr.f32.gmra.mrb[34].mxu0 %v14959_v29  ;;  %v13578_v40 = vpack.c.bf16 %v15663_v16, %v15661_v9 }
 0x16b   : > { %v624_v25 = vpop.f32.mrb[0].mxu1  ;;  %4490 = vmatprep.mubr.f32.mxu0 %v21338_v0  ;;  %13575 = vmatpush1.bf16.msra.mxu0 %v13574_v21 }
 0x16c   : > { %v15779_v13 = vadd.f32 %v942_v42, %v624_v25  ;;  %v626_v15 = vpop.f32.mrb[1].mxu1  ;;  %3795 = vmatmul.mubr.f32.gmra.mrb[44].mxu1 %v14959_v29  ;;  %13577 = vmatprep.subr.bf16.mxu0 %v13576_v10  ;;  %v13532_v25 = vpack.c.bf16 %v15684_v2, %v15681_v56 }
 0x16d   : > { %v15782_v49 = vadd.f32 %v944_v62, %v626_v15  ;;  %v949_v5 = vpop.f32.mrb[2].mxu0  ;;  %3800 = vmatprep.mubr.f32.mxu1 %v21338_v0  ;;  %13527 = vmatpush1.bf16.msra.mxu1 %v13526_v4  ;;  %v13530_v62 = vpack.c.bf16 %v15677_v44, %v15674_v8 }
 0x16e   : > { %22033 = vst [vmem:[#allocation24_spill] sm:$0xff] %v15779_v13  ;;  %v951_v31 = vpop.f32.mrb[3].mxu0  ;;  %v9199_v20 = vrot.slane %v15779_v13, 2  ;;  %v9181_v18 = vrot.slane %v15779_v13, 1  ;;  %4496 = vmatmul.mubr.f32.gmra.mrb[36].mxu0 %v14968_v37  ;;  %13529 = vmatprep.subr.bf16.mxu1 %v13528_v59  ;;  %v9235_v39 = vrot.slane %v15779_v13, 4  ;;  %v9217_v6 = vrot.slane %v15779_v13, 3 }
 0x16f   : > { %22034 = vst [vmem:[#allocation25_spill] sm:$0xff] %v15782_v49  ;;  %v632_v57 = vpop.f32.mrb[2].mxu1  ;;  %4501 = vmatprep.mubr.f32.mxu0 %v21338_v0  ;;  %v9271_v10 = vrot.slane %v15779_v13, 6  ;;  %v9253_v42 = vrot.slane %v15779_v13, 5 }
 0x170   : > { %v15789_v41 = vadd.f32 %v949_v5, %v632_v57  ;;  %9202 = vrot.lane.b32.xlu1 %v9199_v20, %s21538_s15  ;;  %9184 = vrot.lane.b32.xlu0 %v9181_v18, %s21585_s17  ;;  %v634_v36 = vpop.f32.mrb[3].mxu1  ;;  %v9289_v5 = vrot.slane %v15779_v13, 7  ;;  %v13534_v20 = vpack.c.bf16 %v15708_v48, %v15705_v32  ;;  %v9254_v18 = vrot.slane %v15782_v49, 5  ;;  %v16207_v13 = vld [vmem:[%s14845_s3 + $0x220] sm:$0xff] }
 0x171   : > { %v15793_v23 = vadd.f32 %v951_v31, %v634_v36  ;;  %v956_v53 = vpop.f32.mrb[12].mxu0  ;;  %3806 = vmatmul.mubr.f32.gmra.mrb[46].mxu1 %v14968_v37  ;;  %v9218_v31 = vrot.slane %v15782_v49, 3  ;;  %v9182_v57 = vrot.slane %v15782_v49, 1  ;;  %v13582_v36 = vpack.c.bf16 %v15692_v22, %v15690_v55 }
 0x172   : > { %v957_v3 = vpop.f32.mrb[13].mxu0  ;;  %3811 = vmatprep.mubr.f32.mxu1 %v21338_v0  ;;  %4507 = vmatmul.mubr.f32.gmra.mrb[38].mxu0 %v14976_v17  ;;  %v9290_v53 = vrot.slane %v15782_v49, 7 }
 0x173   : > { %v640_v14 = vpop.f32.mrb[12].mxu1  ;;  %4617 = vmatprep.mubr.f32.mxu0 %v21338_v0 }
 0x174   : > { %9238 = vrot.lane.b32.xlu1 %v9235_v39, %s21544_s27  ;;  %9220 = vrot.lane.b32.xlu0 %v9217_v6, %s21566_s19  ;;  %v641_v47 = vpop.f32.mrb[13].mxu1  ;;  %v9200_v39 = vrot.slane %v15782_v49, 2  ;;  %v9236_v6 = vrot.slane %v15782_v49, 4 }
 0x175   : > { %v961_v21 = vpop.f32.mrb[14].mxu0  ;;  %3817 = vmatmul.mubr.f32.gmra.mrb[48].mxu1 %v14976_v17  ;;  %v22036_v47 = vand.u32 4294901760, %v15608_v50  ;;  %v22041_v50 = vand.u32 4294901760, %v15665_v1  ;;  %v22048_v1 = vand.u32 4294901760, %v15692_v22  ;;  %v22053_v22 = vld [vmem:[#allocation21_spill] sm:$0xff] }
 0x176   : > { %v962_v4 = vpop.f32.mrb[15].mxu0  ;;  %3927 = vmatprep.mubr.f32.mxu1 %v21338_v0  ;;  %4619 = vmatmul.mubr.f32.vlgmr.msra.gmra.mrb[32].mxu0 %v14888_v28 }
 0x177   : > { %v646_v59 = vpop.f32.mrb[14].mxu1  ;;  %4624 = vmatprep.mubr.f32.mxu0 %v21338_v0  ;;  %13579 = vmatpush1.bf16.msra.mxu0 %v13578_v40  ;;  %v9272_v40 = vrot.slane %v15782_v49, 6 }
 0x178   : > { %9274 = vrot.lane.b32.xlu1 %v9271_v10, %s21554_s23  ;;  %9256 = vrot.lane.b32.xlu0 %v9253_v42, %s21556_s28  ;;  %v647_v15 = vpop.f32.mrb[15].mxu1  ;;  %v22038_v10 = vand.u32 4294901760, %v15598_v33  ;;  %v22040_v33 = vand.u32 4294901760, %v15663_v16  ;;  %v22044_v59 = vand.u32 4294901760, %v15677_v44  ;;  %v22046_v16 = vand.u32 4294901760, %v15684_v2 }
 0x179   : > { %3929 = vmatmul.mubr.f32.vlgmr.msra.gmra.mrb[42].mxu1 %v14888_v28  ;;  %13581 = vmatprep.subr.bf16.mxu0 %v13580_v43  ;;  %v22037_v43 = vand.u32 4294901760, %v15596_v19  ;;  %v22039_v19 = vand.u32 4294901760, %v15661_v9  ;;  %v22045_v9 = vand.u32 4294901760, %v15681_v56  ;;  %v22049_v44 = vand.u32 4294901760, %v15705_v32 }
 0x17a   : > { %3934 = vmatprep.mubr.f32.mxu1 %v21338_v0  ;;  %13531 = vmatpush1.bf16.msra.mxu1 %v13530_v62  ;;  %v22043_v62 = vand.u32 4294901760, %v15674_v8  ;;  %v22050_v56 = vand.u32 4294901760, %v15708_v48 }
 0x17b   : > { %13533 = vmatprep.subr.bf16.mxu1 %v13532_v25  ;;  %4626 = vmatmul.mubr.f32.gmra.mrb[34].mxu0 %v14917_v51  ;;  %v13592_v42 = vpack.c.bf16 %v22038_v10, %v22037_v43 }
 0x17c   : > { %9292 = vrot.lane.b32.xlu0 %v9289_v5, %s21596_s4  ;;  %9222 = vrot.lane.b32.xlu1 %v9218_v31, %s21566_s19  ;;  %v13546_v25 = vpack.c.bf16 %v22044_v59, %v22043_v62  ;;  %v13548_v5 = vpack.c.bf16 %v22046_v16, %v22045_v9  ;;  %v13550_v2 = vpack.c.bf16 %v22050_v56, %v22049_v44 }
 0x17d   : > { %3936 = vmatmul.mubr.f32.gmra.mrb[44].mxu1 %v14917_v51  ;;  %4631 = vmatprep.mubr.f32.mxu0 %v21338_v0 }
 0x17e   : > { %3941 = vmatprep.mubr.f32.mxu1 %v21338_v0  ;;  %13535 = vmatpush1.bf16.msra.mxu1 %v13534_v20  ;;  %v22051_v20 = vld [vmem:[#allocation18_spill] sm:$0xff] }
 0x17f   : > { %4633 = vmatmul.mubr.f32.gmra.mrb[36].mxu0 %v14919_v52  ;;  %13537 = vmatprep.subr.bf16.mxu1 %v15604_v45 }
 0x180   : > { %9258 = vrot.lane.b32.xlu1 %v9254_v18, %s21556_s28  ;;  %9186 = vrot.lane.b32.xlu0 %v9182_v57, %s21585_s17 }
 0x181   : > { %3943 = vmatmul.mubr.f32.gmra.mrb[46].mxu1 %v14919_v52  ;;  %4638 = vmatprep.mubr.f32.mxu0 %v21338_v0 }
 0x182   : > { %3948 = vmatprep.mubr.f32.mxu1 %v21338_v0  ;;  %13583 = vmatpush1.bf16.msra.mxu0 %v13582_v36 }
 0x183   : > { %4640 = vmatmul.mubr.f32.gmra.mrb[38].mxu0 %v14948_v11  ;;  %13585 = vmatprep.subr.bf16.mxu0 %v15594_v7 }
 0x184   : > { %9294 = vrot.lane.b32.xlu1 %v9290_v53, %s21596_s4  ;;  %9204 = vrot.lane.b32.xlu0 %v9200_v39, %s21538_s15 }
 0x185   : > { %3950 = vmatmul.mubr.f32.gmra.mrb[48].mxu1 %v14948_v11  ;;  %4726 = vmatprep.mubr.f32.mxu0 %v21338_v0 }
 0x186   : > { %4036 = vmatprep.mubr.f32.mxu1 %v21338_v0 }
 0x187   : > { %v1076_v3 = vpop.f32.mrb[22].mxu1  ;;  %4729 = vmatmul.mubr.f32.vlgmr.msra.gmra.mrb[32].mxu0 %v14903_v38 }
 0x188   : > { %9240 = vrot.lane.b32.xlu0 %v9236_v6, %s21544_s27  ;;  %9310 = vrot.lane.b32.xlu1 %v15789_v41, %s21444_s5  ;;  %v1077_v14 = vpop.f32.mrb[23].mxu1  ;;  %v22035_v41 = vand.u32 4294901760, %v15606_v58  ;;  %v13594_v58 = vpack.c.bf16 %v22040_v33, %v22039_v19 }
 0x189   : > { %4039 = vmatmul.mubr.f32.vlgmr.msra.gmra.mrb[42].mxu1 %v14903_v38  ;;  %4734 = vmatprep.mubr.f32.mxu0 %v21338_v0 }
 0x18a   : > { %4044 = vmatprep.mubr.f32.mxu1 %v21338_v0  ;;  %13539 = vmatpush1.bf16.msra.mxu1 %v15637_v30  ;;  %v13544_v21 = vpack.c.bf16 %v22036_v47, %v22035_v41 }
 0x18b   : > { %13541 = vmatprep.subr.bf16.mxu1 %v15679_v35  ;;  %4737 = vmatmul.mubr.f32.gmra.mrb[34].mxu0 %v14927_v60 }
 0x18c   : > { %9276 = vrot.lane.b32.xlu0 %v9272_v40, %s21554_s23  ;;  %4742 = vmatprep.mubr.f32.mxu0 %v21338_v0 }
 0x18d   : > { %4047 = vmatmul.mubr.f32.gmra.mrb[44].mxu1 %v14927_v60  ;;  %13587 = vmatpush1.bf16.msra.mxu0 %v15659_v54 }
 0x18e   : > { %4052 = vmatprep.mubr.f32.mxu1 %v21338_v0  ;;  %13543 = vmatpush1.bf16.msra.mxu1 %v15697_v12 }
 0x18f   : > { %4745 = vmatmul.mubr.f32.gmra.mrb[36].mxu0 %v14930_v61  ;;  %13589 = vmatprep.subr.bf16.mxu0 %v15668_v24 }
 0x190   : > { %9312 = vrot.lane.b32.xlu0 %v15793_v23, %s21444_s5  ;;  %4750 = vmatprep.mubr.f32.mxu0 %v21338_v0  ;;  %v22042_v23 = vand.u32 4294901760, %v15670_v26  ;;  %v22047_v26 = vand.u32 4294901760, %v15690_v55  ;;  %v22052_v55 = vld [vmem:[#allocation19_spill] sm:$0xff] }
 0x191   : > { %4055 = vmatmul.mubr.f32.gmra.mrb[46].mxu1 %v14930_v61  ;;  %13591 = vmatpush1.bf16.msra.mxu0 %v15686_v34 }
 0x192   : > { %4060 = vmatprep.mubr.f32.mxu1 %v21338_v0  ;;  %13545 = vmatprep.subr.bf16.mxu1 %v13544_v21  ;;  %v13596_v4 = vpack.c.bf16 %v22042_v23, %v22041_v50  ;;  %v13598_v8 = vpack.c.bf16 %v22048_v1, %v22047_v26 }
 0x193   : > { %4753 = vmatmul.mubr.f32.gmra.mrb[38].mxu0 %v14957_v27  ;;  %13593 = vmatprep.subr.bf16.mxu0 %v13592_v42 }
 0x194   : > { %4831 = vmatprep.mubr.f32.mxu0 %v21338_v0 }
 0x195   : > { %4063 = vmatmul.mubr.f32.gmra.mrb[48].mxu1 %v14957_v27 }
 0x196   : > { %4141 = vmatprep.mubr.f32.mxu1 %v21338_v0 }
 0x197   : > { %v1207_v15 = vpop.f32.mrb[24].mxu1  ;;  %4835 = vmatmul.mubr.f32.vlgmr.msra.gmra.mrb[32].mxu0 %v14915_v46 }
 0x198   : > { %v1208_v31 = vpop.f32.mrb[25].mxu1  ;;  %4840 = vmatprep.mubr.f32.mxu0 %v21338_v0  ;;  %13595 = vmatpush1.bf16.msra.mxu0 %v13594_v58 }
 0x199   : > { %4145 = vmatmul.mubr.f32.vlgmr.msra.gmra.mrb[42].mxu1 %v14915_v46  ;;  %13597 = vmatprep.subr.bf16.mxu0 %v13596_v4 }
 0x19a   : > { %4150 = vmatprep.mubr.f32.mxu1 %v21338_v0  ;;  %13547 = vmatpush1.bf16.msra.mxu1 %v13546_v25 }
 0x19b   : > { %13549 = vmatprep.subr.bf16.mxu1 %v13548_v5  ;;  %4844 = vmatmul.mubr.f32.gmra.mrb[34].mxu0 %v22051_v20 }
 0x19c   : > { %4849 = vmatprep.mubr.f32.mxu0 %v21338_v0  ;;  %13599 = vmatpush1.bf16.msra.mxu0 %v13598_v8 }
 0x19d   : > { %4154 = vmatmul.mubr.f32.gmra.mrb[44].mxu1 %v22051_v20  ;;  %13601 = vmatprep.subr.bf16.mxu0 %v15594_v7 }
 0x19e   : > { %4159 = vmatprep.mubr.f32.mxu1 %v21338_v0  ;;  %13551 = vmatpush1.bf16.msra.mxu1 %v13550_v2  ;;  %v192_v2 = vld [vmem:[%s14845_s3 + $0x78] sm:$0xff] }
 0x19f   : > { %4853 = vmatmul.mubr.f32.gmra.mrb[36].mxu0 %v22052_v55  ;;  %13553 = vmatprep.subr.bf16.mxu1 %v15604_v45 }
 0x1a0   : > { %4858 = vmatprep.mubr.f32.mxu0 %v21338_v0 }
 0x1a1   : > { %4163 = vmatmul.mubr.f32.gmra.mrb[46].mxu1 %v22052_v55 }
 0x1a2   : > { %4168 = vmatprep.mubr.f32.mxu1 %v21338_v0 }
 0x1a3   : > { %4862 = vmatmul.mubr.f32.gmra.mrb[38].mxu0 %v22053_v22 }
 0x1a4   : > { %4956 = vmatprep.mubr.f32.mxu0 %v21338_v0 }
 0x1a5   : > { %4172 = vmatmul.mubr.f32.gmra.mrb[48].mxu1 %v22053_v22 }
 0x1a6   : > { %4266 = vmatprep.mubr.f32.mxu1 %v21338_v0 }
 0x1a7   : > { %v1318_v7 = vpop.f32.mrb[26].mxu1  ;;  %4958 = vmatmul.mubr.f32.vlgmr.msra.gmra.mrb[32].mxu0 %v14888_v28 }
 0x1a8   : > { %v1319_v32 = vpop.f32.mrb[27].mxu1  ;;  %4963 = vmatprep.mubr.f32.mxu0 %v21338_v0  ;;  %13603 = vmatpush1.bf16.msra.mxu0 %v15659_v54  ;;  %v218_v7 = vld [vmem:[%s14845_s3 + $0x148] sm:$0xff] }
 0x1a9   : > { %4268 = vmatmul.mubr.f32.vlgmr.msra.gmra.mrb[42].mxu1 %v14888_v28  ;;  %13605 = vmatprep.subr.bf16.mxu0 %v15668_v24  ;;  %v5086_v32 = vand.u32 4294901760, %v192_v2 }
 0x1aa   : > { %4273 = vmatprep.mubr.f32.mxu1 %v21338_v0  ;;  %13555 = vmatpush1.bf16.msra.mxu1 %v15637_v30 }
 0x1ab   : > { %13557 = vmatprep.subr.bf16.mxu1 %v15679_v35  ;;  %4965 = vmatmul.mubr.f32.gmra.mrb[34].mxu0 %v14917_v51 }
 0x1ac   : > { %4970 = vmatprep.mubr.f32.mxu0 %v21338_v0  ;;  %13607 = vmatpush1.bf16.msra.mxu0 %v15686_v34 }
 0x1ad   : > { %4275 = vmatmul.mubr.f32.gmra.mrb[44].mxu1 %v14917_v51 }
 0x1ae   : > { %4280 = vmatprep.mubr.f32.mxu1 %v21338_v0  ;;  %13559 = vmatpush1.bf16.msra.mxu1 %v15697_v12 }
 0x1af   : > { %4972 = vmatmul.mubr.f32.gmra.mrb[36].mxu0 %v14919_v52 }
 0x1b0   : > { %4977 = vmatprep.mubr.f32.mxu0 %v21338_v0 }
 0x1b1   : > { %4282 = vmatmul.mubr.f32.gmra.mrb[46].mxu1 %v14919_v52 }
 0x1b2   : > { %4287 = vmatprep.mubr.f32.mxu1 %v21338_v0 }
 0x1b3   : > { %4979 = vmatmul.mubr.f32.gmra.mrb[38].mxu0 %v14948_v11 }
 0x1b4   : > { %5057 = vmatprep.mubr.f32.mxu0 %v21338_v0 }
 0x1b5   : > { %4289 = vmatmul.mubr.f32.gmra.mrb[48].mxu1 %v14948_v11 }
 0x1b6   : > { %4367 = vmatprep.mubr.f32.mxu1 %v21338_v0 }
 0x1b7   : > { %v1425_v45 = vpop.f32.mrb[28].mxu1  ;;  %5059 = vmatmul.mubr.f32.vlgmr.msra.gmra.mrb[32].mxu0 %v14888_v28 }
 0x1b8   : > { %v1426_v30 = vpop.f32.mrb[29].mxu1  ;;  %5064 = vmatprep.mubr.f32.mxu0 %v21338_v0  ;;  %v5090_v45 = vand.u32 4294901760, %v218_v7 }
 0x1b9   : > { %4369 = vmatmul.mubr.f32.vlgmr.msra.gmra.mrb[42].mxu1 %v14888_v28 }
 0x1ba   : > { %4374 = vmatprep.mubr.f32.mxu1 %v21338_v0 }
 0x1bb   : > { %5066 = vmatmul.mubr.f32.gmra.mrb[34].mxu0 %v14917_v51 }
 0x1bc   : > { %5071 = vmatprep.mubr.f32.mxu0 %v21338_v0 }
 0x1bd   : > { %4376 = vmatmul.mubr.f32.gmra.mrb[44].mxu1 %v14917_v51 }
 0x1be   : > { %4381 = vmatprep.mubr.f32.mxu1 %v21338_v0 }
 0x1bf   : > { %5073 = vmatmul.mubr.f32.gmra.mrb[36].mxu0 %v14919_v52 }
 0x1c0   : > { %5078 = vmatprep.mubr.f32.mxu0 %v21338_v0 }
 0x1c1   : > { %4383 = vmatmul.mubr.f32.gmra.mrb[46].mxu1 %v14919_v52 }
 0x1c2   : > { %4388 = vmatprep.mubr.f32.mxu1 %v21338_v0 }
 0x1c3   : > { %5080 = vmatmul.mubr.f32.gmra.mrb[38].mxu0 %v14948_v11 }
 0x1c4   : > { %5848 = vmatprep.mubr.f32.mxu0 %v21338_v0 }
 0x1c5   : > { %4390 = vmatmul.mubr.f32.gmra.mrb[48].mxu1 %v14948_v11 }
 0x1c6   : > { %5158 = vmatprep.mubr.f32.mxu1 %v21338_v0 }
 0x1c7   : > { %v1540_v54 = vpop.f32.mrb[30].mxu1 }
 0x1c8   : > { %v1541_v24 = vpop.f32.mrb[31].mxu1 }
 0x1c9   : > { %v15969_v35 = vpop.f32.mrb[16].mxu0  ;;  %v191_v24 = vld [vmem:[%s14845_s3 + $0x70] sm:$0xff] }
 0x1ca   : > { %22054 = vst [vmem:[#allocation18_spill] sm:$0xff] %v15969_v35  ;;  %v15971_v34 = vpop.f32.mrb[17].mxu0  ;;  %v9672_v58 = vrot.slane %v15969_v35, 1  ;;  %v9686_v4 = vrot.slane %v15969_v35, 2  ;;  %v9761_v62 = vrot.slane %v15969_v35, 7  ;;  %v9700_v59 = vrot.slane %v15969_v35, 3 }
 0x1cb   : > { %22055 = vst [vmem:[#allocation19_spill] sm:$0xff] %v15971_v34  ;;  %v15973_v12 = vpop.f32.mrb[16].mxu1  ;;  %v9714_v15 = vrot.slane %v15969_v35, 4  ;;  %v9728_v16 = vrot.slane %v15969_v35, 5  ;;  %v9743_v31 = vrot.slane %v15969_v35, 6  ;;  %v9762_v44 = vrot.slane %v15971_v34, 7 }
 0x1cc   : > { %22056 = vst [vmem:[#allocation21_spill] sm:$0xff] %v15973_v12  ;;  %v15975_v48 = vpop.f32.mrb[17].mxu1  ;;  %v9219_v18 = vrot.slane %v15973_v12, 3  ;;  %v9183_v57 = vrot.slane %v15973_v12, 1  ;;  %v9255_v3 = vrot.slane %v15973_v12, 5  ;;  %v9201_v14 = vrot.slane %v15973_v12, 2 }
 0x1cd   : > { %22057 = vst [vmem:[#allocation26_spill] sm:$0xff] %v15975_v48  ;;  %v15979_v36 = vpop.f32.mrb[18].mxu0  ;;  %v9291_v43 = vrot.slane %v15973_v12, 7  ;;  %v9237_v10 = vrot.slane %v15973_v12, 4  ;;  %v9273_v50 = vrot.slane %v15973_v12, 6  ;;  %v9671_v25 = vrot.slane %v15975_v48, 1 }
 0x1ce   : > { %9224 = vrot.lane.b32.xlu0 %v9219_v18, %s21566_s19  ;;  %9188 = vrot.lane.b32.xlu1 %v9183_v57, %s21585_s17  ;;  %v15983_v53 = vpop.f32.mrb[19].mxu0  ;;  %v9685_v9 = vrot.slane %v15975_v48, 2  ;;  %v9699_v5 = vrot.slane %v15975_v48, 3  ;;  %v9713_v26 = vrot.slane %v15975_v48, 4  ;;  %v9760_v1 = vrot.slane %v15975_v48, 7  ;;  %v217_v18 = vld [vmem:[%s14845_s3 + $0x140] sm:$0xff] }
 0x1cf   : > { %v15985_v39 = vpop.f32.mrb[18].mxu1  ;;  %v9727_v8 = vrot.slane %v15975_v48, 5  ;;  %v9742_v56 = vrot.slane %v15975_v48, 6  ;;  %v10099_v30 = vrot.slane %v15971_v34, 2  ;;  %v9744_v54 = vrot.slane %v15971_v34, 6 }
 0x1d0   : > { %v15987_v6 = vpop.f32.mrb[19].mxu1  ;;  %v16045_v57 = vpack.c.bf16 %v5090_v45, %v5086_v32 }
 0x1d1   : > { %v15991_v40 = vpop.f32.mrb[20].mxu0  ;;  %v9364_v48 = vrot.slane %v15987_v6, 3 }
 0x1d2   : > { %9260 = vrot.lane.b32.xlu0 %v9255_v3, %s21556_s28  ;;  %9206 = vrot.lane.b32.xlu1 %v9201_v14, %s21538_s15  ;;  %v15995_v41 = vpop.f32.mrb[21].mxu0  ;;  %v5088_v3 = vand.u32 4294901760, %v191_v24  ;;  %v5092_v14 = vand.u32 4294901760, %v217_v18 }
 0x1d3   : > { %v15997_v47 = vpop.f32.mrb[20].mxu1  ;;  %13609 = vmatprep.subr.bf16.mxu1 %v16045_v57 }
 0x1d4   : > { %v15999_v21 = vpop.f32.mrb[21].mxu1 }
 0x1d5   : > { %v2322_v42 = vpop.f32.mrb[22].mxu0 }
 0x1d6   : > { %9296 = vrot.lane.b32.xlu0 %v9291_v43, %s21596_s4  ;;  %9242 = vrot.lane.b32.xlu1 %v9237_v10, %s21544_s27  ;;  %v16005_v19 = vpop.f32.mrb[23].mxu0  ;;  %v244_v43 = vld [vmem:[%s14845_s3 + $0x218] sm:$0xff]  ;;  %v270_v10 = vld [vmem:[%s14845_s3 + $0x2e8] sm:$0xff] }
 0x1d7   : > { %v1639_v33 = vpop.f32.mrb[32].mxu1  ;;  %v5094_v42 = vand.u32 4294901760, %v244_v43 }
 0x1d8   : > { %v1640_v23 = vpop.f32.mrb[33].mxu1  ;;  %v5098_v33 = vand.u32 4294901760, %v270_v10 }
 0x1d9   : > { %v16054_v23 = vpack.c.bf16 %v5092_v14, %v5088_v3 }
 0x1da   : > { %9675 = vrot.lane.b32.xlu0 %v9672_v58, %s21585_s17  ;;  %9278 = vrot.lane.b32.xlu1 %v9273_v50, %s21554_s23  ;;  %v10133_v58 = vrot.slane %v15971_v34, 4  ;;  %v10082_v50 = vrot.slane %v15971_v34, 1 }
 0x1db   : > { %13611 = vmatpush1.bf16.msra.mxu1 %v16054_v23 }
 0x1de   : > { %9689 = vrot.lane.b32.xlu0 %v9686_v4, %s21538_s15  ;;  %9765 = vrot.lane.b32.xlu1 %v9761_v62, %s21596_s4  ;;  %v16056_v4 = vpack.c.bf16 %v5098_v33, %v5094_v42  ;;  %v243_v62 = vld [vmem:[%s14845_s3 + $0x210] sm:$0xff] }
 0x1e0   : > { %13613 = vmatprep.subr.bf16.mxu1 %v16056_v4 }
 0x1e2   : > { %9703 = vrot.lane.b32.xlu0 %v9700_v59, %s21566_s19  ;;  %9673 = vrot.lane.b32.xlu1 %v9671_v25, %s21585_s17  ;;  %v269_v59 = vld [vmem:[%s14845_s3 + $0x2e0] sm:$0xff]  ;;  %v10116_v25 = vrot.slane %v15971_v34, 3 }
 0x1e6   : > { %9717 = vrot.lane.b32.xlu0 %v9714_v15, %s21544_s27  ;;  %9687 = vrot.lane.b32.xlu1 %v9685_v9, %s21538_s15  ;;  %v5096_v15 = vand.u32 4294901760, %v243_v62  ;;  %v5100_v9 = vand.u32 4294901760, %v269_v59 }
 0x1ea   : > { %9731 = vrot.lane.b32.xlu0 %v9728_v16, %s21556_s28  ;;  %9701 = vrot.lane.b32.xlu1 %v9699_v5, %s21566_s19  ;;  %v16068_v16 = vsub.f32 %v192_v2, %v5086_v32  ;;  %v16070_v5 = vsub.f32 %v218_v7, %v5090_v45  ;;  %v9329_v7 = vrot.slane %v15979_v36, 1  ;;  %v16086_v32 = vsub.f32 %v244_v43, %v5094_v42 }
 0x1eb   : > { %v16088_v45 = vsub.f32 %v270_v10, %v5098_v33 }
 0x1ec   : > { %v21336_v2 = vand.u32 4294901760, %v16070_v5 }
 0x1ee   : > { %9747 = vrot.lane.b32.xlu0 %v9743_v31, %s21554_s23  ;;  %9715 = vrot.lane.b32.xlu1 %v9713_v26, %s21544_s27  ;;  %v16072_v31 = vpack.c.bf16 %v5100_v9, %v5096_v15  ;;  %v10150_v26 = vrot.slane %v15971_v34, 5 }
 0x1f0   : > { %13615 = vmatpush1.bf16.msra.mxu1 %v16072_v31 }
 0x1f2   : > { %9763 = vrot.lane.b32.xlu0 %v9760_v1, %s21596_s4  ;;  %9729 = vrot.lane.b32.xlu1 %v9727_v8, %s21556_s28  ;;  %v9327_v1 = vrot.slane %v15985_v39, 1  ;;  %v16076_v8 = vsub.f32 %v191_v24, %v5088_v3  ;;  %v5218_v24 = vsub.f32 %v16070_v5, %v21336_v2  ;;  %v16183_v2 = vld [vmem:[%s14845_s3 + $0x2f8] sm:$0xff] }
 0x1f3   : > { %5164 = vmatmul.mubr.f32.vlgmr.msra.gmra.mrb[50].mxu1 %v14932_v63 }
 0x1f4   : > { %5169 = vmatprep.mubr.f32.mxu1 %v21338_v0  ;;  %v5219_v10 = vand.u32 4294901760, %v5218_v24 }
 0x1f6   : > { %9767 = vrot.lane.b32.xlu0 %v9762_v44, %s21596_s4  ;;  %9745 = vrot.lane.b32.xlu1 %v9742_v56, %s21554_s23  ;;  %v16078_v44 = vsub.f32 %v217_v18, %v5092_v14  ;;  %v21337_v56 = vand.u32 4294901760, %v16068_v16  ;;  %v21335_v18 = vand.u32 4294901760, %v16076_v8  ;;  %v16102_v14 = vsub.f32 %v269_v59, %v5100_v9  ;;  %v16117_v59 = vpop.permute.xlu0 %9184 }
 0x1f7   : > { %5175 = vmatmul.mubr.f32.gmra.mrb[52].mxu1 %v14959_v29  ;;  %22058 = vst [vmem:[#allocation27_spill] sm:$0xff] %v16117_v59 }
 0x1f8   : > { %v21334_v3 = vand.u32 4294901760, %v16078_v44  ;;  %v5212_v42 = vsub.f32 %v16076_v8, %v21335_v18  ;;  %5180 = vmatprep.mubr.f32.mxu1 %v21338_v0  ;;  %v16180_v18 = vld [vmem:[%s14845_s3 + $0x228] sm:$0xff] }
 0x1f9   : > { %v22079_v34 = vand.u32 4294901760, %v16180_v18 }
 0x1fa   : > { %10102 = vrot.lane.b32.xlu0 %v10099_v30, %s21538_s15  ;;  %9749 = vrot.lane.b32.xlu1 %v9744_v54, %s21554_s23  ;;  %v16090_v30 = vsub.f32 %v243_v62, %v5096_v15  ;;  %v5206_v54 = vsub.f32 %v16068_v16, %v21337_v56  ;;  %v5224_v33 = vsub.f32 %v16078_v44, %v21334_v3  ;;  %v21330_v62 = vand.u32 4294901760, %v16088_v45 }
 0x1fb   : > { %v5213_v15 = vand.u32 4294901760, %v5212_v42  ;;  %5186 = vmatmul.mubr.f32.gmra.mrb[54].mxu1 %v14968_v37  ;;  %v9436_v56 = vrot.slane %v15985_v39, 7  ;;  %v16306_v35 = vsub.f32 %v16180_v18, %v22079_v34 }
 0x1fc   : > { %v5207_v43 = vand.u32 4294901760, %v5206_v54  ;;  %v5225_v9 = vand.u32 4294901760, %v5224_v33  ;;  %v21332_v54 = vand.u32 4294901760, %v16102_v14  ;;  %5191 = vmatprep.mubr.f32.mxu1 %v21338_v0 }
 0x1fe   : > { %10136 = vrot.lane.b32.xlu0 %v10133_v58, %s21544_s27  ;;  %10085 = vrot.lane.b32.xlu1 %v10082_v50, %s21585_s17  ;;  %v9363_v58 = vrot.slane %v15985_v39, 3  ;;  %v21331_v50 = vand.u32 4294901760, %v16086_v32  ;;  %v13618_v24 = vpack.c.bf16 %v5225_v9, %v5213_v15  ;;  %v5248_v33 = vsub.f32 %v16102_v14, %v21332_v54  ;;  %v16171_v54 = vld [vmem:[%s14845_s3 + $0x150] sm:$0xff] }
 0x1ff   : > { %5197 = vmatmul.mubr.f32.gmra.mrb[56].mxu1 %v14976_v17  ;;  %v21342_v3 = vand.u32 4294901760, %v16171_v54 }
 0x200   : > { %v5249_v9 = vand.u32 4294901760, %v5248_v33  ;;  %5307 = vmatprep.mubr.f32.mxu1 %v21338_v0 }
 0x202   : > { %9780 = vrot.lane.b32.xlu0 %v15979_v36, %s21444_s5  ;;  %10119 = vrot.lane.b32.xlu1 %v10116_v25, %s21566_s19  ;;  %v13616_v25 = vpack.c.bf16 %v5219_v10, %v5207_v43 }
 0x204   : > { %13617 = vmatprep.subr.bf16.mxu1 %v13616_v25 }
 0x205   : > { %13619 = vmatpush1.bf16.msra.mxu1 %v13618_v24  ;;  %v194_v24 = vld [vmem:[%s14845_s3 + $0x88] sm:$0xff] }
 0x206   : > { %10153 = vrot.lane.b32.xlu1 %v10150_v26, %s21556_s28  ;;  %9330 = vrot.lane.b32.xlu0 %v9327_v1, %s21499_s6  ;;  %v21333_v26 = vand.u32 4294901760, %v16090_v30  ;;  %v5230_v1 = vsub.f32 %v16086_v32, %v21331_v50  ;;  %v16140_v50 = vpop.permute.xlu0 %9220 }
 0x207   : > { %22059 = vst [vmem:[#allocation28_spill] sm:$0xff] %v16140_v50 }
 0x208   : > { %v5236_v43 = vsub.f32 %v16090_v30, %v21333_v26  ;;  %v5231_v10 = vand.u32 4294901760, %v5230_v1  ;;  %v9399_v1 = vrot.slane %v15985_v39, 5 }
 0x20a   : > { %9314 = vrot.lane.b32.xlu1 %v15985_v39, %s21444_s5  ;;  %9334 = vrot.lane.b32.xlu0 %v9329_v7, %s21499_s6  ;;  %v5242_v7 = vsub.f32 %v16088_v45, %v21330_v62  ;;  %v9365_v62 = vrot.slane %v15979_v36, 3 }
 0x20c   : > { %v5243_v42 = vand.u32 4294901760, %v5242_v7  ;;  %v9345_v7 = vrot.slane %v15985_v39, 2 }
 0x20e   : > { %9366 = vrot.lane.b32.xlu0 %v9363_v58, %s21492_s7  ;;  %9778 = vrot.lane.b32.xlu1 %v15987_v6, %s21444_s5  ;;  %v5237_v58 = vand.u32 4294901760, %v5236_v43  ;;  %v13620_v15 = vpack.c.bf16 %v5243_v42, %v5231_v10  ;;  %v220_v43 = vld [vmem:[%s14845_s3 + $0x158] sm:$0xff]  ;;  %v16155_v10 = vpop.permute.xlu1 %9202  ;;  %v5776_v42 = vand.u32 4294901760, %v194_v24 }
 0x20f   : > { %22060 = vst [vmem:[#allocation29_spill] sm:$0xff] %v16155_v10  ;;  %v5780_v33 = vand.u32 4294901760, %v220_v43  ;;  %v16210_v10 = vld [vmem:[%s14845_s3 + $0x2f0] sm:$0xff] }
 0x210   : > { %13621 = vmatprep.subr.bf16.mxu1 %v13620_v15  ;;  %v13622_v25 = vpack.c.bf16 %v5249_v9, %v5237_v58  ;;  %v16157_v58 = vpop.permute.xlu0 %9256  ;;  %v9401_v15 = vrot.slane %v15979_v36, 5  ;;  %v9347_v9 = vrot.slane %v15979_v36, 2 }
 0x211   : > { %22061 = vst [vmem:[#allocation30_spill] sm:$0xff] %v16157_v58 }
 0x212   : > { %9370 = vrot.lane.b32.xlu0 %v9365_v62, %s21492_s7  ;;  %9782 = vrot.lane.b32.xlu1 %v15983_v53, %s21444_s5  ;;  %v13624_v62 = vpack.c.bf16 %v16070_v5, %v16068_v16  ;;  %v16197_v49 = vpop.permute.xlu1 %9238 }
 0x213   : > { %13623 = vmatpush1.bf16.msra.mxu1 %v13622_v25  ;;  %v16163_v25 = vpack.c.bf16 %v5780_v33, %v5776_v42  ;;  %22062 = vst [vmem:[#allocation31_spill] sm:$0xff] %v16197_v49  ;;  %v9417_v49 = vrot.slane %v15985_v39, 6 }
 0x214   : > { %13625 = vmatprep.subr.bf16.mxu1 %v13624_v62  ;;  %v13628_v62 = vpack.c.bf16 %v16088_v45, %v16086_v32  ;;  %v16212_v59 = vpop.permute.xlu0 %9292 }
 0x215   : > { %13657 = vmatprep.subr.bf16.mxu0 %v16163_v25  ;;  %22064 = vst [vmem:[#allocation32_spill] sm:$0xff] %v16212_v59 }
 0x216   : > { %9402 = vrot.lane.b32.xlu0 %v9399_v1, %s21381_s18  ;;  %9348 = vrot.lane.b32.xlu1 %v9345_v7, %s21490_s24  ;;  %v13626_v1 = vpack.c.bf16 %v16078_v44, %v16076_v8  ;;  %v16168_v7 = vld [vmem:[%s14845_s3 + $0x80] sm:$0xff] }
 0x217   : > { %5309 = vmatmul.mubr.f32.vlgmr.msra.gmra.mrb[50].mxu1 %v14888_v28  ;;  %v21345_v26 = vand.u32 4294901760, %v16168_v7 }
 0x218   : > { %5314 = vmatprep.mubr.f32.mxu1 %v21338_v0  ;;  %13627 = vmatpush1.bf16.msra.mxu1 %v13626_v1  ;;  %v9381_v0 = vrot.slane %v15985_v39, 4  ;;  %v22063_v1 = vmov 0.0   ;;  %v16238_v59 = vpop.permute.xlu0 %9186  ;;  %v9382_v39 = vrot.slane %v15987_v6, 4 }
 0x219   : > { %v16195_v58 = vpack.c.bf16 %v21342_v3, %v21345_v26  ;;  %13629 = vmatprep.subr.bf16.mxu1 %v13628_v62  ;;  %v13630_v62 = vpack.c.bf16 %v16102_v14, %v16090_v30  ;;  %v21347_v3 = vand.u32 4294901760, %v16207_v13  ;;  %v9383_v26 = vrot.slane %v15979_v36, 4  ;;  %22066 = vst [vmem:[#allocation34_spill] sm:$0xff] %v16238_v59 }
 0x21a   : > { %9406 = vrot.lane.b32.xlu0 %v9401_v15, %s21381_s18  ;;  %9352 = vrot.lane.b32.xlu1 %v9347_v9, %s21490_s24  ;;  %v21344_v15 = vand.u32 4294901760, %v16180_v18  ;;  %v21343_v9 = vand.u32 4294901760, %v16183_v2 }
 0x21b   : > { %5316 = vmatmul.mubr.f32.gmra.mrb[52].mxu1 %v14917_v51  ;;  %13659 = vmatpush1.bf16.msra.mxu0 %v16195_v58 }
 0x21c   : > { %5321 = vmatprep.mubr.f32.mxu1 %v22063_v1  ;;  %v16204_v50 = vpack.c.bf16 %v21343_v9, %v21344_v15  ;;  %v21346_v9 = vand.u32 4294901760, %v16210_v10  ;;  %v9438_v15 = vrot.slane %v15979_v36, 7  ;;  %13631 = vmatpush1.bf16.msra.mxu1 %v13630_v62  ;;  %v16245_v62 = vsub.f32 %v220_v43, %v5780_v33  ;;  %v16263_v33 = vpop.permute.xlu0 %9204 }
 0x21d   : > { %13633 = vmatprep.subr.bf16.mxu1 %v16045_v57  ;;  %22069 = vst [vmem:[#allocation37_spill] sm:$0xff] %v16263_v33 }
 0x21e   : > { %9440 = vrot.lane.b32.xlu0 %v9436_v56, %s21501_s25  ;;  %9384 = vrot.lane.b32.xlu1 %v9381_v0, %s21483_s20  ;;  %v16229_v0 = vpack.c.bf16 %v21346_v9, %v21347_v3  ;;  %v16234_v56 = vpop.permute.xlu1 %9274  ;;  %v9346_v9 = vrot.slane %v15987_v6, 2  ;;  %v16243_v3 = vsub.f32 %v194_v24, %v5776_v42 }
 0x21f   : > { %5323 = vmatmul.mubr.f32.gmra.mrb[54].mxu1 %v14919_v52  ;;  %13661 = vmatprep.subr.bf16.mxu0 %v16204_v50  ;;  %22065 = vst [vmem:[#allocation33_spill] sm:$0xff] %v16234_v56  ;;  %v22072_v56 = vand.u32 4294901760, %v16171_v54 }
 0x220   : > { %5328 = vmatprep.mubr.f32.mxu1 %v22063_v1  ;;  %13663 = vmatpush1.bf16.msra.mxu0 %v16229_v0  ;;  %v16325_v34 = vpop.permute.xlu0 %9240 }
 0x221   : > { %22084 = vst [vmem:[#allocation45_spill] sm:$0xff] %v16325_v34 }
 0x222   : > { %9444 = vrot.lane.b32.xlu0 %v9438_v15, %s21501_s25  ;;  %9388 = vrot.lane.b32.xlu1 %v9383_v26, %s21483_s20  ;;  %v9419_v26 = vrot.slane %v15979_v36, 6  ;;  %v16255_v24 = vpop.permute.xlu1 %9222  ;;  %v22071_v15 = vand.u32 4294901760, %v16168_v7 }
 0x223   : > { %5330 = vmatmul.mubr.f32.gmra.mrb[56].mxu1 %v14948_v11  ;;  %5854 = vmatmul.mubr.f32.vlgmr.msra.gmra.mrb[40].mxu0 %v14932_v63  ;;  %22067 = vst [vmem:[#allocation35_spill] sm:$0xff] %v16255_v24  ;;  %v9328_v24 = vrot.slane %v15987_v6, 1 }
 0x224   : > { %5416 = vmatprep.mubr.f32.mxu1 %v22063_v1  ;;  %5859 = vmatprep.mubr.f32.mxu0 %v22063_v1 }
 0x226   : > { %9420 = vrot.lane.b32.xlu1 %v9417_v49, %s21487_s26  ;;  %9350 = vrot.lane.b32.xlu0 %v9346_v9, %s21490_s24  ;;  %v16272_v9 = vsub.f32 %v16168_v7, %v22071_v15  ;;  %v16277_v49 = vsub.f32 %v16171_v54, %v22072_v56  ;;  %v22076_v54 = vand.u32 4294901760, %v16243_v3  ;;  %v22077_v15 = vand.u32 4294901760, %v16245_v62  ;;  %v16310_v12 = vpop.permute.xlu1 %9258 }
 0x227   : > { %5419 = vmatmul.mubr.f32.vlgmr.msra.gmra.mrb[50].mxu1 %v14903_v38  ;;  %5865 = vmatmul.mubr.f32.gmra.mrb[42].mxu0 %v14959_v29  ;;  %22080 = vst [vmem:[#allocation43_spill] sm:$0xff] %v16310_v12  ;;  %v22082_v29 = vand.u32 4294901760, %v16183_v2  ;;  %v22086_v12 = vand.u32 4294901760, %v16210_v10 }
 0x228   : > { %5424 = vmatprep.mubr.f32.mxu1 %v22063_v1  ;;  %13635 = vmatpush1.bf16.msra.mxu1 %v16054_v23  ;;  %v5896_v56 = vsub.f32 %v16243_v3, %v22076_v54  ;;  %v5908_v33 = vsub.f32 %v16245_v62, %v22077_v15  ;;  %v9795_v54 = vrot.slane %v15983_v53, 1 }
 0x229   : > { %v16257_v43 = vpop.f32.mrb[24].mxu0  ;;  %13637 = vmatprep.subr.bf16.mxu1 %v16056_v4  ;;  %5870 = vmatprep.mubr.f32.mxu0 %v22063_v1 }
 0x22a   : > { %22068 = vst [vmem:[#allocation36_spill] sm:$0xff] %v16257_v43  ;;  %9424 = vrot.lane.b32.xlu1 %v9419_v26, %s21487_s26  ;;  %9386 = vrot.lane.b32.xlu0 %v9382_v39, %s21483_s20  ;;  %v16267_v36 = vpop.f32.mrb[25].mxu0  ;;  %v9418_v39 = vrot.slane %v15987_v6, 6 }
 0x22b   : > { %22070 = vst [vmem:[#allocation38_spill] sm:$0xff] %v16267_v36  ;;  %v16279_v42 = vpop.f32.mrb[34].mxu1  ;;  %5427 = vmatmul.mubr.f32.gmra.mrb[52].mxu1 %v14927_v60  ;;  %5876 = vmatmul.mubr.f32.gmra.mrb[44].mxu0 %v14968_v37  ;;  %v9829_v37 = vrot.slane %v15983_v53, 3 }
 0x22c   : > { %22073 = vst [vmem:[#allocation39_spill] sm:$0xff] %v16279_v42  ;;  %v16283_v26 = vpop.f32.mrb[35].mxu1  ;;  %5432 = vmatprep.mubr.f32.mxu1 %v22063_v1  ;;  %13639 = vmatpush1.bf16.msra.mxu1 %v16072_v31 }
 0x22d   : > { %22074 = vst [vmem:[#allocation40_spill] sm:$0xff] %v16283_v26  ;;  %v16289_v7 = vpop.f32.mrb[26].mxu0  ;;  %5881 = vmatprep.mubr.f32.mxu0 %v22063_v1 }
 0x22e   : > { %22075 = vst [vmem:[#allocation41_spill] sm:$0xff] %v16289_v7  ;;  %9422 = vrot.lane.b32.xlu0 %v9418_v39, %s21487_s26  ;;  %9332 = vrot.lane.b32.xlu1 %v9328_v24, %s21499_s6  ;;  %v16301_v59 = vpop.f32.mrb[27].mxu0  ;;  %v16317_v39 = vsub.f32 %v16183_v2, %v22082_v29  ;;  %v22083_v24 = vand.u32 4294901760, %v16207_v13  ;;  %v16334_v29 = vsub.f32 %v16210_v10, %v22086_v12  ;;  %v5897_v2 = vand.u32 4294901760, %v5896_v56 }
 0x22f   : > { %22078 = vst [vmem:[#allocation42_spill] sm:$0xff] %v16301_v59  ;;  %v16312_v15 = vpop.f32.mrb[36].mxu1  ;;  %5435 = vmatmul.mubr.f32.gmra.mrb[54].mxu1 %v14930_v61  ;;  %v22089_v12 = vand.u32 4294901760, %v16272_v9  ;;  %5887 = vmatmul.mubr.f32.gmra.mrb[46].mxu0 %v14976_v17  ;;  %v9863_v17 = vrot.slane %v15983_v53, 5 }
 0x230   : > { %22081 = vst [vmem:[#allocation44_spill] sm:$0xff] %v16312_v15  ;;  %v16322_v63 = vsub.f32 %v16207_v13, %v22083_v24  ;;  %v16327_v18 = vpop.f32.mrb[37].mxu1  ;;  %v5909_v24 = vand.u32 4294901760, %v5908_v33  ;;  %5440 = vmatprep.mubr.f32.mxu1 %v22063_v1  ;;  %v21371_v33 = vand.u32 4294901760, %v16306_v35  ;;  %5997 = vmatprep.mubr.f32.mxu0 %v22063_v1 }
 0x231   : > { %22085 = vst [vmem:[#allocation46_spill] sm:$0xff] %v16327_v18  ;;  %v16338_v13 = vpop.f32.mrb[28].mxu0  ;;  %v5902_v10 = vsub.f32 %v16272_v9, %v22089_v12  ;;  %v22090_v18 = vand.u32 4294901760, %v16277_v49 }
 0x232   : > { %22087 = vst [vmem:[#allocation47_spill] sm:$0xff] %v16338_v13  ;;  %9798 = vrot.lane.b32.xlu0 %v9795_v54, %s21499_s6  ;;  %9368 = vrot.lane.b32.xlu1 %v9364_v48, %s21492_s7  ;;  %v16343_v34 = vpop.f32.mrb[29].mxu0  ;;  %v9400_v54 = vrot.slane %v15987_v6, 5  ;;  %v13664_v7 = vpack.c.bf16 %v5909_v24, %v5897_v2  ;;  %v21375_v48 = vand.u32 4294901760, %v16317_v39  ;;  %v16367_v2 = vpop.permute.xlu1 %9294 }
 0x233   : > { %22088 = vst [vmem:[#allocation48_spill] sm:$0xff] %v16343_v34  ;;  %v5914_v13 = vsub.f32 %v16277_v49, %v22090_v18  ;;  %v16353_v56 = vpop.f32.mrb[38].mxu1  ;;  %v21378_v34 = vand.u32 4294901760, %v16322_v63  ;;  %v5903_v12 = vand.u32 4294901760, %v5902_v10  ;;  %5443 = vmatmul.mubr.f32.gmra.mrb[56].mxu1 %v14957_v27  ;;  %v5920_v18 = vsub.f32 %v16306_v35, %v21371_v33  ;;  %22093 = vst [vmem:[#allocation51_spill] sm:$0xff] %v16367_v2  ;;  %v16378_v33 = vpop.permute.xlu0 %9276 }
 0x234   : > { %22091 = vst [vmem:[#allocation49_spill] sm:$0xff] %v16353_v56  ;;  %v16359_v59 = vpop.f32.mrb[39].mxu1  ;;  %13665 = vmatprep.subr.bf16.mxu0 %v13664_v7  ;;  %v5932_v10 = vsub.f32 %v16317_v39, %v21375_v48  ;;  %5521 = vmatprep.mubr.f32.mxu1 %v22063_v1  ;;  %22095 = vst [vmem:[#allocation53_spill] sm:$0xff] %v16378_v33  ;;  %v22097_v33 = vand.u32 4294901760, %v16334_v29 }
 0x235   : > { %22092 = vst [vmem:[#allocation50_spill] sm:$0xff] %v16359_v59  ;;  %v5915_v15 = vand.u32 4294901760, %v5914_v13  ;;  %v16369_v24 = vpop.f32.mrb[30].mxu0  ;;  %v5926_v13 = vsub.f32 %v16322_v63, %v21378_v34  ;;  %v5921_v7 = vand.u32 4294901760, %v5920_v18  ;;  %v9437_v34 = vrot.slane %v15987_v6, 7 }
 0x236   : > { %22094 = vst [vmem:[#allocation52_spill] sm:$0xff] %v16369_v24  ;;  %9832 = vrot.lane.b32.xlu0 %v9829_v37, %s21492_s7  ;;  %9404 = vrot.lane.b32.xlu1 %v9400_v54, %s21381_s18  ;;  %v16382_v56 = vpop.f32.mrb[31].mxu0  ;;  %v5933_v59 = vand.u32 4294901760, %v5932_v10  ;;  %v5938_v37 = vsub.f32 %v16334_v29, %v22097_v33  ;;  %v22099_v6 = vand.u32 4294901760, %v16070_v5  ;;  %v22101_v33 = vand.u32 4294901760, %v16078_v44 }
 0x237   : > { %22096 = vst [vmem:[#allocation54_spill] sm:$0xff] %v16382_v56  ;;  %v13666_v2 = vpack.c.bf16 %v5915_v15, %v5903_v12  ;;  %v16384_v24 = vpop.f32.mrb[40].mxu1  ;;  %v5927_v36 = vand.u32 4294901760, %v5926_v13  ;;  %5525 = vmatmul.mubr.f32.vlgmr.msra.gmra.mrb[50].mxu1 %v14915_v46  ;;  %v22098_v12 = vand.u32 4294901760, %v16068_v16  ;;  %v16405_v13 = vpop.permute.xlu1 %9310  ;;  %v13672_v16 = vpack.c.bf16 %v16245_v62, %v16243_v3 }
 0x238   : > { %v16386_v48 = vpop.f32.mrb[41].mxu1  ;;  %v13668_v54 = vpack.c.bf16 %v5933_v59, %v5921_v7  ;;  %5530 = vmatprep.mubr.f32.mxu1 %v22063_v1  ;;  %v5939_v15 = vand.u32 4294901760, %v5938_v37  ;;  %22102 = vst [vmem:[#allocation55_spill] sm:$0xff] %v16405_v13  ;;  %v16407_v59 = vpop.permute.xlu0 %9312  ;;  %v22104_v5 = vand.u32 4294901760, %v16086_v32  ;;  %v22106_v44 = vand.u32 4294901760, %v16090_v30 }
 0x239   : > { %13667 = vmatpush1.bf16.msra.mxu0 %v13666_v2  ;;  %v13640_v18 = vpack.c.bf16 %v22099_v6, %v22098_v12  ;;  %v22100_v2 = vand.u32 4294901760, %v16076_v8  ;;  %22103 = vst [vmem:[#allocation56_spill] sm:$0xff] %v16407_v59  ;;  %v22105_v8 = vand.u32 4294901760, %v16088_v45  ;;  %v13676_v30 = vpack.c.bf16 %v16317_v39, %v16306_v35 }
 0x23a   : > { %9866 = vrot.lane.b32.xlu0 %v9863_v17, %s21381_s18  ;;  %9442 = vrot.lane.b32.xlu1 %v9437_v34, %s21501_s25  ;;  %v9439_v17 = vrot.slane %v15983_v53, 7  ;;  %v13670_v7 = vpack.c.bf16 %v5939_v15, %v5927_v36  ;;  %v22107_v36 = vand.u32 4294901760, %v16102_v14  ;;  %v13674_v15 = vpack.c.bf16 %v16277_v49, %v16272_v9  ;;  %s21383_s18 = smov 120  }
 0x23b   : > { %13669 = vmatprep.subr.bf16.mxu0 %v13668_v54  ;;  %v13642_v10 = vpack.c.bf16 %v22101_v33, %v22100_v2  ;;  %5534 = vmatmul.mubr.f32.gmra.mrb[52].mxu1 %v22051_v20  ;;  %v13644_v34 = vpack.c.bf16 %v22105_v8, %v22104_v5  ;;  %v9812_v54 = vrot.slane %v15983_v53, 2  ;;  %v9480_v14 = vrot.slane %v15997_v47, 1 }
 0x23c   : > { %13641 = vmatprep.subr.bf16.mxu1 %v13640_v18  ;;  %5539 = vmatprep.mubr.f32.mxu1 %v22063_v1  ;;  %v13646_v37 = vpack.c.bf16 %v22107_v36, %v22106_v44  ;;  %v9846_v18 = vrot.slane %v15983_v53, 4  ;;  %v13678_v2 = vpack.c.bf16 %v16334_v29, %v16322_v63  ;;  %v10118_v59 = vrot.slane %v16283_v26, 3 }
 0x23d   : > { %13643 = vmatpush1.bf16.msra.mxu1 %v13642_v10  ;;  %13671 = vmatpush1.bf16.msra.mxu0 %v13670_v7  ;;  %v9880_v10 = vrot.slane %v15983_v53, 6  ;;  %v9504_v53 = vrot.slane %v15995_v41, 2 }
 0x23e   : > { %9446 = vrot.lane.b32.xlu1 %v9439_v17, %s21501_s25  ;;  %9462 = vrot.lane.b32.xlu0 %v15997_v47, %s21389_s29  ;;  %v9482_v47 = vrot.slane %v15991_v40, 1 }
 0x23f   : > { %13645 = vmatprep.subr.bf16.mxu1 %v13644_v34  ;;  %5543 = vmatmul.mubr.f32.gmra.mrb[54].mxu1 %v22052_v55  ;;  %v22121_v34 = vand.u32 4294901760, %v16245_v62 }
 0x240   : > { %v16425_v32 = vpop.permute.xlu0 %9224  ;;  %v16427_v45 = vpop.permute.xlu1 %9188  ;;  %13673 = vmatprep.subr.bf16.mxu0 %v13672_v16  ;;  %5548 = vmatprep.mubr.f32.mxu1 %v22063_v1 }
 0x241   : > { %22108 = vst [vmem:[#allocation57_spill] sm:$0xff] %v16425_v32  ;;  %22109 = vst [vmem:[#allocation58_spill] sm:$0xff] %v16427_v45  ;;  %13647 = vmatpush1.bf16.msra.mxu1 %v13646_v37  ;;  %5999 = vmatmul.mubr.f32.vlgmr.msra.gmra.mrb[40].mxu0 %v14888_v28 }
 0x242   : > { %9815 = vrot.lane.b32.xlu1 %v9812_v54, %s21490_s24  ;;  %9466 = vrot.lane.b32.xlu0 %v15991_v40, %s21389_s29  ;;  %v9483_v54 = vrot.slane %v15995_v41, 1 }
 0x243   : > { %13649 = vmatprep.subr.bf16.mxu1 %v16045_v57  ;;  %6004 = vmatprep.mubr.f32.mxu0 %v22063_v1 }
 0x244   : > { %v16442_v12 = vpop.permute.xlu0 %9260  ;;  %v16444_v6 = vpop.permute.xlu1 %9206  ;;  %13675 = vmatpush1.bf16.msra.mxu0 %v13674_v15  ;;  %5552 = vmatmul.mubr.f32.gmra.mrb[56].mxu1 %v22053_v22 }
 0x245   : > { %22110 = vst [vmem:[#allocation59_spill] sm:$0xff] %v16442_v12  ;;  %22111 = vst [vmem:[#allocation60_spill] sm:$0xff] %v16444_v6  ;;  %13677 = vmatprep.subr.bf16.mxu0 %v13676_v30  ;;  %6006 = vmatmul.mubr.f32.gmra.mrb[42].mxu0 %v14917_v51  ;;  %v9522_v30 = vrot.slane %v15995_v41, 3 }
 0x246   : > { %9849 = vrot.lane.b32.xlu1 %v9846_v18, %s21483_s20  ;;  %9484 = vrot.lane.b32.xlu0 %v9480_v14, %s21395_s30 }
 0x247   : > { %5646 = vmatprep.mubr.f32.mxu1 %v22063_v1  ;;  %6011 = vmatprep.mubr.f32.mxu0 %v22063_v1 }
 0x248   : > { %v16456_v57 = vpop.permute.xlu0 %9296  ;;  %v16458_v33 = vpop.permute.xlu1 %9242  ;;  %13679 = vmatpush1.bf16.msra.mxu0 %v13678_v2  ;;  %5648 = vmatmul.mubr.f32.vlgmr.msra.gmra.mrb[50].mxu1 %v14888_v28  ;;  %v9558_v2 = vrot.slane %v15995_v41, 5 }
 0x249   : > { %22112 = vst [vmem:[#allocation61_spill] sm:$0xff] %v16456_v57  ;;  %22113 = vst [vmem:[#allocation62_spill] sm:$0xff] %v16458_v33  ;;  %13681 = vmatprep.subr.bf16.mxu0 %v16163_v25  ;;  %6013 = vmatmul.mubr.f32.gmra.mrb[44].mxu0 %v14919_v52 }
 0x24a   : > { %9883 = vrot.lane.b32.xlu1 %v9880_v10, %s21487_s26  ;;  %9488 = vrot.lane.b32.xlu0 %v9482_v47, %s21395_s30  ;;  %v10083_v47 = vrot.slane %v16279_v42, 1  ;;  %v22128_v10 = vand.u32 4294901760, %v16272_v9 }
 0x24b   : > { %5653 = vmatprep.mubr.f32.mxu1 %v22063_v1  ;;  %6018 = vmatprep.mubr.f32.mxu0 %v22063_v1 }
 0x24c   : > { %v16468_v40 = vpop.permute.xlu0 %9675  ;;  %v16470_v17 = vpop.permute.xlu1 %9278  ;;  %13651 = vmatpush1.bf16.msra.mxu1 %v16054_v23  ;;  %v9540_v23 = vrot.slane %v15995_v41, 4 }
 0x24d   : > { %22114 = vst [vmem:[#allocation63_spill] sm:$0xff] %v16468_v40  ;;  %22115 = vst [vmem:[#allocation64_spill] sm:$0xff] %v16470_v17  ;;  %5655 = vmatmul.mubr.f32.gmra.mrb[52].mxu1 %v14917_v51  ;;  %13653 = vmatprep.subr.bf16.mxu1 %v16056_v4  ;;  %v9481_v4 = vrot.slane %v15999_v21, 1 }
 0x24e   : > { %9507 = vrot.lane.b32.xlu0 %v9504_v53, %s21383_s18  ;;  %9464 = vrot.lane.b32.xlu1 %v15999_v21, %s21389_s29  ;;  %s21385_s18 = smov 118   ;;  %v22120_v21 = vand.u32 4294901760, %v16243_v3  ;;  %v9648_v3 = vrot.slane %v16005_v19, 2  ;;  %v22129_v53 = vand.u32 4294901760, %v16277_v49 }
 0x24f   : > { %6020 = vmatmul.mubr.f32.gmra.mrb[46].mxu0 %v14948_v11  ;;  %5660 = vmatprep.mubr.f32.mxu1 %v22063_v1 }
 0x250   : > { %v16482_v7 = vpop.permute.xlu0 %9689  ;;  %v16484_v16 = vpop.permute.xlu1 %9765  ;;  %6106 = vmatprep.mubr.f32.mxu0 %v22063_v1  ;;  %13655 = vmatpush1.bf16.msra.mxu1 %v16072_v31  ;;  %v9576_v31 = vrot.slane %v15995_v41, 6  ;;  %v13688_v44 = vpack.c.bf16 %v22121_v34, %v22120_v21  ;;  %v9594_v34 = vrot.slane %v15995_v41, 7 }
 0x251   : > { %22116 = vst [vmem:[#allocation65_spill] sm:$0xff] %v16482_v7  ;;  %22117 = vst [vmem:[#allocation66_spill] sm:$0xff] %v16484_v16  ;;  %5662 = vmatmul.mubr.f32.gmra.mrb[54].mxu1 %v14919_v52 }
 0x252   : > { %9543 = vrot.lane.b32.xlu0 %v9540_v23, %s21385_s18  ;;  %9468 = vrot.lane.b32.xlu1 %v15995_v41, %s21389_s29  ;;  %s21387_s18 = smov 101   ;;  %s21393_s29 = smov 82   ;;  %v13690_v23 = vpack.c.bf16 %v22129_v53, %v22128_v10  ;;  %v10134_v53 = vrot.slane %v16279_v42, 4 }
 0x253   : > { %6109 = vmatmul.mubr.f32.vlgmr.msra.gmra.mrb[40].mxu0 %v14903_v38  ;;  %5667 = vmatprep.mubr.f32.mxu1 %v22063_v1 }
 0x254   : > { %v16496_v5 = vpop.permute.xlu0 %9703  ;;  %v16498_v8 = vpop.permute.xlu1 %9673  ;;  %6114 = vmatprep.mubr.f32.mxu0 %v22063_v1  ;;  %13683 = vmatpush1.bf16.msra.mxu0 %v16195_v58 }
 0x255   : > { %22118 = vst [vmem:[#allocation67_spill] sm:$0xff] %v16496_v5  ;;  %22119 = vst [vmem:[#allocation68_spill] sm:$0xff] %v16498_v8  ;;  %5669 = vmatmul.mubr.f32.gmra.mrb[56].mxu1 %v14948_v11  ;;  %13685 = vmatprep.subr.bf16.mxu0 %v16204_v50  ;;  %v196_v5 = vld [vmem:[%s14845_s3 + $0x98] sm:$0xff] }
 0x256   : > { %9579 = vrot.lane.b32.xlu0 %v9576_v31, %s21387_s18  ;;  %9486 = vrot.lane.b32.xlu1 %v9481_v4, %s21395_s30  ;;  %s21391_s18 = smov 84   ;;  %v22130_v4 = vand.u32 4294901760, %v16306_v35  ;;  %v22131_v31 = vand.u32 4294901760, %v16317_v39  ;;  %v9630_v35 = vrot.slane %v16005_v19, 1  ;;  %v6466_v7 = vand.u32 4294901760, %v196_v5 }
 0x257   : > { %6117 = vmatmul.mubr.f32.gmra.mrb[42].mxu0 %v14927_v60  ;;  %5747 = vmatprep.mubr.f32.mxu1 %v22063_v1 }
 0x258   : > { %v16513_v36 = vpop.permute.xlu0 %9717  ;;  %v16515_v37 = vpop.permute.xlu1 %9687  ;;  %6122 = vmatprep.mubr.f32.mxu0 %v22063_v1  ;;  %13687 = vmatpush1.bf16.msra.mxu0 %v16229_v0  ;;  %v13692_v21 = vpack.c.bf16 %v22131_v31, %v22130_v4 }
 0x259   : > { %22122 = vst [vmem:[#allocation69_spill] sm:$0xff] %v16513_v36  ;;  %22123 = vst [vmem:[#allocation70_spill] sm:$0xff] %v16515_v37  ;;  %5749 = vmatmul.mubr.f32.vlgmr.msra.gmra.mrb[50].mxu1 %v14888_v28  ;;  %13689 = vmatprep.subr.bf16.mxu0 %v13688_v44  ;;  %v10117_v44 = vrot.slane %v16279_v42, 3 }
 0x25a   : > { %9615 = vrot.lane.b32.xlu0 %v16005_v19, %s21391_s18  ;;  %9490 = vrot.lane.b32.xlu1 %v9483_v54, %s21395_s30  ;;  %s21505_s18 = smov 119   ;;  %v22134_v54 = vand.u32 4294901760, %v16322_v63  ;;  %s21397_s30 = smov 100   ;;  %v10151_v63 = vrot.slane %v16279_v42, 5 }
 0x25b   : > { %6125 = vmatmul.mubr.f32.gmra.mrb[44].mxu0 %v14930_v61  ;;  %5754 = vmatprep.mubr.f32.mxu1 %v22063_v1 }
 0x25c   : > { %v16527_v62 = vpop.permute.xlu0 %9731  ;;  %v16529_v15 = vpop.permute.xlu1 %9701  ;;  %6130 = vmatprep.mubr.f32.mxu0 %v22063_v1 }
 0x25d   : > { %22124 = vst [vmem:[#allocation71_spill] sm:$0xff] %v16527_v62  ;;  %22125 = vst [vmem:[#allocation72_spill] sm:$0xff] %v16529_v15  ;;  %5756 = vmatmul.mubr.f32.gmra.mrb[52].mxu1 %v14917_v51 }
 0x25e   : > { %9651 = vrot.lane.b32.xlu0 %v9648_v3, %s21393_s29  ;;  %9525 = vrot.lane.b32.xlu1 %v9522_v30, %s21505_s18  ;;  %s21507_s29 = smov 102   ;;  %v22135_v3 = vand.u32 4294901760, %v16334_v29 }
 0x25f   : > { %6133 = vmatmul.mubr.f32.gmra.mrb[46].mxu0 %v14957_v27  ;;  %5761 = vmatprep.mubr.f32.mxu1 %v22063_v1 }
 0x260   : > { %v16538_v14 = vpop.permute.xlu0 %9747  ;;  %v16540_v18 = vpop.permute.xlu1 %9715  ;;  %6211 = vmatprep.mubr.f32.mxu0 %v22063_v1  ;;  %v13694_v30 = vpack.c.bf16 %v22135_v3, %v22134_v54  ;;  %v10511_v3 = vrot.slane %v16257_v43, 2 }
 0x261   : > { %22126 = vst [vmem:[#allocation73_spill] sm:$0xff] %v16538_v14  ;;  %22127 = vst [vmem:[#allocation74_spill] sm:$0xff] %v16540_v18  ;;  %5763 = vmatmul.mubr.f32.gmra.mrb[54].mxu1 %v14919_v52  ;;  %v10182_v14 = vrot.slane %v16283_v26, 7 }
 0x262   : > { %9561 = vrot.lane.b32.xlu1 %v9558_v2, %s21507_s29  ;;  %10087 = vrot.lane.b32.xlu0 %v10083_v47, %s21585_s17  ;;  %v10100_v2 = vrot.slane %v16279_v42, 2  ;;  %v10167_v47 = vrot.slane %v16279_v42, 6 }
 0x263   : > { %6215 = vmatmul.mubr.f32.vlgmr.msra.gmra.mrb[40].mxu0 %v14915_v46  ;;  %5768 = vmatprep.mubr.f32.mxu1 %v22063_v1 }
 0x264   : > { %v16558_v9 = vpop.permute.xlu0 %9763  ;;  %v16560_v49 = vpop.permute.xlu1 %9729  ;;  %6220 = vmatprep.mubr.f32.mxu0 %v22063_v1  ;;  %13691 = vmatpush1.bf16.msra.mxu0 %v13690_v23  ;;  %v10181_v23 = vrot.slane %v16279_v42, 7 }
 0x265   : > { %22132 = vst [vmem:[#allocation75_spill] sm:$0xff] %v16558_v9  ;;  %22133 = vst [vmem:[#allocation76_spill] sm:$0xff] %v16560_v49  ;;  %5770 = vmatmul.mubr.f32.gmra.mrb[56].mxu1 %v14948_v11  ;;  %13693 = vmatprep.subr.bf16.mxu0 %v13692_v21  ;;  %v10497_v21 = vrot.slane %v16257_v43, 1  ;;  %v247_v9 = vld [vmem:[%s14845_s3 + $0x230] sm:$0xff] }
 0x266   : > { %9597 = vrot.lane.b32.xlu1 %v9594_v34, %s21397_s30  ;;  %10121 = vrot.lane.b32.xlu0 %v10117_v44, %s21566_s19  ;;  %s21612_s30 = smov 83   ;;  %v10586_v34 = vrot.slane %v16257_v43, 7  ;;  %v6476_v33 = vand.u32 4294901760, %v247_v9 }
 0x267   : > { %6224 = vmatmul.mubr.f32.gmra.mrb[42].mxu0 %v22051_v20  ;;  %6538 = vmatprep.mubr.f32.mxu1 %v22063_v1 }
 0x268   : > { %v16574_v41 = vpop.permute.xlu0 %9767  ;;  %v16576_v39 = vpop.permute.xlu1 %9745  ;;  %6229 = vmatprep.mubr.f32.mxu0 %v22063_v1  ;;  %13695 = vmatpush1.bf16.msra.mxu0 %v13694_v30  ;;  %v10101_v30 = vrot.slane %v16283_v26, 2 }
 0x269   : > { %22136 = vst [vmem:[#allocation77_spill] sm:$0xff] %v16574_v41  ;;  %22137 = vst [vmem:[#allocation78_spill] sm:$0xff] %v16576_v39  ;;  %13697 = vmatprep.subr.bf16.mxu0 %v16163_v25 }
 0x26a   : > { %9633 = vrot.lane.b32.xlu1 %v9630_v35, %s21612_s30  ;;  %10155 = vrot.lane.b32.xlu0 %v10151_v63, %s21556_s28  ;;  %v10525_v35 = vrot.slane %v16257_v43, 3  ;;  %v10135_v63 = vrot.slane %v16283_v26, 4 }
 0x26b   : > { %6233 = vmatmul.mubr.f32.gmra.mrb[44].mxu0 %v22052_v55 }
 0x26c   : > { %v16585_v19 = vpop.permute.xlu0 %10102  ;;  %v16587_v29 = vpop.permute.xlu1 %9749  ;;  %6238 = vmatprep.mubr.f32.mxu0 %v22063_v1 }
 0x26d   : > { %22138 = vst [vmem:[#allocation79_spill] sm:$0xff] %v16585_v19  ;;  %22139 = vst [vmem:[#allocation80_spill] sm:$0xff] %v16587_v29 }
 0x26e   : > { %10104 = vrot.lane.b32.xlu1 %v10100_v2, %s21538_s15  ;;  %10169 = vrot.lane.b32.xlu0 %v10167_v47, %s21554_s23  ;;  %v10539_v47 = vrot.slane %v16257_v43, 4 }
 0x26f   : > { %6242 = vmatmul.mubr.f32.gmra.mrb[46].mxu0 %v22053_v22 }
 0x270   : > { %v16595_v25 = vpop.permute.xlu0 %10136  ;;  %v16597_v10 = vpop.permute.xlu1 %10085  ;;  %6336 = vmatprep.mubr.f32.mxu0 %v22063_v1 }
 0x271   : > { %22140 = vst [vmem:[#allocation81_spill] sm:$0xff] %v16595_v25  ;;  %22141 = vst [vmem:[#allocation82_spill] sm:$0xff] %v16597_v10  ;;  %v195_v10 = vld [vmem:[%s14845_s3 + $0x90] sm:$0xff] }
 0x272   : > { %10138 = vrot.lane.b32.xlu1 %v10134_v53, %s21544_s27  ;;  %10183 = vrot.lane.b32.xlu0 %v10181_v23, %s21596_s4  ;;  %v22150_v53 = vld [vmem:[#allocation38_spill] sm:$0xff] }
 0x273   : > { %6338 = vmatmul.mubr.f32.vlgmr.msra.gmra.mrb[40].mxu0 %v14888_v28  ;;  %v10498_v23 = vrot.slane %v22150_v53, 1  ;;  %v10554_v13 = vrot.slane %v22150_v53, 5 }
 0x274   : > { %v16605_v4 = vpop.permute.xlu0 %9780  ;;  %v16607_v31 = vpop.permute.xlu1 %10119  ;;  %6343 = vmatprep.mubr.f32.mxu0 %v22063_v1  ;;  %13699 = vmatpush1.bf16.msra.mxu0 %v16195_v58 }
 0x275   : > { %22142 = vst [vmem:[#allocation83_spill] sm:$0xff] %v16605_v4  ;;  %22143 = vst [vmem:[#allocation84_spill] sm:$0xff] %v16607_v31  ;;  %13701 = vmatprep.subr.bf16.mxu0 %v16204_v50 }
 0x276   : > { %10499 = vrot.lane.b32.xlu1 %v10497_v21, %s21585_s17  ;;  %10589 = vrot.lane.b32.xlu0 %v10586_v34, %s21596_s4 }
 0x277   : > { %6345 = vmatmul.mubr.f32.gmra.mrb[42].mxu0 %v14917_v51 }
 0x278   : > { %v16617_v44 = vpop.permute.xlu1 %10153  ;;  %v16619_v54 = vpop.permute.xlu0 %9330  ;;  %6350 = vmatprep.mubr.f32.mxu0 %v22063_v1  ;;  %13703 = vmatpush1.bf16.msra.mxu0 %v16229_v0 }
 0x279   : > { %22144 = vst [vmem:[#allocation85_spill] sm:$0xff] %v16617_v44  ;;  %22145 = vst [vmem:[#allocation86_spill] sm:$0xff] %v16619_v54  ;;  %v10569_v44 = vrot.slane %v22150_v53, 6 }
 0x27a   : > { %10513 = vrot.lane.b32.xlu1 %v10511_v3, %s21538_s15  ;;  %10106 = vrot.lane.b32.xlu0 %v10101_v30, %s21538_s15  ;;  %v10553_v3 = vrot.slane %v16257_v43, 5  ;;  %v10512_v30 = vrot.slane %v22150_v53, 2 }
 0x27b   : > { %6352 = vmatmul.mubr.f32.gmra.mrb[44].mxu0 %v14919_v52 }
 0x27c   : > { %v16628_v50 = vpop.permute.xlu1 %9314  ;;  %v16630_v58 = vpop.permute.xlu0 %9334  ;;  %6357 = vmatprep.mubr.f32.mxu0 %v22063_v1 }
 0x27d   : > { %22146 = vst [vmem:[#allocation87_spill] sm:$0xff] %v16628_v50  ;;  %22147 = vst [vmem:[#allocation88_spill] sm:$0xff] %v16630_v58 }
 0x27e   : > { %10527 = vrot.lane.b32.xlu1 %v10525_v35, %s21566_s19  ;;  %10140 = vrot.lane.b32.xlu0 %v10135_v63, %s21544_s27 }
 0x27f   : > { %6359 = vmatmul.mubr.f32.gmra.mrb[46].mxu0 %v14948_v11 }
 0x280   : > { %v16638_v0 = vpop.permute.xlu0 %9366  ;;  %v16640_v2 = vpop.permute.xlu1 %9778  ;;  %6437 = vmatprep.mubr.f32.mxu0 %v22063_v1 }
 0x281   : > { %22148 = vst [vmem:[#allocation89_spill] sm:$0xff] %v16638_v0  ;;  %22149 = vst [vmem:[#allocation90_spill] sm:$0xff] %v16640_v2  ;;  %v10540_v0 = vrot.slane %v22150_v53, 4 }
 0x282   : > { %10541 = vrot.lane.b32.xlu1 %v10539_v47, %s21544_s27  ;;  %10501 = vrot.lane.b32.xlu0 %v10498_v23, %s21585_s17  ;;  %v10568_v47 = vrot.slane %v16257_v43, 6  ;;  %v10526_v23 = vrot.slane %v22150_v53, 3 }
 0x283   : > { %6439 = vmatmul.mubr.f32.vlgmr.msra.gmra.mrb[40].mxu0 %v14888_v28 }
 0x284   : > { %v16648_v21 = vpop.permute.xlu0 %9370  ;;  %v16650_v34 = vpop.permute.xlu1 %9782  ;;  %6444 = vmatprep.mubr.f32.mxu0 %v22063_v1 }
 0x285   : > { %22151 = vst [vmem:[#allocation91_spill] sm:$0xff] %v16648_v21  ;;  %22152 = vst [vmem:[#allocation92_spill] sm:$0xff] %v16650_v34  ;;  %v10152_v34 = vrot.slane %v16283_v26, 5 }
 0x286   : > { %10555 = vrot.lane.b32.xlu1 %v10553_v3, %s21556_s28  ;;  %10515 = vrot.lane.b32.xlu0 %v10512_v30, %s21538_s15 }
 0x287   : > { %6446 = vmatmul.mubr.f32.gmra.mrb[42].mxu0 %v14917_v51 }
 0x288   : > { %v16658_v35 = vpop.permute.xlu0 %9402  ;;  %v16660_v63 = vpop.permute.xlu1 %9348  ;;  %6451 = vmatprep.mubr.f32.mxu0 %v22063_v1 }
 0x289   : > { %22153 = vst [vmem:[#allocation93_spill] sm:$0xff] %v16658_v35  ;;  %22154 = vst [vmem:[#allocation94_spill] sm:$0xff] %v16660_v63  ;;  %v10084_v63 = vrot.slane %v16283_v26, 1 }
 0x28a   : > { %10571 = vrot.lane.b32.xlu1 %v10568_v47, %s21554_s23  ;;  %10529 = vrot.lane.b32.xlu0 %v10526_v23, %s21566_s19  ;;  %v16667_v21 = vpop.f32.mrb[32].mxu0 }
 0x28b   : > { %22155 = vst [vmem:[#allocation95_spill] sm:$0xff] %v16667_v21  ;;  %v16669_v3 = vpop.f32.mrb[33].mxu0  ;;  %6453 = vmatmul.mubr.f32.gmra.mrb[44].mxu0 %v14919_v52 }
 0x28c   : > { %22156 = vst [vmem:[#allocation96_spill] sm:$0xff] %v16669_v3  ;;  %v16672_v30 = vpop.permute.xlu0 %9406  ;;  %v16674_v35 = vpop.permute.xlu1 %9352  ;;  %6458 = vmatprep.mubr.f32.mxu0 %v22063_v1 }
 0x28d   : > { %22157 = vst [vmem:[#allocation97_spill] sm:$0xff] %v16672_v30  ;;  %22158 = vst [vmem:[#allocation98_spill] sm:$0xff] %v16674_v35  ;;  %v16679_v58 = vpop.f32.mrb[42].mxu1 }
 0x28e   : > { %22159 = vst [vmem:[#allocation99_spill] sm:$0xff] %v16679_v58  ;;  %10543 = vrot.lane.b32.xlu0 %v10540_v0, %s21544_s27  ;;  %10089 = vrot.lane.b32.xlu1 %v10084_v63, %s21585_s17  ;;  %v16683_v47 = vpop.f32.mrb[43].mxu1  ;;  %v16685_v23 = vpop.f32.mrb[34].mxu0 }
 0x28f   : > { %22160 = vst [vmem:[#allocation100_spill] sm:$0xff] %v16683_v47  ;;  %22161 = vst [vmem:[#allocation101_spill] sm:$0xff] %v16685_v23  ;;  %v16687_v54 = vpop.f32.mrb[35].mxu0  ;;  %6460 = vmatmul.mubr.f32.gmra.mrb[46].mxu0 %v14948_v11 }
 0x290   : > { %22162 = vst [vmem:[#allocation102_spill] sm:$0xff] %v16687_v54  ;;  %v16690_v30 = vpop.permute.xlu0 %9440  ;;  %v16692_v35 = vpop.permute.xlu1 %9384  ;;  %7228 = vmatprep.mubr.f32.mxu0 %v22063_v1 }
 0x291   : > { %22163 = vst [vmem:[#allocation103_spill] sm:$0xff] %v16690_v30  ;;  %22164 = vst [vmem:[#allocation104_spill] sm:$0xff] %v16692_v35  ;;  %v16697_v0 = vpop.f32.mrb[44].mxu1 }
 0x292   : > { %22165 = vst [vmem:[#allocation105_spill] sm:$0xff] %v16697_v0  ;;  %10557 = vrot.lane.b32.xlu0 %v10554_v13, %s21556_s28  ;;  %10123 = vrot.lane.b32.xlu1 %v10118_v59, %s21566_s19  ;;  %v16701_v63 = vpop.f32.mrb[45].mxu1  ;;  %v16703_v43 = vpop.f32.mrb[36].mxu0 }
 0x293   : > { %22166 = vst [vmem:[#allocation106_spill] sm:$0xff] %v16701_v63  ;;  %22167 = vst [vmem:[#allocation107_spill] sm:$0xff] %v16703_v43  ;;  %v16705_v42 = vpop.f32.mrb[37].mxu0  ;;  %v249_v43 = vld [vmem:[%s14845_s3 + $0x240] sm:$0xff] }
 0x294   : > { %22168 = vst [vmem:[#allocation108_spill] sm:$0xff] %v16705_v42  ;;  %v16707_v30 = vpop.permute.xlu0 %9444  ;;  %v16709_v35 = vpop.permute.xlu1 %9388  ;;  %v7166_v58 = vand.u32 4294901760, %v249_v43 }
 0x295   : > { %22169 = vst [vmem:[#allocation109_spill] sm:$0xff] %v16707_v30  ;;  %22170 = vst [vmem:[#allocation110_spill] sm:$0xff] %v16709_v35  ;;  %v16713_v4 = vpop.f32.mrb[46].mxu1  ;;  %v10168_v35 = vrot.slane %v16283_v26, 6  ;;  %v22187_v26 = vld [vmem:[#allocation41_spill] sm:$0xff] }
 0x296   : > { %22171 = vst [vmem:[#allocation111_spill] sm:$0xff] %v16713_v4  ;;  %10573 = vrot.lane.b32.xlu0 %v10569_v44, %s21554_s23  ;;  %10157 = vrot.lane.b32.xlu1 %v10152_v34, %s21556_s28  ;;  %v16717_v13 = vpop.f32.mrb[47].mxu1  ;;  %v16719_v59 = vpop.f32.mrb[38].mxu0  ;;  %v22178_v44 = vld [vmem:[#allocation44_spill] sm:$0xff]  ;;  %v10223_v2 = vrot.slane %v22187_v26, 2  ;;  %v10237_v15 = vrot.slane %v22187_v26, 3 }
 0x297   : > { %22172 = vst [vmem:[#allocation112_spill] sm:$0xff] %v16717_v13  ;;  %22173 = vst [vmem:[#allocation113_spill] sm:$0xff] %v16719_v59  ;;  %v16721_v41 = vpop.f32.mrb[39].mxu0  ;;  %v9813_v36 = vrot.slane %v22178_v44, 2  ;;  %v9897_v19 = vrot.slane %v22178_v44, 7  ;;  %v9864_v12 = vrot.slane %v22178_v44, 5 }
 0x298   : > { %22174 = vst [vmem:[#allocation114_spill] sm:$0xff] %v16721_v41  ;;  %v16723_v16 = vpop.permute.xlu1 %9420  ;;  %v16725_v30 = vpop.permute.xlu0 %9350  ;;  %v10251_v45 = vrot.slane %v22187_v26, 4  ;;  %v275_v4 = vld [vmem:[%s14845_s3 + $0x310] sm:$0xff] }
 0x299   : > { %22175 = vst [vmem:[#allocation115_spill] sm:$0xff] %v16723_v16  ;;  %22176 = vst [vmem:[#allocation116_spill] sm:$0xff] %v16725_v30  ;;  %v16728_v25 = vpop.f32.mrb[48].mxu1  ;;  %v22182_v16 = vld [vmem:[#allocation42_spill] sm:$0xff] }
 0x29a   : > { %22177 = vst [vmem:[#allocation117_spill] sm:$0xff] %v16728_v25  ;;  %10171 = vrot.lane.b32.xlu1 %v10168_v35, %s21554_s23  ;;  %10195 = vrot.lane.b32.xlu0 %v22178_v44, %s21444_s5  ;;  %v16733_v34 = vpop.f32.mrb[49].mxu1  ;;  %v10587_v35 = vrot.slane %v22150_v53, 7  ;;  %v10210_v42 = vrot.slane %v22182_v16, 1  ;;  %v10224_v13 = vrot.slane %v22182_v16, 2 }
 0x29b   : > { %22179 = vst [vmem:[#allocation44_spill] sm:$0xff] %v16733_v34 }
 0x29c   : > { %v16735_v31 = vpop.permute.xlu1 %9424  ;;  %v16737_v29 = vpop.permute.xlu0 %9386 }
 0x29d   : > { %22180 = vst [vmem:[#allocation118_spill] sm:$0xff] %v16735_v31  ;;  %22181 = vst [vmem:[#allocation119_spill] sm:$0xff] %v16737_v29 }
 0x29e   : > { %10185 = vrot.lane.b32.xlu1 %v10182_v14, %s21596_s4  ;;  %10606 = vrot.lane.b32.xlu0 %v22182_v16, %s21444_s5  ;;  %v9847_v14 = vrot.slane %v22178_v44, 4 }
 0x2a0   : > { %v16743_v30 = vpop.permute.xlu0 %9422  ;;  %v16745_v62 = vpop.permute.xlu1 %9332 }
 0x2a1   : > { %22183 = vst [vmem:[#allocation42_spill] sm:$0xff] %v16743_v30  ;;  %22184 = vst [vmem:[#allocation120_spill] sm:$0xff] %v16745_v62 }
 0x2a2   : > { %10591 = vrot.lane.b32.xlu1 %v10587_v35, %s21596_s4  ;;  %9817 = vrot.lane.b32.xlu0 %v9813_v36, %s21490_s24  ;;  %v9881_v36 = vrot.slane %v22178_v44, 6  ;;  %v22190_v35 = vld [vmem:[#allocation46_spill] sm:$0xff] }
 0x2a3   : > { %v9814_v6 = vrot.slane %v22190_v35, 2  ;;  %v9848_v8 = vrot.slane %v22190_v35, 4 }
 0x2a4   : > { %v16751_v31 = vpop.permute.xlu0 %9798  ;;  %v16753_v29 = vpop.permute.xlu1 %9368 }
 0x2a5   : > { %22185 = vst [vmem:[#allocation121_spill] sm:$0xff] %v16751_v31  ;;  %22186 = vst [vmem:[#allocation122_spill] sm:$0xff] %v16753_v29  ;;  %v221_v31 = vld [vmem:[%s14845_s3 + $0x160] sm:$0xff] }
 0x2a6   : > { %10604 = vrot.lane.b32.xlu1 %v22187_v26, %s21444_s5  ;;  %9851 = vrot.lane.b32.xlu0 %v9847_v14, %s21483_s20  ;;  %v9796_v14 = vrot.slane %v22178_v44, 1 }
 0x2a8   : > { %v16759_v30 = vpop.permute.xlu0 %9832  ;;  %v16761_v62 = vpop.permute.xlu1 %9404 }
 0x2a9   : > { %22188 = vst [vmem:[#allocation41_spill] sm:$0xff] %v16759_v30  ;;  %22189 = vst [vmem:[#allocation123_spill] sm:$0xff] %v16761_v62  ;;  %v10209_v62 = vrot.slane %v22187_v26, 1 }
 0x2aa   : > { %9885 = vrot.lane.b32.xlu0 %v9881_v36, %s21487_s26  ;;  %10197 = vrot.lane.b32.xlu1 %v22190_v35, %s21444_s5  ;;  %v222_v36 = vld [vmem:[%s14845_s3 + $0x168] sm:$0xff]  ;;  %s22197_s5 = smov 41  }
 0x2ab   : > { %v6470_v40 = vand.u32 4294901760, %v222_v36 }
 0x2ac   : > { %v16767_v29 = vpop.permute.xlu0 %9866  ;;  %v16769_v53 = vpop.permute.xlu1 %9442 }
 0x2ad   : > { %22191 = vst [vmem:[#allocation46_spill] sm:$0xff] %v16767_v29  ;;  %22192 = vst [vmem:[#allocation124_spill] sm:$0xff] %v16769_v53  ;;  %v9830_v53 = vrot.slane %v22178_v44, 3  ;;  %v16787_v50 = vpack.c.bf16 %v6470_v40, %v6466_v7 }
 0x2ae   : > { %9899 = vrot.lane.b32.xlu0 %v9897_v19, %s21501_s25  ;;  %9800 = vrot.lane.b32.xlu1 %v9796_v14, %s21499_s6  ;;  %v6468_v19 = vand.u32 4294901760, %v195_v10  ;;  %v6472_v14 = vand.u32 4294901760, %v221_v31 }
 0x2af   : > { %13705 = vmatprep.subr.bf16.mxu1 %v16787_v50 }
 0x2b0   : > { %v16779_v30 = vpop.permute.xlu1 %9446  ;;  %v16781_v29 = vpop.permute.xlu0 %9462  ;;  %v16790_v57 = vpack.c.bf16 %v6472_v14, %v6468_v19  ;;  %v16831_v3 = vsub.f32 %v221_v31, %v6472_v14  ;;  %v16845_v31 = vld [vmem:[%s14845_s3 + $0x178] sm:$0xff] }
 0x2b1   : > { %22193 = vst [vmem:[#allocation125_spill] sm:$0xff] %v16779_v30  ;;  %22194 = vst [vmem:[#allocation126_spill] sm:$0xff] %v16781_v29  ;;  %v248_v30 = vld [vmem:[%s14845_s3 + $0x238] sm:$0xff]  ;;  %v274_v29 = vld [vmem:[%s14845_s3 + $0x308] sm:$0xff] }
 0x2b2   : > { %10211 = vrot.lane.b32.xlu0 %v10209_v62, %s21499_s6  ;;  %9834 = vrot.lane.b32.xlu1 %v9830_v53, %s21492_s7  ;;  %v6474_v62 = vand.u32 4294901760, %v248_v30  ;;  %v6478_v49 = vand.u32 4294901760, %v274_v29  ;;  %v273_v53 = vld [vmem:[%s14845_s3 + $0x300] sm:$0xff]  ;;  %v22209_v59 = vand.u32 4294901760, %v16831_v3 }
 0x2b3   : > { %13707 = vmatpush1.bf16.msra.mxu1 %v16790_v57  ;;  %v6480_v18 = vand.u32 4294901760, %v273_v53 }
 0x2b4   : > { %v16795_v17 = vpop.permute.xlu1 %9815  ;;  %v16797_v39 = vpop.permute.xlu0 %9466  ;;  %v16805_v32 = vpack.c.bf16 %v6478_v49, %v6474_v62 }
 0x2b5   : > { %22195 = vst [vmem:[#allocation127_spill] sm:$0xff] %v16795_v17  ;;  %22196 = vst [vmem:[#allocation128_spill] sm:$0xff] %v16797_v39  ;;  %v16807_v17 = vpack.c.bf16 %v6480_v18, %v6476_v33 }
 0x2b6   : > { %10225 = vrot.lane.b32.xlu0 %v10223_v2, %s21490_s24  ;;  %9868 = vrot.lane.b32.xlu1 %v9864_v12, %s22197_s5  ;;  %v16819_v12 = vsub.f32 %v196_v5, %v6466_v7  ;;  %v16821_v2 = vsub.f32 %v222_v36, %v6470_v40  ;;  %v16856_v5 = vsub.f32 %v248_v30, %v6474_v62  ;;  %v16877_v62 = vld [vmem:[%s14845_s3 + $0xa0] sm:$0xff] }
 0x2b7   : > { %13709 = vmatprep.subr.bf16.mxu1 %v16805_v32  ;;  %v16869_v7 = vsub.f32 %v247_v9, %v6476_v33  ;;  %v16871_v30 = vsub.f32 %v273_v53, %v6480_v18  ;;  %v223_v33 = vld [vmem:[%s14845_s3 + $0x170] sm:$0xff]  ;;  %v10279_v53 = vrot.slane %v22187_v26, 6 }
 0x2b8   : > { %v16809_v39 = vpop.permute.xlu1 %9849  ;;  %v16811_v44 = vpop.permute.xlu0 %9484  ;;  %13711 = vmatpush1.bf16.msra.mxu1 %v16807_v17 }
 0x2b9   : > { %22198 = vst [vmem:[#allocation129_spill] sm:$0xff] %v16809_v39  ;;  %22199 = vst [vmem:[#allocation130_spill] sm:$0xff] %v16811_v44  ;;  %v16823_v39 = vsub.f32 %v195_v10, %v6468_v19  ;;  %v16842_v10 = vld [vmem:[%s14845_s3 + $0xa8] sm:$0xff]  ;;  %v22220_v63 = vand.u32 4294901760, %v16871_v30 }
 0x2ba   : > { %10239 = vrot.lane.b32.xlu0 %v10237_v15, %s21492_s7  ;;  %9819 = vrot.lane.b32.xlu1 %v9814_v6, %s21490_s24  ;;  %v22202_v15 = vld [vmem:[#allocation17_spill] sm:$0xff]  ;;  %v10265_v6 = vrot.slane %v22187_v26, 5  ;;  %v7156_v40 = vand.u32 4294901760, %v16842_v10 }
 0x2bb   : > { %6544 = vmatmul.mubr.f32.vlgmr.msra.gmra.mrb[58].mxu1 %v22202_v15 }
 0x2bc   : > { %v16825_v44 = vpop.permute.xlu1 %9883  ;;  %v16827_v37 = vpop.permute.xlu0 %9488  ;;  %6549 = vmatprep.mubr.f32.mxu1 %v22063_v1  ;;  %v16933_v23 = vsub.f32 %v16842_v10, %v7156_v40 }
 0x2bd   : > { %22200 = vst [vmem:[#allocation131_spill] sm:$0xff] %v16825_v44  ;;  %22201 = vst [vmem:[#allocation132_spill] sm:$0xff] %v16827_v37  ;;  %v16858_v37 = vsub.f32 %v274_v29, %v6478_v49  ;;  %v22207_v44 = vand.u32 4294901760, %v16821_v2  ;;  %v22208_v49 = vand.u32 4294901760, %v16823_v39 }
 0x2be   : > { %10253 = vrot.lane.b32.xlu0 %v10251_v45, %s21483_s20  ;;  %9853 = vrot.lane.b32.xlu1 %v9848_v8, %s21483_s20  ;;  %v9882_v45 = vrot.slane %v22190_v35, 6  ;;  %v22205_v8 = vld [vmem:[#allocation20_spill] sm:$0xff] }
 0x2bf   : > { %6555 = vmatmul.mubr.f32.gmra.mrb[60].mxu1 %v22205_v8  ;;  %v6598_v54 = vsub.f32 %v16821_v2, %v22207_v44  ;;  %v6592_v29 = vsub.f32 %v16823_v39, %v22208_v49  ;;  %v6604_v44 = vsub.f32 %v16831_v3, %v22209_v59  ;;  %v7158_v49 = vand.u32 4294901760, %v16877_v62 }
 0x2c0   : > { %v16847_v36 = vpop.permute.xlu0 %9507  ;;  %v16849_v19 = vpop.permute.xlu1 %9464  ;;  %6560 = vmatprep.mubr.f32.mxu1 %v22063_v1 }
 0x2c1   : > { %22203 = vst [vmem:[#allocation17_spill] sm:$0xff] %v16847_v36  ;;  %22204 = vst [vmem:[#allocation133_spill] sm:$0xff] %v16849_v19  ;;  %v22206_v36 = vand.u32 4294901760, %v16819_v12  ;;  %v6605_v25 = vand.u32 4294901760, %v6604_v44 }
 0x2c2   : > { %10267 = vrot.lane.b32.xlu0 %v10265_v6, %s22197_s5  ;;  %9887 = vrot.lane.b32.xlu1 %v9882_v45, %s21487_s26  ;;  %v22210_v6 = vand.u32 4294901760, %v16845_v31  ;;  %v9898_v45 = vrot.slane %v22190_v35, 7 }
 0x2c3   : > { %v6586_v19 = vsub.f32 %v16819_v12, %v22206_v36  ;;  %v6599_v36 = vand.u32 4294901760, %v6598_v54  ;;  %v6593_v54 = vand.u32 4294901760, %v6592_v29  ;;  %v276_v29 = vld [vmem:[%s14845_s3 + $0x318] sm:$0xff] }
 0x2c4   : > { %v16884_v41 = vpack.c.bf16 %v22210_v6, %v7156_v40  ;;  %v16887_v18 = vpop.permute.xlu0 %9543  ;;  %v16889_v9 = vpop.permute.xlu1 %9468  ;;  %v7162_v6 = vand.u32 4294901760, %v223_v33  ;;  %v7168_v47 = vand.u32 4294901760, %v276_v29  ;;  %v7170_v40 = vand.u32 4294901760, %v275_v4 }
 0x2c5   : > { %v6587_v14 = vand.u32 4294901760, %v6586_v19  ;;  %22211 = vst [vmem:[#allocation20_spill] sm:$0xff] %v16887_v18  ;;  %22212 = vst [vmem:[#allocation134_spill] sm:$0xff] %v16889_v9  ;;  %v22213_v19 = vld [vmem:[#allocation22_spill] sm:$0xff]  ;;  %v13714_v34 = vpack.c.bf16 %v6605_v25, %v6593_v54  ;;  %v22217_v25 = vand.u32 4294901760, %v16856_v5 }
 0x2c6   : > { %6566 = vmatmul.mubr.f32.gmra.mrb[62].mxu1 %v22213_v19  ;;  %13753 = vmatprep.subr.bf16.mxu0 %v16884_v41  ;;  %v250_v9 = vld [vmem:[%s14845_s3 + $0x248] sm:$0xff]  ;;  %v16910_v18 = vpack.c.bf16 %v7162_v6, %v7158_v49 }
 0x2c7   : > { %v13712_v59 = vpack.c.bf16 %v6599_v36, %v6587_v14  ;;  %6571 = vmatprep.mubr.f32.mxu1 %v22063_v1  ;;  %10281 = vrot.lane.b32.xlu0 %v10279_v53, %s21487_s26  ;;  %v6610_v54 = vsub.f32 %v16856_v5, %v22217_v25  ;;  %v22218_v36 = vand.u32 4294901760, %v16858_v37  ;;  %v9797_v25 = vrot.slane %v22190_v35, 1 }
 0x2c8   : > { %9901 = vrot.lane.b32.xlu1 %v9898_v45, %s21501_s25  ;;  %v16904_v44 = vpop.permute.xlu0 %9579  ;;  %v16906_v53 = vpop.permute.xlu1 %9486  ;;  %v10294_v45 = vrot.slane %v22187_v26, 7  ;;  %13755 = vmatpush1.bf16.msra.mxu0 %v16910_v18 }
 0x2c9   : > { %13713 = vmatprep.subr.bf16.mxu1 %v13712_v59  ;;  %22214 = vst [vmem:[#allocation22_spill] sm:$0xff] %v16904_v44  ;;  %22215 = vst [vmem:[#allocation135_spill] sm:$0xff] %v16906_v53  ;;  %v22216_v59 = vld [vmem:[#allocation23_spill] sm:$0xff]  ;;  %v6622_v14 = vsub.f32 %v16858_v37, %v22218_v36  ;;  %v22219_v44 = vand.u32 4294901760, %v16869_v7  ;;  %v7164_v53 = vand.u32 4294901760, %v250_v9  ;;  %v6628_v36 = vsub.f32 %v16871_v30, %v22220_v63 }
 0x2ca   : > { %6577 = vmatmul.mubr.f32.gmra.mrb[64].mxu1 %v22216_v59 }
 0x2cb   : > { %13715 = vmatpush1.bf16.msra.mxu1 %v13714_v34  ;;  %v6616_v26 = vsub.f32 %v16869_v7, %v22219_v44  ;;  %10297 = vrot.lane.b32.xlu0 %v10294_v45, %s21501_s25  ;;  %v6611_v34 = vand.u32 4294901760, %v6610_v54  ;;  %v6623_v44 = vand.u32 4294901760, %v6622_v14  ;;  %v22223_v54 = vand.u32 4294901760, %v16845_v31 }
 0x2cc   : > { %10213 = vrot.lane.b32.xlu1 %v10210_v42, %s21499_s6  ;;  %6687 = vmatprep.mubr.f32.mxu1 %v22063_v1  ;;  %v16937_v42 = vpop.permute.xlu0 %9615  ;;  %v16939_v45 = vpop.permute.xlu1 %9490  ;;  %v6629_v63 = vand.u32 4294901760, %v6628_v36  ;;  %v16946_v56 = vpack.c.bf16 %v7168_v47, %v7164_v53  ;;  %v16951_v14 = vsub.f32 %v16877_v62, %v7158_v49  ;;  %v21481_v36 = vand.u32 4294901760, %v16933_v23 }
 0x2cd   : > { %v6617_v0 = vand.u32 4294901760, %v6616_v26  ;;  %22221 = vst [vmem:[#allocation23_spill] sm:$0xff] %v16937_v42  ;;  %22222 = vst [vmem:[#allocation136_spill] sm:$0xff] %v16939_v45  ;;  %v16944_v21 = vsub.f32 %v16845_v31, %v22223_v54  ;;  %v13716_v10 = vpack.c.bf16 %v6623_v44, %v6611_v34  ;;  %v16953_v26 = vsub.f32 %v223_v33, %v7162_v6 }
 0x2ce   : > { %v10238_v45 = vrot.slane %v22182_v16, 3  ;;  %13757 = vmatprep.subr.bf16.mxu0 %v16946_v56  ;;  %v16957_v31 = vsub.f32 %v250_v9, %v7164_v53  ;;  %v16959_v34 = vpack.c.bf16 %v7170_v40, %v7166_v58  ;;  %v9831_v62 = vrot.slane %v22190_v35, 3 }
 0x2cf   : > { %9802 = vrot.lane.b32.xlu0 %v9797_v25, %s21499_s6  ;;  %v13718_v42 = vpack.c.bf16 %v6629_v63, %v6617_v0  ;;  %13717 = vmatprep.subr.bf16.mxu1 %v13716_v10  ;;  %v16967_v33 = vsub.f32 %v276_v29, %v7168_v47  ;;  %v13720_v0 = vpack.c.bf16 %v16821_v2, %v16819_v12  ;;  %v21478_v49 = vand.u32 4294901760, %v16944_v21  ;;  %s22254_s6 = smov 118  }
 0x2d0   : > { %10227 = vrot.lane.b32.xlu1 %v10224_v13, %s21490_s24  ;;  %v16962_v13 = vpop.permute.xlu0 %9651  ;;  %v16964_v25 = vpop.permute.xlu1 %9525  ;;  %v10252_v9 = vrot.slane %v22182_v16, 4  ;;  %v9865_v6 = vrot.slane %v22190_v35, 5  ;;  %13759 = vmatpush1.bf16.msra.mxu0 %v16959_v34  ;;  %v13722_v53 = vpack.c.bf16 %v16831_v3, %v16823_v39  ;;  %v7275_v44 = vsub.f32 %v16933_v23, %v21481_v36  ;;  %s22246_s24 = smov 22  }
 0x2d1   : > { %22224 = vst [vmem:[#allocation137_spill] sm:$0xff] %v16962_v13  ;;  %22225 = vst [vmem:[#allocation138_spill] sm:$0xff] %v16964_v25  ;;  %13719 = vmatpush1.bf16.msra.mxu1 %v13718_v42  ;;  %v16982_v47 = vsub.f32 %v249_v43, %v7166_v58  ;;  %v7287_v29 = vsub.f32 %v16944_v21, %v21478_v49  ;;  %v21479_v35 = vand.u32 4294901760, %v16951_v14  ;;  %v21480_v42 = vand.u32 4294901760, %v16953_v26 }
 0x2d2   : > { %v16989_v54 = vsub.f32 %v275_v4, %v7170_v40  ;;  %13721 = vmatprep.subr.bf16.mxu1 %v13720_v0  ;;  %v7276_v63 = vand.u32 4294901760, %v7275_v44  ;;  %v21482_v43 = vand.u32 4294901760, %v16957_v31  ;;  %v21489_v0 = vand.u32 4294901760, %v16967_v33 }
 0x2d3   : > { %9836 = vrot.lane.b32.xlu0 %v9831_v62, %s21492_s7  ;;  %7234 = vmatmul.mubr.f32.vlgmr.msra.gmra.mrb[48].mxu0 %v22202_v15  ;;  %v7288_v62 = vand.u32 4294901760, %v7287_v29  ;;  %v7281_v4 = vsub.f32 %v16951_v14, %v21479_v35  ;;  %v7293_v40 = vsub.f32 %v16953_v26, %v21480_v42  ;;  %v22249_v25 = vand.u32 4294901760, %v16821_v2 }
 0x2d4   : > { %10241 = vrot.lane.b32.xlu1 %v10238_v45, %s21492_s7  ;;  %6689 = vmatmul.mubr.f32.vlgmr.msra.gmra.mrb[58].mxu1 %v14888_v28  ;;  %v13724_v45 = vpack.c.bf16 %v16858_v37, %v16856_v5  ;;  %v16995_v58 = vpop.permute.xlu1 %9561  ;;  %v16997_v10 = vpop.permute.xlu0 %10087  ;;  %v7299_v44 = vsub.f32 %v16957_v31, %v21482_v43  ;;  %v7311_v36 = vsub.f32 %v16967_v33, %v21489_v0  ;;  %s22247_s7 = smov 120   ;;  %v22253_v2 = vand.u32 4294901760, %v16831_v3 }
 0x2d5   : > { %22226 = vst [vmem:[#allocation139_spill] sm:$0xff] %v16995_v58  ;;  %22227 = vst [vmem:[#allocation140_spill] sm:$0xff] %v16997_v10  ;;  %6694 = vmatprep.mubr.f32.mxu1 %v22063_v1  ;;  %7238 = vmatprep.mubr.f32.mxu0 %v22063_v1  ;;  %v13760_v29 = vpack.c.bf16 %v7288_v62, %v7276_v63  ;;  %v7282_v49 = vand.u32 4294901760, %v7281_v4  ;;  %v7294_v35 = vand.u32 4294901760, %v7293_v40  ;;  %v21486_v63 = vand.u32 4294901760, %v16989_v54  ;;  %v22231_v40 = vld [vmem:[#allocation49_spill] sm:$0xff] }
 0x2d6   : > { %13723 = vmatpush1.bf16.msra.mxu1 %v13722_v53  ;;  %v7300_v42 = vand.u32 4294901760, %v7299_v44  ;;  %v21485_v53 = vand.u32 4294901760, %v16982_v47  ;;  %v7312_v62 = vand.u32 4294901760, %v7311_v36  ;;  %v22248_v58 = vand.u32 4294901760, %v16819_v12 }
 0x2d7   : > { %9870 = vrot.lane.b32.xlu0 %v9865_v6, %s22197_s5  ;;  %13725 = vmatprep.subr.bf16.mxu1 %v13724_v45  ;;  %v13762_v6 = vpack.c.bf16 %v7294_v35, %v7282_v49  ;;  %v13726_v45 = vpack.c.bf16 %v16871_v30, %v16869_v7  ;;  %v7317_v49 = vsub.f32 %v16989_v54, %v21486_v63  ;;  %v10295_v63 = vrot.slane %v22182_v16, 7 }
 0x2d8   : > { %10255 = vrot.lane.b32.xlu1 %v10252_v9, %s21483_s20  ;;  %6696 = vmatmul.mubr.f32.gmra.mrb[60].mxu1 %v14917_v51  ;;  %v17019_v13 = vpop.permute.xlu1 %9597  ;;  %v17021_v43 = vpop.permute.xlu0 %10121  ;;  %v10266_v9 = vrot.slane %v22182_v16, 5  ;;  %v7305_v4 = vsub.f32 %v16982_v47, %v21485_v53  ;;  %s22230_s20 = smov 23   ;;  %v13764_v35 = vpack.c.bf16 %v7312_v62, %v7300_v42  ;;  %v10280_v53 = vrot.slane %v22182_v16, 6 }
 0x2d9   : > { %22228 = vst [vmem:[#allocation141_spill] sm:$0xff] %v17019_v13  ;;  %22229 = vst [vmem:[#allocation142_spill] sm:$0xff] %v17021_v43  ;;  %7244 = vmatmul.mubr.f32.gmra.mrb[50].mxu0 %v22205_v8  ;;  %6701 = vmatprep.mubr.f32.mxu1 %v22063_v1  ;;  %v13768_v16 = vpack.c.bf16 %v16944_v21, %v16933_v23  ;;  %v9923_v13 = vrot.slane %v22231_v40, 1  ;;  %v22252_v12 = vand.u32 4294901760, %v16823_v39  ;;  %v22258_v39 = vand.u32 4294901760, %v16856_v5 }
 0x2da   : > { %7249 = vmatprep.mubr.f32.mxu0 %v22063_v1  ;;  %13761 = vmatprep.subr.bf16.mxu0 %v13760_v29  ;;  %v7306_v44 = vand.u32 4294901760, %v7305_v4  ;;  %v22259_v3 = vand.u32 4294901760, %v16858_v37  ;;  %v22262_v5 = vand.u32 4294901760, %v16869_v7  ;;  %v22263_v37 = vand.u32 4294901760, %v16871_v30 }
 0x2db   : > { %9911 = vrot.lane.b32.xlu0 %v22231_v40, %s22230_s20  ;;  %13763 = vmatpush1.bf16.msra.mxu0 %v13762_v6  ;;  %v22234_v6 = vld [vmem:[#allocation48_spill] sm:$0xff] }
 0x2dc   : > { %10269 = vrot.lane.b32.xlu1 %v10266_v9, %s22197_s5  ;;  %6703 = vmatmul.mubr.f32.gmra.mrb[62].mxu1 %v14919_v52  ;;  %v17040_v29 = vpop.permute.xlu1 %9633  ;;  %v17042_v36 = vpop.permute.xlu0 %10155  ;;  %v7318_v9 = vand.u32 4294901760, %v7317_v49  ;;  %v9523_v49 = vrot.slane %v22231_v40, 3 }
 0x2dd   : > { %22232 = vst [vmem:[#allocation49_spill] sm:$0xff] %v17040_v29  ;;  %22233 = vst [vmem:[#allocation143_spill] sm:$0xff] %v17042_v36  ;;  %7255 = vmatmul.mubr.f32.gmra.mrb[52].mxu0 %v22213_v19  ;;  %6708 = vmatprep.mubr.f32.mxu1 %v22063_v1 }
 0x2de   : > { %7260 = vmatprep.mubr.f32.mxu0 %v22063_v1  ;;  %13727 = vmatpush1.bf16.msra.mxu1 %v13726_v45  ;;  %v13766_v42 = vpack.c.bf16 %v7318_v9, %v7306_v44  ;;  %v22239_v44 = vld [vmem:[#allocation47_spill] sm:$0xff] }
 0x2df   : > { %10315 = vrot.lane.b32.xlu0 %v22234_v6, %s22230_s20  ;;  %13765 = vmatprep.subr.bf16.mxu0 %v13764_v35  ;;  %v9559_v35 = vrot.slane %v22231_v40, 5 }
 0x2e0   : > { %10283 = vrot.lane.b32.xlu1 %v10280_v53, %s21487_s26  ;;  %6710 = vmatmul.mubr.f32.gmra.mrb[64].mxu1 %v14948_v11  ;;  %v17052_v62 = vpop.permute.xlu1 %10104  ;;  %v17054_v4 = vpop.permute.xlu0 %10169  ;;  %s22242_s26 = smov 100  }
 0x2e1   : > { %22235 = vst [vmem:[#allocation48_spill] sm:$0xff] %v17052_v62  ;;  %22236 = vst [vmem:[#allocation144_spill] sm:$0xff] %v17054_v4  ;;  %7266 = vmatmul.mubr.f32.gmra.mrb[54].mxu0 %v22216_v59  ;;  %6796 = vmatprep.mubr.f32.mxu1 %v22063_v1  ;;  %v9541_v4 = vrot.slane %v22231_v40, 4  ;;  %v22364_v62 = vld [vmem:[#allocation106_spill] sm:$0xff] }
 0x2e2   : > { %13767 = vmatpush1.bf16.msra.mxu0 %v13766_v42  ;;  %7376 = vmatprep.mubr.f32.mxu0 %v22063_v1  ;;  %v10639_v10 = vrot.slane %v22364_v62, 2 }
 0x2e3   : > { %9527 = vrot.lane.b32.xlu0 %v9523_v49, %s21505_s18  ;;  %13729 = vmatprep.subr.bf16.mxu1 %v16787_v50  ;;  %v9595_v49 = vrot.slane %v22231_v40, 7 }
 0x2e4   : > { %10299 = vrot.lane.b32.xlu1 %v10295_v63, %s21501_s25  ;;  %6799 = vmatmul.mubr.f32.vlgmr.msra.gmra.mrb[58].mxu1 %v14903_v38  ;;  %v17067_v53 = vpop.permute.xlu1 %10138  ;;  %v17069_v45 = vpop.permute.xlu0 %10183  ;;  %v13770_v63 = vpack.c.bf16 %v16953_v26, %v16951_v14  ;;  %s22257_s25 = smov 101  }
 0x2e5   : > { %22237 = vst [vmem:[#allocation145_spill] sm:$0xff] %v17067_v53  ;;  %22238 = vst [vmem:[#allocation146_spill] sm:$0xff] %v17069_v45  ;;  %7378 = vmatmul.mubr.f32.vlgmr.msra.gmra.mrb[48].mxu0 %v14888_v28  ;;  %6804 = vmatprep.mubr.f32.mxu1 %v22063_v1  ;;  %v9939_v45 = vrot.slane %v22239_v44, 2 }
 0x2e6   : > { %7382 = vmatprep.mubr.f32.mxu0 %v22063_v1  ;;  %13731 = vmatpush1.bf16.msra.mxu1 %v16790_v57 }
 0x2e7   : > { %9563 = vrot.lane.b32.xlu0 %v9559_v35, %s21507_s29  ;;  %13769 = vmatprep.subr.bf16.mxu0 %v13768_v16  ;;  %v22243_v35 = vld [vmem:[#allocation50_spill] sm:$0xff]  ;;  %v13772_v16 = vpack.c.bf16 %v16967_v33, %v16957_v31 }
 0x2e8   : > { %10313 = vrot.lane.b32.xlu1 %v22239_v44, %s22230_s20  ;;  %6807 = vmatmul.mubr.f32.gmra.mrb[60].mxu1 %v14927_v60  ;;  %v17082_v9 = vpop.permute.xlu1 %10499  ;;  %v17084_v42 = vpop.permute.xlu0 %10589 }
 0x2e9   : > { %22240 = vst [vmem:[#allocation47_spill] sm:$0xff] %v17082_v9  ;;  %22241 = vst [vmem:[#allocation147_spill] sm:$0xff] %v17084_v42  ;;  %7384 = vmatmul.mubr.f32.gmra.mrb[50].mxu0 %v14917_v51  ;;  %6812 = vmatprep.mubr.f32.mxu1 %v22063_v1  ;;  %v13736_v42 = vpack.c.bf16 %v22249_v25, %v22248_v58  ;;  %v277_v9 = vld [vmem:[%s14845_s3 + $0x320] sm:$0xff] }
 0x2ea   : > { %7389 = vmatprep.mubr.f32.mxu0 %v22063_v1  ;;  %13771 = vmatpush1.bf16.msra.mxu0 %v13770_v63  ;;  %v9505_v63 = vrot.slane %v22231_v40, 2 }
 0x2eb   : > { %9599 = vrot.lane.b32.xlu0 %v9595_v49, %s22242_s26  ;;  %13733 = vmatprep.subr.bf16.mxu1 %v16805_v32  ;;  %v13774_v49 = vpack.c.bf16 %v16989_v54, %v16982_v47 }
 0x2ec   : > { %9913 = vrot.lane.b32.xlu1 %v22243_v35, %s22230_s20  ;;  %6815 = vmatmul.mubr.f32.gmra.mrb[62].mxu1 %v14930_v61  ;;  %v17097_v0 = vpop.permute.xlu1 %10513  ;;  %v17099_v29 = vpop.permute.xlu0 %10106 }
 0x2ed   : > { %22244 = vst [vmem:[#allocation50_spill] sm:$0xff] %v17097_v0  ;;  %22245 = vst [vmem:[#allocation148_spill] sm:$0xff] %v17099_v29  ;;  %7391 = vmatmul.mubr.f32.gmra.mrb[52].mxu0 %v14919_v52  ;;  %6820 = vmatprep.mubr.f32.mxu1 %v22063_v1 }
 0x2ee   : > { %7396 = vmatprep.mubr.f32.mxu0 %v22063_v1  ;;  %13735 = vmatpush1.bf16.msra.mxu1 %v16807_v17 }
 0x2ef   : > { %9925 = vrot.lane.b32.xlu0 %v9923_v13, %s22246_s24  ;;  %13773 = vmatprep.subr.bf16.mxu0 %v13772_v16  ;;  %v13738_v13 = vpack.c.bf16 %v22253_v2, %v22252_v12  ;;  %v9953_v16 = vrot.slane %v22239_v44, 3  ;;  %v13742_v12 = vpack.c.bf16 %v22263_v37, %v22262_v5  ;;  %v9924_v5 = vrot.slane %v22243_v35, 1 }
 0x2f0   : > { %9509 = vrot.lane.b32.xlu1 %v9505_v63, %s22247_s7  ;;  %6823 = vmatmul.mubr.f32.gmra.mrb[64].mxu1 %v14957_v27  ;;  %v17116_v0 = vpop.permute.xlu1 %10527  ;;  %v17118_v29 = vpop.permute.xlu0 %10140  ;;  %v9577_v63 = vrot.slane %v22231_v40, 6  ;;  %v13740_v40 = vpack.c.bf16 %v22259_v3, %v22258_v39  ;;  %v9995_v39 = vrot.slane %v22239_v44, 6  ;;  %v9596_v3 = vrot.slane %v22243_v35, 7 }
 0x2f1   : > { %22250 = vst [vmem:[#allocation149_spill] sm:$0xff] %v17116_v0  ;;  %22251 = vst [vmem:[#allocation150_spill] sm:$0xff] %v17118_v29  ;;  %7398 = vmatmul.mubr.f32.gmra.mrb[54].mxu0 %v14948_v11  ;;  %6901 = vmatprep.mubr.f32.mxu1 %v22063_v1  ;;  %v199_v29 = vld [vmem:[%s14845_s3 + $0xb0] sm:$0xff] }
 0x2f2   : > { %13775 = vmatpush1.bf16.msra.mxu0 %v13774_v49  ;;  %7484 = vmatprep.mubr.f32.mxu0 %v22063_v1  ;;  %v9524_v49 = vrot.slane %v22243_v35, 3 }
 0x2f3   : > { %9941 = vrot.lane.b32.xlu0 %v9939_v45, %s22247_s7  ;;  %13737 = vmatprep.subr.bf16.mxu1 %v13736_v42  ;;  %v9967_v42 = vrot.slane %v22239_v44, 4 }
 0x2f4   : > { %9545 = vrot.lane.b32.xlu1 %v9541_v4, %s22254_s6  ;;  %6905 = vmatmul.mubr.f32.vlgmr.msra.gmra.mrb[58].mxu1 %v14915_v46  ;;  %v17132_v25 = vpop.permute.xlu1 %10541  ;;  %v17134_v58 = vpop.permute.xlu0 %10501 }
 0x2f5   : > { %22255 = vst [vmem:[#allocation151_spill] sm:$0xff] %v17132_v25  ;;  %22256 = vst [vmem:[#allocation152_spill] sm:$0xff] %v17134_v58  ;;  %7487 = vmatmul.mubr.f32.vlgmr.msra.gmra.mrb[48].mxu0 %v14903_v38  ;;  %6910 = vmatprep.mubr.f32.mxu1 %v22063_v1  ;;  %v7842_v25 = vand.u32 4294901760, %v199_v29  ;;  %v251_v58 = vld [vmem:[%s14845_s3 + $0x250] sm:$0xff] }
 0x2f6   : > { %7491 = vmatprep.mubr.f32.mxu0 %v22063_v1  ;;  %13739 = vmatpush1.bf16.msra.mxu1 %v13738_v13  ;;  %v7850_v36 = vand.u32 4294901760, %v251_v58 }
 0x2f7   : > { %9955 = vrot.lane.b32.xlu0 %v9953_v16, %s21505_s18  ;;  %13777 = vmatprep.subr.bf16.mxu0 %v16884_v41  ;;  %v9981_v16 = vrot.slane %v22239_v44, 5 }
 0x2f8   : > { %9581 = vrot.lane.b32.xlu1 %v9577_v63, %s22257_s25  ;;  %6914 = vmatmul.mubr.f32.gmra.mrb[60].mxu1 %v22051_v20  ;;  %v17149_v4 = vpop.permute.xlu1 %10555  ;;  %v17151_v45 = vpop.permute.xlu0 %10515  ;;  %v9560_v63 = vrot.slane %v22243_v35, 5 }
 0x2f9   : > { %22260 = vst [vmem:[#allocation153_spill] sm:$0xff] %v17149_v4  ;;  %22261 = vst [vmem:[#allocation154_spill] sm:$0xff] %v17151_v45  ;;  %7494 = vmatmul.mubr.f32.gmra.mrb[50].mxu0 %v14927_v60  ;;  %6919 = vmatprep.mubr.f32.mxu1 %v22063_v1 }
 0x2fa   : > { %7499 = vmatprep.mubr.f32.mxu0 %v22063_v1  ;;  %13779 = vmatpush1.bf16.msra.mxu0 %v16910_v18 }
 0x2fb   : > { %9969 = vrot.lane.b32.xlu0 %v9967_v42, %s22254_s6  ;;  %13741 = vmatprep.subr.bf16.mxu1 %v13740_v40 }
 0x2fc   : > { %9529 = vrot.lane.b32.xlu1 %v9524_v49, %s21505_s18  ;;  %6923 = vmatmul.mubr.f32.gmra.mrb[62].mxu1 %v22052_v55  ;;  %v17166_v2 = vpop.permute.xlu1 %10571  ;;  %v17168_v13 = vpop.permute.xlu0 %10529  ;;  %v10009_v49 = vrot.slane %v22239_v44, 7 }
 0x2fd   : > { %22264 = vst [vmem:[#allocation155_spill] sm:$0xff] %v17166_v2  ;;  %22265 = vst [vmem:[#allocation156_spill] sm:$0xff] %v17168_v13  ;;  %7502 = vmatmul.mubr.f32.gmra.mrb[52].mxu0 %v14930_v61  ;;  %6928 = vmatprep.mubr.f32.mxu1 %v22063_v1 }
 0x2fe   : > { %7507 = vmatprep.mubr.f32.mxu0 %v22063_v1  ;;  %13743 = vmatpush1.bf16.msra.mxu1 %v13742_v12 }
 0x2ff   : > { %9983 = vrot.lane.b32.xlu0 %v9981_v16, %s21507_s29  ;;  %13781 = vmatprep.subr.bf16.mxu0 %v16946_v56  ;;  %v10328_v16 = vrot.slane %v22239_v44, 1  ;;  %v22275_v44 = vand.u32 4294901760, %v16953_v26  ;;  %v22279_v26 = vand.u32 4294901760, %v16967_v33 }
 0x300   : > { %9565 = vrot.lane.b32.xlu1 %v9560_v63, %s21507_s29  ;;  %6932 = vmatmul.mubr.f32.gmra.mrb[64].mxu1 %v22053_v22  ;;  %v17179_v7 = vpop.permute.xlu0 %10543  ;;  %v17181_v30 = vpop.permute.xlu1 %10089  ;;  %v9940_v63 = vrot.slane %v22234_v6, 2 }
 0x301   : > { %22266 = vst [vmem:[#allocation157_spill] sm:$0xff] %v17179_v7  ;;  %22267 = vst [vmem:[#allocation158_spill] sm:$0xff] %v17181_v30  ;;  %7510 = vmatmul.mubr.f32.gmra.mrb[54].mxu0 %v14957_v27  ;;  %7026 = vmatprep.mubr.f32.mxu1 %v22063_v1 }
 0x302   : > { %13783 = vmatpush1.bf16.msra.mxu0 %v16959_v34  ;;  %7588 = vmatprep.mubr.f32.mxu0 %v22063_v1 }
 0x303   : > { %9997 = vrot.lane.b32.xlu0 %v9995_v39, %s22257_s25  ;;  %13745 = vmatprep.subr.bf16.mxu1 %v16787_v50  ;;  %v22272_v39 = vand.u32 4294901760, %v16933_v23  ;;  %v9954_v23 = vrot.slane %v22234_v6, 3 }
 0x304   : > { %9601 = vrot.lane.b32.xlu1 %v9596_v3, %s22242_s26  ;;  %7028 = vmatmul.mubr.f32.vlgmr.msra.gmra.mrb[58].mxu1 %v14888_v28  ;;  %v17192_v40 = vpop.permute.xlu0 %10557  ;;  %v17194_v42 = vpop.permute.xlu1 %10123  ;;  %v22273_v3 = vand.u32 4294901760, %v16944_v21  ;;  %v9506_v21 = vrot.slane %v22243_v35, 2 }
 0x305   : > { %22268 = vst [vmem:[#allocation159_spill] sm:$0xff] %v17192_v40  ;;  %22269 = vst [vmem:[#allocation160_spill] sm:$0xff] %v17194_v42  ;;  %7592 = vmatmul.mubr.f32.vlgmr.msra.gmra.mrb[48].mxu0 %v14915_v46  ;;  %7033 = vmatprep.mubr.f32.mxu1 %v22063_v1 }
 0x306   : > { %7596 = vmatprep.mubr.f32.mxu0 %v22063_v1  ;;  %13747 = vmatpush1.bf16.msra.mxu1 %v16790_v57 }
 0x307   : > { %10011 = vrot.lane.b32.xlu0 %v10009_v49, %s22242_s26  ;;  %v13784_v49 = vpack.c.bf16 %v22273_v3, %v22272_v39  ;;  %v9542_v39 = vrot.slane %v22243_v35, 4  ;;  %13749 = vmatprep.subr.bf16.mxu1 %v16805_v32  ;;  %v22283_v3 = vand.u32 4294901760, %v16989_v54  ;;  %v9982_v54 = vrot.slane %v22234_v6, 5 }
 0x308   : > { %9927 = vrot.lane.b32.xlu1 %v9924_v5, %s22246_s24  ;;  %7035 = vmatmul.mubr.f32.gmra.mrb[60].mxu1 %v14917_v51  ;;  %v17204_v37 = vpop.permute.xlu0 %10573  ;;  %v17206_v12 = vpop.permute.xlu1 %10157  ;;  %v22274_v5 = vand.u32 4294901760, %v16951_v14  ;;  %v22278_v14 = vand.u32 4294901760, %v16957_v31  ;;  %v9968_v31 = vrot.slane %v22234_v6, 4 }
 0x309   : > { %22270 = vst [vmem:[#allocation161_spill] sm:$0xff] %v17204_v37  ;;  %22271 = vst [vmem:[#allocation162_spill] sm:$0xff] %v17206_v12  ;;  %7600 = vmatmul.mubr.f32.gmra.mrb[50].mxu0 %v22051_v20  ;;  %7040 = vmatprep.mubr.f32.mxu1 %v22063_v1 }
 0x30a   : > { %7605 = vmatprep.mubr.f32.mxu0 %v22063_v1  ;;  %v13786_v12 = vpack.c.bf16 %v22275_v44, %v22274_v5  ;;  %13785 = vmatprep.subr.bf16.mxu0 %v13784_v49  ;;  %v9996_v5 = vrot.slane %v22234_v6, 6  ;;  %v22289_v44 = vld [vmem:[#allocation52_spill] sm:$0xff] }
 0x30b   : > { %10331 = vrot.lane.b32.xlu0 %v10328_v16, %s22246_s24  ;;  %v13788_v16 = vpack.c.bf16 %v22279_v26, %v22278_v14  ;;  %13751 = vmatpush1.bf16.msra.mxu1 %v16807_v17 }
 0x30c   : > { %9943 = vrot.lane.b32.xlu1 %v9940_v63, %s22247_s7  ;;  %7042 = vmatmul.mubr.f32.gmra.mrb[62].mxu1 %v14919_v52  ;;  %v17225_v2 = vpop.permute.xlu1 %10171  ;;  %v17227_v50 = vpop.permute.xlu0 %10195 }
 0x30d   : > { %22276 = vst [vmem:[#allocation163_spill] sm:$0xff] %v17225_v2  ;;  %22277 = vst [vmem:[#allocation164_spill] sm:$0xff] %v17227_v50  ;;  %7609 = vmatmul.mubr.f32.gmra.mrb[52].mxu0 %v22052_v55  ;;  %7047 = vmatprep.mubr.f32.mxu1 %v22063_v1 }
 0x30e   : > { %13787 = vmatpush1.bf16.msra.mxu0 %v13786_v12  ;;  %v22282_v12 = vand.u32 4294901760, %v16982_v47  ;;  %7614 = vmatprep.mubr.f32.mxu0 %v22063_v1  ;;  %v9578_v47 = vrot.slane %v22243_v35, 6 }
 0x30f   : > { %9511 = vrot.lane.b32.xlu0 %v9506_v21, %s22247_s7  ;;  %13789 = vmatprep.subr.bf16.mxu0 %v13788_v16  ;;  %v10059_v16 = vrot.slane %v22289_v44, 2 }
 0x310   : > { %9957 = vrot.lane.b32.xlu1 %v9954_v23, %s21505_s18  ;;  %v17240_v63 = vpop.permute.xlu1 %10185  ;;  %v17242_v57 = vpop.permute.xlu0 %10606  ;;  %7049 = vmatmul.mubr.f32.gmra.mrb[64].mxu1 %v14948_v11  ;;  %v13790_v49 = vpack.c.bf16 %v22283_v3, %v22282_v12  ;;  %s22288_s18 = smov 84  }
 0x311   : > { %22280 = vst [vmem:[#allocation165_spill] sm:$0xff] %v17240_v63  ;;  %22281 = vst [vmem:[#allocation166_spill] sm:$0xff] %v17242_v57  ;;  %7618 = vmatmul.mubr.f32.gmra.mrb[54].mxu0 %v22053_v22  ;;  %7127 = vmatprep.mubr.f32.mxu1 %v22063_v1 }
 0x312   : > { %13791 = vmatpush1.bf16.msra.mxu0 %v13790_v49  ;;  %7712 = vmatprep.mubr.f32.mxu0 %v22063_v1  ;;  %v22299_v49 = vld [vmem:[#allocation54_spill] sm:$0xff] }
 0x313   : > { %9547 = vrot.lane.b32.xlu0 %v9542_v39, %s22254_s6  ;;  %13793 = vmatprep.subr.bf16.mxu0 %v16884_v41  ;;  %v10010_v41 = vrot.slane %v22234_v6, 7  ;;  %v10060_v57 = vrot.slane %v22299_v49, 2 }
 0x314   : > { %9971 = vrot.lane.b32.xlu1 %v9968_v31, %s22254_s6  ;;  %v17257_v33 = vpop.permute.xlu1 %10591  ;;  %v17259_v32 = vpop.permute.xlu0 %9817  ;;  %7129 = vmatmul.mubr.f32.vlgmr.msra.gmra.mrb[58].mxu1 %v14888_v28  ;;  %v10042_v31 = vrot.slane %v22299_v49, 1 }
 0x315   : > { %22284 = vst [vmem:[#allocation167_spill] sm:$0xff] %v17257_v33  ;;  %22285 = vst [vmem:[#allocation168_spill] sm:$0xff] %v17259_v32  ;;  %7134 = vmatprep.mubr.f32.mxu1 %v22063_v1  ;;  %7714 = vmatmul.mubr.f32.vlgmr.msra.gmra.mrb[48].mxu0 %v14888_v28  ;;  %v252_v32 = vld [vmem:[%s14845_s3 + $0x258] sm:$0xff] }
 0x316   : > { %7718 = vmatprep.mubr.f32.mxu0 %v22063_v1  ;;  %13795 = vmatpush1.bf16.msra.mxu0 %v16910_v18  ;;  %v9631_v18 = vrot.slane %v16384_v24, 1  ;;  %v7848_v42 = vand.u32 4294901760, %v252_v32 }
 0x317   : > { %9583 = vrot.lane.b32.xlu0 %v9578_v47, %s22257_s25  ;;  %13797 = vmatprep.subr.bf16.mxu0 %v16946_v56  ;;  %v10329_v56 = vrot.slane %v22234_v6, 1 }
 0x318   : > { %9985 = vrot.lane.b32.xlu1 %v9982_v54, %s21507_s29  ;;  %v17270_v17 = vpop.permute.xlu1 %10604  ;;  %v17272_v35 = vpop.permute.xlu0 %9851  ;;  %7136 = vmatmul.mubr.f32.gmra.mrb[60].mxu1 %v14917_v51  ;;  %s22296_s29 = smov 82  }
 0x319   : > { %22286 = vst [vmem:[#allocation169_spill] sm:$0xff] %v17270_v17  ;;  %22287 = vst [vmem:[#allocation170_spill] sm:$0xff] %v17272_v35  ;;  %7141 = vmatprep.mubr.f32.mxu1 %v22063_v1  ;;  %7720 = vmatmul.mubr.f32.gmra.mrb[50].mxu0 %v14917_v51 }
 0x31a   : > { %7725 = vmatprep.mubr.f32.mxu0 %v22063_v1  ;;  %13799 = vmatpush1.bf16.msra.mxu0 %v16959_v34  ;;  %v9650_v34 = vrot.slane %v16386_v48, 2 }
 0x31b   : > { %10026 = vrot.lane.b32.xlu0 %v22289_v44, %s22288_s18 }
 0x31c   : > { %9999 = vrot.lane.b32.xlu1 %v9996_v5, %s22257_s25  ;;  %v17284_v21 = vpop.permute.xlu0 %9885  ;;  %v17286_v23 = vpop.permute.xlu1 %10197  ;;  %7143 = vmatmul.mubr.f32.gmra.mrb[62].mxu1 %v14919_v52  ;;  %v9649_v5 = vrot.slane %v16384_v24, 2 }
 0x31d   : > { %22290 = vst [vmem:[#allocation52_spill] sm:$0xff] %v17284_v21  ;;  %22291 = vst [vmem:[#allocation171_spill] sm:$0xff] %v17286_v23  ;;  %7148 = vmatprep.mubr.f32.mxu1 %v22063_v1  ;;  %7727 = vmatmul.mubr.f32.gmra.mrb[52].mxu0 %v14919_v52 }
 0x31e   : > { %7732 = vmatprep.mubr.f32.mxu0 %v22063_v1 }
 0x31f   : > { %9619 = vrot.lane.b32.xlu0 %v16386_v48, %s22288_s18 }
 0x320   : > { %10013 = vrot.lane.b32.xlu1 %v10010_v41, %s22242_s26  ;;  %v17298_v14 = vpop.permute.xlu0 %9899  ;;  %v17300_v26 = vpop.permute.xlu1 %9800  ;;  %7150 = vmatmul.mubr.f32.gmra.mrb[64].mxu1 %v14948_v11 }
 0x321   : > { %22292 = vst [vmem:[#allocation172_spill] sm:$0xff] %v17298_v14  ;;  %22293 = vst [vmem:[#allocation173_spill] sm:$0xff] %v17300_v26  ;;  %7912 = vmatprep.mubr.f32.mxu1 %v22063_v1  ;;  %7734 = vmatmul.mubr.f32.gmra.mrb[54].mxu0 %v14948_v11 }
 0x322   : > { %7812 = vmatprep.mubr.f32.mxu0 %v22063_v1 }
 0x323   : > { %9635 = vrot.lane.b32.xlu0 %v9631_v18, %s21612_s30 }
 0x324   : > { %10333 = vrot.lane.b32.xlu1 %v10329_v56, %s22246_s24  ;;  %v17311_v39 = vpop.permute.xlu0 %10211  ;;  %v17313_v12 = vpop.permute.xlu1 %9834 }
 0x325   : > { %22294 = vst [vmem:[#allocation174_spill] sm:$0xff] %v17311_v39  ;;  %22295 = vst [vmem:[#allocation175_spill] sm:$0xff] %v17313_v12  ;;  %7814 = vmatmul.mubr.f32.vlgmr.msra.gmra.mrb[48].mxu0 %v14888_v28  ;;  %v225_v12 = vld [vmem:[%s14845_s3 + $0x180] sm:$0xff] }
 0x326   : > { %7818 = vmatprep.mubr.f32.mxu0 %v22063_v1  ;;  %v7846_v7 = vand.u32 4294901760, %v225_v12 }
 0x327   : > { %10062 = vrot.lane.b32.xlu0 %v10059_v16, %s22296_s29 }
 0x328   : > { %9617 = vrot.lane.b32.xlu1 %v16384_v24, %s22288_s18  ;;  %v17321_v6 = vpop.permute.xlu0 %10225  ;;  %v17323_v3 = vpop.permute.xlu1 %9868  ;;  %v10041_v24 = vrot.slane %v22289_v44, 1  ;;  %v9632_v44 = vrot.slane %v16386_v48, 1  ;;  %v17510_v45 = vpack.c.bf16 %v7846_v7, %v7842_v25 }
 0x329   : > { %22297 = vst [vmem:[#allocation176_spill] sm:$0xff] %v17321_v6  ;;  %22298 = vst [vmem:[#allocation177_spill] sm:$0xff] %v17323_v3  ;;  %7820 = vmatmul.mubr.f32.gmra.mrb[50].mxu0 %v14917_v51 }
 0x32a   : > { %7825 = vmatprep.mubr.f32.mxu0 %v22063_v1 }
 0x32b   : > { %9655 = vrot.lane.b32.xlu0 %v9650_v34, %s22296_s29  ;;  %v22306_v34 = vld [vmem:[#allocation99_spill] sm:$0xff] }
 0x32c   : > { %10028 = vrot.lane.b32.xlu1 %v22299_v49, %s22288_s18  ;;  %v17331_v47 = vpop.permute.xlu0 %10239  ;;  %v17333_v54 = vpop.permute.xlu1 %9819  ;;  %v10588_v14 = vrot.slane %v22306_v34, 7  ;;  %v10921_v23 = vrot.slane %v22306_v34, 1 }
 0x32d   : > { %22300 = vst [vmem:[#allocation54_spill] sm:$0xff] %v17331_v47  ;;  %22301 = vst [vmem:[#allocation178_spill] sm:$0xff] %v17333_v54  ;;  %v17337_v41 = vpop.f32.mrb[50].mxu1  ;;  %7827 = vmatmul.mubr.f32.gmra.mrb[52].mxu0 %v14919_v52 }
 0x32e   : > { %22302 = vst [vmem:[#allocation179_spill] sm:$0xff] %v17337_v41  ;;  %v17340_v18 = vpop.f32.mrb[51].mxu1  ;;  %7832 = vmatprep.mubr.f32.mxu0 %v22063_v1 }
 0x32f   : > { %10046 = vrot.lane.b32.xlu0 %v10042_v31, %s21612_s30  ;;  %22303 = vst [vmem:[#allocation180_spill] sm:$0xff] %v17340_v18 }
 0x330   : > { %9653 = vrot.lane.b32.xlu1 %v9649_v5, %s22296_s29  ;;  %v17344_v56 = vpop.permute.xlu0 %10253  ;;  %v17346_v16 = vpop.permute.xlu1 %9853 }
 0x331   : > { %22304 = vst [vmem:[#allocation181_spill] sm:$0xff] %v17344_v56  ;;  %22305 = vst [vmem:[#allocation182_spill] sm:$0xff] %v17346_v16  ;;  %v17351_v47 = vpop.f32.mrb[52].mxu1  ;;  %7834 = vmatmul.mubr.f32.gmra.mrb[54].mxu0 %v14948_v11 }
 0x332   : > { %v17354_v31 = vpop.f32.mrb[53].mxu1  ;;  %8584 = vmatprep.mubr.f32.mxu0 %v22063_v1 }
 0x333   : > { %10593 = vrot.lane.b32.xlu0 %v10588_v14, %s21596_s4  ;;  %22307 = vst [vmem:[#allocation183_spill] sm:$0xff] %v17354_v31 }
 0x334   : > { %10044 = vrot.lane.b32.xlu1 %v10041_v24, %s21612_s30  ;;  %v17358_v5 = vpop.permute.xlu0 %10267  ;;  %v17360_v56 = vpop.permute.xlu1 %9887 }
 0x335   : > { %22308 = vst [vmem:[#allocation184_spill] sm:$0xff] %v17358_v5  ;;  %22309 = vst [vmem:[#allocation185_spill] sm:$0xff] %v17360_v56  ;;  %v17365_v21 = vpop.f32.mrb[54].mxu1  ;;  %v22314_v5 = vld [vmem:[#allocation95_spill] sm:$0xff] }
 0x336   : > { %22310 = vst [vmem:[#allocation186_spill] sm:$0xff] %v17365_v21  ;;  %v17368_v14 = vpop.f32.mrb[55].mxu1  ;;  %v10923_v56 = vrot.slane %v22314_v5, 1 }
 0x337   : > { %10924 = vrot.lane.b32.xlu0 %v10921_v23, %s21585_s17  ;;  %22311 = vst [vmem:[#allocation187_spill] sm:$0xff] %v17368_v14 }
 0x338   : > { %9637 = vrot.lane.b32.xlu1 %v9632_v44, %s21612_s30  ;;  %v17377_v6 = vpop.f32.mrb[56].mxu1  ;;  %v10955_v44 = vrot.slane %v22306_v34, 3  ;;  %s22380_s30 = smov 119  }
 0x339   : > { %v17371_v24 = vpop.permute.xlu0 %10281  ;;  %22315 = vst [vmem:[#allocation95_spill] sm:$0xff] %v17377_v6  ;;  %v17380_v48 = vpop.f32.mrb[57].mxu1 }
 0x33a   : > { %22312 = vst [vmem:[#allocation188_spill] sm:$0xff] %v17371_v24  ;;  %v17373_v17 = vpop.permute.xlu1 %9901  ;;  %22316 = vst [vmem:[#allocation190_spill] sm:$0xff] %v17380_v48 }
 0x33b   : > { %22313 = vst [vmem:[#allocation189_spill] sm:$0xff] %v17373_v17  ;;  %10928 = vrot.lane.b32.xlu0 %v10923_v56, %s21585_s17  ;;  %v10570_v17 = vrot.slane %v22306_v34, 6  ;;  %v10957_v56 = vrot.slane %v22314_v5, 3 }
 0x33c   : > { %10064 = vrot.lane.b32.xlu1 %v10060_v57, %s22296_s29  ;;  %v10938_v57 = vrot.slane %v22306_v34, 2 }
 0x33d   : > { %v17383_v23 = vpop.permute.xlu0 %10297 }
 0x33e   : > { %22317 = vst [vmem:[#allocation191_spill] sm:$0xff] %v17383_v23  ;;  %v17385_v63 = vpop.permute.xlu1 %10213 }
 0x33f   : > { %22318 = vst [vmem:[#allocation192_spill] sm:$0xff] %v17385_v63  ;;  %10958 = vrot.lane.b32.xlu0 %v10955_v44, %s21566_s19  ;;  %v10989_v44 = vrot.slane %v22306_v34, 5 }
 0x340   : > { %10575 = vrot.lane.b32.xlu1 %v10570_v17, %s21554_s23  ;;  %v10940_v17 = vrot.slane %v22314_v5, 2 }
 0x341   : > { %v17393_v24 = vpop.permute.xlu0 %9802 }
 0x342   : > { %v17391_v49 = vpop.permute.xlu1 %10227  ;;  %22320 = vst [vmem:[#allocation194_spill] sm:$0xff] %v17393_v24 }
 0x343   : > { %22319 = vst [vmem:[#allocation193_spill] sm:$0xff] %v17391_v49  ;;  %10962 = vrot.lane.b32.xlu0 %v10957_v56, %s21566_s19  ;;  %v10991_v56 = vrot.slane %v22314_v5, 5 }
 0x344   : > { %10941 = vrot.lane.b32.xlu1 %v10938_v57, %s21538_s15  ;;  %v10972_v57 = vrot.slane %v22306_v34, 4  ;;  %v22329_v34 = vld [vmem:[#allocation100_spill] sm:$0xff] }
 0x345   : > { %v17401_v63 = vpop.permute.xlu0 %9836 }
 0x346   : > { %v17399_v23 = vpop.permute.xlu1 %10241  ;;  %22322 = vst [vmem:[#allocation196_spill] sm:$0xff] %v17401_v63  ;;  %v11020_v63 = vrot.slane %v22329_v34, 7 }
 0x347   : > { %22321 = vst [vmem:[#allocation195_spill] sm:$0xff] %v17399_v23  ;;  %10992 = vrot.lane.b32.xlu0 %v10989_v44, %s21556_s28  ;;  %v11007_v44 = vrot.slane %v22314_v5, 6 }
 0x348   : > { %10945 = vrot.lane.b32.xlu1 %v10940_v17, %s21538_s15  ;;  %v10974_v17 = vrot.slane %v22314_v5, 4 }
 0x349   : > { %v17409_v16 = vpop.permute.xlu0 %9870 }
 0x34a   : > { %v17407_v49 = vpop.permute.xlu1 %10255  ;;  %22324 = vst [vmem:[#allocation198_spill] sm:$0xff] %v17409_v16 }
 0x34b   : > { %22323 = vst [vmem:[#allocation197_spill] sm:$0xff] %v17407_v49  ;;  %10996 = vrot.lane.b32.xlu0 %v10991_v56, %s21556_s28  ;;  %v10939_v56 = vrot.slane %v22329_v34, 2 }
 0x34c   : > { %10975 = vrot.lane.b32.xlu1 %v10972_v57, %s21544_s27  ;;  %v10922_v57 = vrot.slane %v22329_v34, 1 }
 0x34d   : > { %v17417_v33 = vpop.permute.xlu0 %9911 }
 0x34e   : > { %v17415_v23 = vpop.permute.xlu1 %10269  ;;  %22326 = vst [vmem:[#allocation200_spill] sm:$0xff] %v17417_v33 }
 0x34f   : > { %22325 = vst [vmem:[#allocation199_spill] sm:$0xff] %v17415_v23  ;;  %11010 = vrot.lane.b32.xlu0 %v11007_v44, %s21554_s23  ;;  %v10973_v44 = vrot.slane %v22329_v34, 4 }
 0x350   : > { %10979 = vrot.lane.b32.xlu1 %v10974_v17, %s21544_s27  ;;  %v10956_v17 = vrot.slane %v22329_v34, 3 }
 0x351   : > { %v17425_v16 = vpop.permute.xlu0 %10315 }
 0x352   : > { %v17423_v49 = vpop.permute.xlu1 %10283  ;;  %22328 = vst [vmem:[#allocation202_spill] sm:$0xff] %v17425_v16 }
 0x353   : > { %22327 = vst [vmem:[#allocation201_spill] sm:$0xff] %v17423_v49  ;;  %10943 = vrot.lane.b32.xlu0 %v10939_v56, %s21538_s15  ;;  %s22337_s15 = smov 24  }
 0x354   : > { %10926 = vrot.lane.b32.xlu1 %v10922_v57, %s21585_s17  ;;  %v22336_v57 = vld [vmem:[#allocation105_spill] sm:$0xff]  ;;  %s22361_s17 = smov 42  }
 0x355   : > { %v17433_v33 = vpop.permute.xlu0 %9527  ;;  %v10689_v0 = vrot.slane %v22336_v57, 5  ;;  %v10672_v30 = vrot.slane %v22336_v57, 4 }
 0x356   : > { %v17431_v23 = vpop.permute.xlu1 %10299  ;;  %22331 = vst [vmem:[#allocation204_spill] sm:$0xff] %v17433_v33  ;;  %v17438_v49 = vpop.f32.mrb[40].mxu0  ;;  %v10990_v33 = vrot.slane %v22329_v34, 5 }
 0x357   : > { %22330 = vst [vmem:[#allocation203_spill] sm:$0xff] %v17431_v23  ;;  %10977 = vrot.lane.b32.xlu0 %v10973_v44, %s21544_s27  ;;  %22332 = vst [vmem:[#allocation205_spill] sm:$0xff] %v17438_v49  ;;  %v17441_v16 = vpop.f32.mrb[41].mxu0  ;;  %v10296_v23 = vrot.slane %v22336_v57, 7  ;;  %s22342_s27 = smov 60   ;;  %v17693_v49 = vld [vmem:[%s14845_s3 + $0x260] sm:$0xff] }
 0x358   : > { %10960 = vrot.lane.b32.xlu1 %v10956_v17, %s21566_s19  ;;  %22333 = vst [vmem:[#allocation206_spill] sm:$0xff] %v17441_v16  ;;  %s22356_s19 = smov 59  }
 0x359   : > { %v17445_v56 = vpop.permute.xlu0 %9563 }
 0x35a   : > { %v17443_v3 = vpop.permute.xlu1 %10313  ;;  %22335 = vst [vmem:[#allocation208_spill] sm:$0xff] %v17445_v56  ;;  %v17450_v39 = vpop.f32.mrb[42].mxu0  ;;  %v11006_v56 = vrot.slane %v22329_v34, 6  ;;  %v226_v34 = vld [vmem:[%s14845_s3 + $0x188] sm:$0xff] }
 0x35b   : > { %22334 = vst [vmem:[#allocation207_spill] sm:$0xff] %v17443_v3  ;;  %10301 = vrot.lane.b32.xlu0 %v10296_v23, %s22337_s15  ;;  %22338 = vst [vmem:[#allocation105_spill] sm:$0xff] %v17450_v39  ;;  %v17453_v44 = vpop.f32.mrb[43].mxu0  ;;  %v10621_v3 = vrot.slane %v22336_v57, 1  ;;  %v7844_v54 = vand.u32 4294901760, %v226_v34 }
 0x35c   : > { %10994 = vrot.lane.b32.xlu1 %v10990_v33, %s21556_s28  ;;  %22339 = vst [vmem:[#allocation209_spill] sm:$0xff] %v17453_v44  ;;  %s22353_s28 = smov 90  }
 0x35d   : > { %v17455_v35 = vpop.permute.xlu0 %9599  ;;  %v17530_v53 = vsub.f32 %v226_v34, %v7844_v54 }
 0x35e   : > { %22340 = vst [vmem:[#allocation210_spill] sm:$0xff] %v17455_v35  ;;  %v17457_v17 = vpop.permute.xlu1 %9913  ;;  %v17462_v2 = vpop.f32.mrb[44].mxu0  ;;  %v22347_v35 = vld [vmem:[#allocation101_spill] sm:$0xff] }
 0x35f   : > { %22341 = vst [vmem:[#allocation211_spill] sm:$0xff] %v17457_v17  ;;  %10624 = vrot.lane.b32.xlu0 %v10621_v3, %s22342_s27  ;;  %22343 = vst [vmem:[#allocation212_spill] sm:$0xff] %v17462_v2  ;;  %v17465_v23 = vpop.f32.mrb[45].mxu0  ;;  %v10623_v17 = vrot.slane %v22347_v35, 1  ;;  %v10657_v40 = vrot.slane %v22347_v35, 3  ;;  %v10640_v24 = vrot.slane %v22347_v35, 2 }
 0x360   : > { %11008 = vrot.lane.b32.xlu1 %v11006_v56, %s21554_s23  ;;  %22344 = vst [vmem:[#allocation213_spill] sm:$0xff] %v17465_v23  ;;  %s22352_s23 = smov 58   ;;  %v10691_v26 = vrot.slane %v22347_v35, 5  ;;  %v10674_v16 = vrot.slane %v22347_v35, 4 }
 0x361   : > { %v17467_v33 = vpop.permute.xlu0 %9925 }
 0x362   : > { %22345 = vst [vmem:[#allocation214_spill] sm:$0xff] %v17467_v33  ;;  %v17469_v37 = vpop.permute.xlu1 %9509  ;;  %v17474_v50 = vpop.f32.mrb[46].mxu0 }
 0x363   : > { %22346 = vst [vmem:[#allocation215_spill] sm:$0xff] %v17469_v37  ;;  %10628 = vrot.lane.b32.xlu0 %v10623_v17, %s22342_s27  ;;  %22348 = vst [vmem:[#allocation101_spill] sm:$0xff] %v17474_v50  ;;  %v17477_v3 = vpop.f32.mrb[47].mxu0  ;;  %v10655_v37 = vrot.slane %v22336_v57, 3  ;;  %v200_v17 = vld [vmem:[%s14845_s3 + $0xb8] sm:$0xff]  ;;  %v8522_v50 = vand.u32 4294901760, %v17693_v49 }
 0x364   : > { %11022 = vrot.lane.b32.xlu1 %v11020_v63, %s21596_s4  ;;  %22349 = vst [vmem:[#allocation216_spill] sm:$0xff] %v17477_v3  ;;  %s22367_s4 = smov 40  }
 0x365   : > { %v17479_v56 = vpop.permute.xlu0 %9941 }
 0x366   : > { %22350 = vst [vmem:[#allocation217_spill] sm:$0xff] %v17479_v56  ;;  %v17481_v4 = vpop.permute.xlu1 %9545  ;;  %v7840_v56 = vand.u32 4294901760, %v200_v17 }
 0x367   : > { %22351 = vst [vmem:[#allocation218_spill] sm:$0xff] %v17481_v4  ;;  %10658 = vrot.lane.b32.xlu0 %v10655_v37, %s22352_s23  ;;  %v10638_v4 = vrot.slane %v22336_v57, 2 }
 0x368   : > { %10608 = vrot.lane.b32.xlu1 %v22336_v57, %s22353_s28  ;;  %v17498_v37 = vpack.c.bf16 %v7844_v54, %v7840_v56  ;;  %v21598_v54 = vand.u32 4294901760, %v17530_v53 }
 0x369   : > { %v17489_v33 = vpop.permute.xlu0 %9955 }
 0x36a   : > { %22354 = vst [vmem:[#allocation219_spill] sm:$0xff] %v17489_v33  ;;  %v17491_v63 = vpop.permute.xlu1 %9581  ;;  %v278_v33 = vld [vmem:[%s14845_s3 + $0x328] sm:$0xff]  ;;  %13801 = vmatprep.subr.bf16.mxu1 %v17498_v37 }
 0x36b   : > { %22355 = vst [vmem:[#allocation220_spill] sm:$0xff] %v17491_v63  ;;  %10662 = vrot.lane.b32.xlu0 %v10657_v40, %s22352_s23  ;;  %v7852_v40 = vand.u32 4294901760, %v278_v33  ;;  %13803 = vmatpush1.bf16.msra.mxu1 %v17510_v45 }
 0x36c   : > { %10641 = vrot.lane.b32.xlu1 %v10638_v4, %s22356_s19 }
 0x36d   : > { %v17503_v13 = vpop.permute.xlu0 %9969  ;;  %v17513_v4 = vpack.c.bf16 %v7852_v40, %v7848_v42 }
 0x36e   : > { %22357 = vst [vmem:[#allocation221_spill] sm:$0xff] %v17503_v13  ;;  %v17505_v63 = vpop.permute.xlu1 %9529 }
 0x36f   : > { %22358 = vst [vmem:[#allocation222_spill] sm:$0xff] %v17505_v63  ;;  %10692 = vrot.lane.b32.xlu0 %v10689_v0, %s22197_s5  ;;  %13805 = vmatprep.subr.bf16.mxu1 %v17513_v4  ;;  %v7854_v0 = vand.u32 4294901760, %v277_v9 }
 0x370   : > { %10645 = vrot.lane.b32.xlu1 %v10640_v24, %s22356_s19  ;;  %v17528_v24 = vsub.f32 %v200_v17, %v7840_v56  ;;  %v10673_v56 = vrot.slane %v22364_v62, 4  ;;  %v17550_v17 = vsub.f32 %v225_v12, %v7846_v7  ;;  %v7969_v7 = vsub.f32 %v17530_v53, %v21598_v54 }
 0x371   : > { %v17517_v13 = vpop.permute.xlu0 %9983 }
 0x372   : > { %22359 = vst [vmem:[#allocation223_spill] sm:$0xff] %v17517_v13  ;;  %v17519_v63 = vpop.permute.xlu1 %9565  ;;  %v17532_v13 = vpack.c.bf16 %v7854_v0, %v7850_v36  ;;  %v21601_v54 = vand.u32 4294901760, %v17550_v17 }
 0x373   : > { %22360 = vst [vmem:[#allocation224_spill] sm:$0xff] %v17519_v63  ;;  %10696 = vrot.lane.b32.xlu0 %v10691_v26, %s22197_s5  ;;  %v21599_v26 = vand.u32 4294901760, %v17528_v24 }
 0x374   : > { %10675 = vrot.lane.b32.xlu1 %v10672_v30, %s22361_s17  ;;  %13807 = vmatpush1.bf16.msra.mxu1 %v17532_v13  ;;  %v17543_v30 = vsub.f32 %v199_v29, %v7842_v25  ;;  %v10706_v29 = vrot.slane %v22336_v57, 6 }
 0x375   : > { %v17534_v63 = vpop.permute.xlu0 %9997  ;;  %v7957_v25 = vsub.f32 %v17528_v24, %v21599_v26 }
 0x376   : > { %22362 = vst [vmem:[#allocation225_spill] sm:$0xff] %v17534_v63  ;;  %v17536_v43 = vpop.permute.xlu1 %9601  ;;  %v17554_v63 = vsub.f32 %v278_v33, %v7852_v40  ;;  %v21604_v57 = vand.u32 4294901760, %v17543_v30  ;;  %v17575_v40 = vsub.f32 %v277_v9, %v7854_v0  ;;  %v7975_v0 = vsub.f32 %v17550_v17, %v21601_v54 }
 0x377   : > { %22363 = vst [vmem:[#allocation226_spill] sm:$0xff] %v17536_v43  ;;  %10643 = vrot.lane.b32.xlu0 %v10639_v10, %s22356_s19  ;;  %v17552_v43 = vsub.f32 %v252_v32, %v7848_v42  ;;  %7918 = vmatmul.mubr.f32.vlgmr.msra.gmra.mrb[66].mxu1 %v22202_v15  ;;  %v10707_v42 = vrot.slane %v22364_v62, 6  ;;  %v17570_v32 = vsub.f32 %v251_v58, %v7850_v36  ;;  %v7958_v12 = vand.u32 4294901760, %v7957_v25 }
 0x378   : > { %10679 = vrot.lane.b32.xlu1 %v10674_v16, %s22361_s17  ;;  %7921 = vmatprep.mubr.f32.mxu1 %v22063_v1  ;;  %v7970_v16 = vand.u32 4294901760, %v7969_v7  ;;  %v21603_v26 = vand.u32 4294901760, %v17554_v63  ;;  %v10708_v36 = vrot.slane %v22347_v35, 6  ;;  %v7963_v9 = vsub.f32 %v17543_v30, %v21604_v57 }
 0x379   : > { %v17547_v34 = vpop.permute.xlu0 %10011  ;;  %v21608_v54 = vand.u32 4294901760, %v17570_v32 }
 0x37a   : > { %22365 = vst [vmem:[#allocation106_spill] sm:$0xff] %v17547_v34  ;;  %v17557_v10 = vpop.permute.xlu1 %9927  ;;  %v13808_v58 = vpack.c.bf16 %v7970_v16, %v7958_v12  ;;  %v7993_v7 = vsub.f32 %v17554_v63, %v21603_v26  ;;  %v7976_v16 = vand.u32 4294901760, %v7975_v0 }
 0x37b   : > { %22366 = vst [vmem:[#allocation227_spill] sm:$0xff] %v17557_v10  ;;  %10677 = vrot.lane.b32.xlu0 %v10673_v56, %s22361_s17  ;;  %7927 = vmatmul.mubr.f32.gmra.mrb[68].mxu1 %v22205_v8  ;;  %v21602_v56 = vand.u32 4294901760, %v17552_v43  ;;  %v7987_v0 = vsub.f32 %v17570_v32, %v21608_v54  ;;  %v22376_v54 = vld [vmem:[#allocation111_spill] sm:$0xff] }
 0x37c   : > { %10709 = vrot.lane.b32.xlu1 %v10706_v29, %s22367_s4  ;;  %7931 = vmatprep.mubr.f32.mxu1 %v22063_v1  ;;  %v7964_v29 = vand.u32 4294901760, %v7963_v9  ;;  %v10724_v9 = vrot.slane %v22347_v35, 7  ;;  %v7994_v57 = vand.u32 4294901760, %v7993_v7  ;;  %v10382_v2 = vrot.slane %v22376_v54, 4 }
 0x37d   : > { %v17573_v33 = vpop.permute.xlu0 %10331  ;;  %13809 = vmatprep.subr.bf16.mxu1 %v13808_v58  ;;  %v7981_v25 = vsub.f32 %v17552_v43, %v21602_v56  ;;  %v7988_v7 = vand.u32 4294901760, %v7987_v0  ;;  %v13818_v0 = vpack.c.bf16 %v17550_v17, %v17543_v30 }
 0x37e   : > { %22368 = vst [vmem:[#allocation228_spill] sm:$0xff] %v17573_v33  ;;  %v17581_v34 = vpop.permute.xlu1 %9943  ;;  %v13810_v26 = vpack.c.bf16 %v7976_v16, %v7964_v29  ;;  %v22374_v29 = vld [vmem:[#allocation112_spill] sm:$0xff] }
 0x37f   : > { %22369 = vst [vmem:[#allocation229_spill] sm:$0xff] %v17581_v34  ;;  %10711 = vrot.lane.b32.xlu0 %v10707_v42, %s22367_s4  ;;  %v10723_v42 = vrot.slane %v22364_v62, 7  ;;  %7937 = vmatmul.mubr.f32.gmra.mrb[70].mxu1 %v22213_v19  ;;  %v7982_v56 = vand.u32 4294901760, %v7981_v25  ;;  %v10622_v25 = vrot.slane %v22364_v62, 1 }
 0x380   : > { %10713 = vrot.lane.b32.xlu1 %v10708_v36, %s22367_s4  ;;  %v21610_v36 = vand.u32 4294901760, %v17575_v40  ;;  %7942 = vmatprep.mubr.f32.mxu1 %v22063_v1 }
 0x381   : > { %v17599_v12 = vpop.permute.xlu0 %9511  ;;  %13811 = vmatpush1.bf16.msra.mxu1 %v13810_v26  ;;  %v10656_v26 = vrot.slane %v22364_v62, 3 }
 0x382   : > { %22370 = vst [vmem:[#allocation230_spill] sm:$0xff] %v17599_v12  ;;  %v17605_v58 = vpop.permute.xlu1 %9957  ;;  %v280_v12 = vld [vmem:[%s14845_s3 + $0x338] sm:$0xff] }
 0x383   : > { %22371 = vst [vmem:[#allocation231_spill] sm:$0xff] %v17605_v58  ;;  %10725 = vrot.lane.b32.xlu0 %v10723_v42, %s22337_s15  ;;  %7948 = vmatmul.mubr.f32.gmra.mrb[72].mxu1 %v22216_v59  ;;  %v7999_v58 = vsub.f32 %v17575_v40, %v21610_v36  ;;  %v13812_v42 = vpack.c.bf16 %v7994_v57, %v7982_v56  ;;  %v8524_v3 = vand.u32 4294901760, %v280_v12 }
 0x384   : > { %10727 = vrot.lane.b32.xlu1 %v10724_v9, %s22337_s15  ;;  %8058 = vmatprep.mubr.f32.mxu1 %v22063_v1  ;;  %v13816_v36 = vpack.c.bf16 %v17530_v53, %v17528_v24 }
 0x385   : > { %v17611_v33 = vpop.permute.xlu0 %9547  ;;  %13813 = vmatprep.subr.bf16.mxu1 %v13812_v42  ;;  %v8000_v16 = vand.u32 4294901760, %v7999_v58  ;;  %v10365_v58 = vrot.slane %v22376_v54, 3  ;;  %v10690_v42 = vrot.slane %v22364_v62, 5 }
 0x386   : > { %22372 = vst [vmem:[#allocation232_spill] sm:$0xff] %v17611_v33  ;;  %v17620_v34 = vpop.permute.xlu1 %9971  ;;  %v10330_v33 = vrot.slane %v22376_v54, 1 }
 0x387   : > { %22373 = vst [vmem:[#allocation233_spill] sm:$0xff] %v17620_v34  ;;  %10737 = vrot.lane.b32.xlu0 %v22374_v29, %s22230_s20  ;;  %v13814_v57 = vpack.c.bf16 %v8000_v16, %v7988_v7  ;;  %v13820_v7 = vpack.c.bf16 %v17554_v63, %v17552_v43 }
 0x388   : > { %10626 = vrot.lane.b32.xlu1 %v10622_v25, %s22342_s27 }
 0x389   : > { %v17626_v9 = vpop.permute.xlu0 %9583  ;;  %13815 = vmatpush1.bf16.msra.mxu1 %v13814_v57 }
 0x38a   : > { %22375 = vst [vmem:[#allocation112_spill] sm:$0xff] %v17626_v9  ;;  %v17632_v34 = vpop.permute.xlu1 %9985  ;;  %13817 = vmatprep.subr.bf16.mxu1 %v13816_v36  ;;  %v22382_v36 = vld [vmem:[#allocation107_spill] sm:$0xff]  ;;  %v10348_v9 = vrot.slane %v22376_v54, 2 }
 0x38b   : > { %22377 = vst [vmem:[#allocation111_spill] sm:$0xff] %v17632_v34  ;;  %10335 = vrot.lane.b32.xlu0 %v10330_v33, %s22246_s24  ;;  %v10367_v16 = vrot.slane %v22382_v36, 3  ;;  %v10350_v41 = vrot.slane %v22382_v36, 2 }
 0x38c   : > { %10660 = vrot.lane.b32.xlu1 %v10656_v26, %s22352_s23  ;;  %8060 = vmatmul.mubr.f32.vlgmr.msra.gmra.mrb[74].mxu1 %v14888_v28  ;;  %v13822_v26 = vpack.c.bf16 %v17575_v40, %v17570_v32 }
 0x38d   : > { %v17637_v56 = vpop.permute.xlu0 %10026  ;;  %8063 = vmatprep.mubr.f32.mxu1 %v22063_v1  ;;  %13819 = vmatpush1.bf16.msra.mxu1 %v13818_v0  ;;  %v10399_v0 = vrot.slane %v22376_v54, 5 }
 0x38e   : > { %22378 = vst [vmem:[#allocation234_spill] sm:$0xff] %v17637_v56  ;;  %v17642_v25 = vpop.permute.xlu1 %9999  ;;  %13821 = vmatprep.subr.bf16.mxu1 %v13820_v7  ;;  %v202_v7 = vld [vmem:[%s14845_s3 + $0xc8] sm:$0xff] }
 0x38f   : > { %22379 = vst [vmem:[#allocation235_spill] sm:$0xff] %v17642_v25  ;;  %10368 = vrot.lane.b32.xlu0 %v10365_v58, %s22380_s30 }
 0x390   : > { %10694 = vrot.lane.b32.xlu1 %v10690_v42, %s22197_s5  ;;  %8065 = vmatmul.mubr.f32.gmra.mrb[68].mxu1 %v14917_v51 }
 0x391   : > { %v17651_v33 = vpop.permute.xlu0 %9619  ;;  %8069 = vmatprep.mubr.f32.mxu1 %v22063_v1  ;;  %13823 = vmatpush1.bf16.msra.mxu1 %v13822_v26  ;;  %v10401_v26 = vrot.slane %v22382_v36, 5 }
 0x392   : > { %22381 = vst [vmem:[#allocation236_spill] sm:$0xff] %v17651_v33  ;;  %v17656_v57 = vpop.permute.xlu1 %10013  ;;  %13825 = vmatprep.subr.bf16.mxu1 %v17498_v37 }
 0x393   : > { %22383 = vst [vmem:[#allocation107_spill] sm:$0xff] %v17656_v57  ;;  %10372 = vrot.lane.b32.xlu0 %v10367_v16, %s22380_s30  ;;  %v228_v16 = vld [vmem:[%s14845_s3 + $0x198] sm:$0xff] }
 0x394   : > { %10317 = vrot.lane.b32.xlu1 %v22376_v54, %s22230_s20  ;;  %8071 = vmatmul.mubr.f32.gmra.mrb[70].mxu1 %v14919_v52  ;;  %v8516_v56 = vand.u32 4294901760, %v228_v16 }
 0x395   : > { %v17663_v58 = vpop.permute.xlu0 %9635  ;;  %8076 = vmatprep.mubr.f32.mxu1 %v22063_v1 }
 0x396   : > { %22384 = vst [vmem:[#allocation237_spill] sm:$0xff] %v17663_v58  ;;  %v17666_v42 = vpop.permute.xlu1 %10333  ;;  %v201_v58 = vld [vmem:[%s14845_s3 + $0xc0] sm:$0xff] }
 0x397   : > { %22385 = vst [vmem:[#allocation238_spill] sm:$0xff] %v17666_v42  ;;  %10402 = vrot.lane.b32.xlu0 %v10399_v0, %s22386_s0  ;;  %v8512_v42 = vand.u32 4294901760, %v202_v7  ;;  %v227_v0 = vld [vmem:[%s14845_s3 + $0x190] sm:$0xff]  ;;  %v8514_v57 = vand.u32 4294901760, %v201_v58 }
 0x398   : > { %10739 = vrot.lane.b32.xlu1 %v22382_v36, %s22230_s20  ;;  %v8518_v34 = vand.u32 4294901760, %v227_v0  ;;  %8078 = vmatmul.mubr.f32.gmra.mrb[72].mxu1 %v14948_v11 }
 0x399   : > { %v17677_v33 = vpop.permute.xlu0 %10062  ;;  %v17686_v10 = vpack.c.bf16 %v8516_v56, %v8512_v42  ;;  %8164 = vmatprep.mubr.f32.mxu1 %v22063_v1  ;;  %v17735_v14 = vsub.f32 %v201_v58, %v8514_v57  ;;  %v22394_v58 = vand.u32 4294901760, %v17530_v53 }
 0x39a   : > { %22387 = vst [vmem:[#allocation239_spill] sm:$0xff] %v17677_v33  ;;  %v17681_v25 = vpop.permute.xlu1 %9617  ;;  %v254_v33 = vld [vmem:[%s14845_s3 + $0x268] sm:$0xff]  ;;  %v17699_v44 = vpack.c.bf16 %v8518_v34, %v8514_v57  ;;  %v17737_v31 = vsub.f32 %v227_v0, %v8518_v34  ;;  %v22393_v57 = vand.u32 4294901760, %v17528_v24  ;;  %v10416_v34 = vrot.slane %v22376_v54, 6 }
 0x39b   : > { %22388 = vst [vmem:[#allocation240_spill] sm:$0xff] %v17681_v25  ;;  %10406 = vrot.lane.b32.xlu0 %v10401_v26, %s22386_s0  ;;  %v10433_v25 = vrot.slane %v22376_v54, 7  ;;  %13849 = vmatprep.subr.bf16.mxu0 %v17686_v10  ;;  %v279_v26 = vld [vmem:[%s14845_s3 + $0x330] sm:$0xff]  ;;  %v21645_v0 = vand.u32 4294901760, %v17735_v14  ;;  %v17765_v24 = vsub.f32 %v280_v12, %v8524_v3  ;;  %s22424_s3 = smov 83  }
 0x39c   : > { %10351 = vrot.lane.b32.xlu1 %v10348_v9, %s22247_s7  ;;  %v8520_v9 = vand.u32 4294901760, %v254_v33  ;;  %8167 = vmatmul.mubr.f32.vlgmr.msra.gmra.mrb[76].mxu1 %v14903_v38 }
 0x39d   : > { %v17695_v39 = vpop.permute.xlu0 %9655  ;;  %8170 = vmatprep.mubr.f32.mxu1 %v22063_v1  ;;  %13851 = vmatpush1.bf16.msra.mxu0 %v17699_v44 }
 0x39e   : > { %22389 = vst [vmem:[#allocation241_spill] sm:$0xff] %v17695_v39  ;;  %v17702_v18 = vpop.permute.xlu1 %10028  ;;  %v8526_v39 = vand.u32 4294901760, %v279_v26  ;;  %v17710_v48 = vpack.c.bf16 %v8524_v3, %v8520_v9  ;;  %13827 = vmatpush1.bf16.msra.mxu1 %v17510_v45  ;;  %v17778_v3 = vsub.f32 %v17693_v49, %v8522_v50 }
 0x39f   : > { %22390 = vst [vmem:[#allocation242_spill] sm:$0xff] %v17702_v18  ;;  %10436 = vrot.lane.b32.xlu0 %v10433_v25, %s22242_s26  ;;  %v10435_v18 = vrot.slane %v22382_v36, 7  ;;  %13829 = vmatprep.subr.bf16.mxu1 %v17513_v4 }
 0x3a0   : > { %10355 = vrot.lane.b32.xlu1 %v10350_v41, %s22247_s7  ;;  %v17717_v25 = vpack.c.bf16 %v8526_v39, %v8522_v50  ;;  %13853 = vmatprep.subr.bf16.mxu0 %v17710_v48  ;;  %v17728_v41 = vsub.f32 %v202_v7, %v8512_v42  ;;  %v13832_v42 = vpack.c.bf16 %v22394_v58, %v22393_v57 }
 0x3a1   : > { %v17712_v6 = vpop.permute.xlu0 %10046  ;;  %8173 = vmatmul.mubr.f32.gmra.mrb[68].mxu1 %v14927_v60  ;;  %v17780_v54 = vsub.f32 %v279_v26, %v8526_v39  ;;  %v10418_v26 = vrot.slane %v22382_v36, 6 }
 0x3a2   : > { %22391 = vst [vmem:[#allocation243_spill] sm:$0xff] %v17712_v6  ;;  %v17719_v23 = vpop.permute.xlu1 %9653  ;;  %8177 = vmatprep.mubr.f32.mxu1 %v22063_v1  ;;  %v17730_v6 = vsub.f32 %v228_v16, %v8516_v56  ;;  %13855 = vmatpush1.bf16.msra.mxu0 %v17717_v25  ;;  %v10383_v16 = vrot.slane %v22374_v29, 4  ;;  %v22396_v53 = vand.u32 4294901760, %v17728_v41 }
 0x3a3   : > { %22392 = vst [vmem:[#allocation244_spill] sm:$0xff] %v17719_v23  ;;  %10440 = vrot.lane.b32.xlu0 %v10435_v18, %s22242_s26  ;;  %v10349_v23 = vrot.slane %v22374_v29, 2  ;;  %13831 = vmatpush1.bf16.msra.mxu1 %v17532_v13 }
 0x3a4   : > { %10385 = vrot.lane.b32.xlu1 %v10382_v2, %s22254_s6  ;;  %v10384_v2 = vrot.slane %v22382_v36, 4  ;;  %v8628_v57 = vsub.f32 %v17728_v41, %v22396_v53  ;;  %13833 = vmatprep.subr.bf16.mxu1 %v13832_v42  ;;  %v10417_v53 = vrot.slane %v22374_v29, 6  ;;  %v8634_v42 = vsub.f32 %v17735_v14, %v21645_v0 }
 0x3a5   : > { %v17732_v21 = vpop.permute.xlu0 %10593  ;;  %8180 = vmatmul.mubr.f32.gmra.mrb[70].mxu1 %v14930_v61  ;;  %8590 = vmatmul.mubr.f32.vlgmr.msra.gmra.mrb[56].mxu0 %v22202_v15 }
 0x3a6   : > { %v17741_v18 = vpop.permute.xlu1 %10044  ;;  %8185 = vmatprep.mubr.f32.mxu1 %v22063_v1  ;;  %8593 = vmatprep.mubr.f32.mxu0 %v22063_v1  ;;  %v8629_v12 = vand.u32 4294901760, %v8628_v57 }
 0x3a7   : > { %10353 = vrot.lane.b32.xlu0 %v10349_v23, %s22247_s7  ;;  %v17757_v23 = vsub.f32 %v254_v33, %v8520_v9  ;;  %v22397_v33 = vand.u32 4294901760, %v17730_v6 }
 0x3a8   : > { %10389 = vrot.lane.b32.xlu1 %v10384_v2, %s22254_s6  ;;  %v21644_v2 = vand.u32 4294901760, %v17737_v31 }
 0x3a9   : > { %v17754_v7 = vpop.permute.xlu0 %10924  ;;  %v8640_v15 = vsub.f32 %v17730_v6, %v22397_v33  ;;  %8188 = vmatmul.mubr.f32.gmra.mrb[72].mxu1 %v14957_v27  ;;  %8599 = vmatmul.mubr.f32.gmra.mrb[58].mxu0 %v22205_v8  ;;  %v21646_v39 = vand.u32 4294901760, %v17757_v23  ;;  %v22400_v8 = vand.u32 4294901760, %v17550_v17  ;;  %v21647_v33 = vand.u32 4294901760, %v17765_v24 }
 0x3aa   : > { %v17762_v56 = vpop.permute.xlu1 %9637  ;;  %8266 = vmatprep.mubr.f32.mxu1 %v22063_v1  ;;  %v8646_v50 = vsub.f32 %v17737_v31, %v21644_v2  ;;  %8602 = vmatprep.mubr.f32.mxu0 %v22063_v1  ;;  %v21648_v17 = vand.u32 4294901760, %v17778_v3 }
 0x3ab   : > { %22395 = vst [vmem:[#allocation245_spill] sm:$0xff] %v17762_v56  ;;  %10387 = vrot.lane.b32.xlu0 %v10383_v16, %s22254_s6  ;;  %v8641_v9 = vand.u32 4294901760, %v8640_v15  ;;  %v22399_v16 = vand.u32 4294901760, %v17543_v30  ;;  %v8635_v15 = vand.u32 4294901760, %v8634_v42  ;;  %v8652_v0 = vsub.f32 %v17757_v23, %v21646_v39 }
 0x3ac   : > { %10419 = vrot.lane.b32.xlu1 %v10416_v34, %s22257_s25  ;;  %v8647_v2 = vand.u32 4294901760, %v8646_v50  ;;  %v8664_v30 = vsub.f32 %v17765_v24, %v21647_v33  ;;  %v10750_v33 = vrot.slane %v22382_v36, 1 }
 0x3ad   : > { %v17783_v58 = vpop.permute.xlu0 %10928  ;;  %v13856_v34 = vpack.c.bf16 %v8641_v9, %v8629_v12  ;;  %v13834_v57 = vpack.c.bf16 %v22400_v8, %v22399_v16  ;;  %8270 = vmatmul.mubr.f32.vlgmr.msra.gmra.mrb[78].mxu1 %v14915_v46  ;;  %8608 = vmatmul.mubr.f32.gmra.mrb[60].mxu0 %v22213_v19  ;;  %v8653_v50 = vand.u32 4294901760, %v8652_v0  ;;  %v22403_v16 = vand.u32 4294901760, %v17554_v63 }
 0x3ae   : > { %v17794_v49 = vpop.permute.xlu1 %10064  ;;  %8273 = vmatprep.mubr.f32.mxu1 %v22063_v1  ;;  %v13858_v42 = vpack.c.bf16 %v8647_v2, %v8635_v15  ;;  %8613 = vmatprep.mubr.f32.mxu0 %v22063_v1  ;;  %v8665_v12 = vand.u32 4294901760, %v8664_v30  ;;  %v8658_v19 = vsub.f32 %v17778_v3, %v21648_v17  ;;  %v22404_v2 = vand.u32 4294901760, %v17780_v54 }
 0x3af   : > { %22398 = vst [vmem:[#allocation246_spill] sm:$0xff] %v17794_v49  ;;  %10421 = vrot.lane.b32.xlu0 %v10417_v53, %s22257_s25  ;;  %v10749_v53 = vrot.slane %v22374_v29, 1  ;;  %13857 = vmatprep.subr.bf16.mxu0 %v13856_v34  ;;  %v22407_v30 = vand.u32 4294901760, %v17570_v32  ;;  %v13864_v32 = vpack.c.bf16 %v17730_v6, %v17728_v41 }
 0x3b0   : > { %10423 = vrot.lane.b32.xlu1 %v10418_v26, %s22257_s25  ;;  %v22402_v26 = vand.u32 4294901760, %v17552_v43  ;;  %13835 = vmatpush1.bf16.msra.mxu1 %v13834_v57  ;;  %v8670_v0 = vsub.f32 %v17780_v54, %v22404_v2  ;;  %v13860_v43 = vpack.c.bf16 %v8665_v12, %v8653_v50  ;;  %v8659_v63 = vand.u32 4294901760, %v8658_v19  ;;  %v22406_v57 = vld [vmem:[#allocation108_spill] sm:$0xff] }
 0x3b1   : > { %v17815_v9 = vpop.permute.xlu0 %10958  ;;  %8277 = vmatmul.mubr.f32.gmra.mrb[68].mxu1 %v22051_v20  ;;  %v10765_v15 = vrot.slane %v22406_v57, 2  ;;  %13859 = vmatpush1.bf16.msra.mxu0 %v13858_v42  ;;  %v10779_v42 = vrot.slane %v22406_v57, 3  ;;  %v10400_v50 = vrot.slane %v22374_v29, 5  ;;  %v10793_v2 = vrot.slane %v22406_v57, 4 }
 0x3b2   : > { %22401 = vst [vmem:[#allocation247_spill] sm:$0xff] %v17815_v9  ;;  %v13836_v8 = vpack.c.bf16 %v22403_v16, %v22402_v26  ;;  %v17823_v39 = vpop.permute.xlu1 %10575  ;;  %8281 = vmatprep.mubr.f32.mxu1 %v22063_v1  ;;  %v8671_v36 = vand.u32 4294901760, %v8670_v0  ;;  %v22408_v26 = vand.u32 4294901760, %v17575_v40  ;;  %8619 = vmatmul.mubr.f32.gmra.mrb[62].mxu0 %v22216_v59 }
 0x3b3   : > { %10751 = vrot.lane.b32.xlu0 %v10749_v53, %s22246_s24  ;;  %13861 = vmatprep.subr.bf16.mxu0 %v13860_v43  ;;  %v10434_v43 = vrot.slane %v22374_v29, 7 }
 0x3b4   : > { %10753 = vrot.lane.b32.xlu1 %v10750_v33, %s22246_s24  ;;  %13837 = vmatprep.subr.bf16.mxu1 %v13836_v8  ;;  %v13838_v53 = vpack.c.bf16 %v22408_v26, %v22407_v30  ;;  %v10366_v33 = vrot.slane %v22374_v29, 3  ;;  %v13862_v12 = vpack.c.bf16 %v8671_v36, %v8659_v63  ;;  %v13866_v8 = vpack.c.bf16 %v17737_v31, %v17735_v14 }
 0x3b5   : > { %v17837_v34 = vpop.permute.xlu0 %10962  ;;  %8285 = vmatmul.mubr.f32.gmra.mrb[70].mxu1 %v22052_v55  ;;  %8729 = vmatprep.mubr.f32.mxu0 %v22063_v1  ;;  %v13868_v63 = vpack.c.bf16 %v17765_v24, %v17757_v23  ;;  %v13870_v30 = vpack.c.bf16 %v17780_v54, %v17778_v3 }
 0x3b6   : > { %22405 = vst [vmem:[#allocation248_spill] sm:$0xff] %v17837_v34  ;;  %v17844_v16 = vpop.permute.xlu1 %10941  ;;  %8290 = vmatprep.mubr.f32.mxu1 %v22063_v1  ;;  %13863 = vmatpush1.bf16.msra.mxu0 %v13862_v12  ;;  %v22714_v34 = vld [vmem:[#allocation39_spill] sm:$0xff] }
 0x3b7   : > { %22409 = vst [vmem:[#allocation108_spill] sm:$0xff] %v17844_v16  ;;  %10767 = vrot.lane.b32.xlu0 %v10765_v15, %s22247_s7  ;;  %13839 = vmatpush1.bf16.msra.mxu1 %v13838_v53  ;;  %v10826_v15 = vrot.slane %v22406_v57, 6 }
 0x3b8   : > { %10370 = vrot.lane.b32.xlu1 %v10366_v33, %s22380_s30  ;;  %13865 = vmatprep.subr.bf16.mxu0 %v13864_v32  ;;  %v22416_v33 = vld [vmem:[#allocation44_spill] sm:$0xff]  ;;  %v22419_v32 = vld [vmem:[#allocation117_spill] sm:$0xff] }
 0x3b9   : > { %v17854_v40 = vpop.permute.xlu0 %10992  ;;  %8294 = vmatmul.mubr.f32.gmra.mrb[72].mxu1 %v22053_v22  ;;  %8731 = vmatmul.mubr.f32.vlgmr.msra.gmra.mrb[64].mxu0 %v14888_v28 }
 0x3ba   : > { %22410 = vst [vmem:[#allocation249_spill] sm:$0xff] %v17854_v40  ;;  %v17857_v59 = vpop.permute.xlu1 %10945  ;;  %8388 = vmatprep.mubr.f32.mxu1 %v22063_v1  ;;  %13841 = vmatprep.subr.bf16.mxu1 %v17498_v37  ;;  %v10808_v37 = vrot.slane %v22406_v57, 5 }
 0x3bb   : > { %10781 = vrot.lane.b32.xlu0 %v10779_v42, %s22380_s30  ;;  %8734 = vmatprep.mubr.f32.mxu0 %v22063_v1  ;;  %v22420_v42 = vld [vmem:[#allocation114_spill] sm:$0xff] }
 0x3bc   : > { %10404 = vrot.lane.b32.xlu1 %v10400_v50, %s22386_s0  ;;  %13867 = vmatpush1.bf16.msra.mxu0 %v13866_v8 }
 0x3bd   : > { %v17867_v19 = vpop.permute.xlu0 %10996  ;;  %8390 = vmatmul.mubr.f32.vlgmr.msra.gmra.mrb[80].mxu1 %v14888_v28  ;;  %8736 = vmatmul.mubr.f32.gmra.mrb[66].mxu0 %v14917_v51 }
 0x3be   : > { %22411 = vst [vmem:[#allocation250_spill] sm:$0xff] %v17867_v19  ;;  %v17872_v0 = vpop.permute.xlu1 %10975  ;;  %8393 = vmatprep.mubr.f32.mxu1 %v22063_v1  ;;  %13843 = vmatpush1.bf16.msra.mxu1 %v17510_v45  ;;  %v10844_v45 = vrot.slane %v22406_v57, 7  ;;  %v22678_v19 = vld [vmem:[#allocation67_spill] sm:$0xff] }
 0x3bf   : > { %22412 = vst [vmem:[#allocation251_spill] sm:$0xff] %v17872_v0  ;;  %10795 = vrot.lane.b32.xlu0 %v10793_v2, %s22254_s6  ;;  %8739 = vmatprep.mubr.f32.mxu0 %v22063_v1  ;;  %v22423_v2 = vld [vmem:[#allocation113_spill] sm:$0xff] }
 0x3c0   : > { %10438 = vrot.lane.b32.xlu1 %v10434_v43, %s22242_s26  ;;  %13869 = vmatprep.subr.bf16.mxu0 %v13868_v63  ;;  %v10464_v63 = vrot.slane %v22416_v33, 1 }
 0x3c1   : > { %v17882_v36 = vpop.permute.xlu0 %11010  ;;  %8395 = vmatmul.mubr.f32.gmra.mrb[68].mxu1 %v14917_v51  ;;  %8741 = vmatmul.mubr.f32.gmra.mrb[60].mxu0 %v14919_v52 }
 0x3c2   : > { %22413 = vst [vmem:[#allocation252_spill] sm:$0xff] %v17882_v36  ;;  %v17887_v29 = vpop.permute.xlu1 %10979  ;;  %8399 = vmatprep.mubr.f32.mxu1 %v22063_v1  ;;  %13845 = vmatprep.subr.bf16.mxu1 %v17513_v4 }
 0x3c3   : > { %22414 = vst [vmem:[#allocation253_spill] sm:$0xff] %v17887_v29  ;;  %10811 = vrot.lane.b32.xlu0 %v10808_v37, %s22386_s0  ;;  %8746 = vmatprep.mubr.f32.mxu0 %v22063_v1 }
 0x3c4   : > { %10829 = vrot.lane.b32.xlu1 %v10826_v15, %s22257_s25  ;;  %13871 = vmatpush1.bf16.msra.mxu0 %v13870_v30  ;;  %v10478_v30 = vrot.slane %v22416_v33, 2 }
 0x3c5   : > { %v17897_v26 = vpop.permute.xlu0 %10943  ;;  %8401 = vmatmul.mubr.f32.gmra.mrb[70].mxu1 %v14919_v52  ;;  %8748 = vmatmul.mubr.f32.gmra.mrb[62].mxu0 %v14948_v11 }
 0x3c6   : > { %22415 = vst [vmem:[#allocation254_spill] sm:$0xff] %v17897_v26  ;;  %v17902_v53 = vpop.permute.xlu1 %10926  ;;  %8406 = vmatprep.mubr.f32.mxu1 %v22063_v1  ;;  %13847 = vmatpush1.bf16.msra.mxu1 %v17532_v13  ;;  %v10043_v13 = vrot.slane %v22419_v32, 1 }
 0x3c7   : > { %10847 = vrot.lane.b32.xlu0 %v10844_v45, %s22242_s26  ;;  %8834 = vmatprep.mubr.f32.mxu0 %v22063_v1 }
 0x3c8   : > { %10452 = vrot.lane.b32.xlu1 %v22416_v33, %s22288_s18  ;;  %13873 = vmatprep.subr.bf16.mxu0 %v17686_v10 }
 0x3c9   : > { %v17910_v12 = vpop.permute.xlu0 %10977  ;;  %8408 = vmatmul.mubr.f32.gmra.mrb[72].mxu1 %v14948_v11  ;;  %8837 = vmatmul.mubr.f32.vlgmr.msra.gmra.mrb[68].mxu0 %v14903_v38  ;;  %v10061_v38 = vrot.slane %v22419_v32, 2 }
 0x3ca   : > { %22417 = vst [vmem:[#allocation44_spill] sm:$0xff] %v17910_v12  ;;  %v17914_v4 = vpop.permute.xlu1 %10960  ;;  %8486 = vmatprep.mubr.f32.mxu1 %v22063_v1  ;;  %8840 = vmatprep.mubr.f32.mxu0 %v22063_v1  ;;  %v22677_v12 = vld [vmem:[#allocation18_spill] sm:$0xff] }
 0x3cb   : > { %22418 = vst [vmem:[#allocation255_spill] sm:$0xff] %v17914_v4  ;;  %10030 = vrot.lane.b32.xlu0 %v22419_v32, %s22288_s18  ;;  %13875 = vmatpush1.bf16.msra.mxu0 %v17699_v44  ;;  %v22428_v32 = vand.u32 4294901760, %v17728_v41  ;;  %v22713_v4 = vld [vmem:[#allocation152_spill] sm:$0xff] }
 0x3cc   : > { %10865 = vrot.lane.b32.xlu1 %v22420_v42, %s22288_s18  ;;  %13877 = vmatprep.subr.bf16.mxu0 %v17710_v48 }
 0x3cd   : > { %v17923_v50 = vpop.permute.xlu0 %10301  ;;  %8488 = vmatmul.mubr.f32.vlgmr.msra.gmra.mrb[82].mxu1 %v14888_v28  ;;  %8843 = vmatmul.mubr.f32.gmra.mrb[70].mxu0 %v14927_v60  ;;  %v10465_v60 = vrot.slane %v22423_v2, 1 }
 0x3ce   : > { %22421 = vst [vmem:[#allocation117_spill] sm:$0xff] %v17923_v50  ;;  %v17928_v8 = vpop.permute.xlu1 %10994  ;;  %8491 = vmatprep.mubr.f32.mxu1 %v22063_v1  ;;  %8846 = vmatprep.mubr.f32.mxu0 %v22063_v1 }
 0x3cf   : > { %22422 = vst [vmem:[#allocation114_spill] sm:$0xff] %v17928_v8  ;;  %10454 = vrot.lane.b32.xlu0 %v22423_v2, %s22288_s18  ;;  %13879 = vmatpush1.bf16.msra.mxu0 %v17717_v25 }
 0x3d0   : > { %10048 = vrot.lane.b32.xlu1 %v10043_v13, %s22424_s3  ;;  %v22429_v13 = vand.u32 4294901760, %v17730_v6  ;;  %v10880_v6 = vrot.slane %v22420_v42, 1 }
 0x3d1   : > { %v17938_v43 = vpop.permute.xlu0 %10624  ;;  %8493 = vmatmul.mubr.f32.gmra.mrb[68].mxu1 %v14917_v51  ;;  %8849 = vmatmul.mubr.f32.gmra.mrb[60].mxu0 %v14930_v61  ;;  %v10479_v61 = vrot.slane %v22423_v2, 2  ;;  %v22435_v2 = vld [vmem:[#allocation102_spill] sm:$0xff] }
 0x3d2   : > { %v17943_v37 = vpop.permute.xlu1 %11008  ;;  %8497 = vmatprep.mubr.f32.mxu1 %v22063_v1  ;;  %8854 = vmatprep.mubr.f32.mxu0 %v22063_v1 }
 0x3d3   : > { %22425 = vst [vmem:[#allocation113_spill] sm:$0xff] %v17943_v37  ;;  %10066 = vrot.lane.b32.xlu0 %v10061_v38, %s22296_s29  ;;  %v13880_v38 = vpack.c.bf16 %v22429_v13, %v22428_v32  ;;  %v22437_v32 = vand.u32 4294901760, %v17765_v24  ;;  %v11062_v24 = vrot.slane %v22435_v2, 2 }
 0x3d4   : > { %10466 = vrot.lane.b32.xlu1 %v10464_v63, %s22424_s3 }
 0x3d5   : > { %v17952_v15 = vpop.permute.xlu0 %10628  ;;  %8499 = vmatmul.mubr.f32.gmra.mrb[70].mxu1 %v14919_v52  ;;  %8857 = vmatmul.mubr.f32.gmra.mrb[62].mxu0 %v14957_v27 }
 0x3d6   : > { %22426 = vst [vmem:[#allocation256_spill] sm:$0xff] %v17952_v15  ;;  %v17956_v45 = vpop.permute.xlu1 %11022  ;;  %8504 = vmatprep.mubr.f32.mxu1 %v22063_v1  ;;  %8935 = vmatprep.mubr.f32.mxu0 %v22063_v1  ;;  %v22726_v15 = vld [vmem:[#allocation194_spill] sm:$0xff] }
 0x3d7   : > { %22427 = vst [vmem:[#allocation257_spill] sm:$0xff] %v17956_v45  ;;  %10468 = vrot.lane.b32.xlu0 %v10465_v60, %s22424_s3  ;;  %13881 = vmatprep.subr.bf16.mxu0 %v13880_v38  ;;  %v22431_v60 = vand.u32 4294901760, %v17735_v14  ;;  %v11048_v14 = vrot.slane %v22435_v2, 1  ;;  %v22439_v38 = vand.u32 4294901760, %v17780_v54  ;;  %v10898_v54 = vrot.slane %v22420_v42, 2  ;;  %v22461_v45 = vld [vmem:[#allocation183_spill] sm:$0xff] }
 0x3d8   : > { %10480 = vrot.lane.b32.xlu1 %v10478_v30, %s22296_s29  ;;  %v22432_v30 = vand.u32 4294901760, %v17737_v31  ;;  %v22436_v31 = vand.u32 4294901760, %v17757_v23  ;;  %v11076_v42 = vrot.slane %v22435_v2, 3 }
 0x3d9   : > { %v17968_v33 = vpop.permute.xlu0 %10658  ;;  %8506 = vmatmul.mubr.f32.gmra.mrb[72].mxu1 %v14948_v11  ;;  %8939 = vmatmul.mubr.f32.vlgmr.msra.gmra.mrb[72].mxu0 %v14915_v46 }
 0x3da   : > { %22430 = vst [vmem:[#allocation258_spill] sm:$0xff] %v17968_v33  ;;  %v17971_v63 = vpop.permute.xlu1 %10608  ;;  %v13882_v17 = vpack.c.bf16 %v22432_v30, %v22431_v60  ;;  %8942 = vmatprep.mubr.f32.mxu0 %v22063_v1  ;;  %v13884_v13 = vpack.c.bf16 %v22437_v32, %v22436_v31  ;;  %v11021_v60 = vrot.slane %v22314_v5, 7  ;;  %v11091_v32 = vrot.slane %v22435_v2, 4 }
 0x3db   : > { %10482 = vrot.lane.b32.xlu0 %v10479_v61, %s22296_s29 }
 0x3dc   : > { %11034 = vrot.lane.b32.xlu1 %v22364_v62, %s22353_s28  ;;  %13883 = vmatpush1.bf16.msra.mxu0 %v13882_v17  ;;  %v22438_v62 = vand.u32 4294901760, %v17778_v3 }
 0x3dd   : > { %v17983_v27 = vpop.permute.xlu0 %10662  ;;  %13885 = vmatprep.subr.bf16.mxu0 %v13884_v13  ;;  %8946 = vmatmul.mubr.f32.gmra.mrb[74].mxu0 %v22051_v20 }
 0x3de   : > { %22433 = vst [vmem:[#allocation259_spill] sm:$0xff] %v17983_v27  ;;  %v17986_v41 = vpop.permute.xlu1 %10641  ;;  %v13886_v61 = vpack.c.bf16 %v22439_v38, %v22438_v62  ;;  %8949 = vmatprep.mubr.f32.mxu0 %v22063_v1  ;;  %v11178_v38 = vrot.slane %v22406_v57, 1  ;;  %v22681_v27 = vld [vmem:[#allocation79_spill] sm:$0xff] }
 0x3df   : > { %22434 = vst [vmem:[#allocation260_spill] sm:$0xff] %v17986_v41  ;;  %10883 = vrot.lane.b32.xlu0 %v10880_v6, %s22424_s3 }
 0x3e0   : > { %11050 = vrot.lane.b32.xlu1 %v11048_v14, %s22342_s27  ;;  %13887 = vmatpush1.bf16.msra.mxu0 %v13886_v61  ;;  %v11145_v14 = vrot.slane %v22435_v2, 7 }
 0x3e1   : > { %v18000_v46 = vpop.permute.xlu0 %10692  ;;  %13889 = vmatprep.subr.bf16.mxu0 %v17686_v10  ;;  %8953 = vmatmul.mubr.f32.gmra.mrb[60].mxu0 %v22052_v55  ;;  %v11109_v10 = vrot.slane %v22435_v2, 5 }
 0x3e2   : > { %22440 = vst [vmem:[#allocation102_spill] sm:$0xff] %v18000_v46  ;;  %v18004_v23 = vpop.permute.xlu1 %10645  ;;  %8958 = vmatprep.mubr.f32.mxu0 %v22063_v1  ;;  %v22665_v46 = vld [vmem:[#allocation121_spill] sm:$0xff] }
 0x3e3   : > { %22441 = vst [vmem:[#allocation261_spill] sm:$0xff] %v18004_v23  ;;  %11024 = vrot.lane.b32.xlu0 %v11021_v60, %s22442_s1 }
 0x3e4   : > { %11064 = vrot.lane.b32.xlu1 %v11062_v24, %s22356_s19  ;;  %v11127_v24 = vrot.slane %v22435_v2, 6 }
 0x3e5   : > { %v18011_v3 = vpop.permute.xlu0 %10696  ;;  %8962 = vmatmul.mubr.f32.gmra.mrb[62].mxu0 %v22053_v22 }
 0x3e6   : > { %22443 = vst [vmem:[#allocation262_spill] sm:$0xff] %v18011_v3  ;;  %v18015_v20 = vpop.permute.xlu1 %10675  ;;  %9056 = vmatprep.mubr.f32.mxu0 %v22063_v1 }
 0x3e7   : > { %22444 = vst [vmem:[#allocation263_spill] sm:$0xff] %v18015_v20  ;;  %11036 = vrot.lane.b32.xlu0 %v22347_v35, %s22353_s28  ;;  %v18024_v30 = vpop.f32.mrb[58].mxu1 }
 0x3e8   : > { %10901 = vrot.lane.b32.xlu1 %v10898_v54, %s22296_s29  ;;  %22446 = vst [vmem:[#allocation265_spill] sm:$0xff] %v18024_v30  ;;  %v18030_v6 = vpop.f32.mrb[59].mxu1 }
 0x3e9   : > { %v18021_v17 = vpop.permute.xlu0 %10643  ;;  %22448 = vst [vmem:[#allocation267_spill] sm:$0xff] %v18030_v6  ;;  %9058 = vmatmul.mubr.f32.vlgmr.msra.gmra.mrb[76].mxu0 %v14888_v28 }
 0x3ea   : > { %22445 = vst [vmem:[#allocation264_spill] sm:$0xff] %v18021_v17  ;;  %v18027_v55 = vpop.permute.xlu1 %10679  ;;  %9061 = vmatprep.mubr.f32.mxu0 %v22063_v1  ;;  %13891 = vmatpush1.bf16.msra.mxu0 %v17699_v44  ;;  %v11049_v44 = vrot.slane %v17351_v47, 1 }
 0x3eb   : > { %22447 = vst [vmem:[#allocation266_spill] sm:$0xff] %v18027_v55  ;;  %11112 = vrot.lane.b32.xlu0 %v11109_v10, %s22197_s5  ;;  %v18038_v31 = vpop.f32.mrb[60].mxu1  ;;  %13893 = vmatprep.subr.bf16.mxu0 %v17710_v48  ;;  %v11147_v55 = vrot.slane %v22461_v45, 7 }
 0x3ec   : > { %11078 = vrot.lane.b32.xlu1 %v11076_v42, %s22352_s23  ;;  %v18044_v13 = vpop.f32.mrb[61].mxu1 }
 0x3ed   : > { %v18035_v35 = vpop.permute.xlu0 %10677  ;;  %9063 = vmatmul.mubr.f32.gmra.mrb[78].mxu0 %v14917_v51 }
 0x3ee   : > { %22449 = vst [vmem:[#allocation268_spill] sm:$0xff] %v18035_v35  ;;  %v18041_v22 = vpop.permute.xlu1 %10709  ;;  %9066 = vmatprep.mubr.f32.mxu0 %v22063_v1  ;;  %13895 = vmatpush1.bf16.msra.mxu0 %v17717_v25 }
 0x3ef   : > { %22450 = vst [vmem:[#allocation269_spill] sm:$0xff] %v18041_v22  ;;  %11148 = vrot.lane.b32.xlu0 %v11145_v14, %s22337_s15  ;;  %v18054_v61 = vpop.f32.mrb[62].mxu1 }
 0x3f0   : > { %11094 = vrot.lane.b32.xlu1 %v11091_v32, %s22361_s17  ;;  %v18060_v54 = vpop.f32.mrb[63].mxu1  ;;  %v11063_v32 = vrot.slane %v17351_v47, 2 }
 0x3f1   : > { %v18051_v62 = vpop.permute.xlu0 %10711  ;;  %9068 = vmatmul.mubr.f32.gmra.mrb[60].mxu0 %v14919_v52 }
 0x3f2   : > { %22451 = vst [vmem:[#allocation270_spill] sm:$0xff] %v18051_v62  ;;  %v18057_v60 = vpop.permute.xlu1 %10713  ;;  %9073 = vmatprep.mubr.f32.mxu0 %v22063_v1  ;;  %v11092_v62 = vrot.slane %v17351_v47, 4 }
 0x3f3   : > { %22452 = vst [vmem:[#allocation271_spill] sm:$0xff] %v18057_v60  ;;  %11181 = vrot.lane.b32.xlu0 %v11178_v38, %s22246_s24  ;;  %v18069_v10 = vpop.f32.mrb[64].mxu1  ;;  %v11146_v60 = vrot.slane %v17351_v47, 7 }
 0x3f4   : > { %11130 = vrot.lane.b32.xlu1 %v11127_v24, %s22367_s4  ;;  %v18074_v14 = vpop.f32.mrb[65].mxu1  ;;  %v11110_v24 = vrot.slane %v17351_v47, 5 }
 0x3f5   : > { %v18066_v48 = vpop.permute.xlu0 %10725  ;;  %9075 = vmatmul.mubr.f32.gmra.mrb[62].mxu0 %v14948_v11 }
 0x3f6   : > { %22453 = vst [vmem:[#allocation272_spill] sm:$0xff] %v18066_v48  ;;  %v18072_v42 = vpop.permute.xlu1 %10727  ;;  %9153 = vmatprep.mubr.f32.mxu0 %v22063_v1 }
 0x3f7   : > { %22454 = vst [vmem:[#allocation273_spill] sm:$0xff] %v18072_v42  ;;  %11052 = vrot.lane.b32.xlu0 %v11049_v44, %s22342_s27 }
 0x3f8   : > { %11163 = vrot.lane.b32.xlu1 %v22406_v57, %s22230_s20  ;;  %v18089_v42 = vpop.f32.mrb[48].mxu0 }
 0x3f9   : > { %v18080_v25 = vpop.permute.xlu0 %10737  ;;  %v7817_v44 = vpop.f32.mrb[49].mxu0  ;;  %9155 = vmatmul.mubr.f32.vlgmr.msra.gmra.mrb[80].mxu0 %v14888_v28 }
 0x3fa   : > { %22455 = vst [vmem:[#allocation274_spill] sm:$0xff] %v18080_v25  ;;  %v18084_v38 = vpop.permute.xlu1 %10626  ;;  %v11077_v25 = vrot.slane %v17351_v47, 3  ;;  %9158 = vmatprep.mubr.f32.mxu0 %v22063_v1 }
 0x3fb   : > { %22456 = vst [vmem:[#allocation275_spill] sm:$0xff] %v18084_v38  ;;  %11066 = vrot.lane.b32.xlu0 %v11063_v32, %s22356_s19  ;;  %v22735_v38 = vld [vmem:[#allocation175_spill] sm:$0xff] }
 0x3fc   : > { %11114 = vrot.lane.b32.xlu1 %v11110_v24, %s22197_s5  ;;  %v18101_v32 = vpop.f32.mrb[50].mxu0 }
 0x3fd   : > { %v18092_v57 = vpop.permute.xlu0 %10335  ;;  %v18104_v24 = vpop.f32.mrb[51].mxu0  ;;  %9160 = vmatmul.mubr.f32.gmra.mrb[82].mxu0 %v14917_v51 }
 0x3fe   : > { %22457 = vst [vmem:[#allocation276_spill] sm:$0xff] %v18092_v57  ;;  %v18096_v48 = vpop.permute.xlu1 %10660  ;;  %v11093_v57 = vrot.slane %v22461_v45, 4  ;;  %9163 = vmatprep.mubr.f32.mxu0 %v22063_v1 }
 0x3ff   : > { %22458 = vst [vmem:[#allocation277_spill] sm:$0xff] %v18096_v48  ;;  %11080 = vrot.lane.b32.xlu0 %v11077_v25, %s22352_s23  ;;  %v22682_v48 = vld [vmem:[#allocation69_spill] sm:$0xff] }
 0x400   : > { %11150 = vrot.lane.b32.xlu1 %v11146_v60, %s22337_s15  ;;  %v18115_v25 = vpop.f32.mrb[52].mxu0 }
 0x401   : > { %v18106_v44 = vpop.permute.xlu0 %10368  ;;  %22462 = vst [vmem:[#allocation183_spill] sm:$0xff] %v18115_v25  ;;  %v18118_v60 = vpop.f32.mrb[53].mxu0  ;;  %9165 = vmatmul.mubr.f32.gmra.mrb[60].mxu0 %v14919_v52 }
 0x402   : > { %22459 = vst [vmem:[#allocation278_spill] sm:$0xff] %v18106_v44  ;;  %v18110_v28 = vpop.permute.xlu1 %10694  ;;  %22463 = vst [vmem:[#allocation280_spill] sm:$0xff] %v18118_v60  ;;  %v11128_v44 = vrot.slane %v17351_v47, 6  ;;  %9170 = vmatprep.mubr.f32.mxu0 %v22063_v1  ;;  %v22469_v1 = vld [vmem:[#allocation187_spill] sm:$0xff] }
 0x403   : > { %22460 = vst [vmem:[#allocation279_spill] sm:$0xff] %v18110_v28  ;;  %11096 = vrot.lane.b32.xlu0 %v11092_v62, %s22361_s17  ;;  %v11129_v28 = vrot.slane %v22461_v45, 6 }
 0x404   : > { %11098 = vrot.lane.b32.xlu1 %v11093_v57, %s22361_s17  ;;  %v18129_v62 = vpop.f32.mrb[54].mxu0 }
 0x405   : > { %v18120_v3 = vpop.permute.xlu0 %10372  ;;  %v18132_v57 = vpop.f32.mrb[55].mxu0  ;;  %9172 = vmatmul.mubr.f32.gmra.mrb[62].mxu0 %v14948_v11 }
 0x406   : > { %22464 = vst [vmem:[#allocation281_spill] sm:$0xff] %v18120_v3  ;;  %v18124_v51 = vpop.permute.xlu1 %10317  ;;  %22466 = vst [vmem:[#allocation283_spill] sm:$0xff] %v18132_v57  ;;  %v11111_v3 = vrot.slane %v22461_v45, 5  ;;  %v22472_v57 = vld [vmem:[#allocation186_spill] sm:$0xff] }
 0x407   : > { %22465 = vst [vmem:[#allocation282_spill] sm:$0xff] %v18124_v51  ;;  %11132 = vrot.lane.b32.xlu0 %v11128_v44, %s22367_s4  ;;  %v10766_v36 = vrot.slane %v22472_v57, 2 }
 0x408   : > { %11134 = vrot.lane.b32.xlu1 %v11129_v28, %s22367_s4 }
 0x409   : > { %v18134_v37 = vpop.permute.xlu0 %10402 }
 0x40a   : > { %22467 = vst [vmem:[#allocation284_spill] sm:$0xff] %v18134_v37  ;;  %v18138_v52 = vpop.permute.xlu1 %10739  ;;  %v10827_v37 = vrot.slane %v22472_v57, 6 }
 0x40b   : > { %22468 = vst [vmem:[#allocation285_spill] sm:$0xff] %v18138_v52  ;;  %11116 = vrot.lane.b32.xlu0 %v11111_v3, %s22197_s5  ;;  %v10780_v3 = vrot.slane %v22472_v57, 3 }
 0x40c   : > { %11167 = vrot.lane.b32.xlu1 %v22469_v1, %s22230_s20 }
 0x40d   : > { %v18143_v44 = vpop.permute.xlu0 %10406 }
 0x40e   : > { %22470 = vst [vmem:[#allocation187_spill] sm:$0xff] %v18143_v44  ;;  %v18146_v28 = vpop.permute.xlu1 %10351 }
 0x40f   : > { %22471 = vst [vmem:[#allocation286_spill] sm:$0xff] %v18146_v28  ;;  %11152 = vrot.lane.b32.xlu0 %v11147_v55, %s22337_s15  ;;  %v10794_v55 = vrot.slane %v22472_v57, 4 }
 0x410   : > { %10769 = vrot.lane.b32.xlu1 %v10766_v36, %s22247_s7 }
 0x411   : > { %v18151_v11 = vpop.permute.xlu0 %10436 }
 0x412   : > { %22473 = vst [vmem:[#allocation186_spill] sm:$0xff] %v18151_v11  ;;  %v18153_v52 = vpop.permute.xlu1 %10355  ;;  %v22478_v11 = vld [vmem:[#allocation212_spill] sm:$0xff] }
 0x413   : > { %22474 = vst [vmem:[#allocation287_spill] sm:$0xff] %v18153_v52  ;;  %11165 = vrot.lane.b32.xlu0 %v22472_v57, %s22230_s20  ;;  %v11199_v52 = vrot.slane %v22478_v11, 2 }
 0x414   : > { %10783 = vrot.lane.b32.xlu1 %v10780_v3, %s22380_s30  ;;  %v10809_v3 = vrot.slane %v22472_v57, 5 }
 0x415   : > { %v18159_v44 = vpop.permute.xlu0 %10440 }
 0x416   : > { %22475 = vst [vmem:[#allocation288_spill] sm:$0xff] %v18159_v44  ;;  %v18162_v28 = vpop.permute.xlu1 %10385 }
 0x417   : > { %22476 = vst [vmem:[#allocation289_spill] sm:$0xff] %v18162_v28  ;;  %10831 = vrot.lane.b32.xlu0 %v10827_v37, %s22257_s25  ;;  %v11233_v28 = vrot.slane %v22478_v11, 4  ;;  %v10845_v37 = vrot.slane %v22472_v57, 7 }
 0x418   : > { %10797 = vrot.lane.b32.xlu1 %v10794_v55, %s22254_s6 }
 0x419   : > { %v18167_v36 = vpop.permute.xlu0 %10353 }
 0x41a   : > { %22477 = vst [vmem:[#allocation290_spill] sm:$0xff] %v18167_v36  ;;  %v18170_v35 = vpop.permute.xlu1 %10389 }
 0x41b   : > { %22479 = vst [vmem:[#allocation212_spill] sm:$0xff] %v18170_v35  ;;  %11203 = vrot.lane.b32.xlu0 %v11199_v52, %s22247_s7  ;;  %v10810_v35 = vrot.slane %v22469_v1, 5  ;;  %v11179_v52 = vrot.slane %v22472_v57, 1  ;;  %v11180_v57 = vrot.slane %v22469_v1, 1 }
 0x41c   : > { %10813 = vrot.lane.b32.xlu1 %v10809_v3, %s22386_s0 }
 0x41d   : > { %v18175_v44 = vpop.permute.xlu0 %10387 }
 0x41e   : > { %22480 = vst [vmem:[#allocation291_spill] sm:$0xff] %v18175_v44  ;;  %v18178_v22 = vpop.permute.xlu1 %10419 }
 0x41f   : > { %22481 = vst [vmem:[#allocation292_spill] sm:$0xff] %v18178_v22  ;;  %11237 = vrot.lane.b32.xlu0 %v11233_v28, %s22254_s6  ;;  %v10846_v22 = vrot.slane %v22469_v1, 7  ;;  %v11216_v28 = vrot.slane %v22478_v11, 3 }
 0x420   : > { %10849 = vrot.lane.b32.xlu1 %v10845_v37, %s22242_s26 }
 0x421   : > { %v18183_v55 = vpop.permute.xlu0 %10421 }
 0x422   : > { %22482 = vst [vmem:[#allocation293_spill] sm:$0xff] %v18183_v55  ;;  %v18186_v36 = vpop.permute.xlu1 %10423 }
 0x423   : > { %22483 = vst [vmem:[#allocation294_spill] sm:$0xff] %v18186_v36  ;;  %10815 = vrot.lane.b32.xlu0 %v10810_v35, %s22386_s0  ;;  %v10828_v35 = vrot.slane %v22469_v1, 6  ;;  %v22491_v36 = vld [vmem:[#allocation213_spill] sm:$0xff] }
 0x424   : > { %11183 = vrot.lane.b32.xlu1 %v11179_v52, %s22246_s24 }
 0x425   : > { %v18191_v3 = vpop.permute.xlu0 %10751 }
 0x426   : > { %22484 = vst [vmem:[#allocation295_spill] sm:$0xff] %v18191_v3  ;;  %v18194_v44 = vpop.permute.xlu1 %10753 }
 0x427   : > { %22485 = vst [vmem:[#allocation296_spill] sm:$0xff] %v18194_v44  ;;  %10851 = vrot.lane.b32.xlu0 %v10846_v22, %s22242_s26  ;;  %v11215_v44 = vrot.slane %v22469_v1, 3  ;;  %v11198_v22 = vrot.slane %v22469_v1, 2 }
 0x428   : > { %11220 = vrot.lane.b32.xlu1 %v11216_v28, %s22380_s30 }
 0x429   : > { %v18199_v37 = vpop.permute.xlu0 %10767 }
 0x42a   : > { %22486 = vst [vmem:[#allocation297_spill] sm:$0xff] %v18199_v37  ;;  %v18202_v55 = vpop.permute.xlu1 %10370  ;;  %v11217_v37 = vrot.slane %v22491_v36, 3 }
 0x42b   : > { %22487 = vst [vmem:[#allocation298_spill] sm:$0xff] %v18202_v55  ;;  %11185 = vrot.lane.b32.xlu0 %v11180_v57, %s22246_s24  ;;  %v11200_v57 = vrot.slane %v22491_v36, 2 }
 0x42c   : > { %10833 = vrot.lane.b32.xlu1 %v10828_v35, %s22257_s25 }
 0x42d   : > { %v18207_v52 = vpop.permute.xlu0 %10781 }
 0x42e   : > { %22488 = vst [vmem:[#allocation299_spill] sm:$0xff] %v18207_v52  ;;  %v18210_v3 = vpop.permute.xlu1 %10404 }
 0x42f   : > { %22489 = vst [vmem:[#allocation300_spill] sm:$0xff] %v18210_v3  ;;  %11218 = vrot.lane.b32.xlu0 %v11215_v44, %s22380_s30  ;;  %v11232_v44 = vrot.slane %v22469_v1, 4 }
 0x430   : > { %11201 = vrot.lane.b32.xlu1 %v11198_v22, %s22247_s7  ;;  %v22495_v22 = vld [vmem:[#allocation95_spill] sm:$0xff] }
 0x431   : > { %v18215_v28 = vpop.permute.xlu0 %10795 }
 0x432   : > { %22490 = vst [vmem:[#allocation301_spill] sm:$0xff] %v18215_v28  ;;  %v18218_v55 = vpop.permute.xlu1 %10438  ;;  %v10899_v28 = vrot.slane %v22495_v22, 2 }
 0x433   : > { %22492 = vst [vmem:[#allocation213_spill] sm:$0xff] %v18218_v55  ;;  %11222 = vrot.lane.b32.xlu0 %v11217_v37, %s22380_s30  ;;  %v11234_v37 = vrot.slane %v22491_v36, 4 }
 0x434   : > { %11205 = vrot.lane.b32.xlu1 %v11200_v57, %s22247_s7  ;;  %v22498_v57 = vld [vmem:[#allocation190_spill] sm:$0xff] }
 0x435   : > { %v18223_v35 = vpop.permute.xlu0 %10811 }
 0x436   : > { %22493 = vst [vmem:[#allocation302_spill] sm:$0xff] %v18223_v35  ;;  %v18225_v3 = vpop.permute.xlu1 %10829 }
 0x437   : > { %22494 = vst [vmem:[#allocation303_spill] sm:$0xff] %v18225_v3  ;;  %10867 = vrot.lane.b32.xlu0 %v22495_v22, %s22288_s18  ;;  %v10882_v3 = vrot.slane %v22498_v57, 1 }
 0x438   : > { %11235 = vrot.lane.b32.xlu1 %v11232_v44, %s22254_s6 }
 0x439   : > { %v18232_v55 = vpop.permute.xlu0 %10847 }
 0x43a   : > { %22496 = vst [vmem:[#allocation95_spill] sm:$0xff] %v18232_v55  ;;  %v18234_v52 = vpop.permute.xlu1 %10452  ;;  %v10881_v55 = vrot.slane %v22495_v22, 1  ;;  %v11277_v22 = vrot.slane %v22478_v11, 7 }
 0x43b   : > { %22497 = vst [vmem:[#allocation304_spill] sm:$0xff] %v18234_v52  ;;  %10903 = vrot.lane.b32.xlu0 %v10899_v28, %s22296_s29  ;;  %v11249_v52 = vrot.slane %v22478_v11, 5 }
 0x43c   : > { %11239 = vrot.lane.b32.xlu1 %v11234_v37, %s22254_s6 }
 0x43d   : > { %v18240_v1 = vpop.permute.xlu0 %10030 }
 0x43e   : > { %22499 = vst [vmem:[#allocation190_spill] sm:$0xff] %v18240_v1  ;;  %v18242_v35 = vpop.permute.xlu1 %10865 }
 0x43f   : > { %22500 = vst [vmem:[#allocation305_spill] sm:$0xff] %v18242_v35  ;;  %10887 = vrot.lane.b32.xlu0 %v10882_v3, %s22424_s3  ;;  %v11263_v35 = vrot.slane %v22478_v11, 6  ;;  %v10900_v3 = vrot.slane %v22498_v57, 2 }
 0x440   : > { %10869 = vrot.lane.b32.xlu1 %v22498_v57, %s22288_s18 }
 0x441   : > { %v18247_v44 = vpop.permute.xlu0 %10454 }
 0x442   : > { %22501 = vst [vmem:[#allocation306_spill] sm:$0xff] %v18247_v44  ;;  %v18251_v28 = vpop.permute.xlu1 %10048 }
 0x443   : > { %22502 = vst [vmem:[#allocation307_spill] sm:$0xff] %v18251_v28  ;;  %11251 = vrot.lane.b32.xlu0 %v11249_v52, %s22386_s0 }
 0x444   : > { %10885 = vrot.lane.b32.xlu1 %v10881_v55, %s22424_s3  ;;  %v11250_v55 = vrot.slane %v22491_v36, 5 }
 0x445   : > { %v18255_v37 = vpop.permute.xlu0 %10066 }
 0x446   : > { %22503 = vst [vmem:[#allocation308_spill] sm:$0xff] %v18255_v37  ;;  %v18259_v1 = vpop.permute.xlu1 %10466 }
 0x447   : > { %22504 = vst [vmem:[#allocation309_spill] sm:$0xff] %v18259_v1  ;;  %11265 = vrot.lane.b32.xlu0 %v11263_v35, %s22257_s25  ;;  %v11264_v35 = vrot.slane %v22491_v36, 6 }
 0x448   : > { %10905 = vrot.lane.b32.xlu1 %v10900_v3, %s22296_s29  ;;  %v22509_v3 = vld [vmem:[#allocation101_spill] sm:$0xff] }
 0x449   : > { %v18263_v44 = vpop.permute.xlu0 %10468 }
 0x44a   : > { %22505 = vst [vmem:[#allocation310_spill] sm:$0xff] %v18263_v44  ;;  %v18266_v28 = vpop.permute.xlu1 %10480  ;;  %v7919_v52 = vpop.f32.mrb[66].mxu1  ;;  %v11305_v44 = vrot.slane %v22509_v3, 1 }
 0x44b   : > { %22506 = vst [vmem:[#allocation311_spill] sm:$0xff] %v18266_v28  ;;  %11279 = vrot.lane.b32.xlu0 %v11277_v22, %s22242_s26  ;;  %v7920_v1 = vpop.f32.mrb[67].mxu1 }
 0x44c   : > { %11253 = vrot.lane.b32.xlu1 %v11250_v55, %s22386_s0  ;;  %v11278_v55 = vrot.slane %v22491_v36, 7  ;;  %v11319_v1 = vrot.slane %v22509_v3, 2 }
 0x44d   : > { %v18271_v57 = vpop.permute.xlu0 %10482 }
 0x44e   : > { %22507 = vst [vmem:[#allocation312_spill] sm:$0xff] %v18271_v57  ;;  %v18273_v37 = vpop.permute.xlu1 %11034 }
 0x44f   : > { %22508 = vst [vmem:[#allocation313_spill] sm:$0xff] %v18273_v37  ;;  %11293 = vrot.lane.b32.xlu0 %v22509_v3, %s22288_s18 }
 0x450   : > { %11267 = vrot.lane.b32.xlu1 %v11264_v35, %s22257_s25  ;;  %v22514_v35 = vld [vmem:[#allocation216_spill] sm:$0xff] }
 0x451   : > { %v18280_v28 = vpop.permute.xlu0 %10883  ;;  %v11306_v51 = vrot.slane %v22514_v35, 1 }
 0x452   : > { %22510 = vst [vmem:[#allocation101_spill] sm:$0xff] %v18280_v28  ;;  %v18282_v22 = vpop.permute.xlu1 %11050 }
 0x453   : > { %22511 = vst [vmem:[#allocation314_spill] sm:$0xff] %v18282_v22  ;;  %11307 = vrot.lane.b32.xlu0 %v11305_v44, %s22424_s3  ;;  %v22516_v22 = vld [vmem:[#allocation96_spill] sm:$0xff] }
 0x454   : > { %11281 = vrot.lane.b32.xlu1 %v11278_v55, %s22242_s26  ;;  %v11338_v37 = vrot.slane %v22516_v22, 1  ;;  %v11352_v55 = vrot.slane %v22516_v22, 2 }
 0x455   : > { %v18288_v52 = vpop.permute.xlu0 %11024 }
 0x456   : > { %22512 = vst [vmem:[#allocation315_spill] sm:$0xff] %v18288_v52  ;;  %v18290_v57 = vpop.permute.xlu1 %11064 }
 0x457   : > { %22513 = vst [vmem:[#allocation316_spill] sm:$0xff] %v18290_v57  ;;  %11321 = vrot.lane.b32.xlu0 %v11319_v1, %s22296_s29  ;;  %v11320_v1 = vrot.slane %v22514_v35, 2 }
 0x458   : > { %11295 = vrot.lane.b32.xlu1 %v22514_v35, %s22288_s18 }
 0x459   : > { %v18295_v28 = vpop.permute.xlu0 %11036 }
 0x45a   : > { %22515 = vst [vmem:[#allocation216_spill] sm:$0xff] %v18295_v28  ;;  %v18299_v44 = vpop.permute.xlu1 %10901 }
 0x45b   : > { %22517 = vst [vmem:[#allocation317_spill] sm:$0xff] %v18299_v44  ;;  %11340 = vrot.lane.b32.xlu0 %v11338_v37, %s22518_s8  ;;  %v11367_v44 = vrot.slane %v22516_v22, 3  ;;  %v22524_v37 = vld [vmem:[#allocation179_spill] sm:$0xff] }
 0x45c   : > { %11309 = vrot.lane.b32.xlu1 %v11306_v51, %s22424_s3  ;;  %v11339_v51 = vrot.slane %v22524_v37, 1 }
 0x45d   : > { %v18303_v3 = vpop.permute.xlu0 %11112 }
 0x45e   : > { %22519 = vst [vmem:[#allocation318_spill] sm:$0xff] %v18303_v3  ;;  %v18307_v52 = vpop.permute.xlu1 %11078 }
 0x45f   : > { %22520 = vst [vmem:[#allocation319_spill] sm:$0xff] %v18307_v52  ;;  %11354 = vrot.lane.b32.xlu0 %v11352_v55, %s22521_s11  ;;  %v8061_v40 = vpop.f32.mrb[74].mxu1  ;;  %v22527_v52 = vld [vmem:[#allocation180_spill] sm:$0xff] }
 0x460   : > { %11323 = vrot.lane.b32.xlu1 %v11320_v1, %s22296_s29  ;;  %v8062_v3 = vpop.f32.mrb[75].mxu1  ;;  %v11369_v55 = vrot.slane %v22527_v52, 3  ;;  %v11353_v1 = vrot.slane %v22524_v37, 2  ;;  %v11386_v40 = vrot.slane %v22524_v37, 4 }
 0x461   : > { %v18311_v28 = vpop.permute.xlu0 %11148  ;;  %v11368_v3 = vrot.slane %v22524_v37, 3 }
 0x462   : > { %22522 = vst [vmem:[#allocation320_spill] sm:$0xff] %v18311_v28  ;;  %v18314_v57 = vpop.permute.xlu1 %11094 }
 0x463   : > { %22523 = vst [vmem:[#allocation321_spill] sm:$0xff] %v18314_v57  ;;  %11370 = vrot.lane.b32.xlu0 %v11367_v44, %s22525_s10 }
 0x464   : > { %11342 = vrot.lane.b32.xlu1 %v11339_v51, %s22518_s8 }
 0x465   : > { %v18319_v35 = vpop.permute.xlu0 %11181 }
 0x466   : > { %22526 = vst [vmem:[#allocation322_spill] sm:$0xff] %v18319_v35  ;;  %v18322_v8 = vpop.permute.xlu1 %11130  ;;  %v11403_v35 = vrot.slane %v22516_v22, 5 }
 0x467   : > { %22528 = vst [vmem:[#allocation323_spill] sm:$0xff] %v18322_v8  ;;  %11374 = vrot.lane.b32.xlu0 %v11369_v55, %s22525_s10  ;;  %v11385_v55 = vrot.slane %v22516_v22, 4 }
 0x468   : > { %11356 = vrot.lane.b32.xlu1 %v11353_v1, %s22521_s11 }
 0x469   : > { %v18327_v28 = vpop.permute.xlu0 %11052 }
 0x46a   : > { %22529 = vst [vmem:[#allocation324_spill] sm:$0xff] %v18327_v28  ;;  %v18330_v44 = vpop.permute.xlu1 %11163 }
 0x46b   : > { %22530 = vst [vmem:[#allocation325_spill] sm:$0xff] %v18330_v44  ;;  %11390 = vrot.lane.b32.xlu0 %v11386_v40, %s22531_s21  ;;  %v11405_v44 = vrot.slane %v22527_v52, 5  ;;  %v11387_v40 = vrot.slane %v22527_v52, 4 }
 0x46c   : > { %11372 = vrot.lane.b32.xlu1 %v11368_v3, %s22525_s10 }
 0x46d   : > { %v18335_v51 = vpop.permute.xlu0 %11066 }
 0x46e   : > { %22532 = vst [vmem:[#allocation326_spill] sm:$0xff] %v18335_v51  ;;  %v18338_v8 = vpop.permute.xlu1 %11114 }
 0x46f   : > { %22533 = vst [vmem:[#allocation327_spill] sm:$0xff] %v18338_v8  ;;  %11406 = vrot.lane.b32.xlu0 %v11403_v35, %s22534_s12  ;;  %v8168_v3 = vpop.f32.mrb[76].mxu1  ;;  %v11422_v35 = vrot.slane %v22524_v37, 6 }
 0x470   : > { %11388 = vrot.lane.b32.xlu1 %v11385_v55, %s22531_s21  ;;  %v8169_v51 = vpop.f32.mrb[77].mxu1  ;;  %v11404_v55 = vrot.slane %v22524_v37, 5  ;;  %v11439_v3 = vrot.slane %v22516_v22, 7 }
 0x471   : > { %v18343_v1 = vpop.permute.xlu0 %11080  ;;  %v11421_v51 = vrot.slane %v22516_v22, 6 }
 0x472   : > { %22535 = vst [vmem:[#allocation328_spill] sm:$0xff] %v18343_v1  ;;  %v18346_v28 = vpop.permute.xlu1 %11150 }
 0x473   : > { %22536 = vst [vmem:[#allocation329_spill] sm:$0xff] %v18346_v28  ;;  %11410 = vrot.lane.b32.xlu0 %v11405_v44, %s22534_s12 }
 0x474   : > { %11392 = vrot.lane.b32.xlu1 %v11387_v40, %s22531_s21 }
 0x475   : > { %v18351_v8 = vpop.permute.xlu0 %11096 }
 0x476   : > { %22537 = vst [vmem:[#allocation330_spill] sm:$0xff] %v18351_v8  ;;  %v18354_v57 = vpop.permute.xlu1 %11098  ;;  %v11441_v8 = vrot.slane %v22527_v52, 7 }
 0x477   : > { %22538 = vst [vmem:[#allocation331_spill] sm:$0xff] %v18354_v57  ;;  %11426 = vrot.lane.b32.xlu0 %v11422_v35, %s22539_s16 }
 0x478   : > { %11408 = vrot.lane.b32.xlu1 %v11404_v55, %s22534_s12  ;;  %v8591_v40 = vpop.f32.mrb[56].mxu0  ;;  %v11423_v55 = vrot.slane %v22527_v52, 6 }
 0x479   : > { %v18359_v28 = vpop.permute.xlu0 %11132  ;;  %v8592_v35 = vpop.f32.mrb[57].mxu0 }
 0x47a   : > { %22540 = vst [vmem:[#allocation332_spill] sm:$0xff] %v18359_v28  ;;  %v18362_v44 = vpop.permute.xlu1 %11134 }
 0x47b   : > { %22541 = vst [vmem:[#allocation333_spill] sm:$0xff] %v18362_v44  ;;  %11442 = vrot.lane.b32.xlu0 %v11439_v3, %s22442_s1 }
 0x47c   : > { %11424 = vrot.lane.b32.xlu1 %v11421_v51, %s22539_s16  ;;  %v8600_v44 = vpop.f32.mrb[58].mxu0  ;;  %v11440_v51 = vrot.slane %v22524_v37, 7 }
 0x47d   : > { %v18367_v57 = vpop.permute.xlu0 %11116  ;;  %v8601_v3 = vpop.f32.mrb[59].mxu0 }
 0x47e   : > { %22542 = vst [vmem:[#allocation334_spill] sm:$0xff] %v18367_v57  ;;  %v18370_v1 = vpop.permute.xlu1 %11167  ;;  %v22549_v3 = vld [vmem:[#allocation209_spill] sm:$0xff] }
 0x47f   : > { %22543 = vst [vmem:[#allocation335_spill] sm:$0xff] %v18370_v1  ;;  %11446 = vrot.lane.b32.xlu0 %v11441_v8, %s22442_s1  ;;  %v11474_v8 = vrot.slane %v22461_v45, 1 }
 0x480   : > { %11428 = vrot.lane.b32.xlu1 %v11423_v55, %s22539_s16  ;;  %v8271_v40 = vpop.f32.mrb[78].mxu1 }
 0x481   : > { %v18375_v22 = vpop.permute.xlu0 %11152  ;;  %v8272_v35 = vpop.f32.mrb[79].mxu1  ;;  %v11476_v40 = vrot.slane %v22549_v3, 1 }
 0x482   : > { %22544 = vst [vmem:[#allocation336_spill] sm:$0xff] %v18375_v22  ;;  %v18377_v28 = vpop.permute.xlu1 %10769 }
 0x483   : > { %22545 = vst [vmem:[#allocation337_spill] sm:$0xff] %v18377_v28  ;;  %11459 = vrot.lane.b32.xlu0 %v17351_v47, %s22353_s28 }
 0x484   : > { %11444 = vrot.lane.b32.xlu1 %v11440_v51, %s22442_s1  ;;  %v22552_v51 = vld [vmem:[#allocation105_spill] sm:$0xff] }
 0x485   : > { %v18383_v1 = vpop.permute.xlu0 %11165  ;;  %v11492_v35 = vrot.slane %v22552_v51, 2 }
 0x486   : > { %22546 = vst [vmem:[#allocation338_spill] sm:$0xff] %v18383_v1  ;;  %v18386_v55 = vpop.permute.xlu1 %10783 }
 0x487   : > { %22547 = vst [vmem:[#allocation339_spill] sm:$0xff] %v18386_v55  ;;  %11477 = vrot.lane.b32.xlu0 %v11474_v8, %s22342_s27  ;;  %v11475_v8 = vrot.slane %v22552_v51, 1 }
 0x488   : > { %11457 = vrot.lane.b32.xlu1 %v22435_v2, %s22353_s28 }
 0x489   : > { %v18391_v44 = vpop.permute.xlu0 %10831 }
 0x48a   : > { %22548 = vst [vmem:[#allocation340_spill] sm:$0xff] %v18391_v44  ;;  %v18394_v22 = vpop.permute.xlu1 %10797 }
 0x48b   : > { %22550 = vst [vmem:[#allocation209_spill] sm:$0xff] %v18394_v22  ;;  %11481 = vrot.lane.b32.xlu0 %v11476_v40, %s22342_s27  ;;  %v11508_v40 = vrot.slane %v22461_v45, 3 }
 0x48c   : > { %11461 = vrot.lane.b32.xlu1 %v22461_v45, %s22353_s28  ;;  %v8732_v2 = vpop.f32.mrb[64].mxu0 }
 0x48d   : > { %v18399_v47 = vpop.permute.xlu0 %11203  ;;  %v8733_v37 = vpop.f32.mrb[65].mxu0 }
 0x48e   : > { %22551 = vst [vmem:[#allocation341_spill] sm:$0xff] %v18399_v47  ;;  %v18402_v1 = vpop.permute.xlu1 %10813  ;;  %v11491_v47 = vrot.slane %v22461_v45, 2  ;;  %v11493_v37 = vrot.slane %v22549_v3, 2 }
 0x48f   : > { %22553 = vst [vmem:[#allocation105_spill] sm:$0xff] %v18402_v1  ;;  %11496 = vrot.lane.b32.xlu0 %v11492_v35, %s22356_s19 }
 0x490   : > { %11479 = vrot.lane.b32.xlu1 %v11475_v8, %s22342_s27  ;;  %v8391_v55 = vpop.f32.mrb[80].mxu1  ;;  %v8737_v28 = vpop.f32.mrb[66].mxu0  ;;  %v11510_v8 = vrot.slane %v22549_v3, 3 }
 0x491   : > { %v18407_v44 = vpop.permute.xlu0 %11237  ;;  %v8392_v1 = vpop.f32.mrb[81].mxu1  ;;  %v11509_v28 = vrot.slane %v22552_v51, 3 }
 0x492   : > { %22554 = vst [vmem:[#allocation342_spill] sm:$0xff] %v18407_v44  ;;  %v18410_v22 = vpop.permute.xlu1 %10849  ;;  %v8738_v2 = vpop.f32.mrb[67].mxu0  ;;  %v11526_v1 = vrot.slane %v22549_v3, 4 }
 0x493   : > { %22555 = vst [vmem:[#allocation343_spill] sm:$0xff] %v18410_v22  ;;  %11511 = vrot.lane.b32.xlu0 %v11508_v40, %s22352_s23  ;;  %v11540_v40 = vrot.slane %v22549_v3, 5 }
 0x494   : > { %11494 = vrot.lane.b32.xlu1 %v11491_v47, %s22356_s19 }
 0x495   : > { %v18415_v35 = vpop.permute.xlu0 %10815 }
 0x496   : > { %22556 = vst [vmem:[#allocation344_spill] sm:$0xff] %v18415_v35  ;;  %v18418_v44 = vpop.permute.xlu1 %11183 }
 0x497   : > { %22557 = vst [vmem:[#allocation345_spill] sm:$0xff] %v18418_v44  ;;  %11515 = vrot.lane.b32.xlu0 %v11510_v8, %s22352_s23  ;;  %v11525_v8 = vrot.slane %v22552_v51, 4 }
 0x498   : > { %11498 = vrot.lane.b32.xlu1 %v11493_v37, %s22356_s19 }
 0x499   : > { %v18423_v45 = vpop.permute.xlu0 %10851 }
 0x49a   : > { %22558 = vst [vmem:[#allocation346_spill] sm:$0xff] %v18423_v45  ;;  %v18426_v55 = vpop.permute.xlu1 %11220  ;;  %v11554_v45 = vrot.slane %v22549_v3, 6 }
 0x49b   : > { %22559 = vst [vmem:[#allocation347_spill] sm:$0xff] %v18426_v55  ;;  %11529 = vrot.lane.b32.xlu0 %v11526_v1, %s22361_s17 }
 0x49c   : > { %11513 = vrot.lane.b32.xlu1 %v11509_v28, %s22352_s23  ;;  %v8838_v37 = vpop.f32.mrb[68].mxu0  ;;  %v11539_v28 = vrot.slane %v22552_v51, 5 }
 0x49d   : > { %v18431_v47 = vpop.permute.xlu0 %11185  ;;  %v8839_v1 = vpop.f32.mrb[69].mxu0 }
 0x49e   : > { %22560 = vst [vmem:[#allocation348_spill] sm:$0xff] %v18431_v47  ;;  %v18434_v2 = vpop.permute.xlu1 %10833  ;;  %v11553_v1 = vrot.slane %v22552_v51, 6 }
 0x49f   : > { %22561 = vst [vmem:[#allocation349_spill] sm:$0xff] %v18434_v2  ;;  %11543 = vrot.lane.b32.xlu0 %v11540_v40, %s22197_s5 }
 0x4a0   : > { %11527 = vrot.lane.b32.xlu1 %v11525_v8, %s22361_s17  ;;  %v8489_v47 = vpop.f32.mrb[82].mxu1  ;;  %v8844_v35 = vpop.f32.mrb[70].mxu0  ;;  %v11568_v8 = vrot.slane %v22549_v3, 7 }
 0x4a1   : > { %v18439_v55 = vpop.permute.xlu0 %11218  ;;  %v8490_v2 = vpop.f32.mrb[83].mxu1  ;;  %v11567_v35 = vrot.slane %v22552_v51, 7 }
 0x4a2   : > { %22562 = vst [vmem:[#allocation350_spill] sm:$0xff] %v18439_v55  ;;  %v18442_v44 = vpop.permute.xlu1 %11201  ;;  %v8845_v37 = vpop.f32.mrb[71].mxu0 }
 0x4a3   : > { %22563 = vst [vmem:[#allocation351_spill] sm:$0xff] %v18442_v44  ;;  %11557 = vrot.lane.b32.xlu0 %v11554_v45, %s22367_s4 }
 0x4a4   : > { %11541 = vrot.lane.b32.xlu1 %v11539_v28, %s22197_s5  ;;  %v18453_v22 = vpop.f32.mrb[68].mxu1 }
 0x4a5   : > { %v18447_v40 = vpop.permute.xlu0 %11222  ;;  %v8496_v47 = vpop.f32.mrb[69].mxu1 }
 0x4a6   : > { %22564 = vst [vmem:[#allocation352_spill] sm:$0xff] %v18447_v40  ;;  %v18450_v55 = vpop.permute.xlu1 %11205 }
 0x4a7   : > { %22565 = vst [vmem:[#allocation353_spill] sm:$0xff] %v18450_v55  ;;  %11571 = vrot.lane.b32.xlu0 %v11568_v8, %s22337_s15  ;;  %v11594_v8 = vrot.slane %v22491_v36, 1 }
 0x4a8   : > { %11555 = vrot.lane.b32.xlu1 %v11553_v1, %s22367_s4  ;;  %v18462_v28 = vpop.f32.mrb[70].mxu1 }
 0x4a9   : > { %v18457_v45 = vpop.permute.xlu0 %10867  ;;  %v18466_v37 = vpop.f32.mrb[71].mxu1 }
 0x4aa   : > { %22566 = vst [vmem:[#allocation354_spill] sm:$0xff] %v18457_v45  ;;  %v18459_v2 = vpop.permute.xlu1 %11235  ;;  %22568 = vst [vmem:[#allocation356_spill] sm:$0xff] %v18466_v37 }
 0x4ab   : > { %22567 = vst [vmem:[#allocation355_spill] sm:$0xff] %v18459_v2  ;;  %11583 = vrot.lane.b32.xlu0 %v22491_v36, %s22230_s20  ;;  %v11593_v36 = vrot.slane %v22478_v11, 1 }
 0x4ac   : > { %11569 = vrot.lane.b32.xlu1 %v11567_v35, %s22337_s15  ;;  %v18474_v47 = vpop.f32.mrb[72].mxu1  ;;  %v8940_v45 = vpop.f32.mrb[72].mxu0  ;;  %v11610_v35 = vrot.slane %v18060_v54, 2 }
 0x4ad   : > { %v18469_v40 = vpop.permute.xlu0 %10903  ;;  %22571 = vst [vmem:[#allocation359_spill] sm:$0xff] %v18474_v47  ;;  %v18477_v2 = vpop.f32.mrb[73].mxu1 }
 0x4ae   : > { %22569 = vst [vmem:[#allocation357_spill] sm:$0xff] %v18469_v40  ;;  %v18472_v1 = vpop.permute.xlu1 %11239  ;;  %22572 = vst [vmem:[#allocation360_spill] sm:$0xff] %v18477_v2  ;;  %v8941_v44 = vpop.f32.mrb[73].mxu0  ;;  %v11624_v2 = vrot.slane %v18060_v54, 3 }
 0x4af   : > { %22570 = vst [vmem:[#allocation358_spill] sm:$0xff] %v18472_v1  ;;  %11597 = vrot.lane.b32.xlu0 %v11594_v8, %s22246_s24 }
 0x4b0   : > { %11581 = vrot.lane.b32.xlu1 %v22478_v11, %s22230_s20  ;;  %v8947_v8 = vpop.f32.mrb[74].mxu0  ;;  %v11638_v11 = vrot.slane %v18060_v54, 4 }
 0x4b1   : > { %v18481_v55 = vpop.permute.xlu0 %10887  ;;  %v8948_v47 = vpop.f32.mrb[75].mxu0  ;;  %v11653_v8 = vrot.slane %v18060_v54, 5 }
 0x4b2   : > { %22573 = vst [vmem:[#allocation361_spill] sm:$0xff] %v18481_v55  ;;  %v18484_v40 = vpop.permute.xlu1 %10869  ;;  %v11609_v55 = vrot.slane %v18054_v61, 2 }
 0x4b3   : > { %22574 = vst [vmem:[#allocation362_spill] sm:$0xff] %v18484_v40  ;;  %11613 = vrot.lane.b32.xlu0 %v11610_v35, %s22247_s7 }
 0x4b4   : > { %11595 = vrot.lane.b32.xlu1 %v11593_v36, %s22246_s24  ;;  %v11623_v36 = vrot.slane %v18054_v61, 3 }
 0x4b5   : > { %v18489_v1 = vpop.permute.xlu0 %11251 }
 0x4b6   : > { %22575 = vst [vmem:[#allocation363_spill] sm:$0xff] %v18489_v1  ;;  %v18492_v45 = vpop.permute.xlu1 %10885 }
 0x4b7   : > { %22576 = vst [vmem:[#allocation364_spill] sm:$0xff] %v18492_v45  ;;  %11627 = vrot.lane.b32.xlu0 %v11624_v2, %s22380_s30 }
 0x4b8   : > { %11611 = vrot.lane.b32.xlu1 %v11609_v55, %s22247_s7  ;;  %v11637_v55 = vrot.slane %v18054_v61, 4 }
 0x4b9   : > { %v18497_v44 = vpop.permute.xlu0 %11265 }
 0x4ba   : > { %22577 = vst [vmem:[#allocation365_spill] sm:$0xff] %v18497_v44  ;;  %v18500_v35 = vpop.permute.xlu1 %10905 }
 0x4bb   : > { %22578 = vst [vmem:[#allocation366_spill] sm:$0xff] %v18500_v35  ;;  %11641 = vrot.lane.b32.xlu0 %v11638_v11, %s22254_s6  ;;  %v11670_v35 = vrot.slane %v18054_v61, 6 }
 0x4bc   : > { %11625 = vrot.lane.b32.xlu1 %v11623_v36, %s22380_s30  ;;  %v9059_v2 = vpop.f32.mrb[76].mxu0  ;;  %v11652_v36 = vrot.slane %v18054_v61, 5 }
 0x4bd   : > { %v18505_v47 = vpop.permute.xlu0 %11279  ;;  %v9060_v11 = vpop.f32.mrb[77].mxu0 }
 0x4be   : > { %22579 = vst [vmem:[#allocation367_spill] sm:$0xff] %v18505_v47  ;;  %v18508_v45 = vpop.permute.xlu1 %11253 }
 0x4bf   : > { %22580 = vst [vmem:[#allocation368_spill] sm:$0xff] %v18508_v45  ;;  %11657 = vrot.lane.b32.xlu0 %v11653_v8, %s22386_s0  ;;  %v11672_v8 = vrot.slane %v18115_v25, 6 }
 0x4c0   : > { %11639 = vrot.lane.b32.xlu1 %v11637_v55, %s22254_s6  ;;  %v9064_v47 = vpop.f32.mrb[78].mxu0 }
 0x4c1   : > { %v18513_v44 = vpop.permute.xlu0 %11293  ;;  %v9065_v55 = vpop.f32.mrb[79].mxu0  ;;  %v11671_v47 = vrot.slane %v18060_v54, 6 }
 0x4c2   : > { %22581 = vst [vmem:[#allocation369_spill] sm:$0xff] %v18513_v44  ;;  %v18516_v1 = vpop.permute.xlu1 %11267  ;;  %v11654_v44 = vrot.slane %v18115_v25, 5 }
 0x4c3   : > { %22582 = vst [vmem:[#allocation370_spill] sm:$0xff] %v18516_v1  ;;  %11673 = vrot.lane.b32.xlu0 %v11670_v35, %s22257_s25  ;;  %v11689_v35 = vrot.slane %v18060_v54, 7 }
 0x4c4   : > { %11655 = vrot.lane.b32.xlu1 %v11652_v36, %s22386_s0 }
 0x4c5   : > { %v18521_v45 = vpop.permute.xlu0 %11307 }
 0x4c6   : > { %22583 = vst [vmem:[#allocation371_spill] sm:$0xff] %v18521_v45  ;;  %v18524_v2 = vpop.permute.xlu1 %11281 }
 0x4c7   : > { %22584 = vst [vmem:[#allocation372_spill] sm:$0xff] %v18524_v2  ;;  %11677 = vrot.lane.b32.xlu0 %v11672_v8, %s22257_s25  ;;  %v11688_v8 = vrot.slane %v18054_v61, 7 }
 0x4c8   : > { %11659 = vrot.lane.b32.xlu1 %v11654_v44, %s22386_s0 }
 0x4c9   : > { %v18529_v11 = vpop.permute.xlu0 %11321 }
 0x4ca   : > { %22585 = vst [vmem:[#allocation373_spill] sm:$0xff] %v18529_v11  ;;  %v18532_v1 = vpop.permute.xlu1 %11295 }
 0x4cb   : > { %22586 = vst [vmem:[#allocation374_spill] sm:$0xff] %v18532_v1  ;;  %11693 = vrot.lane.b32.xlu0 %v11689_v35, %s22242_s26  ;;  %v11690_v35 = vrot.slane %v18115_v25, 7 }
 0x4cc   : > { %11675 = vrot.lane.b32.xlu1 %v11671_v47, %s22257_s25  ;;  %v9156_v44 = vpop.f32.mrb[80].mxu0 }
 0x4cd   : > { %v18537_v36 = vpop.permute.xlu0 %11340  ;;  %v9157_v45 = vpop.f32.mrb[81].mxu0  ;;  %v11740_v44 = vrot.slane %v18069_v10, 2 }
 0x4ce   : > { %22587 = vst [vmem:[#allocation375_spill] sm:$0xff] %v18537_v36  ;;  %v18539_v55 = vpop.permute.xlu1 %11309  ;;  %v11978_v36 = vrot.slane %v18044_v13, 7 }
 0x4cf   : > { %22588 = vst [vmem:[#allocation376_spill] sm:$0xff] %v18539_v55  ;;  %11709 = vrot.lane.b32.xlu0 %v18069_v10, %s22288_s18  ;;  %v11724_v55 = vrot.slane %v18074_v14, 1 }
 0x4d0   : > { %11691 = vrot.lane.b32.xlu1 %v11688_v8, %s22242_s26  ;;  %v9161_v47 = vpop.f32.mrb[82].mxu0 }
 0x4d1   : > { %v18545_v11 = vpop.permute.xlu0 %11354  ;;  %v9162_v40 = vpop.f32.mrb[83].mxu0  ;;  %v11723_v47 = vrot.slane %v18069_v10, 1 }
 0x4d2   : > { %22589 = vst [vmem:[#allocation377_spill] sm:$0xff] %v18545_v11  ;;  %v18547_v1 = vpop.permute.xlu1 %11323 }
 0x4d3   : > { %22590 = vst [vmem:[#allocation378_spill] sm:$0xff] %v18547_v1  ;;  %11713 = vrot.lane.b32.xlu0 %v18129_v62, %s22288_s18 }
 0x4d4   : > { %11695 = vrot.lane.b32.xlu1 %v11690_v35, %s22242_s26  ;;  %v18561_v45 = vpop.f32.mrb[60].mxu0 }
 0x4d5   : > { %v18554_v2 = vpop.permute.xlu0 %11370  ;;  %22593 = vst [vmem:[#allocation381_spill] sm:$0xff] %v18561_v45  ;;  %v18566_v35 = vpop.f32.mrb[61].mxu0  ;;  %v22649_v45 = vld [vmem:[#allocation62_spill] sm:$0xff] }
 0x4d6   : > { %22591 = vst [vmem:[#allocation379_spill] sm:$0xff] %v18554_v2  ;;  %v18556_v8 = vpop.permute.xlu1 %11342  ;;  %22595 = vst [vmem:[#allocation383_spill] sm:$0xff] %v18566_v35  ;;  %v22655_v35 = vld [vmem:[#allocation64_spill] sm:$0xff] }
 0x4d7   : > { %22592 = vst [vmem:[#allocation380_spill] sm:$0xff] %v18556_v8  ;;  %11728 = vrot.lane.b32.xlu0 %v11724_v55, %s22424_s3  ;;  %v11742_v55 = vrot.slane %v18129_v62, 2 }
 0x4d8   : > { %11711 = vrot.lane.b32.xlu1 %v18074_v14, %s22288_s18  ;;  %v18573_v40 = vpop.f32.mrb[62].mxu0 }
 0x4d9   : > { %v18564_v1 = vpop.permute.xlu0 %11374  ;;  %22597 = vst [vmem:[#allocation385_spill] sm:$0xff] %v18573_v40  ;;  %v18578_v2 = vpop.f32.mrb[63].mxu0  ;;  %v11741_v40 = vrot.slane %v18074_v14, 2  ;;  %v22607_v14 = vld [vmem:[#allocation206_spill] sm:$0xff] }
 0x4da   : > { %22594 = vst [vmem:[#allocation382_spill] sm:$0xff] %v18564_v1  ;;  %v18569_v57 = vpop.permute.xlu1 %11356  ;;  %22599 = vst [vmem:[#allocation387_spill] sm:$0xff] %v18578_v2  ;;  %v11725_v1 = vrot.slane %v18129_v62, 1  ;;  %v11779_v62 = vrot.slane %v22527_v52, 2 }
 0x4db   : > { %22596 = vst [vmem:[#allocation384_spill] sm:$0xff] %v18569_v57  ;;  %11743 = vrot.lane.b32.xlu0 %v11740_v44, %s22296_s29  ;;  %v22602_v44 = vld [vmem:[#allocation205_spill] sm:$0xff] }
 0x4dc   : > { %11726 = vrot.lane.b32.xlu1 %v11723_v47, %s22424_s3  ;;  %v11763_v47 = vrot.slane %v22602_v44, 1 }
 0x4dd   : > { %v18576_v8 = vpop.permute.xlu0 %11390 }
 0x4de   : > { %22598 = vst [vmem:[#allocation386_spill] sm:$0xff] %v18576_v8  ;;  %v18581_v11 = vpop.permute.xlu1 %11372 }
 0x4df   : > { %22600 = vst [vmem:[#allocation388_spill] sm:$0xff] %v18581_v11  ;;  %11747 = vrot.lane.b32.xlu0 %v11742_v55, %s22296_s29  ;;  %v11781_v11 = vrot.slane %v22607_v14, 2 }
 0x4e0   : > { %11730 = vrot.lane.b32.xlu1 %v11725_v1, %s22424_s3  ;;  %v11762_v1 = vrot.slane %v22527_v52, 1  ;;  %v11797_v52 = vrot.slane %v22607_v14, 3 }
 0x4e1   : > { %v18585_v10 = vpop.permute.xlu0 %11406 }
 0x4e2   : > { %22601 = vst [vmem:[#allocation389_spill] sm:$0xff] %v18585_v10  ;;  %v18589_v57 = vpop.permute.xlu1 %11388 }
 0x4e3   : > { %22603 = vst [vmem:[#allocation390_spill] sm:$0xff] %v18589_v57  ;;  %11767 = vrot.lane.b32.xlu0 %v11763_v47, %s22518_s8 }
 0x4e4   : > { %11745 = vrot.lane.b32.xlu1 %v11741_v40, %s22296_s29  ;;  %v11764_v40 = vrot.slane %v22607_v14, 1 }
 0x4e5   : > { %v18593_v2 = vpop.permute.xlu0 %11410 }
 0x4e6   : > { %22604 = vst [vmem:[#allocation391_spill] sm:$0xff] %v18593_v2  ;;  %v18596_v8 = vpop.permute.xlu1 %11392 }
 0x4e7   : > { %22605 = vst [vmem:[#allocation392_spill] sm:$0xff] %v18596_v8  ;;  %11782 = vrot.lane.b32.xlu0 %v11779_v62, %s22521_s11  ;;  %v11780_v62 = vrot.slane %v22602_v44, 2  ;;  %v11825_v8 = vrot.slane %v22607_v14, 5 }
 0x4e8   : > { %11765 = vrot.lane.b32.xlu1 %v11762_v1, %s22518_s8 }
 0x4e9   : > { %v18601_v55 = vpop.permute.xlu0 %11426 }
 0x4ea   : > { %22606 = vst [vmem:[#allocation393_spill] sm:$0xff] %v18601_v55  ;;  %v18604_v10 = vpop.permute.xlu1 %11408  ;;  %v11811_v55 = vrot.slane %v22607_v14, 4 }
 0x4eb   : > { %22608 = vst [vmem:[#allocation394_spill] sm:$0xff] %v18604_v10  ;;  %11786 = vrot.lane.b32.xlu0 %v11781_v11, %s22521_s11  ;;  %v11796_v11 = vrot.slane %v22602_v44, 3 }
 0x4ec   : > { %11769 = vrot.lane.b32.xlu1 %v11764_v40, %s22518_s8 }
 0x4ed   : > { %v18609_v47 = vpop.permute.xlu0 %11442 }
 0x4ee   : > { %22609 = vst [vmem:[#allocation395_spill] sm:$0xff] %v18609_v47  ;;  %v18612_v2 = vpop.permute.xlu1 %11424 }
 0x4ef   : > { %22610 = vst [vmem:[#allocation396_spill] sm:$0xff] %v18612_v2  ;;  %11800 = vrot.lane.b32.xlu0 %v11797_v52, %s22525_s10  ;;  %v11810_v52 = vrot.slane %v22602_v44, 4 }
 0x4f0   : > { %11784 = vrot.lane.b32.xlu1 %v11780_v62, %s22521_s11 }
 0x4f1   : > { %v18617_v1 = vpop.permute.xlu0 %11446 }
 0x4f2   : > { %22611 = vst [vmem:[#allocation397_spill] sm:$0xff] %v18617_v1  ;;  %v18620_v10 = vpop.permute.xlu1 %11428  ;;  %v11839_v1 = vrot.slane %v22607_v14, 6 }
 0x4f3   : > { %22612 = vst [vmem:[#allocation398_spill] sm:$0xff] %v18620_v10  ;;  %11814 = vrot.lane.b32.xlu0 %v11811_v55, %s22531_s21  ;;  %v11824_v55 = vrot.slane %v22602_v44, 5 }
 0x4f4   : > { %11798 = vrot.lane.b32.xlu1 %v11796_v11, %s22525_s10 }
 0x4f5   : > { %v18625_v40 = vpop.permute.xlu0 %11459 }
 0x4f6   : > { %22613 = vst [vmem:[#allocation399_spill] sm:$0xff] %v18625_v40  ;;  %v18628_v47 = vpop.permute.xlu1 %11444  ;;  %v11853_v40 = vrot.slane %v22607_v14, 7  ;;  %v11881_v14 = vrot.slane %v18044_v13, 1 }
 0x4f7   : > { %22614 = vst [vmem:[#allocation400_spill] sm:$0xff] %v18628_v47  ;;  %11828 = vrot.lane.b32.xlu0 %v11825_v8, %s22534_s12  ;;  %v11838_v8 = vrot.slane %v22602_v44, 6 }
 0x4f8   : > { %11812 = vrot.lane.b32.xlu1 %v11810_v52, %s22531_s21 }
 0x4f9   : > { %v18633_v62 = vpop.permute.xlu0 %11477 }
 0x4fa   : > { %22615 = vst [vmem:[#allocation401_spill] sm:$0xff] %v18633_v62  ;;  %v18636_v10 = vpop.permute.xlu1 %11457 }
 0x4fb   : > { %22616 = vst [vmem:[#allocation402_spill] sm:$0xff] %v18636_v10  ;;  %11842 = vrot.lane.b32.xlu0 %v11839_v1, %s22539_s16  ;;  %v11852_v1 = vrot.slane %v22602_v44, 7 }
 0x4fc   : > { %11826 = vrot.lane.b32.xlu1 %v11824_v55, %s22534_s12 }
 0x4fd   : > { %v18641_v11 = vpop.permute.xlu0 %11481 }
 0x4fe   : > { %22617 = vst [vmem:[#allocation403_spill] sm:$0xff] %v18641_v11  ;;  %v18644_v47 = vpop.permute.xlu1 %11461 }
 0x4ff   : > { %22618 = vst [vmem:[#allocation404_spill] sm:$0xff] %v18644_v47  ;;  %11856 = vrot.lane.b32.xlu0 %v11853_v40, %s22442_s1  ;;  %v22641_v47 = vld [vmem:[#allocation70_spill] sm:$0xff] }
 0x500   : > { %11840 = vrot.lane.b32.xlu1 %v11838_v8, %s22539_s16  ;;  %v11895_v8 = vrot.slane %v18044_v13, 2 }
 0x501   : > { %v18649_v52 = vpop.permute.xlu0 %11496 }
 0x502   : > { %22619 = vst [vmem:[#allocation405_spill] sm:$0xff] %v18649_v52  ;;  %v18651_v62 = vpop.permute.xlu1 %11479  ;;  %v11909_v52 = vrot.slane %v18044_v13, 3 }
 0x503   : > { %22620 = vst [vmem:[#allocation406_spill] sm:$0xff] %v18651_v62  ;;  %11868 = vrot.lane.b32.xlu0 %v22549_v3, %s22353_s28  ;;  %v11880_v3 = vrot.slane %v18038_v31, 1 }
 0x504   : > { %11854 = vrot.lane.b32.xlu1 %v11852_v1, %s22442_s1 }
 0x505   : > { %v18657_v55 = vpop.permute.xlu0 %11511 }
 0x506   : > { %22621 = vst [vmem:[#allocation407_spill] sm:$0xff] %v18657_v55  ;;  %v18660_v11 = vpop.permute.xlu1 %11494  ;;  %v22642_v55 = vld [vmem:[#allocation60_spill] sm:$0xff] }
 0x507   : > { %22622 = vst [vmem:[#allocation408_spill] sm:$0xff] %v18660_v11  ;;  %11884 = vrot.lane.b32.xlu0 %v11881_v14, %s22342_s27 }
 0x508   : > { %11866 = vrot.lane.b32.xlu1 %v22552_v51, %s22353_s28  ;;  %v11894_v51 = vrot.slane %v18038_v31, 2 }
 0x509   : > { %v18665_v40 = vpop.permute.xlu0 %11515 }
 0x50a   : > { %22623 = vst [vmem:[#allocation409_spill] sm:$0xff] %v18665_v40  ;;  %v18668_v44 = vpop.permute.xlu1 %11498 }
 0x50b   : > { %22624 = vst [vmem:[#allocation410_spill] sm:$0xff] %v18668_v44  ;;  %11898 = vrot.lane.b32.xlu0 %v11895_v8, %s22356_s19  ;;  %v11924_v44 = vrot.slane %v18044_v13, 4  ;;  %v11908_v8 = vrot.slane %v18038_v31, 3 }
 0x50c   : > { %11882 = vrot.lane.b32.xlu1 %v11880_v3, %s22342_s27 }
 0x50d   : > { %v18673_v1 = vpop.permute.xlu0 %11529 }
 0x50e   : > { %22625 = vst [vmem:[#allocation411_spill] sm:$0xff] %v18673_v1  ;;  %v18676_v14 = vpop.permute.xlu1 %11513  ;;  %v11941_v1 = vrot.slane %v18038_v31, 5 }
 0x50f   : > { %22626 = vst [vmem:[#allocation412_spill] sm:$0xff] %v18676_v14  ;;  %11912 = vrot.lane.b32.xlu0 %v11909_v52, %s22352_s23  ;;  %v11923_v52 = vrot.slane %v18038_v31, 4 }
 0x510   : > { %11896 = vrot.lane.b32.xlu1 %v11894_v51, %s22356_s19 }
 0x511   : > { %v18681_v40 = vpop.permute.xlu0 %11543 }
 0x512   : > { %22627 = vst [vmem:[#allocation413_spill] sm:$0xff] %v18681_v40  ;;  %v18684_v62 = vpop.permute.xlu1 %11527  ;;  %v11943_v40 = vrot.slane %v18101_v32, 5 }
 0x513   : > { %22628 = vst [vmem:[#allocation414_spill] sm:$0xff] %v18684_v62  ;;  %11928 = vrot.lane.b32.xlu0 %v11924_v44, %s22361_s17  ;;  %v11925_v44 = vrot.slane %v18101_v32, 4 }
 0x514   : > { %11910 = vrot.lane.b32.xlu1 %v11908_v8, %s22352_s23 }
 0x515   : > { %v18689_v3 = vpop.permute.xlu0 %11557 }
 0x516   : > { %22629 = vst [vmem:[#allocation415_spill] sm:$0xff] %v18689_v3  ;;  %v18692_v14 = vpop.permute.xlu1 %11541  ;;  %v11960_v3 = vrot.slane %v18044_v13, 6 }
 0x517   : > { %22630 = vst [vmem:[#allocation416_spill] sm:$0xff] %v18692_v14  ;;  %11944 = vrot.lane.b32.xlu0 %v11941_v1, %s22197_s5  ;;  %v11942_v1 = vrot.slane %v18044_v13, 5 }
 0x518   : > { %11926 = vrot.lane.b32.xlu1 %v11923_v52, %s22361_s17 }
 0x519   : > { %v18697_v51 = vpop.permute.xlu0 %11571 }
 0x51a   : > { %22631 = vst [vmem:[#allocation417_spill] sm:$0xff] %v18697_v51  ;;  %v18700_v62 = vpop.permute.xlu1 %11555  ;;  %v11977_v51 = vrot.slane %v18038_v31, 7 }
 0x51b   : > { %22632 = vst [vmem:[#allocation418_spill] sm:$0xff] %v18700_v62  ;;  %11948 = vrot.lane.b32.xlu0 %v11943_v40, %s22197_s5  ;;  %v11959_v40 = vrot.slane %v18038_v31, 6 }
 0x51c   : > { %11930 = vrot.lane.b32.xlu1 %v11925_v44, %s22361_s17  ;;  %v22637_v44 = vld [vmem:[#allocation68_spill] sm:$0xff] }
 0x51d   : > { %v18705_v8 = vpop.permute.xlu0 %11583 }
 0x51e   : > { %22633 = vst [vmem:[#allocation419_spill] sm:$0xff] %v18705_v8  ;;  %v18708_v14 = vpop.permute.xlu1 %11569  ;;  %v22638_v8 = vld [vmem:[#allocation58_spill] sm:$0xff] }
 0x51f   : > { %22634 = vst [vmem:[#allocation420_spill] sm:$0xff] %v18708_v14  ;;  %11964 = vrot.lane.b32.xlu0 %v11960_v3, %s22367_s4  ;;  %v9677_v14 = vsel %vm21886_vm1, %v22638_v8, %v22637_v44  ;;  %v22644_v8 = vld [vmem:[#allocation72_spill] sm:$0xff] }
 0x520   : > { %11946 = vrot.lane.b32.xlu1 %v11942_v1, %s22197_s5  ;;  %v11979_v1 = vrot.slane %v18101_v32, 7 }
 0x521   : > { %v18713_v52 = vpop.permute.xlu0 %11597 }
 0x522   : > { %22635 = vst [vmem:[#allocation421_spill] sm:$0xff] %v18713_v52  ;;  %v18716_v62 = vpop.permute.xlu1 %11581 }
 0x523   : > { %22636 = vst [vmem:[#allocation422_spill] sm:$0xff] %v18716_v62  ;;  %11980 = vrot.lane.b32.xlu0 %v11977_v51, %s22337_s15  ;;  %v11961_v62 = vrot.slane %v18101_v32, 6  ;;  %v9691_v51 = vsel %vm21868_vm2, %v22642_v55, %v22641_v47  ;;  %v22648_v55 = vld [vmem:[#allocation74_spill] sm:$0xff] }
 0x524   : > { %11962 = vrot.lane.b32.xlu1 %v11959_v40, %s22367_s4  ;;  %v22643_v40 = vld [vmem:[#allocation21_spill] sm:$0xff] }
 0x525   : > { %v18724_v3 = vpop.permute.xlu0 %11613  ;;  %v9682_v11 = vadd.f32 %v9677_v14, %v22643_v40  ;;  %v22650_v14 = vld [vmem:[#allocation76_spill] sm:$0xff] }
 0x526   : > { %22639 = vst [vmem:[#allocation68_spill] sm:$0xff] %v18724_v3  ;;  %v18727_v52 = vpop.permute.xlu1 %11595  ;;  %v22645_v3 = vld [vmem:[#allocation57_spill] sm:$0xff] }
 0x527   : > { %22640 = vst [vmem:[#allocation423_spill] sm:$0xff] %v18727_v52  ;;  %11984 = vrot.lane.b32.xlu0 %v11979_v1, %s22337_s15  ;;  %v9705_v10 = vsel %vm21867_vm3, %v22645_v3, %v22644_v8  ;;  %v9696_v52 = vadd.f32 %v9691_v51, %v9682_v11  ;;  %v9719_v1 = vsel %vm21866_vm4, %v22649_v45, %v22648_v55  ;;  %v22651_v3 = vld [vmem:[#allocation59_spill] sm:$0xff]  ;;  %v12008_v51 = vrot.slane %v18054_v61, 1  ;;  %v22654_v45 = vld [vmem:[#allocation78_spill] sm:$0xff] }
 0x528   : > { %11966 = vrot.lane.b32.xlu1 %v11961_v62, %s22367_s4  ;;  %v9733_v40 = vsel %vm21865_vm5, %v22651_v3, %v22650_v14  ;;  %v9751_v37 = vsel %vm9280_vm6, %v22655_v35, %v22654_v45 }
 0x529   : > { %v18739_v2 = vpop.permute.xlu0 %11627  ;;  %v9710_v62 = vadd.f32 %v9705_v10, %v9696_v52  ;;  %v12010_v52 = vrot.slane %v18115_v25, 1 }
 0x52a   : > { %22646 = vst [vmem:[#allocation70_spill] sm:$0xff] %v18739_v2  ;;  %v18741_v57 = vpop.permute.xlu1 %11611 }
 0x52b   : > { %22647 = vst [vmem:[#allocation72_spill] sm:$0xff] %v18741_v57  ;;  %11996 = vrot.lane.b32.xlu0 %v18060_v54, %s22230_s20  ;;  %v9724_v2 = vadd.f32 %v9719_v1, %v9710_v62  ;;  %v22658_v1 = vld [vmem:[#allocation75_spill] sm:$0xff]  ;;  %v22659_v62 = vld [vmem:[#allocation61_spill] sm:$0xff] }
 0x52c   : > { %11982 = vrot.lane.b32.xlu1 %v11978_v36, %s22337_s15 }
 0x52d   : > { %v18753_v11 = vpop.permute.xlu0 %11641  ;;  %v9738_v10 = vadd.f32 %v9733_v40, %v9724_v2  ;;  %v9769_v2 = vsel %vm9298_vm7, %v22659_v62, %v22658_v1  ;;  %v22660_v40 = vld [vmem:[#allocation90_spill] sm:$0xff]  ;;  %v12181_v62 = vrot.slane %v18024_v30, 2 }
 0x52e   : > { %22652 = vst [vmem:[#allocation74_spill] sm:$0xff] %v18753_v11  ;;  %v18756_v57 = vpop.permute.xlu1 %11625 }
 0x52f   : > { %22653 = vst [vmem:[#allocation76_spill] sm:$0xff] %v18756_v57  ;;  %12011 = vrot.lane.b32.xlu0 %v12008_v51, %s22246_s24  ;;  %v9757_v3 = vadd.f32 %v9751_v37, %v9738_v10  ;;  %v12167_v37 = vrot.slane %v18024_v30, 1 }
 0x530   : > { %11994 = vrot.lane.b32.xlu1 %v18054_v61, %s22230_s20  ;;  %v22661_v61 = vld [vmem:[#allocation87_spill] sm:$0xff] }
 0x531   : > { %v18764_v36 = vpop.permute.xlu0 %11657  ;;  %v9784_v51 = vsel %vm9316_vm8, %v22661_v61, %v22660_v40  ;;  %v9775_v10 = vadd.f32 %v9769_v2, %v9757_v3  ;;  %v22667_v3 = vld [vmem:[#allocation127_spill] sm:$0xff] }
 0x532   : > { %22656 = vst [vmem:[#allocation78_spill] sm:$0xff] %v18764_v36  ;;  %v18767_v11 = vpop.permute.xlu1 %11639 }
 0x533   : > { %22657 = vst [vmem:[#allocation424_spill] sm:$0xff] %v18767_v11  ;;  %12015 = vrot.lane.b32.xlu0 %v12010_v52, %s22246_s24  ;;  %v12009_v52 = vrot.slane %v18060_v54, 1  ;;  %v9790_v11 = vadd.f32 %v9784_v51, %v9775_v10  ;;  %v12196_v51 = vrot.slane %v18024_v30, 3 }
 0x534   : > { %11998 = vrot.lane.b32.xlu1 %v18115_v25, %s22230_s20 }
 0x535   : > { %v18778_v35 = vpop.permute.xlu0 %11673  ;;  %v9809_v61 = vadd.f32 %v22665_v46, %v9790_v11  ;;  %v12168_v11 = vrot.slane %v18030_v6, 1 }
 0x536   : > { %22662 = vst [vmem:[#allocation75_spill] sm:$0xff] %v18778_v35  ;;  %v18781_v36 = vpop.permute.xlu1 %11655  ;;  %v12027_v35 = vrot.slane %v18115_v25, 2  ;;  %v22675_v25 = vld [vmem:[#allocation82_spill] sm:$0xff] }
 0x537   : > { %22663 = vst [vmem:[#allocation90_spill] sm:$0xff] %v18781_v36  ;;  %12169 = vrot.lane.b32.xlu0 %v12167_v37, %s22518_s8  ;;  %v9826_v2 = vadd.f32 %v22667_v3, %v9809_v61  ;;  %v22669_v37 = vld [vmem:[#allocation63_spill] sm:$0xff]  ;;  %v22672_v61 = vld [vmem:[#allocation41_spill] sm:$0xff]  ;;  %v22674_v36 = vld [vmem:[#allocation140_spill] sm:$0xff] }
 0x538   : > { %12013 = vrot.lane.b32.xlu1 %v12009_v52, %s22246_s24  ;;  %v9678_v10 = vsel %vm21886_vm1, %v22637_v44, %v22669_v37  ;;  %v10091_v44 = vsel %vm21886_vm1, %v22675_v25, %v22674_v36 }
 0x539   : > { %v18786_v57 = vpop.permute.xlu0 %11677 }
 0x53a   : > { %22664 = vst [vmem:[#allocation425_spill] sm:$0xff] %v18786_v57  ;;  %v18790_v50 = vpop.permute.xlu1 %11659  ;;  %v22671_v57 = vld [vmem:[#allocation65_spill] sm:$0xff] }
 0x53b   : > { %22666 = vst [vmem:[#allocation121_spill] sm:$0xff] %v18790_v50  ;;  %12183 = vrot.lane.b32.xlu0 %v12181_v62, %s22521_s11  ;;  %v9692_v62 = vsel %vm21868_vm2, %v22641_v47, %v22671_v57  ;;  %v9706_v47 = vsel %vm21867_vm3, %v22644_v8, %v22678_v19  ;;  %v22684_v8 = vld [vmem:[#allocation19_spill] sm:$0xff] }
 0x53c   : > { %12030 = vrot.lane.b32.xlu1 %v12027_v35, %s22247_s7  ;;  %v9843_v35 = vadd.f32 %v22672_v61, %v9826_v2  ;;  %v10096_v20 = vadd.f32 %v10091_v44, %v22684_v8  ;;  %v22692_v8 = vld [vmem:[#allocation84_spill] sm:$0xff] }
 0x53d   : > { %v18796_v54 = vpop.permute.xlu0 %11693 }
 0x53e   : > { %22668 = vst [vmem:[#allocation127_spill] sm:$0xff] %v18796_v54  ;;  %v18802_v52 = vpop.permute.xlu1 %11675  ;;  %v22673_v54 = vld [vmem:[#allocation26_spill] sm:$0xff] }
 0x53f   : > { %22670 = vst [vmem:[#allocation63_spill] sm:$0xff] %v18802_v52  ;;  %12199 = vrot.lane.b32.xlu0 %v12196_v51, %s22525_s10  ;;  %v9683_v50 = vadd.f32 %v9678_v10, %v22673_v54  ;;  %v12198_v52 = vrot.slane %v18089_v42, 3  ;;  %v9684_v51 = vadd.f32 %v22669_v37, %v22677_v12  ;;  %v22680_v10 = vld [vmem:[#allocation48_spill] sm:$0xff]  ;;  %v9720_v12 = vsel %vm21866_vm4, %v22648_v55, %v22682_v48  ;;  %v22683_v37 = vld [vmem:[#allocation129_spill] sm:$0xff] }
 0x540   : > { %12171 = vrot.lane.b32.xlu1 %v12168_v11, %s22518_s8  ;;  %v12182_v11 = vrot.slane %v18030_v6, 2  ;;  %v10108_v25 = vsel %vm21868_vm2, %v22681_v27, %v22680_v10  ;;  %v9860_v23 = vadd.f32 %v22683_v37, %v9843_v35  ;;  %v12197_v55 = vrot.slane %v18030_v6, 3  ;;  %s14682_s8 = smov 8  }
 0x541   : > { %v18815_v0 = vpop.permute.xlu0 %11709  ;;  %v9697_v54 = vadd.f32 %v9692_v62, %v9683_v50  ;;  %v12215_v62 = vrot.slane %v18030_v6, 4 }
 0x542   : > { %22676 = vst [vmem:[#allocation65_spill] sm:$0xff] %v18815_v0  ;;  %v18823_v2 = vpop.permute.xlu1 %11691  ;;  %v9698_v0 = vadd.f32 %v22671_v57, %v9684_v51  ;;  %v10113_v51 = vadd.f32 %v10108_v25, %v10096_v20  ;;  %v22691_v25 = vld [vmem:[#allocation142_spill] sm:$0xff] }
 0x543   : > { %22679 = vst [vmem:[#allocation41_spill] sm:$0xff] %v18823_v2  ;;  %12203 = vrot.lane.b32.xlu0 %v12198_v52, %s22525_s10  ;;  %v9711_v2 = vadd.f32 %v9706_v47, %v9697_v54  ;;  %v22686_v52 = vld [vmem:[#allocation71_spill] sm:$0xff]  ;;  %v22688_v47 = vld [vmem:[#allocation73_spill] sm:$0xff]  ;;  %v22689_v54 = vld [vmem:[#allocation46_spill] sm:$0xff] }
 0x544   : > { %12185 = vrot.lane.b32.xlu1 %v12182_v11, %s22521_s11  ;;  %v9712_v27 = vadd.f32 %v22678_v19, %v9698_v0  ;;  %v9734_v57 = vsel %vm21865_vm5, %v22650_v14, %v22686_v52  ;;  %v9752_v11 = vsel %vm9280_vm6, %v22654_v45, %v22688_v47  ;;  %v9877_v19 = vadd.f32 %v22689_v54, %v9860_v23  ;;  %v22690_v14 = vld [vmem:[#allocation80_spill] sm:$0xff]  ;;  %s14679_s11 = smov 104  }
 0x545   : > { %v18837_v50 = vpop.permute.xlu0 %11713  ;;  %v9725_v35 = vadd.f32 %v9720_v12, %v9711_v2  ;;  %v9753_v20 = vsel %vm9280_vm6, %v22688_v47, %v22690_v14  ;;  %v10125_v2 = vsel %vm21867_vm3, %v22692_v8, %v22691_v25  ;;  %v12214_v23 = vrot.slane %v18024_v30, 4  ;;  %v22697_v8 = vld [vmem:[#allocation131_spill] sm:$0xff] }
 0x546   : > { %22685 = vst [vmem:[#allocation26_spill] sm:$0xff] %v18837_v50  ;;  %v18844_v17 = vpop.permute.xlu1 %11695  ;;  %v9726_v44 = vadd.f32 %v22682_v48, %v9712_v27  ;;  %v12232_v48 = vrot.slane %v18024_v30, 5  ;;  %v10130_v45 = vadd.f32 %v10125_v2, %v10113_v51  ;;  %v22699_v51 = vld [vmem:[#allocation66_spill] sm:$0xff]  ;;  %v12216_v2 = vrot.slane %v18089_v42, 4 }
 0x547   : > { %22687 = vst [vmem:[#allocation140_spill] sm:$0xff] %v18844_v17  ;;  %12219 = vrot.lane.b32.xlu0 %v12215_v62, %s22531_s21  ;;  %v9739_v0 = vadd.f32 %v9734_v57, %v9725_v35  ;;  %v22696_v35 = vld [vmem:[#allocation81_spill] sm:$0xff]  ;;  %v9894_v17 = vadd.f32 %v22697_v8, %v9877_v19 }
 0x548   : > { %12201 = vrot.lane.b32.xlu1 %v12197_v55, %s22525_s10  ;;  %v9740_v62 = vadd.f32 %v22686_v52, %v9726_v44  ;;  %v22695_v55 = vld [vmem:[#allocation145_spill] sm:$0xff]  ;;  %v12234_v52 = vrot.slane %v18089_v42, 5  ;;  %v9770_v44 = vsel %vm9298_vm7, %v22658_v1, %v22699_v51  ;;  %s14678_s10 = smov 44  }
 0x549   : > { %v18860_v12 = vpop.permute.xlu0 %11728  ;;  %v9758_v57 = vadd.f32 %v9752_v11, %v9739_v0  ;;  %v10142_v47 = vsel %vm21866_vm4, %v22696_v35, %v22695_v55  ;;  %v22701_v35 = vld [vmem:[#allocation77_spill] sm:$0xff] }
 0x54a   : > { %22693 = vst [vmem:[#allocation82_spill] sm:$0xff] %v18860_v12  ;;  %v18864_v27 = vpop.permute.xlu1 %11711  ;;  %v9759_v50 = vadd.f32 %v9753_v20, %v9740_v62  ;;  %v10147_v11 = vadd.f32 %v10142_v47, %v10130_v45  ;;  %v9771_v20 = vsel %vm9298_vm7, %v22699_v51, %v22701_v35  ;;  %v22704_v45 = vld [vmem:[#allocation125_spill] sm:$0xff]  ;;  %v22707_v51 = vld [vmem:[#allocation158_spill] sm:$0xff] }
 0x54b   : > { %22694 = vst [vmem:[#allocation18_spill] sm:$0xff] %v18864_v27  ;;  %12235 = vrot.lane.b32.xlu0 %v12232_v48, %s22534_s12  ;;  %v9776_v19 = vadd.f32 %v9770_v44, %v9758_v57  ;;  %v22702_v48 = vld [vmem:[#allocation83_spill] sm:$0xff]  ;;  %v9908_v47 = vadd.f32 %v9894_v17, %v22704_v45 }
 0x54c   : > { %12217 = vrot.lane.b32.xlu1 %v12214_v23, %s22531_s21  ;;  %v9785_v62 = vsel %vm9316_vm8, %v22660_v40, %v22702_v48  ;;  %v9777_v23 = vadd.f32 %v9771_v20, %v9759_v50  ;;  %v22705_v27 = vld [vmem:[#allocation143_spill] sm:$0xff]  ;;  %v12251_v20 = vrot.slane %v18030_v6, 6 }
 0x54d   : > { %v18873_v12 = vpop.permute.xlu0 %11743  ;;  %v22708_v44 = vld [vmem:[#allocation47_spill] sm:$0xff]  ;;  %v9791_v33 = vadd.f32 %v9785_v62, %v9776_v19  ;;  %v22716_v19 = vld [vmem:[#allocation136_spill] sm:$0xff] }
 0x54e   : > { %22698 = vst [vmem:[#allocation67_spill] sm:$0xff] %v18873_v12  ;;  %v18879_v0 = vpop.permute.xlu1 %11726  ;;  %v22703_v12 = vld [vmem:[#allocation92_spill] sm:$0xff]  ;;  %v10503_v40 = vsel %vm21886_vm1, %v22707_v51, %v22708_v44 }
 0x54f   : > { %22700 = vst [vmem:[#allocation48_spill] sm:$0xff] %v18879_v0  ;;  %12239 = vrot.lane.b32.xlu0 %v12234_v52, %s22534_s12  ;;  %v9786_v1 = vsel %vm9316_vm8, %v22702_v48, %v22703_v12  ;;  %v22706_v0 = vld [vmem:[#allocation85_spill] sm:$0xff]  ;;  %v10092_v52 = vsel %vm21886_vm1, %v22674_v36, %v22707_v51  ;;  %v22712_v36 = vld [vmem:[#allocation134_spill] sm:$0xff] }
 0x550   : > { %12221 = vrot.lane.b32.xlu1 %v12216_v2, %s22531_s21  ;;  %v10159_v57 = vsel %vm21865_vm5, %v22706_v0, %v22705_v27  ;;  %v22710_v2 = vld [vmem:[#allocation40_spill] sm:$0xff]  ;;  %v12233_v0 = vrot.slane %v18030_v6, 5  ;;  %v9792_v60 = vadd.f32 %v9786_v1, %v9777_v23  ;;  %v9920_v9 = vadd.f32 %v9908_v47, %v22712_v36  ;;  %v22718_v47 = vld [vmem:[#allocation146_spill] sm:$0xff]  ;;  %s14681_s21 = smov 68  }
 0x551   : > { %v18903_v50 = vpop.permute.xlu0 %11747  ;;  %v10164_v17 = vadd.f32 %v10159_v57, %v10147_v11  ;;  %v10098_v48 = vadd.f32 %v22707_v51, %v22710_v2  ;;  %v10097_v11 = vadd.f32 %v10092_v52, %v22714_v34  ;;  %v10508_v57 = vadd.f32 %v10503_v40, %v22710_v2  ;;  %v22715_v51 = vld [vmem:[#allocation173_spill] sm:$0xff]  ;;  %v22717_v23 = vld [vmem:[#allocation144_spill] sm:$0xff] }
 0x552   : > { %22709 = vst [vmem:[#allocation79_spill] sm:$0xff] %v18903_v50  ;;  %v18908_v29 = vpop.permute.xlu1 %11730  ;;  %v10504_v50 = vsel %vm21886_vm1, %v22708_v44, %v22713_v4  ;;  %v18923_v62 = vadd.f32 %v9920_v9, %v22716_v19  ;;  %v10173_v1 = vsel %vm9280_vm6, %v22690_v14, %v22717_v23  ;;  %v10187_v44 = vsel %vm9298_vm7, %v22701_v35, %v22718_v47  ;;  %v22722_v14 = vld [vmem:[#allocation50_spill] sm:$0xff]  ;;  %v22723_v35 = vld [vmem:[#allocation36_spill] sm:$0xff] }
 0x553   : > { %22711 = vst [vmem:[#allocation69_spill] sm:$0xff] %v18908_v29  ;;  %12255 = vrot.lane.b32.xlu0 %v12251_v20, %s22539_s16  ;;  %v9804_v29 = vsel %vm21871_vm10, %v22665_v46, %v22715_v51  ;;  %v12267_v52 = vrot.slane %v18024_v30, 7  ;;  %v10178_v40 = vadd.f32 %v10173_v1, %v10164_v17  ;;  %v22720_v20 = vld [vmem:[#allocation148_spill] sm:$0xff]  ;;  %v10509_v26 = vadd.f32 %v10504_v50, %v22723_v35  ;;  %v22725_v1 = vld [vmem:[#allocation154_spill] sm:$0xff] }
 0x554   : > { %12237 = vrot.lane.b32.xlu1 %v12233_v0, %s22534_s12  ;;  %v10109_v46 = vsel %vm21868_vm2, %v22680_v10, %v22720_v20  ;;  %v10115_v9 = vadd.f32 %v22720_v20, %v10098_v48  ;;  %v12250_v0 = vrot.slane %v18024_v30, 6  ;;  %v10517_v16 = vsel %vm21868_vm2, %v22720_v20, %v22722_v14  ;;  %v22727_v20 = vld [vmem:[#allocation160_spill] sm:$0xff]  ;;  %s14680_s12 = smov 36  }
 0x555   : > { %v18931_v34 = vpop.permute.xlu0 %11767  ;;  %v9810_v17 = vadd.f32 %v9804_v29, %v9791_v33  ;;  %v10518_v10 = vsel %vm21868_vm2, %v22722_v14, %v22725_v1  ;;  %v10114_v48 = vadd.f32 %v10109_v46, %v10097_v11  ;;  %v9805_v30 = vsel %vm21871_vm10, %v22715_v51, %v22726_v15  ;;  %v22730_v11 = vld [vmem:[#allocation156_spill] sm:$0xff] }
 0x556   : > { %22719 = vst [vmem:[#allocation129_spill] sm:$0xff] %v18931_v34  ;;  %v18938_v2 = vpop.permute.xlu1 %11745  ;;  %v22724_v34 = vld [vmem:[#allocation38_spill] sm:$0xff]  ;;  %v10126_v29 = vsel %vm21867_vm3, %v22691_v25, %v22727_v20  ;;  %v10132_v51 = vadd.f32 %v22727_v20, %v10115_v9  ;;  %v12252_v25 = vrot.slane %v18089_v42, 6  ;;  %vm21883_vm2 = vcmask 965632  }
 0x557   : > { %22721 = vst [vmem:[#allocation19_spill] sm:$0xff] %v18938_v2  ;;  %v10510_v49 = vadd.f32 %v22713_v4, %v22724_v34  ;;  %12270 = vrot.lane.b32.xlu0 %v12267_v52, %s22442_s1  ;;  %v10522_v2 = vadd.f32 %v10517_v16, %v10508_v57  ;;  %v22728_v4 = vld [vmem:[#allocation149_spill] sm:$0xff]  ;;  %v12269_v16 = vrot.slane %v18089_v42, 7  ;;  %v22731_v52 = vld [vmem:[#allocation168_spill] sm:$0xff]  ;;  %v10192_v42 = vadd.f32 %v10187_v44, %v10178_v40 }
 0x558   : > { %12253 = vrot.lane.b32.xlu1 %v12250_v0, %s22539_s16  ;;  %v10531_v33 = vsel %vm21867_vm3, %v22727_v20, %v22728_v4  ;;  %v10532_v57 = vsel %vm21867_vm3, %v22728_v4, %v22730_v11  ;;  %v10523_v0 = vadd.f32 %v10518_v10, %v10509_v26  ;;  %v22734_v4 = vld [vmem:[#allocation151_spill] sm:$0xff]  ;;  %v10131_v20 = vadd.f32 %v10126_v29, %v10114_v48  ;;  %v22736_v26 = vld [vmem:[#allocation150_spill] sm:$0xff] }
 0x559   : > { %v10524_v50 = vadd.f32 %v22725_v1, %v10510_v49  ;;  %v18962_v34 = vpop.permute.xlu0 %11782  ;;  %v9821_v49 = vsel %vm21872_vm9, %v22667_v3, %v22731_v52  ;;  %v9811_v1 = vadd.f32 %v9805_v30, %v9792_v60  ;;  %v10536_v41 = vadd.f32 %v10531_v33, %v10522_v2  ;;  %v22740_v29 = vld [vmem:[#allocation159_spill] sm:$0xff]  ;;  %v22741_v33 = vld [vmem:[#allocation153_spill] sm:$0xff] }
 0x55a   : > { %22729 = vst [vmem:[#allocation71_spill] sm:$0xff] %v18962_v34  ;;  %v18972_v46 = vpop.permute.xlu1 %11765  ;;  %v9827_v35 = vadd.f32 %v9821_v49, %v9810_v17  ;;  %v22733_v34 = vld [vmem:[#allocation157_spill] sm:$0xff]  ;;  %v9838_v3 = vsel %vm21882_vm11, %v22672_v61, %v22735_v38  ;;  %v10143_v17 = vsel %vm21866_vm4, %v22695_v55, %v22736_v26  ;;  %v10545_v30 = vsel %vm21866_vm4, %v22736_v26, %v22734_v4  ;;  %v22738_v61 = vld [vmem:[#allocation178_spill] sm:$0xff]  ;;  %v22742_v49 = vld [vmem:[#allocation164_spill] sm:$0xff] }
 0x55b   : > { %22732 = vst [vmem:[#allocation73_spill] sm:$0xff] %v18972_v46  ;;  %v10538_v14 = vadd.f32 %v22730_v11, %v10524_v50  ;;  %12274 = vrot.lane.b32.xlu0 %v12269_v16, %s22442_s1  ;;  %v10546_v9 = vsel %vm21866_vm4, %v22734_v4, %v22733_v34  ;;  %v10537_v60 = vadd.f32 %v10532_v57, %v10523_v0  ;;  %v12268_v55 = vrot.slane %v18030_v6, 7  ;;  %v22745_v4 = vld [vmem:[#allocation155_spill] sm:$0xff] }
 0x55c   : > { %12257 = vrot.lane.b32.xlu1 %v12252_v25, %s22539_s16  ;;  %v10149_v48 = vadd.f32 %v22736_v26, %v10132_v51  ;;  %v9822_v44 = vsel %vm21872_vm9, %v22731_v52, %v22738_v61  ;;  %v10560_v16 = vsel %vm21865_vm5, %v22741_v33, %v22740_v29  ;;  %v9844_v11 = vadd.f32 %v9838_v3, %v9827_v35  ;;  %v22743_v25 = vld [vmem:[#allocation196_spill] sm:$0xff]  ;;  %v22749_v26 = vld [vmem:[#allocation170_spill] sm:$0xff] }
 0x55d   : > { %v18990_v10 = vpop.permute.xlu0 %11786  ;;  %v18993_v2 = vadd.f32 %v22733_v34, %v10538_v14  ;;  %v10551_v50 = vadd.f32 %v10546_v9, %v10537_v60  ;;  %v9828_v57 = vadd.f32 %v9822_v44, %v9811_v1  ;;  %v10148_v34 = vadd.f32 %v10143_v17, %v10131_v20  ;;  %v22744_v14 = vld [vmem:[#allocation161_spill] sm:$0xff]  ;;  %v22746_v1 = vld [vmem:[#allocation162_spill] sm:$0xff]  ;;  %v22748_v20 = vld [vmem:[#allocation163_spill] sm:$0xff] }
 0x55e   : > { %22737 = vst [vmem:[#allocation46_spill] sm:$0xff] %v18990_v10  ;;  %v18999_v40 = vpop.permute.xlu1 %11769  ;;  %v10550_v51 = vadd.f32 %v10545_v30, %v10536_v41  ;;  %v10199_v52 = vsel %vm9316_vm8, %v22703_v12, %v22742_v49  ;;  %v9839_v0 = vsel %vm21882_vm11, %v22735_v38, %v22743_v25  ;;  %v10578_v35 = vsel %vm9280_vm6, %v22745_v4, %v22744_v14  ;;  %v22750_v30 = vld [vmem:[#allocation174_spill] sm:$0xff] }
 0x55f   : > { %22739 = vst [vmem:[#allocation80_spill] sm:$0xff] %v18999_v40  ;;  %12286 = vrot.lane.b32.xlu0 %v18044_v13, %s22353_s28  ;;  %v10160_v13 = vsel %vm21865_vm5, %v22705_v27, %v22746_v1  ;;  %v10559_v41 = vsel %vm21865_vm5, %v22746_v1, %v22741_v33  ;;  %v12300_v12 = vrot.slane %v18101_v32, 1  ;;  %v10166_v38 = vadd.f32 %v22746_v1, %v10149_v48 }
 0x560   : > { %12272 = vrot.lane.b32.xlu1 %v12268_v55, %s22442_s1  ;;  %v10174_v3 = vsel %vm9280_vm6, %v22717_v23, %v22748_v20  ;;  %v9855_v17 = vsel %vm21881_vm12, %v22683_v37, %v22749_v26  ;;  %v10215_v27 = vsel %vm21871_vm10, %v22726_v15, %v22750_v30  ;;  %v10577_v44 = vsel %vm9280_vm6, %v22748_v20, %v22745_v4  ;;  %v22752_v37 = vld [vmem:[#allocation177_spill] sm:$0xff]  ;;  %v22753_v4 = vld [vmem:[#allocation167_spill] sm:$0xff]  ;;  %s14677_s1 = smov 112  }
 0x561   : > { %v19023_v9 = vpop.permute.xlu0 %11800  ;;  %v10204_v55 = vadd.f32 %v10199_v52, %v10192_v42  ;;  %v9861_v48 = vadd.f32 %v9855_v17, %v9844_v11  ;;  %v9845_v33 = vadd.f32 %v9839_v0, %v9828_v57  ;;  %v10565_v23 = vadd.f32 %v10560_v16, %v10551_v50  ;;  %v22754_v42 = vld [vmem:[#allocation147_spill] sm:$0xff]  ;;  %v22756_v0 = vld [vmem:[#allocation182_spill] sm:$0xff] }
 0x562   : > { %22747 = vst [vmem:[#allocation142_spill] sm:$0xff] %v19023_v9  ;;  %v19036_v60 = vpop.permute.xlu1 %11784  ;;  %v10165_v1 = vadd.f32 %v10160_v13, %v10148_v34  ;;  %v10564_v6 = vadd.f32 %v10559_v41, %v10550_v51  ;;  %v9872_v46 = vsel %vm9408_vm13, %v22689_v54, %v22752_v37  ;;  %v10180_v15 = vadd.f32 %v22748_v20, %v10166_v38  ;;  %v22758_v13 = vld [vmem:[#allocation165_spill] sm:$0xff]  ;;  %v22760_v17 = vld [vmem:[#allocation198_spill] sm:$0xff] }
 0x563   : > { %22751 = vst [vmem:[#allocation84_spill] sm:$0xff] %v19036_v60  ;;  %12303 = vrot.lane.b32.xlu0 %v12300_v12, %s22342_s27  ;;  %v10596_v11 = vsel %vm9298_vm7, %v22754_v42, %v22753_v4  ;;  %v10220_v57 = vadd.f32 %v10215_v27, %v10204_v55  ;;  %v12302_v50 = vrot.slane %v18453_v22, 1  ;;  %v10584_v16 = vadd.f32 %v10578_v35, %v10565_v23  ;;  %v22763_v55 = vld [vmem:[#allocation52_spill] sm:$0xff]  ;;  %v22900_v60 = vld [vmem:[#allocation281_spill] sm:$0xff]  ;;  %v22940_v9 = vld [vmem:[#allocation186_spill] sm:$0xff] }
 0x564   : > { %12284 = vrot.lane.b32.xlu1 %v18038_v31, %s22353_s28  ;;  %v10179_v34 = vadd.f32 %v10174_v3, %v10165_v1  ;;  %v10583_v51 = vadd.f32 %v10577_v44, %v10564_v6  ;;  %v9856_v54 = vsel %vm21881_vm12, %v22749_v26, %v22756_v0  ;;  %v10188_v41 = vsel %vm9298_vm7, %v22718_v47, %v22758_v13  ;;  %v22759_v3 = vld [vmem:[#allocation176_spill] sm:$0xff]  ;;  %v22761_v47 = vld [vmem:[#allocation166_spill] sm:$0xff]  ;;  %v22765_v1 = vld [vmem:[#allocation171_spill] sm:$0xff] }
 0x565   : > { %v19051_v52 = vpop.permute.xlu0 %11814  ;;  %v10194_v12 = vadd.f32 %v22758_v13, %v10180_v15  ;;  %v9878_v38 = vadd.f32 %v9872_v46, %v9861_v48  ;;  %v9862_v20 = vadd.f32 %v9856_v54, %v9845_v33  ;;  %v10595_v6 = vsel %vm9298_vm7, %v22758_v13, %v22754_v42  ;;  %v22762_v46 = vld [vmem:[#allocation169_spill] sm:$0xff]  ;;  %v22766_v42 = vld [vmem:[#allocation54_spill] sm:$0xff] }
 0x566   : > { %22755 = vst [vmem:[#allocation145_spill] sm:$0xff] %v19051_v52  ;;  %v19057_v31 = vpop.permute.xlu1 %11798  ;;  %v10602_v35 = vadd.f32 %v10596_v11, %v10584_v16  ;;  %v10229_v26 = vsel %vm21872_vm9, %v22738_v61, %v22759_v3  ;;  %v9873_v27 = vsel %vm9408_vm13, %v22752_v37, %v22760_v17  ;;  %vm9470_vm5 = vcmask 187392   ;;  %v22920_v52 = vld [vmem:[#allocation284_spill] sm:$0xff] }
 0x567   : > { %22757 = vst [vmem:[#allocation81_spill] sm:$0xff] %v19057_v31  ;;  %12307 = vrot.lane.b32.xlu0 %v12302_v50, %s22342_s27  ;;  %v10611_v44 = vsel %vm9316_vm8, %v22762_v46, %v22761_v47  ;;  %v9889_v48 = vsel %vm9426_vm14, %v22697_v8, %v22763_v55  ;;  %v10234_v33 = vadd.f32 %v10229_v26, %v10220_v57  ;;  %vm9531_vm4 = vcmask 973824   ;;  %v22795_v31 = vld [vmem:[#allocation199_spill] sm:$0xff] }
 0x568   : > { %12288 = vrot.lane.b32.xlu1 %v18101_v32, %s22353_s28  ;;  %v12318_v61 = vrot.slane %v18104_v24, 2  ;;  %v10200_v37 = vsel %vm9316_vm8, %v22742_v49, %v22765_v1  ;;  %v10610_v15 = vsel %vm9316_vm8, %v22765_v1, %v22762_v46  ;;  %v10243_v11 = vsel %vm21882_vm11, %v22743_v25, %v22766_v42  ;;  %v22768_v46 = vld [vmem:[#allocation217_spill] sm:$0xff] }
 0x569   : > { %v19081_v23 = vpop.permute.xlu0 %11828  ;;  %v12301_v8 = vrot.slane %v18104_v24, 1  ;;  %vm9492_vm3 = vcmask 179200   ;;  %v10193_v57 = vadd.f32 %v10188_v41, %v10179_v34  ;;  %v10601_v16 = vadd.f32 %v10595_v6, %v10583_v51  ;;  %v22772_v6 = vld [vmem:[#allocation185_spill] sm:$0xff] }
 0x56a   : > { %22764 = vst [vmem:[#allocation131_spill] sm:$0xff] %v19081_v23  ;;  %v19093_v50 = vpop.permute.xlu1 %11812  ;;  %v9895_v54 = vadd.f32 %v9889_v48, %v9878_v38  ;;  %v9879_v13 = vadd.f32 %v9873_v27, %v9862_v20  ;;  %v19099_v49 = vadd.f32 %v22740_v29, %v18993_v2  ;;  %v19101_v26 = vadd.f32 %v10611_v44, %v10602_v35  ;;  %v22769_v23 = vld [vmem:[#allocation230_spill] sm:$0xff]  ;;  %v22771_v2 = vld [vmem:[#allocation172_spill] sm:$0xff] }
 0x56b   : > { %22767 = vst [vmem:[#allocation66_spill] sm:$0xff] %v19093_v50  ;;  %12322 = vrot.lane.b32.xlu0 %v12318_v61, %s22356_s19  ;;  %v10206_v25 = vadd.f32 %v22765_v1, %v10194_v12  ;;  %v9945_v50 = vsel %vm9513_vm15, %v22769_v23, %v22768_v46  ;;  %v10205_v34 = vadd.f32 %v10200_v37, %v10193_v57  ;;  %v12334_v20 = vrot.slane %v18101_v32, 3  ;;  %v22773_v35 = vld [vmem:[#allocation192_spill] sm:$0xff]  ;;  %v22778_v57 = vld [vmem:[#allocation193_spill] sm:$0xff] }
 0x56c   : > { %12305 = vrot.lane.b32.xlu1 %v12301_v8, %s22342_s27  ;;  %v10248_v51 = vadd.f32 %v10243_v11, %v10234_v33  ;;  %v19108_v41 = vadd.f32 %v10610_v15, %v10601_v16  ;;  %v9903_v29 = vsel %vm9448_vm0, %v22704_v45, %v22771_v2  ;;  %v9890_v12 = vsel %vm9426_vm14, %v22763_v55, %v22772_v6  ;;  %v22775_v33 = vld [vmem:[#allocation181_spill] sm:$0xff]  ;;  %v22776_v11 = vld [vmem:[#allocation188_spill] sm:$0xff]  ;;  %v22788_v45 = vld [vmem:[#allocation214_spill] sm:$0xff] }
 0x56d   : > { %v19110_v38 = vpop.permute.xlu0 %11842  ;;  %v10216_v27 = vsel %vm21871_vm10, %v22750_v30, %v22773_v35  ;;  %v12317_v48 = vrot.slane %v18101_v32, 2  ;;  %v10257_v61 = vsel %vm21881_vm12, %v22756_v0, %v22775_v33  ;;  %v9896_v1 = vadd.f32 %v9890_v12, %v9879_v13  ;;  %v22777_v8 = vld [vmem:[#allocation189_spill] sm:$0xff] }
 0x56e   : > { %22770 = vst [vmem:[#allocation77_spill] sm:$0xff] %v19110_v38  ;;  %v19122_v44 = vpop.permute.xlu1 %11826  ;;  %v9909_v37 = vadd.f32 %v9903_v29, %v9895_v54  ;;  %v9950_v15 = vadd.f32 %v9945_v50, %v18923_v62  ;;  %v10285_v55 = vsel %vm9426_vm14, %v22772_v6, %v22776_v11  ;;  %v9904_v30 = vsel %vm9448_vm0, %v22771_v2, %v22777_v8  ;;  %v22779_v50 = vld [vmem:[#allocation184_spill] sm:$0xff]  ;;  %v22782_v29 = vld [vmem:[#allocation211_spill] sm:$0xff] }
 0x56f   : > { %22774 = vst [vmem:[#allocation83_spill] sm:$0xff] %v19122_v44  ;;  %12337 = vrot.lane.b32.xlu0 %v12334_v20, %s22352_s23  ;;  %v10222_v32 = vadd.f32 %v22773_v35, %v10206_v25  ;;  %v10230_v0 = vsel %vm21872_vm9, %v22759_v3, %v22778_v57  ;;  %v10221_v16 = vadd.f32 %v10216_v27, %v10205_v34  ;;  %vm9567_vm10 = vcmask 834560   ;;  %v22781_v2 = vld [vmem:[#allocation200_spill] sm:$0xff]  ;;  %v22783_v6 = vld [vmem:[#allocation219_spill] sm:$0xff]  ;;  %v22784_v34 = vld [vmem:[#allocation222_spill] sm:$0xff] }
 0x570   : > { %12320 = vrot.lane.b32.xlu1 %v12317_v48, %s22356_s19  ;;  %v10262_v62 = vadd.f32 %v10257_v61, %v10248_v51  ;;  %v10271_v54 = vsel %vm9408_vm13, %v22760_v17, %v22779_v50  ;;  %v12336_v20 = vrot.slane %v18453_v22, 3  ;;  %v9915_v25 = vsel %vm9470_vm5, %v22712_v36, %v22781_v2  ;;  %v22786_v27 = vld [vmem:[#allocation195_spill] sm:$0xff]  ;;  %v22787_v36 = vld [vmem:[#allocation197_spill] sm:$0xff]  ;;  %v22791_v38 = vld [vmem:[#allocation232_spill] sm:$0xff] }
 0x571   : > { %v19144_v13 = vpop.permute.xlu0 %11856  ;;  %v9916_v3 = vsel %vm9470_vm5, %v22781_v2, %v22782_v29  ;;  %v9959_v51 = vsel %vm9531_vm4, %v22784_v34, %v22783_v6  ;;  %v12319_v17 = vrot.slane %v18453_v22, 2  ;;  %v10235_v35 = vadd.f32 %v10230_v0, %v10221_v16  ;;  %v22790_v16 = vld [vmem:[#allocation221_spill] sm:$0xff] }
 0x572   : > { %22780 = vst [vmem:[#allocation92_spill] sm:$0xff] %v19144_v13  ;;  %v19156_v12 = vpop.permute.xlu1 %11840  ;;  %v10244_v48 = vsel %vm21882_vm11, %v22766_v42, %v22786_v27  ;;  %v9910_v61 = vadd.f32 %v9904_v30, %v9896_v1  ;;  %vm21884_vm9 = vcmask 826368   ;;  %v9964_v23 = vadd.f32 %v9959_v51, %v9950_v15  ;;  %v22789_v13 = vld [vmem:[#allocation227_spill] sm:$0xff] }
 0x573   : > { %22785 = vst [vmem:[#allocation143_spill] sm:$0xff] %v19156_v12  ;;  %12341 = vrot.lane.b32.xlu0 %v12336_v20, %s22352_s23  ;;  %v10258_v2 = vsel %vm21881_vm12, %v22775_v33, %v22787_v36  ;;  %v9929_v34 = vsel %vm9492_vm3, %v22716_v19, %v22788_v45  ;;  %v9930_v0 = vsel %vm9492_vm3, %v22788_v45, %v22789_v13  ;;  %v12352_v33 = vrot.slane %v18453_v22, 4  ;;  %v22793_v12 = vld [vmem:[#allocation229_spill] sm:$0xff] }
 0x574   : > { %v9973_v42 = vsel %vm21883_vm2, %v22791_v38, %v22790_v16  ;;  %12324 = vrot.lane.b32.xlu1 %v12319_v17, %s22356_s19  ;;  %v10276_v1 = vadd.f32 %v10271_v54, %v10262_v62  ;;  %v9921_v15 = vadd.f32 %v9915_v25, %v9909_v37  ;;  %v9922_v30 = vadd.f32 %v9916_v3, %v9910_v61  ;;  %v22797_v17 = vld [vmem:[#allocation231_spill] sm:$0xff]  ;;  %s14684_s19 = smov 16  }
 0x575   : > { %v19176_v20 = vpop.permute.xlu0 %11868  ;;  %v10236_v51 = vadd.f32 %v22778_v57, %v10222_v32  ;;  %v10249_v19 = vadd.f32 %v10244_v48, %v10235_v35  ;;  %v9946_v45 = vsel %vm9513_vm15, %v22768_v46, %v22793_v12  ;;  %v12335_v38 = vrot.slane %v18104_v24, 3  ;;  %v22796_v32 = vld [vmem:[#allocation191_spill] sm:$0xff] }
 0x576   : > { %22792 = vst [vmem:[#allocation85_spill] sm:$0xff] %v19176_v20  ;;  %v19183_v44 = vpop.permute.xlu1 %11854  ;;  %v10272_v37 = vsel %vm9408_vm13, %v22779_v50, %v22795_v31  ;;  %vm21925_vm12 = vcmask 818176   ;;  %v9935_v62 = vadd.f32 %v9929_v34, %v9921_v15  ;;  %v9936_v54 = vadd.f32 %v9930_v0, %v9922_v30  ;;  %v22798_v34 = vld [vmem:[#allocation201_spill] sm:$0xff] }
 0x577   : > { %22794 = vst [vmem:[#allocation158_spill] sm:$0xff] %v19183_v44  ;;  %v9978_v25 = vadd.f32 %v9973_v42, %v9964_v23  ;;  %vm21890_vm11 = vcmask 687104   ;;  %12355 = vrot.lane.b32.xlu0 %v12352_v33, %s22361_s17  ;;  %v10303_v57 = vsel %vm9448_vm0, %v22777_v8, %v22796_v32  ;;  %v10250_v46 = vadd.f32 %v22786_v27, %v10236_v51  ;;  %v22800_v42 = vld [vmem:[#allocation223_spill] sm:$0xff]  ;;  %v22801_v27 = vld [vmem:[#allocation224_spill] sm:$0xff]  ;;  %v22899_v44 = vld [vmem:[#allocation278_spill] sm:$0xff] }
 0x578   : > { %v10263_v3 = vadd.f32 %v10258_v2, %v10249_v19  ;;  %v9960_v35 = vsel %vm9531_vm4, %v22783_v6, %v22797_v17  ;;  %12339 = vrot.lane.b32.xlu1 %v12335_v38, %s22352_s23  ;;  %v10290_v50 = vadd.f32 %v10285_v55, %v10276_v1  ;;  %v10286_v23 = vsel %vm9426_vm14, %v22776_v11, %v22798_v34  ;;  %v22802_v2 = vld [vmem:[#allocation233_spill] sm:$0xff]  ;;  %v22804_v51 = vld [vmem:[#allocation203_spill] sm:$0xff] }
 0x579   : > { %v9951_v48 = vadd.f32 %v9946_v45, %v9935_v62  ;;  %v19201_v61 = vpop.permute.xlu0 %11884  ;;  %v12366_v0 = vrot.slane %v18453_v22, 5  ;;  %v9987_v19 = vsel %vm9567_vm10, %v22801_v27, %v22800_v42  ;;  %v9974_v6 = vsel %vm21883_vm2, %v22790_v16, %v22802_v2  ;;  %v22806_v62 = vld [vmem:[#allocation225_spill] sm:$0xff] }
 0x57a   : > { %22799 = vst [vmem:[#allocation47_spill] sm:$0xff] %v19201_v61  ;;  %v10277_v8 = vadd.f32 %v10272_v37, %v10263_v3  ;;  %v19210_v38 = vpop.permute.xlu1 %11866  ;;  %v12351_v55 = vrot.slane %v18104_v24, 4  ;;  %v10264_v11 = vadd.f32 %v22787_v36, %v10250_v46  ;;  %v9952_v1 = vadd.f32 %v22793_v12, %v9936_v54  ;;  %v22805_v37 = vld [vmem:[#allocation111_spill] sm:$0xff]  ;;  %v22807_v3 = vld [vmem:[#allocation112_spill] sm:$0xff] }
 0x57b   : > { %22803 = vst [vmem:[#allocation40_spill] sm:$0xff] %v19210_v38  ;;  %v9965_v15 = vadd.f32 %v9960_v35, %v9951_v48  ;;  %v9992_v30 = vadd.f32 %v9987_v19, %v9978_v25  ;;  %12369 = vrot.lane.b32.xlu0 %v12366_v0, %s22197_s5  ;;  %v10304_v45 = vsel %vm9448_vm0, %v22796_v32, %v22804_v51  ;;  %v22808_v36 = vld [vmem:[#allocation207_spill] sm:$0xff]  ;;  %vm21885_vm2 = vcmask 678912   ;;  %v22898_v38 = vld [vmem:[#allocation298_spill] sm:$0xff] }
 0x57c   : > { %v10291_v33 = vadd.f32 %v10286_v23, %v10277_v8  ;;  %v9988_v16 = vsel %vm9567_vm10, %v22800_v42, %v22805_v37  ;;  %v10001_v27 = vsel %vm21884_vm9, %v22807_v3, %v22806_v62  ;;  %12353 = vrot.lane.b32.xlu1 %v12351_v55, %s22361_s17  ;;  %v10319_v12 = vsel %vm9470_vm5, %v22782_v29, %v22808_v36  ;;  %v22810_v48 = vld [vmem:[#allocation235_spill] sm:$0xff]  ;;  %v22812_v55 = vld [vmem:[#allocation202_spill] sm:$0xff]  ;;  %s14683_s17 = smov 76  }
 0x57d   : > { %v9966_v54 = vadd.f32 %v22797_v17, %v9952_v1  ;;  %v9979_v25 = vadd.f32 %v9974_v6, %v9965_v15  ;;  %v19230_v46 = vpop.permute.xlu0 %11898  ;;  %v12380_v32 = vrot.slane %v18453_v22, 6  ;;  %v10278_v35 = vadd.f32 %v22795_v31, %v10264_v11  ;;  %v22814_v1 = vld [vmem:[#allocation107_spill] sm:$0xff]  ;;  %v22815_v15 = vld [vmem:[#allocation106_spill] sm:$0xff] }
 0x57e   : > { %22809 = vst [vmem:[#allocation152_spill] sm:$0xff] %v19230_v46  ;;  %v10309_v23 = vadd.f32 %v10303_v57, %v10290_v50  ;;  %v10002_v0 = vsel %vm21884_vm9, %v22806_v62, %v22810_v48  ;;  %v19237_v8 = vpop.permute.xlu1 %11882  ;;  %v12365_v42 = vrot.slane %v18104_v24, 5  ;;  %v10310_v29 = vadd.f32 %v10304_v45, %v10291_v33  ;;  %v22813_v50 = vld [vmem:[#allocation228_spill] sm:$0xff]  ;;  %v22842_v3 = vld [vmem:[#allocation255_spill] sm:$0xff]  ;;  %v22875_v46 = vld [vmem:[#allocation282_spill] sm:$0xff] }
 0x57f   : > { %22811 = vst [vmem:[#allocation39_spill] sm:$0xff] %v19237_v8  ;;  %v9980_v17 = vadd.f32 %v22802_v2, %v9966_v54  ;;  %v9993_v19 = vadd.f32 %v9988_v16, %v9979_v25  ;;  %v10006_v6 = vadd.f32 %v10001_v27, %v9992_v30  ;;  %12383 = vrot.lane.b32.xlu0 %v12380_v32, %s22367_s4  ;;  %vm21974_vm9 = vcmask 670720   ;;  %v22820_v25 = vld [vmem:[#allocation242_spill] sm:$0xff] }
 0x580   : > { %v10320_v31 = vsel %vm9470_vm5, %v22808_v36, %v22812_v55  ;;  %v10325_v57 = vadd.f32 %v10319_v12, %v10309_v23  ;;  %v10337_v11 = vsel %vm9492_vm3, %v22789_v13, %v22813_v50  ;;  %v10016_v62 = vsel %vm21925_vm12, %v22815_v15, %v22814_v1  ;;  %12367 = vrot.lane.b32.xlu1 %v12365_v42, %s22197_s5  ;;  %v22817_v13 = vld [vmem:[#allocation226_spill] sm:$0xff]  ;;  %v22819_v12 = vld [vmem:[#allocation236_spill] sm:$0xff] }
 0x581   : > { %v9994_v2 = vadd.f32 %v22805_v37, %v9980_v17  ;;  %v10007_v27 = vadd.f32 %v10002_v0, %v9993_v19  ;;  %v10579_v30 = vsel %vm9280_vm6, %v22744_v14, %v17823_v39  ;;  %v19256_v33 = vpop.permute.xlu0 %11912  ;;  %v12394_v45 = vrot.slane %v18453_v22, 7  ;;  %v22818_v36 = vld [vmem:[#allocation234_spill] sm:$0xff] }
 0x582   : > { %22816 = vst [vmem:[#allocation173_spill] sm:$0xff] %v19256_v33  ;;  %v10015_v16 = vsel %vm21925_vm12, %v22817_v13, %v22815_v15  ;;  %v10032_v54 = vsel %vm21890_vm11, %v22819_v12, %v22818_v36  ;;  %v10033_v37 = vsel %vm21890_vm11, %v22818_v36, %v22820_v25  ;;  %v19268_v32 = vpop.permute.xlu1 %11896  ;;  %v12379_v14 = vrot.slane %v18104_v24, 6  ;;  %v22873_v33 = vld [vmem:[#allocation249_spill] sm:$0xff] }
 0x583   : > { %22821 = vst [vmem:[#allocation144_spill] sm:$0xff] %v19268_v32  ;;  %v19272_v23 = vadd.f32 %v22798_v34, %v10278_v35  ;;  %v10008_v22 = vadd.f32 %v22810_v48, %v9994_v2  ;;  %v10021_v0 = vadd.f32 %v10016_v62, %v10007_v27  ;;  %v10020_v42 = vadd.f32 %v10015_v16, %v10006_v6  ;;  %v22825_v62 = vld [vmem:[#allocation99_spill] sm:$0xff] }
 0x584   : > { %12397 = vrot.lane.b32.xlu0 %v12394_v45, %s22337_s15  ;;  %v10326_v17 = vadd.f32 %v10320_v31, %v10310_v29  ;;  %v19276_v19 = vadd.f32 %v10337_v11, %v10325_v57  ;;  %v10585_v15 = vadd.f32 %v10579_v30, %v19099_v49  ;;  %v10930_v36 = vsel %vm21886_vm1, %v17754_v7, %v17902_v53  ;;  %v22823_v31 = vld [vmem:[#allocation243_spill] sm:$0xff]  ;;  %v22826_v45 = vld [vmem:[#allocation100_spill] sm:$0xff] }
 0x585   : > { %12381 = vrot.lane.b32.xlu1 %v12379_v14, %s22367_s4  ;;  %v19284_v34 = vadd.f32 %v22814_v1, %v10008_v22  ;;  %v10038_v35 = vadd.f32 %v10032_v54, %v10020_v42  ;;  %v10039_v48 = vadd.f32 %v10033_v37, %v10021_v0  ;;  %v10931_v6 = vsel %vm21886_vm1, %v17902_v53, %v17783_v58  ;;  %v19289_v29 = vpop.permute.xlu0 %11928  ;;  %v22827_v54 = vld [vmem:[#allocation275_spill] sm:$0xff]  ;;  %v22829_v37 = vld [vmem:[#allocation238_spill] sm:$0xff]  ;;  %v22830_v14 = vld [vmem:[#allocation260_spill] sm:$0xff] }
 0x586   : > { %22822 = vst [vmem:[#allocation146_spill] sm:$0xff] %v19289_v29  ;;  %v10051_v49 = vsel %vm21885_vm2, %v17741_v18, %v22823_v31  ;;  %v10597_v7 = vsel %vm9298_vm7, %v22753_v4, %v17732_v21  ;;  %v10937_v57 = vadd.f32 %v17783_v58, %v22314_v5  ;;  %v19299_v11 = vpop.permute.xlu1 %11910  ;;  %v12393_v1 = vrot.slane %v18104_v24, 7  ;;  %v22831_v22 = vld [vmem:[#allocation256_spill] sm:$0xff]  ;;  %v22858_v29 = vld [vmem:[#allocation277_spill] sm:$0xff] }
 0x587   : > { %22824 = vst [vmem:[#allocation148_spill] sm:$0xff] %v19299_v11  ;;  %v10050_v53 = vsel %vm21885_vm2, %v17762_v56, %v17741_v18  ;;  %v10935_v2 = vadd.f32 %v10930_v36, %v22825_v62  ;;  %v10635_v27 = vadd.f32 %v17938_v43, %v19108_v41  ;;  %v10612_v4 = vsel %vm9316_vm8, %v22761_v47, %v17971_v63 }
 0x588   : > { %12409 = vrot.lane.b32.xlu0 %v18462_v28, %s22230_s20  ;;  %v10954_v30 = vadd.f32 %v17857_v59, %v10937_v57  ;;  %v10936_v24 = vadd.f32 %v10931_v6, %v22826_v45  ;;  %v10603_v16 = vadd.f32 %v10597_v7, %v10585_v15  ;;  %vm22828_vm2 = vcmask 490496   ;;  %v22834_v6 = vld [vmem:[#allocation246_spill] sm:$0xff]  ;;  %v22835_v7 = vld [vmem:[#allocation239_spill] sm:$0xff] }
 0x589   : > { %v10630_v18 = vsel %vm22828_vm2, %v17938_v43, %v22827_v54  ;;  %12395 = vrot.lane.b32.xlu1 %v12393_v1, %s22337_s15  ;;  %v10338_v41 = vsel %vm9492_vm3, %v22813_v50, %v22829_v37  ;;  %v10652_v47 = vadd.f32 %v22830_v14, %v10635_v27  ;;  %vm22832_vm1 = vmmov %vm22828_vm2  ;;  %v19326_v42 = vpop.permute.xlu0 %11944  ;;  %v12029_v15 = vrot.slane %v18462_v28, 2  ;;  %v22836_v57 = vld [vmem:[#allocation254_spill] sm:$0xff]  ;;  %v22837_v1 = vld [vmem:[#allocation108_spill] sm:$0xff] }
 0x58a   : > { %v10631_v0 = vsel %vm22832_vm1, %v22827_v54, %v22831_v22  ;;  %22833 = vst [vmem:[#allocation50_spill] sm:$0xff] %v19326_v42  ;;  %v10057_v36 = vadd.f32 %v10051_v49, %v10039_v48  ;;  %v10069_v43 = vsel %vm21974_vm9, %v22835_v7, %v22834_v6  ;;  %vm22838_vm2 = vcmask 1031168   ;;  %v19335_v45 = vpop.permute.xlu1 %11926  ;;  %v22841_v48 = vld [vmem:[#allocation248_spill] sm:$0xff]  ;;  %v22843_v42 = vld [vmem:[#allocation247_spill] sm:$0xff] }
 0x58b   : > { %v10947_v62 = vsel %vm22838_vm2, %v22837_v1, %v22836_v57  ;;  %v10618_v50 = vadd.f32 %v10612_v4, %v10603_v16  ;;  %22839 = vst [vmem:[#allocation36_spill] sm:$0xff] %v19335_v45  ;;  %v10056_v27 = vadd.f32 %v10050_v53, %v10038_v35  ;;  %vm22840_vm1 = vmmov %vm22838_vm2  ;;  %v10636_v12 = vadd.f32 %v10630_v18, %v19101_v26  ;;  %v22845_v16 = vld [vmem:[#allocation280_spill] sm:$0xff]  ;;  %v22848_v26 = vld [vmem:[#allocation258_spill] sm:$0xff] }
 0x58c   : > { %v10948_v54 = vsel %vm22840_vm1, %v22836_v57, %v17857_v59  ;;  %v10952_v56 = vadd.f32 %v10947_v62, %v10935_v2  ;;  %12034 = vrot.lane.b32.xlu0 %v12029_v15, %s22247_s7  ;;  %v10971_v49 = vadd.f32 %v22841_v48, %v10954_v30  ;;  %vm22844_vm11 = vcmask 900096   ;;  %v22850_v15 = vld [vmem:[#allocation253_spill] sm:$0xff] }
 0x58d   : > { %v10953_v13 = vadd.f32 %v10948_v54, %v10936_v24  ;;  %v10964_v1 = vsel %vm22844_vm11, %v22843_v42, %v22842_v3  ;;  %v10637_v4 = vadd.f32 %v10631_v0, %v10618_v50  ;;  %12407 = vrot.lane.b32.xlu1 %v22845_v16, %s22230_s20  ;;  %v19348_v35 = vadd.f32 %v10069_v43, %v10057_v36  ;;  %vm22847_vm2 = vmmov %vm22844_vm11  ;;  %v19354_v18 = vpop.permute.xlu0 %11948  ;;  %v22851_v0 = vld [vmem:[#allocation264_spill] sm:$0xff] }
 0x58e   : > { %v10965_v53 = vsel %vm22847_vm2, %v22842_v3, %v22841_v48  ;;  %v10669_v2 = vadd.f32 %v22848_v26, %v10652_v47  ;;  %22849 = vst [vmem:[#allocation154_spill] sm:$0xff] %v19354_v18  ;;  %v12420_v30 = vrot.slane %v18462_v28, 1  ;;  %v19357_v24 = vadd.f32 %v10338_v41, %v10326_v17  ;;  %v19363_v36 = vpop.permute.xlu1 %11930  ;;  %v22854_v3 = vld [vmem:[#allocation263_spill] sm:$0xff]  ;;  %v22855_v47 = vld [vmem:[#allocation261_spill] sm:$0xff] }
 0x58f   : > { %22846 = vst [vmem:[#allocation38_spill] sm:$0xff] %v19348_v35  ;;  %v10988_v42 = vadd.f32 %v22850_v15, %v10971_v49  ;;  %vm22852_vm11 = vcmask 482304   ;;  %22853 = vst [vmem:[#allocation194_spill] sm:$0xff] %v19363_v36  ;;  %v12028_v43 = vrot.slane %v22845_v16, 2  ;;  %v10969_v62 = vadd.f32 %v10964_v1, %v10952_v56  ;;  %v22857_v17 = vld [vmem:[#allocation241_spill] sm:$0xff]  ;;  %v22860_v1 = vld [vmem:[#allocation259_spill] sm:$0xff] }
 0x590   : > { %v10647_v57 = vsel %vm22852_vm11, %v22830_v14, %v22851_v0  ;;  %v10686_v50 = vadd.f32 %v22854_v3, %v10669_v2  ;;  %vm22856_vm1 = vmmov %vm22852_vm11  ;;  %12423 = vrot.lane.b32.xlu0 %v12420_v30, %s22246_s24  ;;  %v10068_v41 = vsel %vm21974_vm9, %v22857_v17, %v22835_v7  ;;  %v10970_v49 = vadd.f32 %v10965_v53, %v10953_v13  ;;  %v22864_v13 = vld [vmem:[#allocation250_spill] sm:$0xff]  ;;  %v22866_v53 = vld [vmem:[#allocation251_spill] sm:$0xff] }
 0x591   : > { %v10648_v54 = vsel %vm22856_vm1, %v22851_v0, %v22855_v47  ;;  %v10653_v18 = vadd.f32 %v10647_v57, %v10636_v12  ;;  %vm22859_vm2 = vcmask 474112   ;;  %12032 = vrot.lane.b32.xlu1 %v12028_v43, %s22247_s7  ;;  %v19382_v2 = vpop.permute.xlu0 %11964  ;;  %v12045_v30 = vrot.slane %v22845_v16, 3  ;;  %v22868_v57 = vld [vmem:[#allocation117_spill] sm:$0xff]  ;;  %v22951_v35 = vld [vmem:[#allocation375_spill] sm:$0xff] }
 0x592   : > { %v10654_v14 = vadd.f32 %v10648_v54, %v10637_v4  ;;  %v10664_v36 = vsel %vm22859_vm2, %v22848_v26, %v22858_v29  ;;  %vm22861_vm11 = vmmov %vm22859_vm2  ;;  %22862 = vst [vmem:[#allocation160_spill] sm:$0xff] %v19382_v2  ;;  %v19385_v0 = vadd.f32 %v10068_v41, %v10056_v27  ;;  %v11005_v7 = vadd.f32 %v22864_v13, %v10988_v42  ;;  %v22865_v4 = vld [vmem:[#allocation44_spill] sm:$0xff]  ;;  %v19394_v54 = vpop.permute.xlu1 %11946  ;;  %v22871_v41 = vld [vmem:[#allocation102_spill] sm:$0xff] }
 0x593   : > { %v10665_v12 = vsel %vm22861_vm11, %v22858_v29, %v22860_v1  ;;  %vm22867_vm1 = vcmask 891904   ;;  %v10305_v43 = vsel %vm9448_vm0, %v22804_v51, %v22868_v57  ;;  %22869 = vst [vmem:[#allocation156_spill] sm:$0xff] %v19394_v54  ;;  %v12419_v29 = vrot.slane %v22845_v16, 1 }
 0x594   : > { %22863 = vst [vmem:[#allocation149_spill] sm:$0xff] %v19385_v0  ;;  %v10981_v26 = vsel %vm22867_vm1, %v22866_v53, %v22865_v4  ;;  %vm22870_vm2 = vmmov %vm22867_vm1  ;;  %v10703_v17 = vadd.f32 %v22871_v41, %v10686_v50  ;;  %v10670_v42 = vadd.f32 %v10664_v36, %v10653_v18  ;;  %12049 = vrot.lane.b32.xlu0 %v12045_v30, %s22380_s30  ;;  %v22872_v53 = vld [vmem:[#allocation114_spill] sm:$0xff]  ;;  %vm22874_vm11 = vcmask 883712   ;;  %v22877_v36 = vld [vmem:[#allocation269_spill] sm:$0xff] }
 0x595   : > { %v10982_v56 = vsel %vm22870_vm2, %v22865_v4, %v22850_v15  ;;  %v10986_v27 = vadd.f32 %v10981_v26, %v10969_v62  ;;  %v10998_v45 = vsel %vm22874_vm11, %v22873_v33, %v22872_v53  ;;  %v10671_v51 = vadd.f32 %v10665_v12, %v10654_v14  ;;  %12421 = vrot.lane.b32.xlu1 %v12419_v29, %s22246_s24  ;;  %vm22876_vm1 = vmmov %vm22874_vm11  ;;  %v22880_v33 = vld [vmem:[#allocation268_spill] sm:$0xff]  ;;  %v22884_v26 = vld [vmem:[#allocation183_spill] sm:$0xff] }
 0x596   : > { %v10987_v2 = vadd.f32 %v10982_v56, %v10970_v49  ;;  %v10321_v54 = vsel %vm9470_vm5, %v22812_v55, %v22875_v46  ;;  %v10999_v62 = vsel %vm22876_vm1, %v22872_v53, %v22864_v13  ;;  %v10311_v18 = vadd.f32 %v10305_v43, %v19272_v23  ;;  %v19414_v49 = vpop.permute.xlu0 %11980  ;;  %v22879_v56 = vld [vmem:[#allocation356_spill] sm:$0xff]  ;;  %v19423_v4 = vpop.permute.xlu1 %11962  ;;  %v22885_v43 = vld [vmem:[#allocation266_spill] sm:$0xff] }
 0x597   : > { %v10720_v50 = vadd.f32 %v22877_v36, %v10703_v17  ;;  %22878 = vst [vmem:[#allocation168_spill] sm:$0xff] %v19414_v49  ;;  %v12436_v30 = vrot.slane %v22879_v56, 2  ;;  %vm22881_vm2 = vcmask 343040   ;;  %v22882_v12 = vld [vmem:[#allocation252_spill] sm:$0xff]  ;;  %22883 = vst [vmem:[#allocation157_spill] sm:$0xff] %v19423_v4  ;;  %v12044_v29 = vrot.slane %v22884_v26, 3 }
 0x598   : > { %v10681_v14 = vsel %vm22881_vm2, %v22854_v3, %v22880_v33  ;;  %v19421_v55 = vadd.f32 %v22882_v12, %v11005_v7  ;;  %v11003_v23 = vadd.f32 %v10998_v45, %v10986_v27  ;;  %vm22886_vm11 = vmmov %vm22881_vm2  ;;  %v10327_v11 = vadd.f32 %v10321_v54, %v10311_v18  ;;  %v22887_v3 = vld [vmem:[#allocation113_spill] sm:$0xff]  ;;  %v22888_v4 = vld [vmem:[#allocation279_spill] sm:$0xff] }
 0x599   : > { %v10682_v17 = vsel %vm22886_vm11, %v22880_v33, %v22885_v43  ;;  %v10687_v49 = vadd.f32 %v10681_v14, %v10670_v42  ;;  %12439 = vrot.lane.b32.xlu0 %v12436_v30, %s22247_s7  ;;  %v11004_v61 = vadd.f32 %v10999_v62, %v10987_v2  ;;  %v11012_v7 = vsel %vm9280_vm6, %v17823_v39, %v22887_v3  ;;  %v22889_v27 = vld [vmem:[#allocation262_spill] sm:$0xff]  ;;  %v22891_v39 = vld [vmem:[#allocation383_spill] sm:$0xff]  ;;  %v22892_v62 = vld [vmem:[#allocation276_spill] sm:$0xff] }
 0x59a   : > { %v10688_v32 = vadd.f32 %v10682_v17, %v10671_v51  ;;  %v10698_v20 = vsel %vm9408_vm13, %v22871_v41, %v22888_v4  ;;  %12047 = vrot.lane.b32.xlu1 %v12044_v29, %s22380_s30  ;;  %v11013_v45 = vsel %vm9280_vm6, %v22887_v3, %v22882_v12  ;;  %v10734_v54 = vadd.f32 %v10720_v50, %v22868_v57  ;;  %v19445_v42 = vpop.permute.xlu0 %11984  ;;  %v22893_v18 = vld [vmem:[#allocation290_spill] sm:$0xff]  ;;  %v22895_v14 = vld [vmem:[#allocation287_spill] sm:$0xff]  ;;  %v19457_v29 = vpop.permute.xlu1 %11966  ;;  %v22897_v3 = vld [vmem:[#allocation257_spill] sm:$0xff] }
 0x59b   : > { %v10699_v2 = vsel %vm9408_vm13, %v22888_v4, %v22889_v27  ;;  %22890 = vst [vmem:[#allocation151_spill] sm:$0xff] %v19445_v42  ;;  %v12438_v51 = vrot.slane %v22891_v39, 2  ;;  %v10339_v41 = vsel %vm9492_vm3, %v22829_v37, %v22892_v62  ;;  %v22894_v30 = vld [vmem:[#allocation286_spill] sm:$0xff]  ;;  %v10358_v50 = vsel %vm9513_vm15, %v22893_v18, %v22895_v14  ;;  %22896 = vst [vmem:[#allocation175_spill] sm:$0xff] %v19457_v29 }
 0x59c   : > { %v10357_v33 = vsel %vm9513_vm15, %v22894_v30, %v22893_v18  ;;  %v12046_v4 = vrot.slane %v18462_v28, 3  ;;  %v11017_v17 = vadd.f32 %v11012_v7, %v11003_v23  ;;  %v11026_v53 = vsel %vm9298_vm7, %v17732_v21, %v22897_v3 }
 0x59d   : > { %v10704_v42 = vadd.f32 %v10698_v20, %v10687_v49  ;;  %v10345_v8 = vadd.f32 %v10339_v41, %v10327_v11  ;;  %12443 = vrot.lane.b32.xlu0 %v12438_v51, %s22247_s7  ;;  %v10705_v37 = vadd.f32 %v10699_v2, %v10688_v32  ;;  %v10746_v30 = vadd.f32 %v10734_v54, %v22875_v46  ;;  %v22904_v2 = vld [vmem:[#allocation381_spill] sm:$0xff]  ;;  %v22905_v51 = vld [vmem:[#allocation271_spill] sm:$0xff] }
 0x59e   : > { %v10374_v18 = vsel %vm9531_vm4, %v22899_v44, %v22898_v38  ;;  %v10375_v29 = vsel %vm9531_vm4, %v22898_v38, %v22900_v60  ;;  %12051 = vrot.lane.b32.xlu1 %v12046_v4, %s22380_s30  ;;  %v10362_v21 = vadd.f32 %v10357_v33, %v19276_v19  ;;  %v10363_v20 = vadd.f32 %v10358_v50, %v19357_v24  ;;  %v19475_v11 = vpop.permute.xlu0 %11996  ;;  %v22902_v44 = vld [vmem:[#allocation270_spill] sm:$0xff]  ;;  %v19485_v54 = vpop.permute.xlu1 %11982  ;;  %v22906_v33 = vld [vmem:[#allocation297_spill] sm:$0xff] }
 0x59f   : > { %v10364_v23 = vadd.f32 %v22895_v14, %v10345_v8  ;;  %22901 = vst [vmem:[#allocation150_spill] sm:$0xff] %v19475_v11  ;;  %v12062_v32 = vrot.slane %v22845_v16, 4  ;;  %v19478_v49 = vadd.f32 %v11013_v45, %v11004_v61  ;;  %v19480_v7 = vadd.f32 %v11026_v53, %v11017_v17  ;;  %22903 = vst [vmem:[#allocation178_spill] sm:$0xff] %v19485_v54  ;;  %v22907_v53 = vld [vmem:[#allocation272_spill] sm:$0xff]  ;;  %v22908_v45 = vld [vmem:[#allocation273_spill] sm:$0xff] }
 0x5a0   : > { %v10715_v38 = vsel %vm9426_vm14, %v22877_v36, %v22902_v44  ;;  %v12437_v8 = vrot.slane %v22904_v2, 2  ;;  %v10716_v19 = vsel %vm9426_vm14, %v22902_v44, %v22905_v51  ;;  %v10379_v24 = vadd.f32 %v10374_v18, %v10362_v21  ;;  %v22909_v21 = vld [vmem:[#allocation299_spill] sm:$0xff]  ;;  %v22912_v44 = vld [vmem:[#allocation289_spill] sm:$0xff]  ;;  %v22919_v54 = vld [vmem:[#allocation300_spill] sm:$0xff] }
 0x5a1   : > { %v10380_v41 = vadd.f32 %v10375_v29, %v10363_v20  ;;  %v10771_v61 = vsel %vm9513_vm15, %v22895_v14, %v22906_v33  ;;  %12066 = vrot.lane.b32.xlu0 %v12062_v32, %s22254_s6  ;;  %v10729_v36 = vsel %vm9448_vm0, %v22868_v57, %v22907_v53  ;;  %v10730_v50 = vsel %vm9448_vm0, %v22907_v53, %v22908_v45  ;;  %v22911_v32 = vld [vmem:[#allocation291_spill] sm:$0xff] }
 0x5a2   : > { %v10721_v4 = vadd.f32 %v10715_v38, %v10704_v42  ;;  %v10760_v17 = vadd.f32 %v10746_v30, %v22892_v62  ;;  %12441 = vrot.lane.b32.xlu1 %v12437_v8, %s22247_s7  ;;  %v10722_v29 = vadd.f32 %v10716_v19, %v10705_v37  ;;  %v10381_v18 = vadd.f32 %v22900_v60, %v10364_v23  ;;  %v19507_v20 = vpop.permute.xlu0 %12011  ;;  %v22914_v42 = vld [vmem:[#allocation212_spill] sm:$0xff]  ;;  %v19516_v37 = vpop.permute.xlu1 %11994 }
 0x5a3   : > { %v10785_v14 = vsel %vm9531_vm4, %v22900_v60, %v22909_v21  ;;  %22910 = vst [vmem:[#allocation159_spill] sm:$0xff] %v19507_v20  ;;  %v12454_v57 = vrot.slane %v22879_v56, 3  ;;  %vm22913_vm1 = vcmask 965632   ;;  %22916 = vst [vmem:[#allocation153_spill] sm:$0xff] %v19516_v37  ;;  %v12061_v23 = vrot.slane %v22884_v26, 4  ;;  %v22917_v20 = vld [vmem:[#allocation301_spill] sm:$0xff] }
 0x5a4   : > { %v10391_v53 = vsel %vm22913_vm1, %v22912_v44, %v22911_v32  ;;  %vm22915_vm2 = vmmov %vm22913_vm1  ;;  %v10776_v38 = vadd.f32 %v10771_v61, %v10760_v17  ;;  %v10398_v8 = vadd.f32 %v22914_v42, %v10381_v18  ;;  %v10735_v44 = vadd.f32 %v10729_v36, %v10721_v4  ;;  %v22921_v61 = vld [vmem:[#allocation187_spill] sm:$0xff]  ;;  %v22923_v18 = vld [vmem:[#allocation285_spill] sm:$0xff] }
 0x5a5   : > { %v10392_v30 = vsel %vm22915_vm2, %v22911_v32, %v22914_v42  ;;  %v10396_v60 = vadd.f32 %v10391_v53, %v10379_v24  ;;  %vm22918_vm11 = vmmov %vm22913_vm1  ;;  %12457 = vrot.lane.b32.xlu0 %v12454_v57, %s22380_s30  ;;  %v10408_v32 = vsel %vm9567_vm10, %v22920_v52, %v22919_v54  ;;  %v10409_v17 = vsel %vm9567_vm10, %v22919_v54, %v22921_v61  ;;  %v22922_v24 = vld [vmem:[#allocation274_spill] sm:$0xff] }
 0x5a6   : > { %v10397_v19 = vadd.f32 %v10392_v30, %v10380_v41  ;;  %v10799_v11 = vsel %vm22918_vm11, %v22914_v42, %v22917_v20  ;;  %v10790_v26 = vadd.f32 %v10785_v14, %v10776_v38  ;;  %12064 = vrot.lane.b32.xlu1 %v12061_v23, %s22254_s6  ;;  %v10741_v41 = vsel %vm9470_vm5, %v22875_v46, %v22922_v24  ;;  %v22924_v36 = vld [vmem:[#allocation302_spill] sm:$0xff]  ;;  %v19540_v52 = vpop.permute.xlu0 %12015  ;;  %v22926_v42 = vld [vmem:[#allocation283_spill] sm:$0xff]  ;;  %v19544_v38 = vpop.permute.xlu1 %11998 }
 0x5a7   : > { %v10742_v57 = vsel %vm9470_vm5, %v22922_v24, %v22923_v18  ;;  %v10817_v4 = vsel %vm9567_vm10, %v22921_v61, %v22924_v36  ;;  %22925 = vst [vmem:[#allocation164_spill] sm:$0xff] %v19540_v52  ;;  %v12456_v53 = vrot.slane %v22891_v39, 3  ;;  %v10736_v54 = vadd.f32 %v10730_v50, %v10722_v29  ;;  %22927 = vst [vmem:[#allocation196_spill] sm:$0xff] %v19544_v38  ;;  %v22928_v50 = vld [vmem:[#allocation294_spill] sm:$0xff] }
 0x5a8   : > { %v10804_v14 = vadd.f32 %v10799_v11, %v10790_v26  ;;  %v12063_v46 = vrot.slane %v18462_v28, 4  ;;  %v10415_v23 = vadd.f32 %v22921_v61, %v10398_v8  ;;  %v10413_v37 = vadd.f32 %v10408_v32, %v10396_v60  ;;  %v22931_v32 = vld [vmem:[#allocation292_spill] sm:$0xff] }
 0x5a9   : > { %v10414_v24 = vadd.f32 %v10409_v17, %v10397_v19  ;;  %12461 = vrot.lane.b32.xlu0 %v12456_v53, %s22380_s30  ;;  %v10748_v10 = vadd.f32 %v10742_v57, %v10736_v54  ;;  %v10747_v52 = vadd.f32 %v10741_v41, %v10735_v44  ;;  %v12078_v11 = vrot.slane %v22845_v16, 5  ;;  %v22930_v19 = vld [vmem:[#allocation293_spill] sm:$0xff]  ;;  %v22934_v17 = vld [vmem:[#allocation295_spill] sm:$0xff]  ;;  %v22936_v53 = vld [vmem:[#allocation296_spill] sm:$0xff] }
 0x5aa   : > { %v10823_v40 = vadd.f32 %v10817_v4, %v10804_v14  ;;  %12068 = vrot.lane.b32.xlu1 %v12063_v46, %s22254_s6  ;;  %v10432_v29 = vadd.f32 %v22928_v50, %v10415_v23  ;;  %v19553_v26 = vpop.permute.xlu0 %12169  ;;  %v12079_v30 = vrot.slane %v18462_v28, 5  ;;  %v12092_v8 = vrot.slane %v22845_v16, 6  ;;  %v19567_v57 = vpop.permute.xlu1 %12013  ;;  %v22937_v23 = vld [vmem:[#allocation303_spill] sm:$0xff]  ;;  %v22941_v60 = vld [vmem:[#allocation288_spill] sm:$0xff] }
 0x5ab   : > { %22929 = vst [vmem:[#allocation161_spill] sm:$0xff] %v19553_v26  ;;  %vm22932_vm1 = vcmask 826368   ;;  %v10755_v41 = vsel %vm9492_vm3, %v22892_v62, %v22934_v17  ;;  %22935 = vst [vmem:[#allocation155_spill] sm:$0xff] %v19567_v57  ;;  %v12455_v4 = vrot.slane %v22904_v2, 3  ;;  %v10756_v54 = vsel %vm9492_vm3, %v22934_v17, %v22936_v53  ;;  %v22942_v26 = vld [vmem:[#allocation313_spill] sm:$0xff] }
 0x5ac   : > { %v10425_v61 = vsel %vm22932_vm1, %v22931_v32, %v22930_v19  ;;  %vm22933_vm2 = vmmov %vm22932_vm1  ;;  %v19597_v17 = vadd.f32 %v10755_v41, %v10747_v52 }
 0x5ad   : > { %v10426_v44 = vsel %vm22933_vm2, %v22930_v19, %v22928_v50  ;;  %v10430_v14 = vadd.f32 %v10425_v61, %v10413_v37  ;;  %vm22938_vm11 = vmmov %vm22932_vm1  ;;  %12082 = vrot.lane.b32.xlu0 %v12079_v30, %s22386_s0  ;;  %v22939_v19 = vld [vmem:[#allocation213_spill] sm:$0xff]  ;;  %v11038_v37 = vsel %vm9316_vm8, %v17971_v63, %v22942_v26  ;;  %v22944_v30 = vld [vmem:[#allocation190_spill] sm:$0xff]  ;;  %vm22945_vm1 = vcmask 687104  }
 0x5ae   : > { %v10431_v46 = vadd.f32 %v10426_v44, %v10414_v24  ;;  %v10835_v32 = vsel %vm22938_vm11, %v22928_v50, %v22937_v23  ;;  %v10442_v62 = vsel %vm21925_vm12, %v22940_v9, %v22939_v19  ;;  %v10443_v57 = vsel %vm21925_vm12, %v22939_v19, %v22941_v60  ;;  %12459 = vrot.lane.b32.xlu1 %v12455_v4, %s22380_s30  ;;  %v22943_v24 = vld [vmem:[#allocation95_spill] sm:$0xff]  ;;  %v19594_v44 = vpop.permute.xlu0 %12183  ;;  %vm22948_vm2 = vmmov %vm22945_vm1  ;;  %v22949_v4 = vld [vmem:[#allocation314_spill] sm:$0xff]  ;;  %v19608_v0 = vpop.permute.xlu1 %12030 }
 0x5af   : > { %v10841_v38 = vadd.f32 %v10835_v32, %v10823_v40  ;;  %v10853_v50 = vsel %vm21925_vm12, %v22941_v60, %v22943_v24  ;;  %v10034_v61 = vsel %vm22945_vm1, %v22820_v25, %v22944_v30  ;;  %v10449_v9 = vadd.f32 %v22941_v60, %v10432_v29  ;;  %22946 = vst [vmem:[#allocation162_spill] sm:$0xff] %v19594_v44  ;;  %v22947_v32 = vld [vmem:[#allocation304_spill] sm:$0xff]  ;;  %v22956_v23 = vld [vmem:[#allocation377_spill] sm:$0xff] }
 0x5b0   : > { %v12473_v40 = vrot.slane %v22904_v2, 4  ;;  %v10456_v63 = vsel %vm22948_vm2, %v22944_v30, %v22947_v32  ;;  %vm22950_vm11 = vcmask 490496   ;;  %vm22952_vm12 = vcmask 1039360   ;;  %22953 = vst [vmem:[#allocation163_spill] sm:$0xff] %v19608_v0  ;;  %v22954_v24 = vld [vmem:[#allocation316_spill] sm:$0xff] }
 0x5b1   : > { %v11054_v19 = vsel %vm22950_vm11, %v22831_v22, %v22949_v4  ;;  %v11344_v25 = vsel %vm22952_vm12, %v17783_v58, %v22951_v35  ;;  %v19610_v29 = vadd.f32 %v10756_v54, %v10748_v10  ;;  %v10447_v60 = vadd.f32 %v10442_v62, %v10430_v14  ;;  %v22958_v54 = vld [vmem:[#allocation306_spill] sm:$0xff] }
 0x5b2   : > { %v10448_v44 = vadd.f32 %v10443_v57, %v10431_v46  ;;  %v11043_v52 = vadd.f32 %v11038_v37, %v19480_v7  ;;  %12477 = vrot.lane.b32.xlu0 %v12473_v40, %s22254_s6  ;;  %v10859_v41 = vadd.f32 %v10853_v50, %v10841_v38  ;;  %v10040_v30 = vadd.f32 %v10034_v61, %v19284_v34  ;;  %v19626_v14 = vpop.permute.xlu0 %12199  ;;  %v19637_v62 = vpop.permute.xlu1 %12171  ;;  %v22965_v50 = vld [vmem:[#allocation307_spill] sm:$0xff] }
 0x5b3   : > { %vm22955_vm1 = vcmask 482304   ;;  %vm22957_vm12 = vcmask 1031168   ;;  %12080 = vrot.lane.b32.xlu1 %v12078_v11, %s22386_s0  ;;  %v10461_v10 = vadd.f32 %v10456_v63, %v10447_v60  ;;  %v10457_v7 = vsel %vm22948_vm2, %v22947_v32, %v22958_v54  ;;  %22959 = vst [vmem:[#allocation170_spill] sm:$0xff] %v19626_v14  ;;  %22964 = vst [vmem:[#allocation174_spill] sm:$0xff] %v19637_v62  ;;  %v22967_v61 = vld [vmem:[#allocation315_spill] sm:$0xff]  ;;  %v22969_v63 = vld [vmem:[#allocation308_spill] sm:$0xff] }
 0x5b4   : > { %v11068_v22 = vsel %vm22955_vm1, %v22855_v47, %v22954_v24  ;;  %v11358_v58 = vsel %vm22957_vm12, %v17857_v59, %v22956_v23  ;;  %v11059_v57 = vadd.f32 %v11054_v19, %v11043_v52  ;;  %v11349_v38 = vadd.f32 %v11344_v25, %v22314_v5  ;;  %v22960_v47 = vld [vmem:[#allocation319_spill] sm:$0xff]  ;;  %v22970_v25 = vld [vmem:[#allocation321_spill] sm:$0xff]  ;;  %v22972_v60 = vld [vmem:[#allocation390_spill] sm:$0xff] }
 0x5b5   : > { %v19629_v34 = vadd.f32 %v22958_v54, %v10449_v9  ;;  %vm22961_vm11 = vcmask 474112   ;;  %v22962_v59 = vld [vmem:[#allocation379_spill] sm:$0xff]  ;;  %vm22963_vm1 = vcmask 900096   ;;  %v12472_v37 = vrot.slane %v22879_v56, 4  ;;  %v22974_v52 = vld [vmem:[#allocation216_spill] sm:$0xff] }
 0x5b6   : > { %v11082_v46 = vsel %vm22961_vm11, %v22860_v1, %v22960_v47  ;;  %v11376_v11 = vsel %vm22963_vm1, %v22841_v48, %v22962_v59  ;;  %vm22966_vm12 = vcmask 678912   ;;  %v11027_v9 = vsel %vm9298_vm7, %v22897_v3, %v22967_v61  ;;  %12094 = vrot.lane.b32.xlu0 %v12092_v8, %s22257_s25  ;;  %v22968_v1 = vld [vmem:[#allocation305_spill] sm:$0xff]  ;;  %v19667_v0 = vpop.permute.xlu1 %12185  ;;  %v22977_v14 = vld [vmem:[#allocation324_spill] sm:$0xff] }
 0x5b7   : > { %v10052_v5 = vsel %vm22966_vm12, %v22823_v31, %v22965_v50  ;;  %v11073_v40 = vadd.f32 %v11068_v22, %v11059_v57  ;;  %v11363_v32 = vadd.f32 %v11358_v58, %v11349_v38  ;;  %v10871_v48 = vsel %vm22948_vm2, %v22958_v54, %v22968_v1  ;;  %12475 = vrot.lane.b32.xlu1 %v12472_v37, %s22254_s6  ;;  %v19663_v54 = vpop.permute.xlu0 %12203 }
 0x5b8   : > { %v10070_v19 = vsel %vm21974_vm9, %v22834_v6, %v22969_v63  ;;  %vm22971_vm11 = vcmask 343040   ;;  %vm22973_vm1 = vcmask 891904   ;;  %v11039_v8 = vsel %vm9316_vm8, %v22942_v26, %v22974_v52  ;;  %22975 = vst [vmem:[#allocation177_spill] sm:$0xff] %v19663_v54  ;;  %22976 = vst [vmem:[#allocation167_spill] sm:$0xff] %v19667_v0 }
 0x5b9   : > { %v11100_v31 = vsel %vm22971_vm11, %v22885_v43, %v22970_v25  ;;  %v11394_v3 = vsel %vm22973_vm1, %v22850_v15, %v22972_v60  ;;  %v11087_v22 = vadd.f32 %v11082_v46, %v11073_v40  ;;  %v11382_v58 = vadd.f32 %v11376_v11, %v11363_v32  ;;  %v22984_v40 = vld [vmem:[#allocation326_spill] sm:$0xff] }
 0x5ba   : > { %v12490_v6 = vrot.slane %v22879_v56, 5  ;;  %v10462_v57 = vadd.f32 %v10457_v7, %v10448_v44  ;;  %v10058_v38 = vadd.f32 %v10052_v5, %v10040_v30  ;;  %v11032_v43 = vadd.f32 %v11027_v9, %v19478_v49  ;;  %v22980_v44 = vld [vmem:[#allocation309_spill] sm:$0xff]  ;;  %v22982_v30 = vld [vmem:[#allocation311_spill] sm:$0xff] }
 0x5bb   : > { %v12474_v15 = vrot.slane %v22891_v39, 4  ;;  %v19670_v62 = vadd.f32 %v10871_v48, %v10859_v41  ;;  %v11106_v37 = vadd.f32 %v11100_v31, %v11087_v22  ;;  %vm22978_vm12 = vcmask 490496   ;;  %v19693_v48 = vpop.permute.xlu0 %12219 }
 0x5bc   : > { %v11055_v26 = vsel %vm22978_vm12, %v22949_v4, %v22977_v14  ;;  %v11400_v46 = vadd.f32 %v11394_v3, %v11382_v58  ;;  %12493 = vrot.lane.b32.xlu0 %v12490_v6, %s22386_s0  ;;  %v19676_v11 = vadd.f32 %v10070_v19, %v10058_v38  ;;  %vm22981_vm2 = vcmask 678912   ;;  %v22983_v4 = vld [vmem:[#allocation318_spill] sm:$0xff]  ;;  %22986 = vst [vmem:[#allocation182_spill] sm:$0xff] %v19693_v48  ;;  %v22989_v3 = vld [vmem:[#allocation396_spill] sm:$0xff] }
 0x5bd   : > { %v10470_v49 = vsel %vm22981_vm2, %v22965_v50, %v22980_v44  ;;  %v10484_v7 = vsel %vm21974_vm9, %v22969_v63, %v22982_v30  ;;  %v11044_v41 = vadd.f32 %v11039_v8, %v11032_v43  ;;  %12479 = vrot.lane.b32.xlu1 %v12474_v15, %s22254_s6  ;;  %v11033_v5 = vadd.f32 %v22967_v61, %v19421_v55  ;;  %v22987_v63 = vld [vmem:[#allocation389_spill] sm:$0xff]  ;;  %v19702_v8 = vpop.permute.xlu1 %12201  ;;  %v22993_v43 = vld [vmem:[#allocation310_spill] sm:$0xff]  ;;  %v22994_v15 = vld [vmem:[#allocation323_spill] sm:$0xff]  ;;  %s13168_s6 = scalar_lea.sflag [#allocation4], %s14841_s22 }
 0x5be   : > { %22979 = vst [vmem:[#allocation147_spill] sm:$0xff] %v19676_v11  ;;  %v11118_v9 = vsel %vm9408_vm13, %v22889_v27, %v22983_v4  ;;  %vm22985_vm11 = vcmask 482304   ;;  %v12492_v50 = vrot.slane %v22891_v39, 5  ;;  %vm22988_vm1 = vcmask 883712   ;;  %22990 = vst [vmem:[#allocation165_spill] sm:$0xff] %v19702_v8  ;;  %v23041_v8 = vld [vmem:[#allocation392_spill] sm:$0xff] }
 0x5bf   : > { %v11069_v32 = vsel %vm22985_vm11, %v22954_v24, %v22984_v40  ;;  %v11060_v19 = vadd.f32 %v11055_v26, %v11044_v41  ;;  %v11412_v31 = vsel %vm22988_vm1, %v22864_v13, %v22987_v63  ;;  %v11430_v55 = vsel %vm9280_vm6, %v22882_v12, %v22989_v3  ;;  %v22991_v24 = vld [vmem:[#allocation328_spill] sm:$0xff] }
 0x5c0   : > { %v12093_v27 = vrot.slane %v18462_v28, 6  ;;  %v10475_v22 = vadd.f32 %v10470_v49, %v10461_v10  ;;  %v11124_v58 = vadd.f32 %v11118_v9, %v11106_v37  ;;  %vm22992_vm12 = vcmask 474112   ;;  %12497 = vrot.lane.b32.xlu0 %v12492_v50, %s22386_s0  ;;  %v22996_v37 = vld [vmem:[#allocation330_spill] sm:$0xff]  ;;  %v19722_v49 = vpop.permute.xlu0 %12235  ;;  %v23030_v9 = vld [vmem:[#allocation408_spill] sm:$0xff] }
 0x5c1   : > { %v11083_v6 = vsel %vm22992_vm12, %v22960_v47, %v22991_v24  ;;  %v11418_v38 = vadd.f32 %v11412_v31, %v11400_v46  ;;  %v10471_v13 = vsel %vm22981_vm2, %v22980_v44, %v22993_v43  ;;  %v11136_v12 = vsel %vm9426_vm14, %v22905_v51, %v22994_v15  ;;  %22998 = vst [vmem:[#allocation198_spill] sm:$0xff] %v19722_v49  ;;  %v23000_v31 = vld [vmem:[#allocation312_spill] sm:$0xff]  ;;  %vm23009_vm12 = vmmov %vm22981_vm2  ;;  %v23048_v49 = vld [vmem:[#allocation394_spill] sm:$0xff] }
 0x5c2   : > { %v11045_v26 = vadd.f32 %v22974_v52, %v11033_v5  ;;  %v11074_v41 = vadd.f32 %v11069_v32, %v11060_v19  ;;  %12096 = vrot.lane.b32.xlu1 %v12093_v27, %s22257_s25  ;;  %v19717_v10 = vadd.f32 %v10484_v7, %v10475_v22  ;;  %vm22997_vm11 = vcmask 343040   ;;  %v19727_v5 = vpop.permute.xlu1 %12217 }
 0x5c3   : > { %v11101_v47 = vsel %vm22997_vm11, %v22970_v25, %v22996_v37  ;;  %v11436_v46 = vadd.f32 %v11430_v55, %v11418_v38  ;;  %v12107_v44 = vrot.slane %v18462_v28, 7  ;;  %22999 = vst [vmem:[#allocation166_spill] sm:$0xff] %v19727_v5  ;;  %v12491_v32 = vrot.slane %v22904_v2, 5  ;;  %v23003_v38 = vld [vmem:[#allocation331_spill] sm:$0xff]  ;;  %vm23004_vm1 = vmmov %vm22997_vm11 }
 0x5c4   : > { %22995 = vst [vmem:[#allocation176_spill] sm:$0xff] %v19717_v10  ;;  %v11061_v51 = vadd.f32 %v22977_v14, %v11045_v26  ;;  %v11088_v50 = vadd.f32 %v11083_v6, %v11074_v41  ;;  %v10476_v7 = vadd.f32 %v10471_v13, %v10462_v57  ;;  %v10477_v19 = vadd.f32 %v22993_v43, %v19629_v34  ;;  %v23001_v14 = vld [vmem:[#allocation395_spill] sm:$0xff]  ;;  %v23002_v6 = vld [vmem:[#allocation402_spill] sm:$0xff]  ;;  %v19748_v13 = vpop.permute.xlu0 %12239  ;;  %v23008_v26 = vld [vmem:[#allocation101_spill] sm:$0xff] }
 0x5c5   : > { %v10485_v25 = vsel %vm21974_vm9, %v22982_v30, %v23000_v31  ;;  %v11142_v55 = vadd.f32 %v11136_v12, %v11124_v58  ;;  %12110 = vrot.lane.b32.xlu0 %v12107_v44, %s22242_s26  ;;  %v11448_v22 = vsel %vm9298_vm7, %v22967_v61, %v23001_v14  ;;  %v11463_v57 = vsel %vm9316_vm8, %v22974_v52, %v23002_v6  ;;  %v23011_v44 = vld [vmem:[#allocation320_spill] sm:$0xff]  ;;  %v23078_v5 = vld [vmem:[#allocation351_spill] sm:$0xff] }
 0x5c6   : > { %v11075_v28 = vadd.f32 %v22984_v40, %v11061_v51  ;;  %v11107_v27 = vadd.f32 %v11101_v47, %v11088_v50  ;;  %12495 = vrot.lane.b32.xlu1 %v12491_v32, %s22386_s0  ;;  %v11102_v30 = vsel %vm23004_vm1, %v22996_v37, %v23003_v38  ;;  %v11454_v58 = vadd.f32 %v11448_v22, %v11436_v46  ;;  %v19760_v47 = vpop.permute.xlu1 %12221  ;;  %v23012_v46 = vld [vmem:[#allocation327_spill] sm:$0xff]  ;;  %v23013_v50 = vld [vmem:[#allocation334_spill] sm:$0xff]  ;;  %v23016_v22 = vld [vmem:[#allocation325_spill] sm:$0xff]  ;;  %s14676_s0 = smov 52  }
 0x5c7   : > { %23005 = vst [vmem:[#allocation169_spill] sm:$0xff] %v19748_v13  ;;  %v12509_v40 = vrot.slane %v22904_v2, 6  ;;  %v19751_v12 = vadd.f32 %v10485_v25, %v10476_v7  ;;  %v19754_v61 = vadd.f32 %v23000_v31, %v10477_v19  ;;  %v10889_v52 = vsel %vm23009_vm12, %v22993_v43, %v23008_v26  ;;  %23010 = vst [vmem:[#allocation54_spill] sm:$0xff] %v19760_v47  ;;  %v23014_v43 = vld [vmem:[#allocation317_spill] sm:$0xff] }
 0x5c8   : > { %v11089_v41 = vadd.f32 %v22991_v24, %v11075_v28  ;;  %v11154_v37 = vsel %vm9448_vm0, %v22908_v45, %v23011_v44  ;;  %v11119_v51 = vsel %vm9408_vm13, %v22983_v4, %v23012_v46  ;;  %v11120_v32 = vsel %vm9408_vm13, %v23012_v46, %v23013_v50  ;;  %v23038_v47 = vld [vmem:[#allocation105_spill] sm:$0xff] }
 0x5c9   : > { %23006 = vst [vmem:[#allocation52_spill] sm:$0xff] %v19751_v12  ;;  %23007 = vst [vmem:[#allocation171_spill] sm:$0xff] %v19754_v61  ;;  %v11469_v7 = vadd.f32 %v11463_v57, %v11454_v58  ;;  %12513 = vrot.lane.b32.xlu0 %v12509_v40, %s22257_s25  ;;  %v10907_v24 = vsel %vm21974_vm9, %v23000_v31, %v23014_v43  ;;  %v11160_v19 = vadd.f32 %v11154_v37, %v11142_v55  ;;  %v23017_v57 = vld [vmem:[#allocation332_spill] sm:$0xff]  ;;  %v23018_v40 = vld [vmem:[#allocation337_spill] sm:$0xff]  ;;  %v19788_v55 = vpop.permute.xlu0 %12255  ;;  %vm23027_vm2 = vcmask 965632  }
 0x5ca   : > { %v11108_v25 = vadd.f32 %v11102_v30, %v11089_v41  ;;  %v11125_v28 = vadd.f32 %v11119_v51, %v11107_v27  ;;  %v23015_v45 = vrot.slane %v22845_v16, 7  ;;  %v10895_v4 = vadd.f32 %v10889_v52, %v19670_v62  ;;  %23019 = vst [vmem:[#allocation217_spill] sm:$0xff] %v19788_v55  ;;  %v19792_v62 = vpop.permute.xlu1 %12237  ;;  %v23022_v41 = vld [vmem:[#allocation322_spill] sm:$0xff]  ;;  %v23023_v37 = vld [vmem:[#allocation339_spill] sm:$0xff]  ;;  %v23024_v51 = vld [vmem:[#allocation401_spill] sm:$0xff] }
 0x5cb   : > { %v11169_v46 = vsel %vm9470_vm5, %v22923_v18, %v23016_v22  ;;  %v11137_v58 = vsel %vm9426_vm14, %v22994_v15, %v23017_v57  ;;  %v10772_v31 = vsel %vm9513_vm15, %v22906_v33, %v23018_v40  ;;  %23020 = vst [vmem:[#allocation172_spill] sm:$0xff] %v19792_v62  ;;  %v12508_v52 = vrot.slane %v22879_v56, 6  ;;  %v23025_v16 = vld [vmem:[#allocation333_spill] sm:$0xff]  ;;  %v23029_v27 = vld [vmem:[#allocation380_spill] sm:$0xff] }
 0x5cc   : > { %12108 = vrot.lane.b32.xlu1 %v23015_v45, %s22242_s26  ;;  %v11126_v30 = vadd.f32 %v11120_v32, %v11108_v25  ;;  %v19795_v18 = vadd.f32 %v10907_v24, %v10895_v4  ;;  %v11187_v15 = vsel %vm9492_vm3, %v22936_v53, %v23022_v41  ;;  %v10786_v33 = vsel %vm9531_vm4, %v22909_v21, %v23023_v37  ;;  %v23026_v53 = vld [vmem:[#allocation209_spill] sm:$0xff]  ;;  %v23028_v21 = vld [vmem:[#allocation179_spill] sm:$0xff]  ;;  %v23037_v62 = vld [vmem:[#allocation336_spill] sm:$0xff] }
 0x5cd   : > { %v11488_v45 = vadd.f32 %v23024_v51, %v11469_v7  ;;  %12122 = vrot.lane.b32.xlu0 %v22926_v42, %s22288_s18  ;;  %v11175_v32 = vadd.f32 %v11169_v46, %v11160_v19  ;;  %v11143_v25 = vadd.f32 %v11137_v58, %v11125_v28  ;;  %v11138_v24 = vsel %vm9426_vm14, %v23017_v57, %v23025_v16  ;;  %v19817_v13 = vpop.permute.xlu0 %12270  ;;  %v23032_v57 = vld [vmem:[#allocation382_spill] sm:$0xff]  ;;  %v23033_v58 = vld [vmem:[#allocation388_spill] sm:$0xff] }
 0x5ce   : > { %23021 = vst [vmem:[#allocation185_spill] sm:$0xff] %v19795_v18  ;;  %v10777_v4 = vadd.f32 %v10772_v31, %v19597_v17  ;;  %v10800_v34 = vsel %vm23027_vm2, %v22917_v20, %v23026_v53  ;;  %v11351_v7 = vadd.f32 %v23029_v27, %v23028_v21  ;;  %23031 = vst [vmem:[#allocation192_spill] sm:$0xff] %v19817_v13  ;;  %v12526_v19 = vrot.slane %v22879_v56, 7  ;;  %v19823_v31 = vpop.permute.xlu1 %12253  ;;  %v23036_v20 = vld [vmem:[#allocation329_spill] sm:$0xff] }
 0x5cf   : > { %v11505_v55 = vadd.f32 %v23030_v9, %v11488_v45  ;;  %v11144_v28 = vadd.f32 %v11138_v24, %v11126_v30  ;;  %vm23034_vm11 = vcmask 900096   ;;  %23035 = vst [vmem:[#allocation181_spill] sm:$0xff] %v19823_v31  ;;  %v11155_v21 = vsel %vm9448_vm0, %v23011_v44, %v23036_v20  ;;  %v23039_v30 = vld [vmem:[#allocation384_spill] sm:$0xff]  ;;  %v23042_v44 = vld [vmem:[#allocation386_spill] sm:$0xff] }
 0x5d0   : > { %12511 = vrot.lane.b32.xlu1 %v12508_v52, %s22257_s25  ;;  %v10791_v46 = vadd.f32 %v10786_v33, %v10777_v4  ;;  %v11378_v17 = vsel %vm23034_vm11, %v23033_v58, %v23032_v57  ;;  %v12510_v52 = vrot.slane %v22891_v39, 6  ;;  %v11156_v45 = vsel %vm9448_vm0, %v23036_v20, %v23037_v62  ;;  %v23040_v4 = vld [vmem:[#allocation338_spill] sm:$0xff]  ;;  %v23044_v20 = vld [vmem:[#allocation335_spill] sm:$0xff]  ;;  %v23051_v57 = vld [vmem:[#allocation340_spill] sm:$0xff] }
 0x5d1   : > { %v10818_v56 = vsel %vm9567_vm10, %v22924_v36, %v23038_v47  ;;  %v11365_v33 = vadd.f32 %v23039_v30, %v11351_v7  ;;  %12529 = vrot.lane.b32.xlu0 %v12526_v19, %s22242_s26  ;;  %v11161_v24 = vadd.f32 %v11155_v21, %v11143_v25  ;;  %v11170_v48 = vsel %vm9470_vm5, %v23016_v22, %v23040_v4  ;;  %v23045_v7 = vld [vmem:[#allocation407_spill] sm:$0xff]  ;;  %v19848_v19 = vpop.permute.xlu0 %12274 }
 0x5d2   : > { %v10805_v54 = vadd.f32 %v10800_v34, %v10791_v46  ;;  %vm23043_vm1 = vcmask 891904   ;;  %v11171_v36 = vsel %vm9470_vm5, %v23040_v4, %v23044_v20  ;;  %v11522_v31 = vadd.f32 %v23045_v7, %v11505_v55  ;;  %23046 = vst [vmem:[#allocation188_spill] sm:$0xff] %v19848_v19  ;;  %v23047_v21 = vld [vmem:[#allocation391_spill] sm:$0xff] }
 0x5d3   : > { %v11396_v0 = vsel %vm23043_vm1, %v23042_v44, %v23041_v8  ;;  %v11384_v13 = vadd.f32 %v11378_v17, %v11365_v33  ;;  %v12528_v25 = vrot.slane %v22891_v39, 7  ;;  %v10778_v34 = vadd.f32 %v23018_v40, %v19610_v29  ;;  %v19856_v8 = vpop.permute.xlu1 %12257  ;;  %v23052_v29 = vld [vmem:[#allocation303_spill] sm:$0xff]  ;;  %v23054_v40 = vld [vmem:[#allocation398_spill] sm:$0xff] }
 0x5d4   : > { %12515 = vrot.lane.b32.xlu1 %v12510_v52, %s22257_s25  ;;  %v11162_v22 = vadd.f32 %v11156_v45, %v11144_v28  ;;  %v10824_v46 = vadd.f32 %v10818_v56, %v10805_v54  ;;  %vm23049_vm12 = vcmask 883712   ;;  %23050 = vst [vmem:[#allocation189_spill] sm:$0xff] %v19856_v8  ;;  %v11176_v17 = vadd.f32 %v11170_v48, %v11161_v24  ;;  %v23055_v28 = vld [vmem:[#allocation393_spill] sm:$0xff]  ;;  %v23056_v56 = vld [vmem:[#allocation359_spill] sm:$0xff] }
 0x5d5   : > { %v11414_v52 = vsel %vm23049_vm12, %v23048_v49, %v23047_v21  ;;  %v11193_v33 = vadd.f32 %v11187_v15, %v11175_v32  ;;  %v11402_v55 = vadd.f32 %v11396_v0, %v11384_v13  ;;  %12533 = vrot.lane.b32.xlu0 %v12528_v25, %s22242_s26  ;;  %v10792_v39 = vadd.f32 %v23023_v37, %v10778_v34  ;;  %v19874_v37 = vpop.permute.xlu0 %12286  ;;  %v23060_v25 = vld [vmem:[#allocation400_spill] sm:$0xff]  ;;  %v23062_v4 = vld [vmem:[#allocation343_spill] sm:$0xff] }
 0x5d6   : > { %v11177_v19 = vadd.f32 %v11171_v36, %v11162_v22  ;;  %vm23053_vm2 = vcmask 826368   ;;  %v11432_v45 = vsel %vm9280_vm6, %v23055_v28, %v23054_v40  ;;  %vm23057_vm11 = vcmask 1039360   ;;  %23058 = vst [vmem:[#allocation193_spill] sm:$0xff] %v19874_v37  ;;  %v23059_v36 = vld [vmem:[#allocation397_spill] sm:$0xff]  ;;  %v23071_v8 = vld [vmem:[#allocation399_spill] sm:$0xff] }
 0x5d7   : > { %v10836_v54 = vsel %vm23053_vm2, %v23052_v29, %v23051_v57  ;;  %v11345_v0 = vsel %vm23057_vm11, %v22951_v35, %v23029_v27  ;;  %v11420_v48 = vadd.f32 %v11414_v52, %v11402_v55  ;;  %v11536_v13 = vadd.f32 %v11522_v31, %v23003_v38  ;;  %v19880_v22 = vpop.permute.xlu1 %12272  ;;  %v23063_v35 = vld [vmem:[#allocation95_spill] sm:$0xff]  ;;  %v23065_v31 = vld [vmem:[#allocation344_spill] sm:$0xff]  ;;  %v23067_v55 = vld [vmem:[#allocation345_spill] sm:$0xff] }
 0x5d8   : > { %12124 = vrot.lane.b32.xlu1 %v23056_v56, %s22288_s18  ;;  %v12135_v15 = vrot.slane %v23056_v56, 1  ;;  %v10806_v32 = vadd.f32 %v23026_v53, %v10792_v39  ;;  %v10842_v24 = vadd.f32 %v10836_v54, %v10824_v46  ;;  %v11450_v34 = vsel %vm9298_vm7, %v23060_v25, %v23059_v36  ;;  %23061 = vst [vmem:[#allocation184_spill] sm:$0xff] %v19880_v22  ;;  %v23070_v22 = vld [vmem:[#allocation404_spill] sm:$0xff]  ;;  %v23074_v36 = vld [vmem:[#allocation403_spill] sm:$0xff] }
 0x5d9   : > { %v12527_v29 = vrot.slane %v22904_v2, 7  ;;  %vm23064_vm1 = vcmask 818176   ;;  %v10819_v52 = vsel %vm9567_vm10, %v23038_v47, %v23065_v31  ;;  %vm23066_vm12 = vcmask 1031168   ;;  %v23068_v2 = vld [vmem:[#allocation348_spill] sm:$0xff] }
 0x5da   : > { %v10854_v27 = vsel %vm23064_vm1, %v23063_v35, %v23062_v4  ;;  %v11359_v53 = vsel %vm23066_vm12, %v22956_v23, %v23039_v30  ;;  %v11438_v46 = vadd.f32 %v11432_v45, %v11420_v48  ;;  %12138 = vrot.lane.b32.xlu0 %v12135_v15, %s22424_s3  ;;  %v11188_v39 = vsel %vm9492_vm3, %v23022_v41, %v23067_v55  ;;  %v23069_v35 = vld [vmem:[#allocation96_spill] sm:$0xff]  ;;  %v23072_v23 = vld [vmem:[#allocation349_spill] sm:$0xff]  ;;  %v19911_v15 = vpop.permute.xlu0 %12303 }
 0x5db   : > { %v11189_v54 = vsel %vm9492_vm3, %v23067_v55, %v23068_v2  ;;  %v11350_v37 = vadd.f32 %v11345_v0, %v23069_v35  ;;  %v11465_v47 = vsel %vm9316_vm8, %v23071_v8, %v23070_v22  ;;  %v10837_v30 = vsel %vm23053_vm2, %v23051_v57, %v23072_v23  ;;  %v23075_v22 = vld [vmem:[#allocation406_spill] sm:$0xff]  ;;  %v19916_v40 = vpop.permute.xlu1 %12284  ;;  %v23077_v57 = vld [vmem:[#allocation341_spill] sm:$0xff] }
 0x5dc   : > { %12531 = vrot.lane.b32.xlu1 %v12527_v29, %s22242_s26  ;;  %vm23073_vm11 = vcmask 900096   ;;  %v11456_v45 = vadd.f32 %v11450_v34, %v11438_v46  ;;  %v11550_v48 = vadd.f32 %v11536_v13, %v23013_v50  ;;  %v10860_v0 = vadd.f32 %v10854_v27, %v10842_v24  ;;  %v23080_v13 = vld [vmem:[#allocation385_spill] sm:$0xff]  ;;  %v23081_v34 = vld [vmem:[#allocation410_spill] sm:$0xff] }
 0x5dd   : > { %v11377_v41 = vsel %vm23073_vm11, %v22962_v59, %v23033_v58  ;;  %v10825_v55 = vadd.f32 %v10819_v52, %v10806_v32  ;;  %v11364_v35 = vadd.f32 %v11359_v53, %v11350_v37  ;;  %vm23076_vm1 = vcmask 490496   ;;  %v23082_v27 = vld [vmem:[#allocation405_spill] sm:$0xff] }
 0x5de   : > { %v11484_v29 = vsel %vm23076_vm1, %v23075_v22, %v23074_v36  ;;  %v11194_v21 = vadd.f32 %v11188_v39, %v11176_v17  ;;  %v11207_v61 = vsel %vm9513_vm15, %v23078_v5, %v23077_v57  ;;  %vm23079_vm12 = vcmask 891904   ;;  %12549 = vrot.lane.b32.xlu0 %v23080_v13, %s22288_s18  ;;  %v23085_v5 = vld [vmem:[#allocation353_spill] sm:$0xff]  ;;  %v19939_v46 = vpop.permute.xlu0 %12307  ;;  %v23088_v39 = vld [vmem:[#allocation346_spill] sm:$0xff] }
 0x5df   : > { %v11395_v59 = vsel %vm23079_vm12, %v22972_v60, %v23042_v44  ;;  %v11471_v58 = vadd.f32 %v11465_v47, %v11456_v45  ;;  %v10843_v37 = vadd.f32 %v10837_v30, %v10825_v55  ;;  %v11195_v32 = vadd.f32 %v11189_v54, %v11177_v19  ;;  %23087 = vst [vmem:[#allocation200_spill] sm:$0xff] %v19939_v46  ;;  %v23091_v45 = vld [vmem:[#allocation412_spill] sm:$0xff] }
 0x5e0   : > { %v11383_v24 = vadd.f32 %v11377_v41, %v11364_v35  ;;  %vm23083_vm2 = vcmask 482304   ;;  %v23084_v17 = vrot.slane %v22926_v42, 1  ;;  %v11208_v53 = vsel %vm9513_vm15, %v23077_v57, %v23085_v5  ;;  %v23090_v41 = vld [vmem:[#allocation409_spill] sm:$0xff]  ;;  %v19947_v35 = vpop.permute.xlu1 %12288  ;;  %v23094_v57 = vld [vmem:[#allocation347_spill] sm:$0xff] }
 0x5e1   : > { %v11501_v52 = vsel %vm23083_vm2, %v23082_v27, %v23081_v34  ;;  %vm23086_vm11 = vcmask 883712   ;;  %v11490_v44 = vadd.f32 %v11484_v29, %v11471_v58  ;;  %v11564_v19 = vadd.f32 %v11550_v48, %v23025_v16  ;;  %23093 = vst [vmem:[#allocation211_spill] sm:$0xff] %v19947_v35  ;;  %v23097_v58 = vld [vmem:[#allocation411_spill] sm:$0xff] }
 0x5e2   : > { %12136 = vrot.lane.b32.xlu1 %v23084_v17, %s22424_s3  ;;  %v11413_v60 = vsel %vm23086_vm11, %v22987_v63, %v23048_v49  ;;  %vm23089_vm1 = vcmask 818176   ;;  %v11212_v47 = vadd.f32 %v11207_v61, %v11193_v33  ;;  %v11401_v30 = vadd.f32 %v11395_v59, %v11383_v24  ;;  %v23095_v17 = vld [vmem:[#allocation350_spill] sm:$0xff]  ;;  %v23113_v35 = vld [vmem:[#allocation387_spill] sm:$0xff] }
 0x5e3   : > { %v10855_v54 = vsel %vm23089_vm1, %v23062_v4, %v23088_v39  ;;  %vm23092_vm12 = vcmask 474112   ;;  %v11224_v63 = vsel %vm9531_vm4, %v23095_v17, %v23094_v57  ;;  %v11214_v49 = vadd.f32 %v23085_v5, %v11195_v32  ;;  %v23098_v24 = vld [vmem:[#allocation414_spill] sm:$0xff]  ;;  %v23100_v17 = vld [vmem:[#allocation360_spill] sm:$0xff] }
 0x5e4   : > { %v11518_v55 = vsel %vm23092_vm12, %v23091_v45, %v23090_v41  ;;  %v11431_v48 = vsel %vm9280_vm6, %v22989_v3, %v23055_v28  ;;  %v11507_v29 = vadd.f32 %v11501_v52, %v11490_v44  ;;  %v23096_v61 = vrot.slane %v22926_v42, 2  ;;  %v23102_v52 = vld [vmem:[#allocation352_spill] sm:$0xff]  ;;  %v23103_v44 = vld [vmem:[#allocation413_spill] sm:$0xff] }
 0x5e5   : > { %v11213_v4 = vadd.f32 %v11208_v53, %v11194_v21  ;;  %v19959_v33 = vadd.f32 %v10855_v54, %v10843_v37  ;;  %v11419_v59 = vadd.f32 %v11413_v60, %v11401_v30  ;;  %vm23099_vm2 = vcmask 343040   ;;  %v19971_v21 = vpop.permute.xlu0 %12322  ;;  %v23104_v54 = vld [vmem:[#allocation416_spill] sm:$0xff] }
 0x5e6   : > { %12150 = vrot.lane.b32.xlu0 %v23096_v61, %s22296_s29  ;;  %v11532_v46 = vsel %vm23099_vm2, %v23098_v24, %v23097_v58  ;;  %12547 = vrot.lane.b32.xlu1 %v23100_v17, %s22288_s18  ;;  %v11449_v3 = vsel %vm9298_vm7, %v23001_v14, %v23060_v25  ;;  %v11524_v28 = vadd.f32 %v11518_v55, %v11507_v29  ;;  %v12561_v32 = vrot.slane %v23100_v17, 1  ;;  %v19979_v61 = vpop.permute.xlu1 %12305  ;;  %v23106_v25 = vld [vmem:[#allocation354_spill] sm:$0xff]  ;;  %v23117_v58 = vld [vmem:[#allocation357_spill] sm:$0xff] }
 0x5e7   : > { %v11578_v42 = vadd.f32 %v11564_v19, %v23037_v62  ;;  %23101 = vst [vmem:[#allocation219_spill] sm:$0xff] %v19971_v21  ;;  %v11229_v37 = vadd.f32 %v11224_v63, %v11212_v47  ;;  %v11225_v53 = vsel %vm9531_vm4, %v23094_v57, %v23102_v52  ;;  %v11437_v60 = vadd.f32 %v11431_v48, %v11419_v59  ;;  %v23108_v63 = vld [vmem:[#allocation342_spill] sm:$0xff]  ;;  %v23109_v48 = vld [vmem:[#allocation355_spill] sm:$0xff] }
 0x5e8   : > { %v11546_v30 = vsel %vm9408_vm13, %v23104_v54, %v23103_v44  ;;  %23105 = vst [vmem:[#allocation195_spill] sm:$0xff] %v19979_v61  ;;  %v11231_v14 = vadd.f32 %v23102_v52, %v11214_v49  ;;  %vm23107_vm11 = vcmask 687104   ;;  %v11464_v47 = vsel %vm9316_vm8, %v23002_v6, %v23071_v8  ;;  %v23111_v21 = vld [vmem:[#allocation415_spill] sm:$0xff]  ;;  %v23112_v61 = vld [vmem:[#allocation418_spill] sm:$0xff] }
 0x5e9   : > { %v10872_v19 = vsel %vm23107_vm11, %v22968_v1, %v23106_v25  ;;  %v11538_v55 = vadd.f32 %v11532_v46, %v11524_v28  ;;  %v11230_v57 = vadd.f32 %v11225_v53, %v11213_v4  ;;  %vm23110_vm1 = vcmask 965632   ;;  %v20002_v4 = vpop.permute.xlu0 %12337  ;;  %v23116_v53 = vld [vmem:[#allocation420_spill] sm:$0xff] }
 0x5ea   : > { %12564 = vrot.lane.b32.xlu0 %v12561_v32, %s22424_s3  ;;  %v11241_v29 = vsel %vm23110_vm1, %v23109_v48, %v23108_v63  ;;  %v11455_v59 = vadd.f32 %v11449_v3, %v11437_v60  ;;  %v11560_v49 = vsel %vm9426_vm14, %v23112_v61, %v23111_v21  ;;  %12551 = vrot.lane.b32.xlu1 %v23113_v35, %s22288_s18  ;;  %vm23114_vm12 = vcmask 490496   ;;  %v23115_v32 = vld [vmem:[#allocation417_spill] sm:$0xff]  ;;  %v20008_v21 = vpop.permute.xlu1 %12320  ;;  %vm23120_vm11 = vmmov %vm23110_vm1 }
 0x5eb   : > { %v11483_v1 = vsel %vm23114_vm12, %v23024_v51, %v23075_v22  ;;  %v11552_v8 = vadd.f32 %v11546_v30, %v11538_v55  ;;  %v11590_v6 = vadd.f32 %v11578_v42, %v23044_v20  ;;  %v12563_v46 = vrot.slane %v23113_v35, 1  ;;  %v23119_v42 = vld [vmem:[#allocation358_spill] sm:$0xff]  ;;  %v23123_v55 = vld [vmem:[#allocation72_spill] sm:$0xff] }
 0x5ec   : > { %v10878_v28 = vadd.f32 %v10872_v19, %v10860_v0  ;;  %v11470_v3 = vadd.f32 %v11464_v47, %v11455_v59  ;;  %v11574_v60 = vsel %vm9448_vm0, %v23116_v53, %v23115_v32  ;;  %v12149_v48 = vrot.slane %v23056_v56, 2  ;;  %v23121_v19 = vld [vmem:[#allocation419_spill] sm:$0xff]  ;;  %v23122_v47 = vld [vmem:[#allocation422_spill] sm:$0xff] }
 0x5ed   : > { %v11246_v44 = vadd.f32 %v11241_v29, %v11229_v37  ;;  %v20013_v51 = vsel %vm21974_vm9, %v23014_v43, %v23117_v58  ;;  %vm23118_vm2 = vcmask 482304   ;;  %v11566_v0 = vadd.f32 %v11560_v49, %v11552_v8  ;;  %v20034_v59 = vpop.permute.xlu0 %12341  ;;  %v23126_v8 = vld [vmem:[#allocation423_spill] sm:$0xff] }
 0x5ee   : > { %v11500_v22 = vsel %vm23118_vm2, %v23030_v9, %v23082_v27  ;;  %12568 = vrot.lane.b32.xlu0 %v12563_v46, %s22424_s3  ;;  %v11242_v30 = vsel %vm23120_vm11, %v23108_v63, %v23119_v42  ;;  %v11489_v56 = vadd.f32 %v11483_v1, %v11470_v3  ;;  %v11586_v37 = vsel %vm9470_vm5, %v23122_v47, %v23121_v19  ;;  %v23125_v1 = vld [vmem:[#allocation421_spill] sm:$0xff]  ;;  %v23127_v3 = vld [vmem:[#allocation76_spill] sm:$0xff] }
 0x5ef   : > { %v11615_v43 = vsel %vm9513_vm15, %v23085_v5, %v23123_v55  ;;  %12152 = vrot.lane.b32.xlu1 %v12149_v48, %s22296_s29  ;;  %vm23124_vm1 = vcmask 474112   ;;  %v11580_v27 = vadd.f32 %v11574_v60, %v11566_v0  ;;  %v11604_v29 = vadd.f32 %v11590_v6, %v23068_v2  ;;  %v20043_v48 = vpop.permute.xlu1 %12324  ;;  %v23129_v0 = vld [vmem:[#allocation362_spill] sm:$0xff] }
 0x5f0   : > { %v11517_v9 = vsel %vm23124_vm1, %v23045_v7, %v23091_v45  ;;  %v12579_v63 = vrot.slane %v23080_v13, 2  ;;  %v11506_v49 = vadd.f32 %v11500_v22, %v11489_v56  ;;  %v11600_v46 = vsel %vm9492_vm3, %v23126_v8, %v23125_v1 }
 0x5f1   : > { %v11629_v5 = vsel %vm9531_vm4, %v23102_v52, %v23127_v3  ;;  %v12562_v32 = vrot.slane %v23080_v13, 1  ;;  %v20046_v7 = vadd.f32 %v23119_v42, %v11231_v14  ;;  %vm23128_vm12 = vcmask 343040   ;;  %v23131_v13 = vld [vmem:[#allocation424_spill] sm:$0xff]  ;;  %v23132_v14 = vld [vmem:[#allocation363_spill] sm:$0xff] }
 0x5f2   : > { %v11531_v45 = vsel %vm23128_vm12, %v23003_v38, %v23098_v24  ;;  %v11592_v6 = vadd.f32 %v11586_v37, %v11580_v27  ;;  %v11620_v60 = vadd.f32 %v11615_v43, %v11604_v29  ;;  %12583 = vrot.lane.b32.xlu0 %v12579_v63, %s22296_s29  ;;  %v11247_v22 = vadd.f32 %v11242_v30, %v11230_v57  ;;  %v20065_v37 = vpop.permute.xlu0 %12355  ;;  %v23134_v43 = vld [vmem:[#allocation364_spill] sm:$0xff]  ;;  %v23136_v29 = vld [vmem:[#allocation90_spill] sm:$0xff] }
 0x5f3   : > { %vm23130_vm2 = vcmask 687104   ;;  %v11523_v56 = vadd.f32 %v11517_v9, %v11506_v49  ;;  %v11643_v19 = vsel %vm23120_vm11, %v23119_v42, %v23131_v13  ;;  %12566 = vrot.lane.b32.xlu1 %v12562_v32, %s22424_s3  ;;  %v11255_v38 = vsel %vm9567_vm10, %v23065_v31, %v23132_v14  ;;  %v23137_v63 = vld [vmem:[#allocation368_spill] sm:$0xff]  ;;  %v20074_v31 = vpop.permute.xlu1 %12339 }
 0x5f4   : > { %v10873_v52 = vsel %vm23130_vm2, %v23106_v25, %v23129_v0  ;;  %v11545_v24 = vsel %vm9408_vm13, %v23013_v50, %v23104_v54  ;;  %v11606_v57 = vadd.f32 %v11600_v46, %v11592_v6  ;;  %v11634_v30 = vadd.f32 %v11629_v5, %v11620_v60  ;;  %v23133_v25 = vld [vmem:[#allocation361_spill] sm:$0xff] }
 0x5f5   : > { %vm23135_vm1 = vcmask 678912   ;;  %v11537_v27 = vadd.f32 %v11531_v45, %v11523_v56  ;;  %v12578_v42 = vrot.slane %v23100_v17, 2  ;;  %v11661_v49 = vsel %vm9567_vm10, %v23137_v63, %v23136_v29  ;;  %v23139_v5 = vld [vmem:[#allocation149_spill] sm:$0xff]  ;;  %v23141_v45 = vld [vmem:[#allocation366_spill] sm:$0xff] }
 0x5f6   : > { %v10891_v9 = vsel %vm23135_vm1, %v23134_v43, %v23133_v25  ;;  %v10879_v1 = vadd.f32 %v10873_v52, %v19959_v33  ;;  %vm23138_vm12 = vmmov %vm23135_vm1  ;;  %v11559_v54 = vsel %vm9426_vm14, %v23025_v16, %v23112_v61  ;;  %v11648_v46 = vadd.f32 %v11643_v19, %v11634_v30  ;;  %v23142_v61 = vld [vmem:[#allocation68_spill] sm:$0xff] }
 0x5f7   : > { %v10890_v50 = vsel %vm23138_vm12, %v23008_v26, %v23134_v43  ;;  %v23140_v17 = vsub.f32 0.0, %v23139_v5  ;;  %v11260_v32 = vadd.f32 %v11255_v38, %v11246_v44  ;;  %v10909_v6 = vsel %vm21974_vm9, %v23117_v58, %v23141_v45  ;;  %12581 = vrot.lane.b32.xlu1 %v12578_v42, %s22296_s29  ;;  %v20097_v44 = vpop.permute.xlu0 %12369  ;;  %v23143_v38 = vld [vmem:[#allocation370_spill] sm:$0xff]  ;;  %v23144_v58 = vld [vmem:[#allocation365_spill] sm:$0xff]  ;;  %v23150_v42 = vld [vmem:[#allocation367_spill] sm:$0xff] }
 0x5f8   : > { %v11256_v33 = vsel %vm9567_vm10, %v23132_v14, %v23137_v63  ;;  %v11551_v60 = vadd.f32 %v11545_v24, %v11537_v27  ;;  %v10897_v26 = vadd.f32 %v10891_v9, %v10879_v1  ;;  %v11573_v16 = vsel %vm9448_vm0, %v23037_v62, %v23116_v53  ;;  %v20103_v24 = vpop.permute.xlu1 %12353  ;;  %v23149_v27 = vld [vmem:[#allocation372_spill] sm:$0xff]  ;;  %v23152_v1 = vld [vmem:[#allocation75_spill] sm:$0xff] }
 0x5f9   : > { %12601 = vrot.lane.b32.xlu0 %v23140_v17, %s22342_s27  ;;  %v11622_v52 = vadd.f32 %v23142_v61, %v11606_v57  ;;  %v11667_v56 = vadd.f32 %v11661_v49, %v11648_v46  ;;  %v10896_v19 = vadd.f32 %v10890_v50, %v10878_v28  ;;  %vm23145_vm2 = vcmask 826368  }
 0x5fa   : > { %v11270_v30 = vsel %vm23145_vm2, %v23144_v58, %v23143_v38  ;;  %v11565_v43 = vadd.f32 %v11559_v54, %v11551_v60  ;;  %v12580_v14 = vrot.slane %v23113_v35, 2  ;;  %v20105_v9 = vadd.f32 %v10909_v6, %v10897_v26  ;;  %vm23147_vm11 = vmmov %vm23145_vm2  ;;  %v23154_v54 = vld [vmem:[#allocation41_spill] sm:$0xff]  ;;  %v23158_v26 = vld [vmem:[#allocation374_spill] sm:$0xff] }
 0x5fb   : > { %v11269_v62 = vsel %vm23147_vm11, %v23072_v23, %v23144_v58  ;;  %v11261_v53 = vadd.f32 %v11256_v33, %v11247_v22  ;;  %v11585_v28 = vsel %vm9470_vm5, %v23044_v20, %v23122_v47  ;;  %v23148_v57 = vsub.f32 0.0, %v19676_v11  ;;  %vm23153_vm12 = vmmov %vm23145_vm2  ;;  %v23156_v22 = vld [vmem:[#allocation70_spill] sm:$0xff]  ;;  %v20130_v6 = vpop.permute.xlu0 %12383  ;;  %v23179_v11 = vld [vmem:[#allocation140_spill] sm:$0xff] }
 0x5fc   : > { %23146 = vst [vmem:[#allocation197_spill] sm:$0xff] %v20105_v9  ;;  %vm23151_vm1 = vcmask 818176   ;;  %v11579_v49 = vadd.f32 %v11573_v16, %v11565_v43  ;;  %v11679_v50 = vsel %vm23153_vm12, %v23143_v38, %v23152_v1  ;;  %12585 = vrot.lane.b32.xlu1 %v12580_v14, %s22296_s29  ;;  %v11599_v47 = vsel %vm9492_vm3, %v23068_v2, %v23126_v8  ;;  %v23159_v16 = vld [vmem:[#allocation369_spill] sm:$0xff]  ;;  %v20138_v14 = vpop.permute.xlu1 %12367 }
 0x5fd   : > { %12605 = vrot.lane.b32.xlu0 %v23148_v57, %s22342_s27  ;;  %v11284_v35 = vsel %vm23151_vm1, %v23150_v42, %v23149_v27  ;;  %vm23155_vm2 = vmmov %vm23151_vm1  ;;  %v11275_v20 = vadd.f32 %v11270_v30, %v11261_v53  ;;  %v11636_v46 = vadd.f32 %v23156_v22, %v11622_v52  ;;  %v11685_v17 = vadd.f32 %v11679_v50, %v11667_v56  ;;  %v23162_v52 = vld [vmem:[#allocation376_spill] sm:$0xff]  ;;  %v23163_v56 = vld [vmem:[#allocation371_spill] sm:$0xff] }
 0x5fe   : > { %v11697_v23 = vsel %vm23155_vm2, %v23149_v27, %v23154_v54  ;;  %v20133_v33 = vadd.f32 %v20013_v51, %v10896_v19  ;;  %v11274_v60 = vadd.f32 %v11269_v62, %v11260_v32  ;;  %vm23160_vm11 = vcmask 687104   ;;  %v23166_v57 = vld [vmem:[#allocation78_spill] sm:$0xff]  ;;  %v23173_v30 = vld [vmem:[#allocation425_spill] sm:$0xff] }
 0x5ff   : > { %v11298_v58 = vsel %vm23160_vm11, %v23159_v16, %v23158_v26  ;;  %v11591_v43 = vadd.f32 %v11585_v28, %v11579_v49  ;;  %v11289_v53 = vadd.f32 %v11284_v35, %v11275_v20  ;;  %v11616_v2 = vsel %vm9513_vm15, %v23123_v55, %v23142_v61  ;;  %v23165_v28 = vld [vmem:[#allocation121_spill] sm:$0xff]  ;;  %v23167_v55 = vld [vmem:[#allocation38_spill] sm:$0xff]  ;;  %v20165_v20 = vpop.permute.xlu0 %12397  ;;  %vm23170_vm2 = vmmov %vm23160_vm11 }
 0x600   : > { %23157 = vst [vmem:[#allocation214_spill] sm:$0xff] %v20133_v33  ;;  %v11703_v8 = vadd.f32 %v11697_v23, %v11685_v17  ;;  %v23161_v51 = vsub.f32 0.0, %v19751_v12  ;;  %v11283_v32 = vsel %vm23151_vm1, %v23088_v39, %v23150_v42  ;;  %vm23164_vm12 = vcmask 678912   ;;  %v23169_v42 = vld [vmem:[#allocation74_spill] sm:$0xff] }
 0x601   : > { %v11312_v19 = vsel %vm23164_vm12, %v23163_v56, %v23162_v52  ;;  %v11605_v62 = vadd.f32 %v11599_v47, %v11591_v43  ;;  %v11663_v35 = vsel %vm9567_vm10, %v23166_v57, %v23165_v28  ;;  %v23168_v61 = vsub.f32 0.0, %v23167_v55  ;;  %v23171_v17 = vld [vmem:[#allocation378_spill] sm:$0xff]  ;;  %v23172_v43 = vld [vmem:[#allocation373_spill] sm:$0xff] }
 0x602   : > { %12620 = vrot.lane.b32.xlu0 %v23161_v51, %s22247_s7  ;;  %v11262_v49 = vadd.f32 %v23137_v63, %v20046_v7  ;;  %v11303_v50 = vadd.f32 %v11298_v58, %v11289_v53  ;;  %v11630_v39 = vsel %vm9531_vm4, %v23127_v3, %v23156_v22  ;;  %v11650_v23 = vadd.f32 %v23169_v42, %v11636_v46  ;;  %v23174_v7 = vld [vmem:[#allocation63_spill] sm:$0xff]  ;;  %v20176_v58 = vpop.permute.xlu1 %12381  ;;  %v23177_v53 = vld [vmem:[#allocation65_spill] sm:$0xff] }
 0x603   : > { %12603 = vrot.lane.b32.xlu1 %v23168_v61, %s22342_s27  ;;  %v11297_v47 = vsel %vm23170_vm2, %v23129_v0, %v23159_v16  ;;  %v11326_v51 = vsel %vm21974_vm9, %v23172_v43, %v23171_v17  ;;  %v11621_v61 = vadd.f32 %v11616_v2, %v11605_v62  ;;  %vm23175_vm11 = vcmask 826368  }
 0x604   : > { %v11681_v63 = vsel %vm23175_vm11, %v23174_v7, %v23173_v30  ;;  %v11317_v3 = vadd.f32 %v11312_v19, %v11303_v50  ;;  %vm23176_vm1 = vcmask 965632   ;;  %v11669_v46 = vadd.f32 %v11663_v35, %v11650_v23  ;;  %v23180_v19 = vld [vmem:[#allocation127_spill] sm:$0xff]  ;;  %v20200_v23 = vpop.permute.xlu0 %12409 }
 0x605   : > { %v11644_v22 = vsel %vm23176_vm1, %v23131_v13, %v23169_v42  ;;  %v11720_v12 = vadd.f32 %v23177_v53, %v11703_v8  ;;  %v23178_v0 = vsub.f32 0.0, %v19795_v18  ;;  %v11288_v16 = vadd.f32 %v11283_v32, %v11274_v60  ;;  %v23184_v32 = vld [vmem:[#allocation48_spill] sm:$0xff] }
 0x606   : > { %v11311_v2 = vsel %vm23164_vm12, %v23133_v25, %v23163_v56  ;;  %v11635_v62 = vadd.f32 %v11630_v39, %v11621_v61  ;;  %vm23181_vm2 = vcmask 818176   ;;  %v23182_v13 = vsub.f32 0.0, %v19717_v10  ;;  %v23185_v61 = vld [vmem:[#allocation26_spill] sm:$0xff] }
 0x607   : > { %12635 = vrot.lane.b32.xlu0 %v23178_v0, %s14676_s0  ;;  %v11699_v50 = vsel %vm23181_vm2, %v23180_v19, %v23179_v11  ;;  %v20194_v8 = vadd.f32 %v11326_v51, %v11317_v3  ;;  %v11662_v35 = vsel %vm9567_vm10, %v23136_v29, %v23166_v57  ;;  %v11687_v60 = vadd.f32 %v11681_v63, %v11669_v46  ;;  %v23186_v0 = vld [vmem:[#allocation18_spill] sm:$0xff]  ;;  %v23190_v3 = vld [vmem:[#allocation69_spill] sm:$0xff] }
 0x608   : > { %12618 = vrot.lane.b32.xlu1 %v23182_v13, %s22247_s7  ;;  %v11737_v42 = vadd.f32 %v23184_v32, %v11720_v12  ;;  %v11276_v25 = vadd.f32 %v23143_v38, %v11262_v49  ;;  %v11302_v56 = vadd.f32 %v11297_v47, %v11288_v16  ;;  %v11649_v39 = vadd.f32 %v11644_v22, %v11635_v62  ;;  %v20206_v13 = vpop.permute.xlu1 %12395  ;;  %v23191_v22 = vld [vmem:[#allocation82_spill] sm:$0xff]  ;;  %v23192_v16 = vld [vmem:[#allocation171_spill] sm:$0xff] }
 0x609   : > { %23183 = vst [vmem:[#allocation227_spill] sm:$0xff] %v20194_v8  ;;  %vm23187_vm11 = vcmask 687104   ;;  %v21952_v51 = vsub.f32 0.0, %v20133_v33  ;;  %v11325_v29 = vsel %vm21974_vm9, %v23141_v45, %v23172_v43  ;;  %vm23188_vm1 = vcmask 826368   ;;  %v23194_v62 = vld [vmem:[#allocation67_spill] sm:$0xff] }
 0x60a   : > { %v11716_v55 = vsel %vm23187_vm11, %v23186_v0, %v23185_v61  ;;  %v11680_v12 = vsel %vm23188_vm1, %v23152_v1, %v23174_v7  ;;  %v11705_v57 = vadd.f32 %v11699_v50, %v11687_v60  ;;  %v23189_v38 = vsub.f32 0.0, %v20105_v9  ;;  %vm23199_vm1 = vmmov %vm23164_vm12  ;;  %v23223_v9 = vld [vmem:[#allocation71_spill] sm:$0xff] }
 0x60b   : > { %v11316_v49 = vadd.f32 %v11311_v2, %v11302_v56  ;;  %v11290_v47 = vadd.f32 %v23149_v27, %v11276_v25  ;;  %v11668_v63 = vadd.f32 %v11662_v35, %v11649_v39  ;;  %v11733_v46 = vsel %vm23164_vm12, %v23191_v22, %v23190_v3  ;;  %v20232_v27 = vpop.permute.xlu0 %12034  ;;  %v23197_v25 = vld [vmem:[#allocation79_spill] sm:$0xff] }
 0x60c   : > { %12639 = vrot.lane.b32.xlu0 %v23189_v38, %s14676_s0  ;;  %v23193_v45 = vsub.f32 0.0, %v23192_v16  ;;  %v21950_v43 = vsub.f32 0.0, %v20194_v8  ;;  %v11698_v1 = vsel %vm23181_vm2, %v23154_v54, %v23180_v19  ;;  %v11722_v7 = vadd.f32 %v11716_v55, %v11705_v57  ;;  %v23198_v56 = vld [vmem:[#allocation19_spill] sm:$0xff]  ;;  %v20240_v38 = vpop.permute.xlu1 %12407  ;;  %v23220_v8 = vld [vmem:[#allocation145_spill] sm:$0xff] }
 0x60d   : > { %v20230_v2 = vadd.f32 %v23194_v62, %v11737_v42  ;;  %v11304_v50 = vadd.f32 %v23158_v26, %v11290_v47  ;;  %v20235_v35 = vadd.f32 %v11325_v29, %v11316_v49  ;;  %v11686_v60 = vadd.f32 %v11680_v12, %v11668_v63 }
 0x60e   : > { %12622 = vrot.lane.b32.xlu1 %v23193_v45, %s22247_s7  ;;  %v11750_v39 = vsel %vm21974_vm9, %v23198_v56, %v23197_v25  ;;  %v11715_v54 = vsel %vm23187_vm11, %v23177_v53, %v23186_v0  ;;  %v11739_v55 = vadd.f32 %v11733_v46, %v11722_v7  ;;  %v11732_v42 = vsel %vm23199_vm1, %v23184_v32, %v23191_v22 }
 0x60f   : > { %23195 = vst [vmem:[#allocation221_spill] sm:$0xff] %v20230_v2  ;;  %23196 = vst [vmem:[#allocation229_spill] sm:$0xff] %v20235_v35  ;;  %v11318_v26 = vadd.f32 %v23162_v52, %v11304_v50  ;;  %v11704_v19 = vadd.f32 %v11698_v1, %v11686_v60  ;;  %v21953_v29 = vsub.f32 0.0, %v20230_v2  ;;  %v20258_v0 = vpop.permute.xlu0 %12423  ;;  %v21954_v12 = vsub.f32 0.0, %v20235_v35  ;;  %v23205_v60 = vld [vmem:[#allocation161_spill] sm:$0xff]  ;;  %v23225_v35 = vld [vmem:[#allocation180_spill] sm:$0xff] }
 0x610   : > { %12655 = vrot.lane.b32.xlu0 %v21950_v43, %s14677_s1  ;;  %v20256_v53 = vadd.f32 %v11750_v39, %v11739_v55  ;;  %v20264_v49 = vpop.permute.xlu1 %12032  ;;  %v11749_v47 = vsel %vm21974_vm9, %v23194_v62, %v23198_v56  ;;  %v23206_v56 = vld [vmem:[#allocation80_spill] sm:$0xff]  ;;  %vm23207_vm12 = vcmask 1039360   ;;  %v23208_v55 = vld [vmem:[#allocation162_spill] sm:$0xff]  ;;  %vm23210_vm2 = vcmask 1031168  }
 0x611   : > { %v20262_v57 = vadd.f32 %v23171_v17, %v11318_v26  ;;  %v11721_v52 = vadd.f32 %v11715_v54, %v11704_v19  ;;  %v12173_v39 = vsel %vm23207_vm12, %v23206_v56, %v23205_v60  ;;  %v23209_v26 = vld [vmem:[#allocation46_spill] sm:$0xff]  ;;  %vm23214_vm11 = vcmask 900096   ;;  %vm23218_vm1 = vmmov %vm23207_vm12 }
 0x612   : > { %12637 = vrot.lane.b32.xlu1 %v21952_v51, %s14676_s0  ;;  %23200 = vst [vmem:[#allocation199_spill] sm:$0xff] %v20256_v53  ;;  %v21948_v17 = vsub.f32 0.0, %v20256_v53  ;;  %v12187_v19 = vsel %vm23210_vm2, %v23209_v26, %v23208_v55  ;;  %v23217_v51 = vld [vmem:[#allocation73_spill] sm:$0xff]  ;;  %vm23221_vm12 = vcmask 891904  }
 0x613   : > { %23201 = vst [vmem:[#allocation191_spill] sm:$0xff] %v20262_v57  ;;  %v11738_v32 = vadd.f32 %v11732_v42, %v11721_v52  ;;  %v20276_v63 = vpop.permute.xlu0 %12049  ;;  %v21951_v22 = vsub.f32 0.0, %v20262_v57  ;;  %v23211_v42 = vld [vmem:[#allocation206_spill] sm:$0xff]  ;;  %v23222_v57 = vld [vmem:[#allocation84_spill] sm:$0xff] }
 0x614   : > { %12671 = vrot.lane.b32.xlu0 %v21953_v29, %s14678_s10  ;;  %v20281_v45 = vpop.permute.xlu1 %12421  ;;  %v12178_v52 = vadd.f32 %v12173_v39, %v23211_v42  ;;  %v11778_v53 = vadd.f32 %v23206_v56, %v23211_v42  ;;  %v11788_v33 = vsel %vm23210_vm2, %v23223_v9, %v23222_v57  ;;  %v23227_v42 = vld [vmem:[#allocation81_spill] sm:$0xff] }
 0x615   : > { %v20279_v46 = vadd.f32 %v11749_v47, %v11738_v32  ;;  %v23212_v32 = vld [vmem:[#allocation170_spill] sm:$0xff] }
 0x616   : > { %12653 = vrot.lane.b32.xlu1 %v21954_v12, %s14677_s1  ;;  %v12192_v12 = vadd.f32 %v12187_v19, %v12178_v52  ;;  %v23228_v52 = vld [vmem:[#allocation382_spill] sm:$0xff]  ;;  %v11795_v25 = vadd.f32 %v23209_v26, %v11778_v53  ;;  %v23238_v53 = vld [vmem:[#allocation131_spill] sm:$0xff] }
 0x617   : > { %23202 = vst [vmem:[#allocation231_spill] sm:$0xff] %v20279_v46  ;;  %v20289_v1 = vpop.permute.xlu0 %12439  ;;  %v21949_v7 = vsub.f32 0.0, %v20279_v46  ;;  %v23219_v46 = vld [vmem:[#allocation166_spill] sm:$0xff] }
 0x618   : > { %12675 = vrot.lane.b32.xlu0 %v21948_v17, %s14678_s10  ;;  %23203 = vst [vmem:[#allocation201_spill] sm:$0xff] %v20289_v1  ;;  %v20292_v62 = vpop.permute.xlu1 %12047  ;;  %v23213_v17 = vld [vmem:[#allocation142_spill] sm:$0xff]  ;;  %v12223_v39 = vsel %vm23221_vm12, %v23220_v8, %v23219_v46  ;;  %vm23230_vm12 = vmmov %vm23210_vm2  ;;  %vm23234_vm2 = vcmask 891904   ;;  %v23246_v1 = vld [vmem:[#allocation181_spill] sm:$0xff] }
 0x619   : > { %v11789_v9 = vsel %vm23230_vm12, %v23222_v57, %v23209_v26  ;;  %v23242_v57 = vld [vmem:[#allocation391_spill] sm:$0xff] }
 0x61a   : > { %12657 = vrot.lane.b32.xlu1 %v21951_v22, %s14677_s1  ;;  %v23216_v22 = vld [vmem:[#allocation129_spill] sm:$0xff] }
 0x61b   : > { %v20297_v50 = vpop.permute.xlu0 %12443  ;;  %v11771_v29 = vsel %vm23218_vm1, %v23217_v51, %v23216_v22 }
 0x61c   : > { %23204 = vst [vmem:[#allocation223_spill] sm:$0xff] %v20297_v50  ;;  %v20302_v54 = vpop.permute.xlu1 %12051  ;;  %v11776_v18 = vadd.f32 %v11771_v29, %v23225_v35  ;;  %v23232_v29 = vld [vmem:[#allocation66_spill] sm:$0xff]  ;;  %v23233_v50 = vld [vmem:[#allocation392_spill] sm:$0xff] }
 0x61e   : > { %12673 = vrot.lane.b32.xlu1 %v21949_v7, %s14678_s10  ;;  %v12205_v7 = vsel %vm23214_vm11, %v23213_v17, %v23212_v32  ;;  %vm23226_vm11 = vmmov %vm23218_vm1  ;;  %vm23229_vm1 = vcmask 900096  }
 0x61f   : > { %v20308_v47 = vpop.permute.xlu0 %12066  ;;  %v12211_v16 = vadd.f32 %v12205_v7, %v12192_v12  ;;  %v11772_v51 = vsel %vm23226_vm11, %v23216_v22, %v23206_v56  ;;  %v11802_v10 = vsel %vm23229_vm1, %v23228_v52, %v23227_v42  ;;  %v11793_v12 = vadd.f32 %v11788_v33, %v11776_v18  ;;  %v23231_v7 = vld [vmem:[#allocation205_spill] sm:$0xff]  ;;  %vm23236_vm11 = vmmov %vm23229_vm1  ;;  %v23241_v33 = vld [vmem:[#allocation83_spill] sm:$0xff] }
 0x620   : > { %v20313_v43 = vpop.permute.xlu1 %12441  ;;  %v11777_v35 = vadd.f32 %v11772_v51, %v23231_v7  ;;  %v11816_v22 = vsel %vm23234_vm2, %v23233_v50, %v23232_v29  ;;  %v11803_v52 = vsel %vm23236_vm11, %v23227_v42, %v23213_v17  ;;  %vm23239_vm1 = vcmask 883712  }
 0x621   : > { %23215 = vst [vmem:[#allocation233_spill] sm:$0xff] %v20313_v43  ;;  %v12229_v5 = vadd.f32 %v12223_v39, %v12211_v16  ;;  %v11807_v16 = vadd.f32 %v11802_v10, %v11793_v12  ;;  %v23237_v39 = vld [vmem:[#allocation198_spill] sm:$0xff]  ;;  %vm23243_vm12 = vmmov %vm23239_vm1  ;;  %v11809_v50 = vadd.f32 %v23213_v17, %v11795_v25  ;;  %v11817_v7 = vsel %vm23234_vm2, %v23232_v29, %v23220_v8  ;;  %v23244_v12 = vld [vmem:[#allocation143_spill] sm:$0xff] }
 0x622   : > { %v11794_v18 = vadd.f32 %v11789_v9, %v11777_v35  ;;  %v11830_v26 = vsel %vm23243_vm12, %v23242_v57, %v23241_v33  ;;  %vm23248_vm11 = vmmov %vm23239_vm1  ;;  %v23250_v29 = vld [vmem:[#allocation158_spill] sm:$0xff]  ;;  %vm23262_vm12 = vcmask 482304  }
 0x623   : > { %v20326_v2 = vpop.permute.xlu0 %12457  ;;  %v11821_v42 = vadd.f32 %v11816_v22, %v11807_v16  ;;  %v11823_v35 = vadd.f32 %v23220_v8, %v11809_v50  ;;  %v23251_v22 = vld [vmem:[#allocation397_spill] sm:$0xff]  ;;  %v23254_v50 = vld [vmem:[#allocation404_spill] sm:$0xff] }
 0x624   : > { %23224 = vst [vmem:[#allocation203_spill] sm:$0xff] %v20326_v2  ;;  %v20332_v19 = vpop.permute.xlu1 %12064  ;;  %v12241_v2 = vsel %vm23239_vm1, %v23238_v53, %v23237_v39  ;;  %v11808_v10 = vadd.f32 %v11803_v52, %v11794_v18  ;;  %v11858_v52 = vsel %vm9298_vm7, %v23251_v22, %v23250_v29  ;;  %v23252_v16 = vld [vmem:[#allocation77_spill] sm:$0xff]  ;;  %vm23259_vm1 = vcmask 490496  }
 0x625   : > { %v12247_v51 = vadd.f32 %v12241_v2, %v12229_v5  ;;  %v11831_v5 = vsel %vm23248_vm11, %v23241_v33, %v23238_v53  ;;  %v11835_v2 = vadd.f32 %v11830_v26, %v11821_v42  ;;  %v11845_v18 = vsel %vm9280_vm6, %v23244_v12, %v23252_v16  ;;  %v23255_v26 = vld [vmem:[#allocation192_spill] sm:$0xff]  ;;  %vm23264_vm2 = vmmov %vm23259_vm1 }
 0x626   : > { %v11822_v17 = vadd.f32 %v11817_v7, %v11808_v10  ;;  %v23257_v10 = vld [vmem:[#allocation92_spill] sm:$0xff]  ;;  %vm23267_vm11 = vcmask 474112  }
 0x627   : > { %v20345_v56 = vpop.permute.xlu0 %12461 }
 0x628   : > { %23235 = vst [vmem:[#allocation111_spill] sm:$0xff] %v20345_v56  ;;  %v20353_v3 = vpop.permute.xlu1 %12068  ;;  %v23245_v56 = vld [vmem:[#allocation398_spill] sm:$0xff]  ;;  %v11836_v8 = vadd.f32 %v11831_v5, %v11822_v17  ;;  %v23260_v17 = vld [vmem:[#allocation85_spill] sm:$0xff] }
 0x629   : > { %23240 = vst [vmem:[#allocation225_spill] sm:$0xff] %v20353_v3  ;;  %v11844_v43 = vsel %vm9280_vm6, %v23245_v56, %v23244_v12  ;;  %v12264_v3 = vadd.f32 %v23246_v1, %v12247_v51  ;;  %v11837_v56 = vadd.f32 %v23238_v53, %v11823_v35  ;;  %v23253_v51 = vld [vmem:[#allocation40_spill] sm:$0xff]  ;;  %v11859_v53 = vsel %vm9298_vm7, %v23250_v29, %v23257_v10 }
 0x62a   : > { %v11849_v57 = vadd.f32 %v11844_v43, %v11835_v2  ;;  %v11870_v33 = vsel %vm9316_vm8, %v23254_v50, %v23253_v51  ;;  %v11850_v12 = vadd.f32 %v11845_v18, %v11836_v8  ;;  %v23258_v43 = vld [vmem:[#allocation39_spill] sm:$0xff] }
 0x62b   : > { %v20366_v9 = vpop.permute.xlu0 %12082  ;;  %v12281_v42 = vadd.f32 %v23255_v26, %v12264_v3  ;;  %v11851_v7 = vadd.f32 %v23252_v16, %v11837_v56  ;;  %v11886_v5 = vsel %vm23259_vm1, %v23074_v36, %v23258_v43  ;;  %v11871_v56 = vsel %vm9316_vm8, %v23253_v51, %v23260_v17 }
 0x62c   : > { %23247 = vst [vmem:[#allocation207_spill] sm:$0xff] %v20366_v9  ;;  %v20372_v25 = vpop.permute.xlu1 %12459  ;;  %v11863_v35 = vadd.f32 %v11858_v52, %v11849_v57  ;;  %v11864_v50 = vadd.f32 %v11859_v53, %v11850_v12  ;;  %v23263_v57 = vld [vmem:[#allocation47_spill] sm:$0xff]  ;;  %vm23269_vm1 = vcmask 1039360   ;;  %v23270_v12 = vld [vmem:[#allocation152_spill] sm:$0xff] }
 0x62d   : > { %23249 = vst [vmem:[#allocation235_spill] sm:$0xff] %v20372_v25  ;;  %v12295_v2 = vadd.f32 %v19916_v40, %v12281_v42  ;;  %v11865_v3 = vadd.f32 %v23257_v10, %v11851_v7  ;;  %v11887_v36 = vsel %vm23264_vm2, %v23258_v43, %v23263_v57  ;;  %v23266_v10 = vld [vmem:[#allocation148_spill] sm:$0xff]  ;;  %vm23273_vm2 = vcmask 343040  }
 0x62e   : > { %v11875_v16 = vadd.f32 %v11870_v33, %v11863_v35  ;;  %v11876_v7 = vadd.f32 %v11871_v56, %v11864_v50  ;;  %v11914_v51 = vsel %vm23267_vm11, %v23090_v41, %v23266_v10  ;;  %v23268_v33 = vld [vmem:[#allocation174_spill] sm:$0xff]  ;;  %v23272_v56 = vld [vmem:[#allocation411_spill] sm:$0xff]  ;;  %vm23275_vm11 = vcmask 1031168  }
 0x62f   : > { %v20385_v25 = vpop.permute.xlu0 %12477  ;;  %v11877_v18 = vadd.f32 %v23260_v17, %v11865_v3  ;;  %v12314_v53 = vadd.f32 %v19911_v15, %v12295_v2  ;;  %v23271_v17 = vld [vmem:[#allocation36_spill] sm:$0xff]  ;;  %v23274_v50 = vld [vmem:[#allocation167_spill] sm:$0xff]  ;;  %v23277_v2 = vld [vmem:[#allocation173_spill] sm:$0xff] }
 0x630   : > { %23256 = vst [vmem:[#allocation202_spill] sm:$0xff] %v20385_v25  ;;  %v20391_v22 = vpop.permute.xlu1 %12080  ;;  %v23261_v25 = vld [vmem:[#allocation144_spill] sm:$0xff]  ;;  %v11891_v8 = vadd.f32 %v11886_v5, %v11875_v16  ;;  %v11892_v3 = vadd.f32 %v11887_v36, %v11876_v7  ;;  %v11932_v16 = vsel %vm23273_vm2, %v23272_v56, %v23271_v17  ;;  %v12188_v41 = vsel %vm23275_vm11, %v23208_v55, %v23274_v50  ;;  %v23280_v36 = vld [vmem:[#allocation267_spill] sm:$0xff]  ;;  %v23282_v55 = vld [vmem:[#allocation165_spill] sm:$0xff] }
 0x631   : > { %v11900_v29 = vsel %vm23262_vm12, %v23081_v34, %v23261_v25  ;;  %v12174_v34 = vsel %vm23269_vm1, %v23205_v60, %v23268_v33  ;;  %v11893_v35 = vadd.f32 %v23263_v57, %v11877_v18  ;;  %v11901_v43 = vsel %vm23262_vm12, %v23261_v25, %v23270_v12  ;;  %v23279_v25 = vld [vmem:[#allocation265_spill] sm:$0xff] }
 0x632   : > { %v11905_v5 = vadd.f32 %v11900_v29, %v11891_v8  ;;  %v12331_v60 = vadd.f32 %v20008_v21, %v12314_v53  ;;  %vm23278_vm1 = vcmask 474112   ;;  %v12179_v29 = vadd.f32 %v12174_v34, %v23279_v25 }
 0x633   : > { %v20404_v52 = vpop.permute.xlu0 %12094  ;;  %v11915_v18 = vsel %vm23278_vm1, %v23266_v10, %v23277_v2  ;;  %v12180_v8 = vadd.f32 %v23268_v33, %v23280_v36  ;;  %v11907_v56 = vadd.f32 %v23270_v12, %v11893_v35  ;;  %v11906_v9 = vadd.f32 %v11901_v43, %v11892_v3  ;;  %v23286_v10 = vld [vmem:[#allocation146_spill] sm:$0xff] }
 0x634   : > { %v20410_v42 = vpop.permute.xlu1 %12475  ;;  %v11919_v57 = vadd.f32 %v11914_v51, %v11905_v5  ;;  %vm23283_vm12 = vcmask 900096   ;;  %vm23287_vm11 = vcmask 343040   ;;  %v12193_v5 = vadd.f32 %v12188_v41, %v12179_v29  ;;  %v23288_v36 = vld [vmem:[#allocation182_spill] sm:$0xff] }
 0x635   : > { %23265 = vst [vmem:[#allocation228_spill] sm:$0xff] %v20410_v42  ;;  %v12206_v53 = vsel %vm23283_vm12, %v23212_v32, %v23282_v55  ;;  %vm23285_vm2 = vmmov %vm23283_vm12  ;;  %v11933_v51 = vsel %vm23287_vm11, %v23271_v17, %v23286_v10  ;;  %v12194_v33 = vadd.f32 %v23274_v50, %v12180_v8  ;;  %v11920_v25 = vadd.f32 %v11915_v18, %v11906_v9  ;;  %v23290_v12 = vld [vmem:[#allocation54_spill] sm:$0xff]  ;;  %v23297_v8 = vld [vmem:[#allocation172_spill] sm:$0xff] }
 0x636   : > { %v11938_v34 = vadd.f32 %v11932_v16, %v11919_v57  ;;  %vm23289_vm1 = vcmask 891904   ;;  %v12348_v43 = vadd.f32 %v20002_v4, %v12331_v60  ;;  %v11921_v3 = vadd.f32 %v23277_v2, %v11907_v56  ;;  %v23293_v17 = vld [vmem:[#allocation50_spill] sm:$0xff]  ;;  %v23294_v16 = vld [vmem:[#allocation413_spill] sm:$0xff] }
 0x637   : > { %v20430_v42 = vpop.permute.xlu0 %12493  ;;  %v12224_v35 = vsel %vm23289_vm1, %v23219_v46, %v23288_v36  ;;  %vm23291_vm12 = vmmov %vm23289_vm1  ;;  %v11950_v41 = vsel %vm9408_vm13, %v23294_v16, %v23293_v17  ;;  %v12212_v50 = vadd.f32 %v12206_v53, %v12193_v5  ;;  %v11939_v57 = vadd.f32 %v11933_v51, %v11920_v25  ;;  %v23295_v46 = vld [vmem:[#allocation194_spill] sm:$0xff]  ;;  %v23303_v51 = vld [vmem:[#allocation156_spill] sm:$0xff] }
 0x638   : > { %23276 = vst [vmem:[#allocation107_spill] sm:$0xff] %v20430_v42  ;;  %v20438_v7 = vpop.permute.xlu1 %12479  ;;  %v23284_v42 = vld [vmem:[#allocation177_spill] sm:$0xff]  ;;  %v12225_v32 = vsel %vm23291_vm12, %v23288_v36, %v23290_v12  ;;  %v11956_v56 = vadd.f32 %v11950_v41, %v11938_v34  ;;  %v23302_v12 = vld [vmem:[#allocation415_spill] sm:$0xff]  ;;  %v12362_v34 = vadd.f32 %v12348_v43, %v23295_v46  ;;  %vm23315_vm12 = vcmask 490496  }
 0x639   : > { %23281 = vst [vmem:[#allocation106_spill] sm:$0xff] %v20438_v7  ;;  %v12207_v61 = vsel %vm23285_vm2, %v23282_v55, %v23284_v42  ;;  %vm23296_vm2 = vmmov %vm23287_vm11  ;;  %vm23298_vm11 = vcmask 883712   ;;  %v23299_v55 = vld [vmem:[#allocation169_spill] sm:$0xff]  ;;  %v12230_v53 = vadd.f32 %v12224_v35, %v12212_v50 }
 0x63a   : > { %v12213_v9 = vadd.f32 %v12207_v61, %v12194_v33  ;;  %v11934_v29 = vsel %vm23296_vm2, %v23286_v10, %v23295_v46  ;;  %v12242_v60 = vsel %vm23298_vm11, %v23237_v39, %v23297_v8  ;;  %vm23300_vm1 = vmmov %vm23298_vm11  ;;  %v23301_v36 = vld [vmem:[#allocation157_spill] sm:$0xff]  ;;  %v11951_v33 = vsel %vm9408_vm13, %v23293_v17, %v23303_v51 }
 0x63b   : > { %v20458_v42 = vpop.permute.xlu0 %12497  ;;  %v12243_v2 = vsel %vm23300_vm1, %v23297_v8, %v23299_v55  ;;  %v11968_v61 = vsel %vm9426_vm14, %v23302_v12, %v23301_v36  ;;  %v23304_v10 = vld [vmem:[#allocation217_spill] sm:$0xff]  ;;  %v11940_v8 = vadd.f32 %v11934_v29, %v11921_v3  ;;  %v23306_v55 = vld [vmem:[#allocation154_spill] sm:$0xff]  ;;  %v11957_v29 = vadd.f32 %v11951_v33, %v11939_v57  ;;  %vm23317_vm2 = vmmov %vm23315_vm12 }
 0x63c   : > { %23292 = vst [vmem:[#allocation234_spill] sm:$0xff] %v20458_v42  ;;  %v20464_v18 = vpop.permute.xlu1 %12096  ;;  %v12231_v5 = vadd.f32 %v12225_v32, %v12213_v9  ;;  %v12259_v25 = vsel %vm9280_vm6, %v23246_v1, %v23304_v10  ;;  %v23305_v39 = vld [vmem:[#allocation189_spill] sm:$0xff]  ;;  %v11952_v35 = vsel %vm9408_vm13, %v23303_v51, %v23306_v55  ;;  %v12248_v32 = vadd.f32 %v12242_v60, %v12230_v53  ;;  %v23307_v9 = vld [vmem:[#allocation160_spill] sm:$0xff] }
 0x63d   : > { %v12260_v16 = vsel %vm9280_vm6, %v23304_v10, %v23305_v39  ;;  %v11969_v1 = vsel %vm9426_vm14, %v23301_v36, %v23307_v9  ;;  %v11974_v12 = vadd.f32 %v11968_v61, %v11956_v56  ;;  %v23308_v42 = vld [vmem:[#allocation184_spill] sm:$0xff]  ;;  %v23310_v39 = vld [vmem:[#allocation175_spill] sm:$0xff]  ;;  %v23311_v51 = vld [vmem:[#allocation193_spill] sm:$0xff]  ;;  %v12376_v61 = vadd.f32 %v12362_v34, %v23306_v55 }
 0x63e   : > { %v12249_v50 = vadd.f32 %v12243_v2, %v12231_v5  ;;  %v12276_v43 = vsel %vm9298_vm7, %v23255_v26, %v23308_v42  ;;  %v23309_v10 = vld [vmem:[#allocation188_spill] sm:$0xff]  ;;  %v11970_v60 = vsel %vm9426_vm14, %v23307_v9, %v23310_v39  ;;  %v12265_v2 = vadd.f32 %v12259_v25, %v12248_v32  ;;  %v23312_v36 = vld [vmem:[#allocation211_spill] sm:$0xff]  ;;  %v23318_v9 = vld [vmem:[#allocation178_spill] sm:$0xff] }
 0x63f   : > { %v20488_v41 = vpop.permute.xlu0 %12110  ;;  %v12277_v3 = vsel %vm9298_vm7, %v23308_v42, %v23309_v10  ;;  %v11958_v5 = vadd.f32 %v11952_v35, %v11940_v8  ;;  %v12290_v56 = vsel %vm9316_vm8, %v19916_v40, %v23311_v51  ;;  %v12291_v26 = vsel %vm9316_vm8, %v23311_v51, %v23312_v36  ;;  %v23313_v25 = vld [vmem:[#allocation168_spill] sm:$0xff]  ;;  %v23314_v35 = vld [vmem:[#allocation195_spill] sm:$0xff] }
 0x640   : > { %v20493_v17 = vpop.permute.xlu1 %12495  ;;  %v12266_v53 = vadd.f32 %v12260_v16, %v12249_v50  ;;  %v11975_v42 = vadd.f32 %v11969_v1, %v11957_v29  ;;  %v12282_v57 = vadd.f32 %v12276_v43, %v12265_v2  ;;  %v11991_v16 = vadd.f32 %v23313_v25, %v11974_v12  ;;  %v23316_v32 = vld [vmem:[#allocation200_spill] sm:$0xff]  ;;  %v23319_v1 = vld [vmem:[#allocation151_spill] sm:$0xff]  ;;  %v23320_v12 = vld [vmem:[#allocation153_spill] sm:$0xff] }
 0x641   : > { %v11976_v8 = vadd.f32 %v11970_v60, %v11958_v5  ;;  %v12309_v40 = vsel %vm23315_vm12, %v19911_v15, %v23314_v35  ;;  %v12310_v50 = vsel %vm23317_vm2, %v23314_v35, %v23316_v32  ;;  %v11986_v34 = vsel %vm9448_vm0, %v23313_v25, %v23318_v9  ;;  %v23321_v2 = vld [vmem:[#allocation219_spill] sm:$0xff] }
 0x642   : > { %v12283_v33 = vadd.f32 %v12277_v3, %v12266_v53  ;;  %v11987_v43 = vsel %vm9448_vm0, %v23318_v9, %v23319_v1  ;;  %v12296_v3 = vadd.f32 %v12290_v56, %v12282_v57  ;;  %v12005_v60 = vadd.f32 %v23320_v12, %v11991_v16 }
 0x643   : > { %v20514_v7 = vpop.permute.xlu0 %12513  ;;  %vm23322_vm11 = vcmask 482304   ;;  %v12390_v53 = vadd.f32 %v12376_v61, %v23310_v39  ;;  %v11992_v56 = vadd.f32 %v11986_v34, %v11975_v42  ;;  %vm23324_vm12 = vcmask 474112   ;;  %v23326_v61 = vld [vmem:[#allocation196_spill] sm:$0xff]  ;;  %v23329_v42 = vld [vmem:[#allocation159_spill] sm:$0xff] }
 0x644   : > { %v20516_v10 = vpop.permute.xlu1 %12108  ;;  %v12297_v29 = vadd.f32 %v12291_v26, %v12283_v33  ;;  %v12326_v15 = vsel %vm23322_vm11, %v20008_v21, %v23321_v2  ;;  %vm23323_vm1 = vmmov %vm23322_vm11  ;;  %v12315_v36 = vadd.f32 %v12309_v40, %v12296_v3  ;;  %v11993_v26 = vadd.f32 %v11987_v43, %v11976_v8  ;;  %v23327_v33 = vld [vmem:[#allocation150_spill] sm:$0xff]  ;;  %v23328_v40 = vld [vmem:[#allocation163_spill] sm:$0xff] }
 0x645   : > { %v12327_v5 = vsel %vm23323_vm1, %v23321_v2, %v20043_v48  ;;  %v12343_v57 = vsel %vm23324_vm12, %v20002_v4, %v20074_v31  ;;  %vm23325_vm2 = vmmov %vm23324_vm12  ;;  %v12001_v48 = vsel %vm9470_vm5, %v23327_v33, %v23326_v61  ;;  %v12022_v8 = vadd.f32 %v23329_v42, %v12005_v60 }
 0x646   : > { %v12316_v25 = vadd.f32 %v12310_v50, %v12297_v29  ;;  %v12344_v21 = vsel %vm23325_vm2, %v20074_v31, %v20034_v59  ;;  %v12332_v16 = vadd.f32 %v12326_v15, %v12315_v36  ;;  %v12036_v50 = vsel %vm9513_vm15, %v23328_v40, %v20264_v49  ;;  %v23332_v15 = vld [vmem:[#allocation164_spill] sm:$0xff] }
 0x647   : > { %v20539_v51 = vpop.permute.xlu0 %12122  ;;  %vm23330_vm11 = vcmask 343040   ;;  %v12404_v31 = vadd.f32 %v12390_v53, %v23319_v1  ;;  %v12000_v34 = vsel %vm9470_vm5, %v23320_v12, %v23327_v33  ;;  %v12053_v29 = vsel %vm9531_vm4, %v20292_v62, %v20276_v63  ;;  %v23333_v12 = vld [vmem:[#allocation155_spill] sm:$0xff] }
 0x648   : > { %v20541_v35 = vpop.permute.xlu1 %12511  ;;  %v12333_v32 = vadd.f32 %v12327_v5, %v12316_v25  ;;  %v12357_v4 = vsel %vm23330_vm11, %v23295_v46, %v20103_v24  ;;  %vm23331_vm1 = vmmov %vm23330_vm11  ;;  %v12349_v43 = vadd.f32 %v12343_v57, %v12332_v16  ;;  %v12007_v46 = vadd.f32 %v12001_v48, %v11993_v26 }
 0x649   : > { %v12358_v59 = vsel %vm23331_vm1, %v20103_v24, %v20065_v37  ;;  %v12371_v37 = vsel %vm9408_vm13, %v23306_v55, %v20138_v14  ;;  %v12372_v24 = vsel %vm9408_vm13, %v20138_v14, %v20097_v44  ;;  %v12041_v2 = vadd.f32 %v12036_v50, %v12022_v8 }
 0x64a   : > { %v12350_v3 = vadd.f32 %v12344_v21, %v12333_v32  ;;  %v12018_v53 = vsel %vm9492_vm3, %v23333_v12, %v23332_v15  ;;  %v12363_v5 = vadd.f32 %v12357_v4, %v12349_v43  ;;  %vm23334_vm12 = vcmask 965632  }
 0x64b   : > { %v20563_v9 = vpop.permute.xlu0 %12529  ;;  %v12070_v62 = vsel %vm23334_vm12, %v20332_v19, %v20308_v47  ;;  %v12385_v25 = vsel %vm9426_vm14, %v23310_v39, %v20176_v58  ;;  %v12386_v55 = vsel %vm9426_vm14, %v20176_v58, %v20130_v6  ;;  %v12058_v44 = vadd.f32 %v12053_v29, %v12041_v2 }
 0x64c   : > { %v20571_v60 = vpop.permute.xlu1 %12515  ;;  %v12364_v36 = vadd.f32 %v12358_v59, %v12350_v3  ;;  %v12416_v14 = vadd.f32 %v12404_v31, %v23326_v61  ;;  %v12017_v57 = vsel %vm9492_vm3, %v23329_v42, %v23333_v12  ;;  %v12377_v21 = vadd.f32 %v12371_v37, %v12363_v5 }
 0x64d   : > { %v12084_v19 = vsel %vm9567_vm10, %v23165_v28, %v20391_v22  ;;  %v12006_v48 = vadd.f32 %v12000_v34, %v11992_v56  ;;  %v12399_v6 = vsel %vm9448_vm0, %v23319_v1, %v20206_v13  ;;  %v12400_v58 = vsel %vm9448_vm0, %v20206_v13, %v20165_v20 }
 0x64e   : > { %v12378_v33 = vadd.f32 %v12372_v24, %v12364_v36  ;;  %v12075_v16 = vadd.f32 %v12070_v62, %v12058_v44  ;;  %v12024_v32 = vadd.f32 %v12018_v53, %v12007_v46  ;;  %v12391_v40 = vadd.f32 %v12385_v25, %v12377_v21  ;;  %v23339_v24 = vld [vmem:[#allocation201_spill] sm:$0xff] }
 0x64f   : > { %v20592_v26 = vpop.permute.xlu0 %12533  ;;  %vm23335_vm2 = vcmask 826368   ;;  %v12023_v28 = vadd.f32 %v12017_v57, %v12006_v48  ;;  %v12037_v56 = vsel %vm9513_vm15, %v20264_v49, %v20232_v27  ;;  %v12430_v8 = vadd.f32 %v12416_v14, %v23332_v15  ;;  %v23343_v14 = vld [vmem:[#allocation69_spill] sm:$0xff]  ;;  %v23345_v48 = vld [vmem:[#allocation203_spill] sm:$0xff] }
 0x650   : > { %v20600_v39 = vpop.permute.xlu1 %12124  ;;  %v12392_v50 = vadd.f32 %v12386_v55, %v12378_v33  ;;  %v12098_v42 = vsel %vm23335_vm2, %v23173_v30, %v20404_v52  ;;  %v12089_v1 = vadd.f32 %v12084_v19, %v12075_v16  ;;  %v12405_v59 = vadd.f32 %v12399_v6, %v12391_v40  ;;  %v23347_v40 = vld [vmem:[#allocation223_spill] sm:$0xff] }
 0x651   : > { %v12043_v13 = vadd.f32 %v20232_v27, %v12024_v32  ;;  %vm23336_vm11 = vcmask 818176   ;;  %v12411_v30 = vsel %vm9470_vm5, %v23326_v61, %v20240_v38  ;;  %v12412_v49 = vsel %vm9470_vm5, %v20240_v38, %v20200_v23  ;;  %v23337_v61 = vld [vmem:[#allocation26_spill] sm:$0xff] }
 0x652   : > { %v12406_v20 = vadd.f32 %v12400_v58, %v12392_v50  ;;  %v12112_v31 = vsel %vm23336_vm11, %v23179_v11, %v20516_v10  ;;  %v12054_v43 = vsel %vm9531_vm4, %v20276_v63, %v20302_v54  ;;  %v12103_v3 = vadd.f32 %v12098_v42, %v12089_v1  ;;  %v23340_v63 = vld [vmem:[#allocation225_spill] sm:$0xff] }
 0x653   : > { %v20615_v4 = vpop.permute.xlu0 %12138  ;;  %v12042_v29 = vadd.f32 %v12037_v56, %v12023_v28  ;;  %v12425_v11 = vsel %vm9492_vm3, %v23332_v15, %v20281_v45  ;;  %v12426_v46 = vsel %vm9492_vm3, %v20281_v45, %v20258_v0  ;;  %vm23338_vm1 = vcmask 687104   ;;  %v23341_v45 = vld [vmem:[#allocation233_spill] sm:$0xff]  ;;  %v23348_v56 = vld [vmem:[#allocation79_spill] sm:$0xff] }
 0x654   : > { %v20621_v34 = vpop.permute.xlu1 %12531  ;;  %v12126_v37 = vsel %vm23338_vm1, %v23337_v61, %v20539_v51  ;;  %v12445_v23 = vsel %vm9513_vm15, %v20232_v27, %v23339_v24  ;;  %v12060_v38 = vadd.f32 %v20302_v54, %v12043_v13  ;;  %v12071_v2 = vsel %vm23334_vm12, %v20308_v47, %v23340_v63  ;;  %v23342_v27 = vld [vmem:[#allocation207_spill] sm:$0xff] }
 0x655   : > { %v12117_v12 = vadd.f32 %v12112_v31, %v12103_v3  ;;  %v12417_v53 = vadd.f32 %v12411_v30, %v12405_v59  ;;  %v12418_v5 = vadd.f32 %v12412_v49, %v12406_v20  ;;  %v12059_v0 = vadd.f32 %v12054_v43, %v12042_v29  ;;  %v23349_v59 = vld [vmem:[#allocation235_spill] sm:$0xff]  ;;  %v23352_v43 = vld [vmem:[#allocation228_spill] sm:$0xff] }
 0x656   : > { %v12446_v36 = vsel %vm9513_vm15, %v23339_v24, %v23341_v45  ;;  %v12077_v25 = vadd.f32 %v23340_v63, %v12060_v38  ;;  %v12085_v55 = vsel %vm9567_vm10, %v20391_v22, %v23342_v27  ;;  %vm23344_vm2 = vcmask 678912   ;;  %v23351_v30 = vld [vmem:[#allocation111_spill] sm:$0xff] }
 0x657   : > { %v20648_v15 = vpop.permute.xlu0 %12549  ;;  %v12131_v44 = vadd.f32 %v12126_v37, %v12117_v12  ;;  %v12431_v57 = vadd.f32 %v12425_v11, %v12417_v53  ;;  %v12432_v21 = vadd.f32 %v12426_v46, %v12418_v5  ;;  %v12451_v33 = vadd.f32 %v12445_v23, %v12430_v8  ;;  %v23353_v11 = vld [vmem:[#allocation202_spill] sm:$0xff]  ;;  %v23356_v38 = vld [vmem:[#allocation107_spill] sm:$0xff] }
 0x658   : > { %v12137_v62 = vpop.permute.xlu1 %12136  ;;  %v12076_v19 = vadd.f32 %v12071_v2, %v12059_v0  ;;  %v12463_v6 = vsel %vm9531_vm4, %v20302_v54, %v23345_v48  ;;  %v12091_v58 = vadd.f32 %v23342_v27, %v12077_v25  ;;  %vm23346_vm11 = vcmask 826368  }
 0x659   : > { %v12140_v47 = vsel %vm23344_vm2, %v23343_v14, %v12137_v62  ;;  %v12099_v16 = vsel %vm23346_vm11, %v20404_v52, %v20464_v18  ;;  %v12447_v50 = vsel %vm9513_vm15, %v23341_v45, %v23347_v40  ;;  %v12452_v42 = vadd.f32 %v12446_v36, %v12431_v57  ;;  %vm23354_vm2 = vmmov %vm23334_vm12  ;;  %v23361_v57 = vld [vmem:[#allocation234_spill] sm:$0xff] }
 0x65a   : > { %v12145_v32 = vadd.f32 %v12140_v47, %v12131_v44  ;;  %v12090_v28 = vadd.f32 %v12085_v55, %v12076_v19  ;;  %v12464_v54 = vsel %vm9531_vm4, %v23345_v48, %v23349_v59  ;;  %vm23350_vm1 = vcmask 818176   ;;  %v23359_v44 = vld [vmem:[#allocation106_spill] sm:$0xff] }
 0x65b   : > { %v12151_v22 = vpop.permute.xlu0 %12150  ;;  %v12113_v52 = vsel %vm23350_vm1, %v20516_v10, %v20488_v41  ;;  %v12105_v20 = vadd.f32 %v20464_v18, %v12091_v58  ;;  %v12469_v31 = vadd.f32 %v12463_v6, %v12451_v33  ;;  %v12465_v49 = vsel %vm9531_vm4, %v23349_v59, %v23351_v30 }
 0x65c   : > { %v12154_v8 = vsel %vm21974_vm9, %v23348_v56, %v12151_v22  ;;  %v12548_v1 = vpop.permute.xlu1 %12547  ;;  %v12481_v3 = vsel %vm23334_vm12, %v23340_v63, %v23352_v43  ;;  %v12104_v29 = vadd.f32 %v12099_v16, %v12090_v28  ;;  %v12482_v46 = vsel %vm23354_vm2, %v23352_v43, %v23353_v11 }
 0x65d   : > { %v20678_v13 = vadd.f32 %v12154_v8, %v12145_v32  ;;  %v12119_v10 = vadd.f32 %v20488_v41, %v12105_v20  ;;  %vm23355_vm11 = vcmask 687104   ;;  %v12453_v24 = vadd.f32 %v12447_v50, %v12432_v21 }
 0x65e   : > { %v12127_v61 = vsel %vm23355_vm11, %v20539_v51, %v20600_v39  ;;  %v12470_v23 = vadd.f32 %v12464_v54, %v12452_v42  ;;  %v12499_v2 = vsel %vm9567_vm10, %v23342_v27, %v23356_v38  ;;  %v12118_v63 = vadd.f32 %v12113_v52, %v12104_v29 }
 0x65f   : > { %v12162_v37 = vsub.f32 0.0, %v20678_v13  ;;  %v12565_v53 = vpop.permute.xlu0 %12564  ;;  %v12487_v5 = vadd.f32 %v12481_v3, %v12469_v31  ;;  %v12500_v0 = vsel %vm9567_vm10, %v23356_v38, %v20493_v17  ;;  %v12133_v45 = vadd.f32 %v20600_v39, %v12119_v10 }
 0x660   : > { %v12552_v12 = vpop.permute.xlu1 %12551  ;;  %vm23357_vm1 = vcmask 678912   ;;  %v12471_v36 = vadd.f32 %v12465_v49, %v12453_v24  ;;  %v12488_v25 = vadd.f32 %v12482_v46, %v12470_v23  ;;  %vm23358_vm12 = vcmask 826368  }
 0x661   : > { %v12141_v51 = vsel %vm23357_vm1, %v12137_v62, %v20615_v4  ;;  %12689 = vrot.lane.b32.xlu1 %v12162_v37, %s14679_s11  ;;  %v12517_v27 = vsel %vm23358_vm12, %v20464_v18, %v20541_v35  ;;  %v12132_v55 = vadd.f32 %v12127_v61, %v12118_v63  ;;  %v12483_v14 = vsel %vm23354_vm2, %v23353_v11, %v23359_v44  ;;  %vm23360_vm11 = vmmov %vm23358_vm12  ;;  %v23370_v63 = vld [vmem:[#allocation27_spill] sm:$0xff]  ;;  %v23379_v44 = vld [vmem:[#allocation28_spill] sm:$0xff] }
 0x662   : > { %v12505_v39 = vadd.f32 %v12499_v2, %v12487_v5  ;;  %v12518_v62 = vsel %vm23360_vm11, %v20541_v35, %v20514_v7  ;;  %v12147_v47 = vadd.f32 %v20615_v4, %v12133_v45  ;;  %v12501_v21 = vsel %vm9567_vm10, %v20493_v17, %v23361_v57  ;;  %vm23364_vm2 = vmmov %vm23360_vm11  ;;  %v23369_v2 = vld [vmem:[#allocation34_spill] sm:$0xff]  ;;  %v23373_v5 = vld [vmem:[#allocation29_spill] sm:$0xff] }
 0x663   : > { %v12506_v33 = vadd.f32 %v12500_v0, %v12488_v25  ;;  %vm23362_vm1 = vcmask 818176   ;;  %v12146_v19 = vadd.f32 %v12141_v51, %v12132_v55  ;;  %v12489_v4 = vadd.f32 %v12483_v14, %v12471_v36  ;;  %v12569_v17 = vpop.permute.xlu0 %12568  ;;  %v23375_v45 = vld [vmem:[#allocation24_spill] sm:$0xff]  ;;  %v23376_v25 = vld [vmem:[#allocation58_spill] sm:$0xff]  ;;  %v23378_v55 = vld [vmem:[#allocation35_spill] sm:$0xff] }
 0x664   : > { %v12535_v18 = vsel %vm23362_vm1, %v20488_v41, %v20563_v9  ;;  %v12153_v48 = vpop.permute.xlu1 %12152  ;;  %v12523_v6 = vadd.f32 %v12517_v27, %v12505_v39  ;;  %vm23363_vm12 = vmmov %vm23362_vm1  ;;  %v12519_v41 = vsel %vm23364_vm2, %v20514_v7, %v20571_v60  ;;  %vm23365_vm11 = vcmask 687104   ;;  %v23381_v39 = vld [vmem:[#allocation60_spill] sm:$0xff]  ;;  %v23383_v57 = vld [vmem:[#allocation25_spill] sm:$0xff] }
 0x665   : > { %v12536_v58 = vsel %vm23363_vm12, %v20563_v9, %v20621_v34  ;;  %v12155_v35 = vsel %vm21974_vm9, %v12151_v22, %v12153_v48  ;;  %v20726_v16 = vadd.f32 %v12153_v48, %v12147_v47  ;;  %v12524_v32 = vadd.f32 %v12518_v62, %v12506_v33  ;;  %vm23367_vm2 = vmmov %vm23365_vm11  ;;  %v23384_v33 = vld [vmem:[#allocation45_spill] sm:$0xff] }
 0x666   : > { %v20728_v40 = vadd.f32 %v12155_v35, %v12146_v19  ;;  %v12541_v50 = vadd.f32 %v12535_v18, %v12523_v6  ;;  %v12553_v42 = vsel %vm23365_vm11, %v12548_v1, %v20648_v15  ;;  %v12507_v9 = vadd.f32 %v12501_v21, %v12489_v4  ;;  %v23385_v18 = vld [vmem:[#allocation31_spill] sm:$0xff]  ;;  %v23387_v48 = vld [vmem:[#allocation21_spill] sm:$0xff] }
 0x667   : > { %v12164_v28 = vsub.f32 0.0, %v20726_v16  ;;  %v12542_v56 = vadd.f32 %v12536_v58, %v12524_v32  ;;  %v12537_v59 = vsel %vm23362_vm1, %v20621_v34, %v20592_v26  ;;  %vm23366_vm12 = vcmask 678912   ;;  %v12584_v26 = vpop.permute.xlu0 %12583  ;;  %v23388_v32 = vld [vmem:[#allocation57_spill] sm:$0xff] }
 0x668   : > { %v12163_v22 = vsub.f32 0.0, %v20728_v40  ;;  %v12567_v8 = vpop.permute.xlu1 %12566  ;;  %v12558_v54 = vadd.f32 %v12548_v1, %v12541_v50  ;;  %v12525_v7 = vadd.f32 %v12519_v41, %v12507_v9  ;;  %v12554_v20 = vsel %vm23367_vm2, %v20648_v15, %v12552_v12  ;;  %vm23368_vm11 = vmmov %vm23366_vm12  ;;  %v23390_v50 = vld [vmem:[#allocation43_spill] sm:$0xff] }
 0x669   : > { %v12570_v52 = vsel %vm23366_vm12, %v12565_v53, %v12567_v8  ;;  %12693 = vrot.lane.b32.xlu1 %v12164_v28, %s14679_s11  ;;  %v12559_v60 = vadd.f32 %v12553_v42, %v12542_v56  ;;  %v12571_v1 = vsel %vm23368_vm11, %v12567_v8, %v12569_v17  ;;  %vm23371_vm1 = vcmask 1039360   ;;  %v23391_v42 = vld [vmem:[#allocation30_spill] sm:$0xff] }
 0x66a   : > { %12691 = vrot.lane.b32.xlu0 %v12163_v22, %s14679_s11  ;;  %v12575_v31 = vadd.f32 %v12565_v53, %v12558_v54  ;;  %v12543_v30 = vadd.f32 %v12537_v59, %v12525_v7  ;;  %v9191_v12 = vsel %vm23371_vm1, %v23370_v63, %v23369_v2  ;;  %v23372_v53 = vld [vmem:[#allocation37_spill] sm:$0xff]  ;;  %vm23374_vm12 = vcmask 1031168   ;;  %vm23377_vm2 = vmmov %vm23371_vm1  ;;  %v23393_v8 = vld [vmem:[#allocation62_spill] sm:$0xff] }
 0x66b   : > { %v12576_v49 = vadd.f32 %v12570_v52, %v12559_v60  ;;  %v9209_v0 = vsel %vm23374_vm12, %v23373_v5, %v23372_v53  ;;  %v9196_v51 = vadd.f32 %v23375_v45, %v9191_v12  ;;  %v9192_v27 = vsel %vm23377_vm2, %v23369_v2, %v23376_v25  ;;  %v23395_v52 = vld [vmem:[#allocation53_spill] sm:$0xff]  ;;  %v23402_v63 = vld [vmem:[#allocation56_spill] sm:$0xff]  ;;  %v23403_v12 = vld [vmem:[#allocation55_spill] sm:$0xff] }
 0x66c   : > { %v12582_v34 = vpop.permute.xlu1 %12581  ;;  %v12560_v29 = vadd.f32 %v12554_v20, %v12543_v30  ;;  %vm23380_vm11 = vcmask 900096   ;;  %v9197_v21 = vadd.f32 %v23383_v57, %v9192_v27  ;;  %vm23386_vm1 = vcmask 891904   ;;  %v23396_v7 = vld [vmem:[#allocation33_spill] sm:$0xff]  ;;  %v23404_v45 = vld [vmem:[#allocation120_spill] sm:$0xff] }
 0x66d   : > { %v12587_v43 = vsel %vm21974_vm9, %v12582_v34, %v12584_v26  ;;  %v20751_v3 = vadd.f32 %v12582_v34, %v12575_v31  ;;  %v9214_v36 = vadd.f32 %v9209_v0, %v9196_v51  ;;  %v9227_v14 = vsel %vm23380_vm11, %v23379_v44, %v23378_v55  ;;  %vm23394_vm2 = vmmov %vm23386_vm1  ;;  %v23405_v51 = vld [vmem:[#allocation86_spill] sm:$0xff]  ;;  %v23407_v27 = vld [vmem:[#allocation61_spill] sm:$0xff] }
 0x66e   : > { %v20753_v11 = vadd.f32 %v12587_v43, %v12576_v49  ;;  %v12577_v10 = vadd.f32 %v12571_v1, %v12560_v29  ;;  %v9245_v19 = vsel %vm23386_vm1, %v23385_v18, %v23384_v33  ;;  %v9198_v6 = vadd.f32 %v23376_v25, %v23387_v48  ;;  %v23397_v49 = vld [vmem:[#allocation59_spill] sm:$0xff]  ;;  %v23400_v43 = vld [vmem:[#allocation32_spill] sm:$0xff]  ;;  %v23412_v48 = vld [vmem:[#allocation94_spill] sm:$0xff] }
 0x66f   : > { %v12595_v46 = vsub.f32 0.0, %v20751_v3  ;;  %v9232_v47 = vadd.f32 %v9227_v14, %v9214_v36  ;;  %v9246_v59 = vsel %vm23394_vm2, %v23384_v33, %v23393_v8  ;;  %v9281_v60 = vsel %vm9280_vm6, %v23396_v7, %v23395_v52  ;;  %v23399_v1 = vld [vmem:[#allocation51_spill] sm:$0xff]  ;;  %v23409_v57 = vld [vmem:[#allocation88_spill] sm:$0xff] }
 0x670   : > { %v12596_v61 = vsub.f32 0.0, %v20753_v11  ;;  %v12586_v15 = vpop.permute.xlu1 %12585  ;;  %v9216_v35 = vadd.f32 %v23381_v39, %v9198_v6  ;;  %v9299_v29 = vsel %vm9298_vm7, %v23400_v43, %v23399_v1  ;;  %vm23406_vm1 = vcmask 490496   ;;  %v23408_v44 = vld [vmem:[#allocation87_spill] sm:$0xff]  ;;  %v23422_v7 = vld [vmem:[#allocation104_spill] sm:$0xff] }
 0x671   : > { %v12588_v24 = vsel %vm21974_vm9, %v12584_v26, %v12586_v15  ;;  %12707 = vrot.lane.b32.xlu0 %v12595_v46, %s14680_s12  ;;  %vm23382_vm9 = vmmov %vm23374_vm12  ;;  %v9250_v4 = vadd.f32 %v9245_v19, %v9232_v47  ;;  %v23401_v15 = vld [vmem:[#allocation64_spill] sm:$0xff]  ;;  %v9337_v36 = vsel %vm23406_vm1, %v23405_v51, %v23404_v45  ;;  %v9318_v14 = vsel %vm9316_vm8, %v23402_v63, %v23408_v44  ;;  %v23431_v51 = vld [vmem:[#allocation125_spill] sm:$0xff] }
 0x672   : > { %v20761_v23 = vadd.f32 %v12588_v24, %v12577_v10  ;;  %12709 = vrot.lane.b32.xlu1 %v12596_v61, %s14680_s12  ;;  %v9210_v62 = vsel %vm23382_vm9, %v23372_v53, %v23381_v39  ;;  %vm23389_vm12 = vmmov %vm23380_vm11  ;;  %vm23392_vm9 = vcmask 883712   ;;  %v9234_v56 = vadd.f32 %v23388_v32, %v9216_v35  ;;  %v23411_v19 = vld [vmem:[#allocation116_spill] sm:$0xff] }
 0x673   : > { %v9215_v58 = vadd.f32 %v9210_v62, %v9197_v21  ;;  %v9228_v17 = vsel %vm23389_vm12, %v23378_v55, %v23388_v32  ;;  %v9263_v9 = vsel %vm23392_vm9, %v23391_v42, %v23390_v50  ;;  %vm23398_vm11 = vmmov %vm23392_vm9  ;;  %v9282_v24 = vsel %vm9280_vm6, %v23395_v52, %v23401_v15  ;;  %v23415_v32 = vld [vmem:[#allocation89_spill] sm:$0xff]  ;;  %v23421_v52 = vld [vmem:[#allocation119_spill] sm:$0xff] }
 0x674   : > { %v12597_v38 = vsub.f32 0.0, %v20761_v23  ;;  %v9268_v54 = vadd.f32 %v9263_v9, %v9250_v4  ;;  %v9252_v31 = vadd.f32 %v23393_v8, %v9234_v56  ;;  %v9264_v26 = vsel %vm23398_vm11, %v23390_v50, %v23397_v49  ;;  %vm23410_vm12 = vmmov %vm23406_vm1  ;;  %v23414_v4 = vld [vmem:[#allocation122_spill] sm:$0xff] }
 0x675   : > { %v9233_v41 = vadd.f32 %v9228_v17, %v9215_v58  ;;  %v9317_v53 = vsel %vm9316_vm8, %v23403_v12, %v23402_v63  ;;  %v9300_v55 = vsel %vm9298_vm7, %v23399_v1, %v23407_v27  ;;  %v9338_v21 = vsel %vm23410_vm12, %v23404_v45, %v23409_v57  ;;  %v23417_v50 = vld [vmem:[#allocation98_spill] sm:$0xff] }
 0x676   : > { %12711 = vrot.lane.b32.xlu0 %v12597_v38, %s14680_s12  ;;  %v9286_v30 = vadd.f32 %v9281_v60, %v9268_v54  ;;  %v9270_v10 = vadd.f32 %v23397_v49, %v9252_v31  ;;  %vm23413_vm9 = vcmask 482304   ;;  %vm23416_vm7 = vcmask 474112   ;;  %v23424_v49 = vld [vmem:[#allocation123_spill] sm:$0xff]  ;;  %v23426_v1 = vld [vmem:[#allocation110_spill] sm:$0xff] }
 0x677   : > { %v9251_v20 = vadd.f32 %v9246_v59, %v9233_v41  ;;  %v9355_v6 = vsel %vm23413_vm9, %v23412_v48, %v23411_v19  ;;  %v9373_v17 = vsel %vm23416_vm7, %v23415_v32, %v23414_v4  ;;  %vm23418_vm8 = vmmov %vm23413_vm9  ;;  %v23419_v59 = vld [vmem:[#allocation91_spill] sm:$0xff]  ;;  %vm23423_vm11 = vcmask 343040   ;;  %v23429_v12 = vld [vmem:[#allocation42_spill] sm:$0xff] }
 0x678   : > { %v9304_v2 = vadd.f32 %v9299_v29, %v9286_v30  ;;  %v9288_v0 = vadd.f32 %v23401_v15, %v9270_v10  ;;  %v9356_v42 = vsel %vm23418_vm8, %v23411_v19, %v23417_v50  ;;  %vm23420_vm2 = vmmov %vm23416_vm7  ;;  %v9391_v60 = vsel %vm23423_vm11, %v23422_v7, %v23421_v52  ;;  %v23438_v19 = vld [vmem:[#allocation133_spill] sm:$0xff]  ;;  %v23439_v48 = vld [vmem:[#allocation126_spill] sm:$0xff] }
 0x679   : > { %v9269_v34 = vadd.f32 %v9264_v26, %v9251_v20  ;;  %v9374_v54 = vsel %vm23420_vm2, %v23414_v4, %v23419_v59  ;;  %v23425_v26 = vld [vmem:[#allocation93_spill] sm:$0xff]  ;;  %vm23427_vm1 = vmmov %vm23423_vm11  ;;  %v23440_v4 = vld [vmem:[#allocation136_spill] sm:$0xff]  ;;  %vm23469_vm12 = vcmask 687104   ;;  %vm23476_vm7 = vcmask 678912  }
 0x67a   : > { %v9322_v25 = vadd.f32 %v9317_v53, %v9304_v2  ;;  %v9306_v47 = vadd.f32 %v23407_v27, %v9288_v0  ;;  %v9392_v29 = vsel %vm23427_vm1, %v23421_v52, %v23426_v1  ;;  %v23430_v53 = vld [vmem:[#allocation115_spill] sm:$0xff]  ;;  %v23433_v27 = vld [vmem:[#allocation118_spill] sm:$0xff]  ;;  %v23441_v32 = vld [vmem:[#allocation132_spill] sm:$0xff]  ;;  %vm23479_vm8 = vcmask 670720  }
 0x67b   : > { %v9287_v5 = vadd.f32 %v9282_v24, %v9269_v34  ;;  %v9409_v34 = vsel %vm9408_vm13, %v23425_v26, %v23424_v49  ;;  %v23428_v24 = vld [vmem:[#allocation97_spill] sm:$0xff]  ;;  %v23444_v7 = vld [vmem:[#allocation215_spill] sm:$0xff]  ;;  %vm23472_vm9 = vmmov %vm23469_vm12  ;;  %vm23483_vm1 = vcmask 490496  }
 0x67c   : > { %v9342_v62 = vadd.f32 %v9337_v36, %v9322_v25  ;;  %v9324_v18 = vadd.f32 %v23408_v44, %v9306_v47  ;;  %v9410_v2 = vsel %vm9408_vm13, %v23424_v49, %v23428_v24  ;;  %v23432_v36 = vld [vmem:[#allocation109_spill] sm:$0xff]  ;;  %v23434_v44 = vld [vmem:[#allocation124_spill] sm:$0xff]  ;;  %vm23480_vm2 = vmmov %vm23476_vm7 }
 0x67d   : > { %v9305_v39 = vadd.f32 %v9300_v55, %v9287_v5  ;;  %v9427_v5 = vsel %vm9426_vm14, %v23430_v53, %v23429_v12  ;;  %v9451_v25 = vsel %vm9448_vm0, %v23432_v36, %v23431_v51  ;;  %v23437_v47 = vld [vmem:[#allocation128_spill] sm:$0xff]  ;;  %v23449_v53 = vld [vmem:[#allocation222_spill] sm:$0xff]  ;;  %vm23482_vm11 = vmmov %vm23479_vm8 }
 0x67e   : > { %v9360_v35 = vadd.f32 %v9355_v6, %v9342_v62  ;;  %v9344_v41 = vadd.f32 %v23409_v57, %v9324_v18  ;;  %v23436_v62 = vld [vmem:[#allocation134_spill] sm:$0xff]  ;;  %v9471_v6 = vsel %vm9470_vm5, %v23439_v48, %v23438_v19 }
 0x67f   : > { %v9323_v33 = vadd.f32 %v9318_v14, %v9305_v39  ;;  %v23435_v14 = vld [vmem:[#allocation103_spill] sm:$0xff]  ;;  %v9473_v57 = vsel %vm9470_vm5, %v23437_v47, %v23436_v62 }
 0x680   : > { %v9378_v56 = vadd.f32 %v9373_v17, %v9360_v35  ;;  %v9362_v8 = vadd.f32 %v23417_v50, %v9344_v41  ;;  %v9449_v39 = vsel %vm9448_vm0, %v23435_v14, %v23434_v44  ;;  %v9495_v17 = vsel %vm9492_vm3, %v23441_v32, %v23440_v4 }
 0x681   : > { %v9343_v58 = vadd.f32 %v9338_v21, %v9323_v33  ;;  %v20877_v21 = vpop.permute.xlu0 %12601  ;;  %v9428_v33 = vsel %vm9426_vm14, %v23429_v12, %v23433_v27  ;;  %v9450_v41 = vsel %vm9448_vm0, %v23434_v44, %v23432_v36  ;;  %v23450_v36 = vld [vmem:[#allocation218_spill] sm:$0xff]  ;;  %v23453_v44 = vld [vmem:[#allocation232_spill] sm:$0xff]  ;;  %vm23465_vm14 = vcmask 818176  }
 0x682   : > { %v9396_v31 = vadd.f32 %v9391_v60, %v9378_v56  ;;  %v9380_v30 = vadd.f32 %v23419_v59, %v9362_v8  ;;  %v20894_v59 = vpop.permute.xlu1 %12603  ;;  %v23445_v60 = vld [vmem:[#allocation17_spill] sm:$0xff] }
 0x683   : > { %v9361_v9 = vadd.f32 %v9356_v42, %v9343_v58  ;;  %v23442_v42 = vld [vmem:[#allocation135_spill] sm:$0xff] }
 0x684   : > { %v9398_v43 = vadd.f32 %v23426_v1, %v9380_v30  ;;  %v9414_v15 = vadd.f32 %v9409_v34, %v9396_v31  ;;  %v9494_v26 = vsel %vm9492_vm3, %v23442_v42, %v23441_v32  ;;  %v23446_v34 = vld [vmem:[#allocation230_spill] sm:$0xff]  ;;  %v23458_v32 = vld [vmem:[#allocation220_spill] sm:$0xff] }
 0x685   : > { %v9379_v20 = vadd.f32 %v9374_v54, %v9361_v9  ;;  %v23443_v9 = vld [vmem:[#allocation130_spill] sm:$0xff]  ;;  %v9472_v54 = vsel %vm9470_vm5, %v23438_v19, %v23437_v47  ;;  %v20902_v49 = vpop.permute.xlu0 %12605  ;;  %v23456_v19 = vld [vmem:[#allocation139_spill] sm:$0xff] }
 0x686   : > { %v9416_v63 = vadd.f32 %v23428_v24, %v9398_v43  ;;  %v9432_v45 = vadd.f32 %v9427_v5, %v9414_v15  ;;  %v9493_v56 = vsel %vm9492_vm3, %v23443_v9, %v23442_v42  ;;  %v12619_v24 = vpop.permute.xlu1 %12618  ;;  %vm23452_vm3 = vcmask 965632   ;;  %v23461_v9 = vld [vmem:[#allocation112_spill] sm:$0xff] }
 0x687   : > { %v9397_v10 = vadd.f32 %v9392_v29, %v9379_v20  ;;  %v9514_v20 = vsel %vm9513_vm15, %v23445_v60, %v23444_v7  ;;  %vm23454_vm5 = vmmov %vm23452_vm3  ;;  %v23463_v60 = vld [vmem:[#allocation210_spill] sm:$0xff] }
 0x688   : > { %v9434_v55 = vadd.f32 %v23433_v27, %v9416_v63  ;;  %v9455_v35 = vadd.f32 %v9449_v39, %v9432_v45  ;;  %v23448_v63 = vld [vmem:[#allocation138_spill] sm:$0xff] }
 0x689   : > { %v9415_v0 = vadd.f32 %v9410_v2, %v9397_v10  ;;  %v9515_v10 = vsel %vm9513_vm15, %v23444_v7, %v23446_v34  ;;  %v23447_v2 = vld [vmem:[#allocation204_spill] sm:$0xff]  ;;  %v20915_v51 = vpop.permute.xlu0 %12620 }
 0x68a   : > { %v9457_v18 = vadd.f32 %v9451_v25, %v9434_v55  ;;  %v9477_v8 = vadd.f32 %v9471_v6, %v9455_v35  ;;  %v9532_v12 = vsel %vm9531_vm4, %v23448_v63, %v23447_v2  ;;  %v23451_v25 = vld [vmem:[#allocation20_spill] sm:$0xff]  ;;  %v9533_v55 = vsel %vm9531_vm4, %v23447_v2, %v23449_v53  ;;  %v20924_v47 = vpop.permute.xlu1 %12622 }
 0x68b   : > { %v9433_v58 = vadd.f32 %v9428_v33, %v9415_v0  ;;  %v9550_v27 = vsel %vm23452_vm3, %v23451_v25, %v23450_v36  ;;  %v23457_v6 = vld [vmem:[#allocation224_spill] sm:$0xff]  ;;  %vm23460_vm4 = vcmask 826368   ;;  %vm12641_vm3 = vcmask 424960  }
 0x68c   : > { %v9479_v50 = vadd.f32 %v9473_v57, %v9457_v18  ;;  %v9499_v30 = vadd.f32 %v9493_v56, %v9477_v8  ;;  %v9551_v57 = vsel %vm23454_vm5, %v23450_v36, %v23453_v44  ;;  %v23455_v18 = vld [vmem:[#allocation208_spill] sm:$0xff]  ;;  %vm23462_vm13 = vmmov %vm23460_vm4  ;;  %vm12659_vm5 = vcmask 916480  }
 0x68d   : > { %v9456_v31 = vadd.f32 %v9450_v41, %v9433_v58  ;;  %v12636_v33 = vpop.permute.xlu0 %12635  ;;  %v9568_v48 = vsel %vm9567_vm10, %v23456_v19, %v23455_v18  ;;  %v9569_v42 = vsel %vm9567_vm10, %v23455_v18, %v23457_v6  ;;  %v9587_v7 = vsel %vm23462_vm13, %v23458_v32, %v23461_v9  ;;  %v23470_v2 = vld [vmem:[#allocation236_spill] sm:$0xff]  ;;  %vm23471_vm10 = vmmov %vm23465_vm14 }
 0x68e   : > { %v9501_v52 = vadd.f32 %v9495_v17, %v9479_v50  ;;  %v9519_v29 = vadd.f32 %v9514_v20, %v9499_v30  ;;  %v23459_v17 = vld [vmem:[#allocation22_spill] sm:$0xff]  ;;  %v12638_v50 = vpop.permute.xlu1 %12637  ;;  %v23464_v20 = vld [vmem:[#allocation141_spill] sm:$0xff]  ;;  %vm12677_vm13 = vcmask 359424  }
 0x68f   : > { %v9478_v43 = vadd.f32 %v9472_v54, %v9456_v31  ;;  %v9586_v41 = vsel %vm23460_vm4, %v23459_v17, %v23458_v32  ;;  %v9604_v31 = vsel %vm23465_vm14, %v23464_v20, %v23463_v60  ;;  %v23466_v30 = vld [vmem:[#allocation226_spill] sm:$0xff]  ;;  %vm23484_vm4 = vmmov %vm23483_vm1  ;;  %vm12695_vm14 = vcmask 850944  }
 0x690   : > { %v9521_v1 = vadd.f32 %v23446_v34, %v9501_v52  ;;  %v9537_v0 = vadd.f32 %v9532_v12, %v9519_v29  ;;  %v23467_v34 = vld [vmem:[#allocation240_spill] sm:$0xff] }
 0x691   : > { %v9500_v15 = vadd.f32 %v9494_v26, %v9478_v43  ;;  %v12640_v52 = vpop.permute.xlu0 %12639 }
 0x692   : > { %v9539_v5 = vadd.f32 %v23449_v53, %v9521_v1  ;;  %v9555_v39 = vadd.f32 %v9550_v27, %v9537_v0  ;;  %v23468_v1 = vld [vmem:[#allocation23_spill] sm:$0xff]  ;;  %v9623_v0 = vsel %vm23472_vm9, %v23467_v34, %v23470_v2  ;;  %v23474_v27 = vld [vmem:[#allocation237_spill] sm:$0xff]  ;;  %vm12790_vm9 = vcmask 64512  }
 0x693   : > { %v9520_v45 = vadd.f32 %v9515_v10, %v9500_v15  ;;  %v9622_v43 = vsel %vm23469_vm12, %v23468_v1, %v23467_v34  ;;  %v12654_v15 = vpop.permute.xlu1 %12653  ;;  %vm12713_vm12 = vcmask 293888  }
 0x694   : > { %v9557_v14 = vadd.f32 %v23453_v44, %v9539_v5  ;;  %v9573_v35 = vadd.f32 %v9568_v48, %v9555_v39  ;;  %v9605_v5 = vsel %vm23471_vm10, %v23463_v60, %v23466_v30  ;;  %v23478_v39 = vld [vmem:[#allocation137_spill] sm:$0xff]  ;;  %vm12749_vm10 = vcmask 556032  }
 0x695   : > { %v9538_v62 = vadd.f32 %v9533_v55, %v9520_v45  ;;  %v12656_v53 = vpop.permute.xlu0 %12655  ;;  %v23473_v45 = vld [vmem:[#allocation245_spill] sm:$0xff] }
 0x696   : > { %v9575_v58 = vadd.f32 %v23457_v6, %v9557_v14  ;;  %v9591_v8 = vadd.f32 %v9586_v41, %v9573_v35  ;;  %v23475_v55 = vld [vmem:[#allocation49_spill] sm:$0xff]  ;;  %v23477_v14 = vld [vmem:[#allocation244_spill] sm:$0xff] }
 0x697   : > { %v9556_v4 = vadd.f32 %v9551_v57, %v9538_v62  ;;  %v9640_v44 = vsel %vm23476_vm7, %v23475_v55, %v23474_v27  ;;  %v9658_v62 = vsel %vm23479_vm8, %v23478_v39, %v23477_v14  ;;  %v9641_v57 = vsel %vm23480_vm2, %v23474_v27, %v23473_v45  ;;  %v12658_v48 = vpop.permute.xlu1 %12657  ;;  %v23481_v6 = vld [vmem:[#allocation241_spill] sm:$0xff] }
 0x698   : > { %v9593_v56 = vadd.f32 %v23461_v9, %v9575_v58  ;;  %v9609_v10 = vadd.f32 %v9604_v31, %v9591_v8  ;;  %v9659_v17 = vsel %vm23482_vm11, %v23477_v14, %v23481_v6  ;;  %vm12848_vm7 = vcmask 621568  }
 0x699   : > { %v9574_v54 = vadd.f32 %v9569_v42, %v9556_v4  ;;  %v12672_v32 = vpop.permute.xlu0 %12671  ;;  %v12607_v42 = vsel %vm23483_vm1, %v20877_v21, %v20894_v59  ;;  %v12608_v21 = vsel %vm23484_vm4, %v20894_v59, %v20902_v49  ;;  %vm12906_vm8 = vcmask 130048  }
 0x69a   : > { %v9611_v26 = vadd.f32 %v23466_v30, %v9593_v56  ;;  %v9627_v12 = vadd.f32 %v9622_v43, %v9609_v10  ;;  %v12642_v30 = vsel %vm12641_vm3, %v12636_v33, %v12638_v50  ;;  %v12660_v43 = vsel %vm12659_vm5, %v12654_v15, %v12656_v53 }
 0x69b   : > { %v9592_v29 = vadd.f32 %v9587_v7, %v9574_v54  ;;  %v12674_v8 = vpop.permute.xlu1 %12673  ;;  %v12624_v7 = vsel %vm9513_vm15, %v12619_v24, %v20915_v51  ;;  %v12625_v24 = vsel %vm9513_vm15, %v20915_v51, %v20924_v47  ;;  %v12643_v33 = vsel %vm12641_vm3, %v12638_v50, %v12640_v52 }
 0x69c   : > { %v9629_v63 = vadd.f32 %v23470_v2, %v9611_v26  ;;  %v9645_v19 = vadd.f32 %v9640_v44, %v9627_v12  ;;  %v12678_v2 = vsel %vm12677_vm13, %v12672_v32, %v12674_v8  ;;  %v23485_v32 = vld [vmem:[#allocation149_spill] sm:$0xff]  ;;  %vm23509_vm2 = vcmask 687104  }
 0x69d   : > { %v9610_v25 = vadd.f32 %v9605_v5, %v9592_v29  ;;  %v12676_v20 = vpop.permute.xlu0 %12675  ;;  %vm23512_vm11 = vmmov %vm23509_vm2 }
 0x69e   : > { %v9647_v36 = vadd.f32 %v23473_v45, %v9629_v63  ;;  %v20970_v35 = vadd.f32 %v9658_v62, %v9645_v19 }
 0x69f   : > { %v9628_v18 = vadd.f32 %v9623_v0, %v9610_v25  ;;  %v12661_v0 = vsel %vm12659_vm5, %v12656_v53, %v12658_v48 }
 0x6a0   : > { %v20968_v58 = vadd.f32 %v23481_v6, %v9647_v36  ;;  %v9666_v56 = vsub.f32 0.0, %v20970_v35  ;;  %v12679_v36 = vsel %vm12677_vm13, %v12674_v8, %v12676_v20 }
 0x6a1   : > { %v9646_v4 = vadd.f32 %v9641_v57, %v9628_v18 }
 0x6a2   : > { %v9668_v41 = vsub.f32 0.0, %v20968_v58  ;;  %v12612_v60 = vmax.f32 %v9666_v56, %v12607_v42 }
 0x6a3   : > { %v20979_v9 = vadd.f32 %v9659_v17, %v9646_v4  ;;  %v23486_v17 = vsub.f32 0.0, %v23485_v32 }
 0x6a4   : > { %v12614_v54 = vmax.f32 %v9668_v41, %v20902_v49  ;;  %v12629_v34 = vmax.f32 %v12612_v60, %v12624_v7 }
 0x6a5   : > { %v9667_v26 = vsub.f32 0.0, %v20979_v9 }
 0x6a6   : > { %v12631_v31 = vmax.f32 %v12614_v54, %v20924_v47  ;;  %v12647_v10 = vmax.f32 %v12629_v34, %v12642_v30 }
 0x6a7   : > { %v12613_v29 = vmax.f32 %v9667_v26, %v12608_v21  ;;  %v23487_v21 = vld [vmem:[#allocation176_spill] sm:$0xff] }
 0x6a8   : > { %v12649_v49 = vmax.f32 %v12631_v31, %v12640_v52  ;;  %v12665_v12 = vmax.f32 %v12647_v10, %v12660_v43  ;;  %v23488_v31 = vsub.f32 0.0, %v23487_v21  ;;  %v23489_v43 = vld [vmem:[#allocation185_spill] sm:$0xff] }
 0x6a9   : > { %v12630_v63 = vmax.f32 %v12613_v29, %v12625_v24  ;;  %v23490_v29 = vsub.f32 0.0, %v23489_v43 }
 0x6aa   : > { %v12667_v45 = vmax.f32 %v12649_v49, %v12658_v48  ;;  %v12683_v15 = vmax.f32 %v12665_v12, %v12678_v2 }
 0x6ab   : > { %v12648_v47 = vmax.f32 %v12630_v63, %v12643_v33 }
 0x6ac   : > { %v12685_v50 = vmax.f32 %v12667_v45, %v12676_v20 }
 0x6ad   : > { %v12666_v27 = vmax.f32 %v12648_v47, %v12661_v0 }
 0x6af   : > { %v12684_v39 = vmax.f32 %v12666_v27, %v12679_v36 }
 0x6d3   : > { %v12690_v1 = vpop.permute.xlu1 %12689 }
 0x6db   : > { %v12694_v5 = vpop.permute.xlu1 %12693 }
 0x6dc   : > { %v12692_v59 = vpop.permute.xlu0 %12691  ;;  %v12703_v53 = vmax.f32 %v12685_v50, %v12694_v5 }
 0x6dd   : > { %v12696_v51 = vsel %vm12695_vm14, %v12690_v1, %v12692_v59  ;;  %v12697_v52 = vsel %vm12695_vm14, %v12692_v59, %v12694_v5  ;;  %v23491_v5 = vld [vmem:[#allocation229_spill] sm:$0xff] }
 0x6de   : > { %v12701_v55 = vmax.f32 %v12683_v15, %v12696_v51  ;;  %v12702_v57 = vmax.f32 %v12684_v39, %v12697_v52  ;;  %v23492_v0 = vsub.f32 0.0, %v23491_v5 }
 0x6e3   : > { %v12708_v25 = vpop.permute.xlu0 %12707 }
 0x6e4   : > { %v12710_v44 = vpop.permute.xlu1 %12709 }
 0x6e5   : > { %v12714_v14 = vsel %vm12713_vm12, %v12708_v25, %v12710_v44  ;;  %v23493_v25 = vld [vmem:[#allocation221_spill] sm:$0xff] }
 0x6e6   : > { %v21008_v62 = vmax.f32 %v12701_v55, %v12714_v14  ;;  %v23494_v27 = vsub.f32 0.0, %v23493_v25 }
 0x6e8   : > { %12743 = vrot.lane.b32.xlu1 %v21008_v62, %s14681_s21  ;;  %v12712_v18 = vpop.permute.xlu0 %12711 }
 0x6e9   : > { %v12715_v19 = vsel %vm12713_vm12, %v12710_v44, %v12712_v18  ;;  %v21012_v48 = vmax.f32 %v12703_v53, %v12712_v18 }
 0x6ea   : > { %v21014_v6 = vmax.f32 %v12702_v57, %v12715_v19 }
 0x6ec   : > { %12747 = vrot.lane.b32.xlu1 %v21012_v48, %s14681_s21  ;;  %12745 = vrot.lane.b32.xlu0 %v21014_v6, %s14681_s21 }
 0x6f0   : > { %12786 = vrot.lane.b32.xlu1 %v21014_v6, %s14682_s8  ;;  %12784 = vrot.lane.b32.xlu0 %v21008_v62, %s14682_s8 }
 0x6f4   : > { %12842 = vrot.lane.b32.xlu1 %v21008_v62, %s14683_s17  ;;  %12788 = vrot.lane.b32.xlu0 %v21012_v48, %s14682_s8 }
 0x6f8   : > { %12846 = vrot.lane.b32.xlu1 %v21012_v48, %s14683_s17  ;;  %12844 = vrot.lane.b32.xlu0 %v21014_v6, %s14683_s17 }
 0x6fc   : > { %12902 = vrot.lane.b32.xlu1 %v21014_v6, %s14684_s19  ;;  %12900 = vrot.lane.b32.xlu0 %v21008_v62, %s14684_s19 }
 0x700   : > { %12958 = vrot.lane.b32.xlu1 %v21008_v62, %s22288_s18  ;;  %12904 = vrot.lane.b32.xlu0 %v21012_v48, %s14684_s19 }
 0x704   : > { %12962 = vrot.lane.b32.xlu1 %v21012_v48, %s22288_s18  ;;  %12960 = vrot.lane.b32.xlu0 %v21014_v6, %s22288_s18 }
 0x708   : > { %13017 = vrot.lane.b32.xlu1 %v21014_v6, %s22337_s15  ;;  %13015 = vrot.lane.b32.xlu0 %v21008_v62, %s22337_s15 }
 0x70c   : > { %13072 = vrot.lane.b32.xlu1 %v21008_v62, %s22539_s16  ;;  %13019 = vrot.lane.b32.xlu0 %v21012_v48, %s22337_s15  ;;  %s14360_s15 = smul.u32 48, %s14723_s13  ;;  %s14686_s13 = smov [#allocation7]  }
 0x70d   : > { %s14575_s18 = sshll.u32 %s14686_s13, 4  ;;  %s14576_s18 = int_to_ptr.vmem [resolvable:$false] %s14575_s18 }
 0x70e   : > { %s21228_s5 = scalar_lea.hbm %s21274_s2, %s14360_s15  ;;  %s14577_s24 = scalar_lea.vmem %s14576_s18, 96 }
 0x710   : > { %13076 = vrot.lane.b32.xlu1 %v21012_v48, %s22539_s16  ;;  %13074 = vrot.lane.b32.xlu0 %v21014_v6, %s22539_s16  ;;  %s14359_s16 = smul.u32 3, %s14841_s22 }
 0x75a   : > { %v12744_v4 = vpop.permute.xlu1 %12743 }
 0x75b   : > { %v12755_v42 = vsub.f32 %v23486_v17, %v12744_v4 }
 0x75d   : > { %v12758_v8 = vmul.f32 1.442695, %v12755_v42 }
 0x75e   : > { %v12748_v54 = vpop.permute.xlu1 %12747  ;;  %v12746_v7 = vpop.permute.xlu0 %12745 }
 0x75f   : > { %14459 = vpow2.f32 %v12758_v8  ;;  %v12750_v21 = vsel %vm12749_vm10, %v12744_v4, %v12746_v7  ;;  %v12751_v13 = vsel %vm12749_vm10, %v12746_v7, %v12748_v54 }
 0x762   : > { %v12787_v60 = vpop.permute.xlu1 %12786  ;;  %v12785_v20 = vpop.permute.xlu0 %12784 }
 0x763   : > { %v12796_v30 = vsub.f32 %v23488_v31, %v12785_v20 }
 0x765   : > { %v12799_v34 = vmul.f32 1.442695, %v12796_v30 }
 0x766   : > { %v12843_v1 = vpop.permute.xlu1 %12842  ;;  %v12789_v24 = vpop.permute.xlu0 %12788 }
 0x767   : > { %14461 = vpow2.f32 %v12799_v34  ;;  %v12854_v10 = vsub.f32 %v23490_v29, %v12843_v1  ;;  %v12792_v34 = vsel %vm12790_vm9, %v12787_v60, %v12789_v24  ;;  %v23497_v29 = vld [vmem:[#allocation147_spill] sm:$0xff] }
 0x769   : > { %v14460_v59 = vpop.eup %14459  ;;  %v12857_v49 = vmul.f32 1.442695, %v12854_v10  ;;  %v23498_v10 = vsub.f32 0.0, %v23497_v29  ;;  %v23510_v29 = vld [vmem:[#allocation227_spill] sm:$0xff] }
 0x76a   : > { %v12847_v33 = vpop.permute.xlu1 %12846  ;;  %12767 = vrot.lane.b32.xlu0 %v14460_v59, %s22342_s27  ;;  %v12845_v2 = vpop.permute.xlu0 %12844 }
 0x76b   : > { %14463 = vpow2.f32 %v12857_v49  ;;  %v12757_v59 = vsub.f32 %v23498_v10, %v12751_v13  ;;  %v23499_v49 = vld [vmem:[#allocation171_spill] sm:$0xff]  ;;  %v12849_v4 = vsel %vm12848_vm7, %v12843_v1, %v12845_v2  ;;  %v23511_v10 = vsub.f32 0.0, %v23510_v29 }
 0x76c   : > { %v23500_v5 = vsub.f32 0.0, %v23499_v49 }
 0x76e   : > { %v21052_v63 = vpop.permute.xlu1 %12902  ;;  %v21054_v12 = vpop.permute.xlu0 %12900 }
 0x76f   : > { %v12912_v45 = vsub.f32 %v23492_v0, %v21054_v12  ;;  %v12798_v0 = vsub.f32 %v23500_v5, %v12792_v34 }
 0x771   : > { %v14462_v51 = vpop.eup %14461  ;;  %v12915_v47 = vmul.f32 1.442695, %v12912_v45  ;;  %v12762_v45 = vmul.f32 1.442695, %v12757_v59 }
 0x772   : > { %v21059_v15 = vpop.permute.xlu1 %12958  ;;  %12808 = vrot.lane.b32.xlu1 %v14462_v51, %s22247_s7  ;;  %v12905_v36 = vpop.permute.xlu0 %12904  ;;  %v12822_v54 = vmul.f32 2.0, %v14462_v51 }
 0x773   : > { %14465 = vpow2.f32 %v12915_v47  ;;  %v12969_v55 = vsub.f32 %v23494_v27, %v21059_v15  ;;  %v23501_v47 = vld [vmem:[#allocation52_spill] sm:$0xff]  ;;  %v12803_v27 = vmul.f32 1.442695, %v12798_v0  ;;  %v12908_v1 = vsel %vm12906_vm8, %v21052_v63, %v12905_v36 }
 0x774   : > { %v23502_v25 = vsub.f32 0.0, %v23501_v47 }
 0x775   : > { %v14464_v44 = vpop.eup %14463  ;;  %v12972_v50 = vmul.f32 1.442695, %v12969_v55 }
 0x776   : > { %v21065_v52 = vpop.permute.xlu1 %12962  ;;  %12866 = vrot.lane.b32.xlu0 %v14464_v44, %s14676_s0  ;;  %v21068_v14 = vpop.permute.xlu0 %12960  ;;  %v12880_v51 = vmul.f32 3.0, %v14464_v44 }
 0x777   : > { %14467 = vpow2.f32 %v12972_v50 }
 0x77a   : > { %v21070_v39 = vpop.permute.xlu1 %13017  ;;  %v21072_v53 = vpop.permute.xlu0 %13015 }
 0x77b   : > { %v13026_v57 = vsub.f32 %v12162_v37, %v21072_v53  ;;  %v23495_v37 = vld [vmem:[#allocation38_spill] sm:$0xff] }
 0x77c   : > { %v23496_v31 = vsub.f32 0.0, %v23495_v37 }
 0x77d   : > { %v14466_v18 = vpop.eup %14465  ;;  %v13029_v19 = vmul.f32 1.442695, %v13026_v57 }
 0x77e   : > { %v21077_v32 = vpop.permute.xlu1 %13072  ;;  %12924 = vrot.lane.b32.xlu1 %v14466_v18, %s14677_s1  ;;  %v12756_v30 = vsub.f32 %v23496_v31, %v12750_v21  ;;  %v12938_v57 = vmul.f32 4.0, %v14466_v18  ;;  %v13020_v44 = vpop.permute.xlu0 %13019  ;;  %v12964_v18 = vsel %vm23509_vm2, %v21059_v15, %v21068_v14 }
 0x77f   : > { %14469 = vpow2.f32 %v13029_v19  ;;  %v13083_v17 = vsub.f32 %v12595_v46, %v21077_v32  ;;  %v12791_v46 = vsel %vm12790_vm9, %v12785_v20, %v12787_v60  ;;  %v12850_v60 = vsel %vm12848_vm7, %v12845_v2, %v12847_v33  ;;  %v23503_v20 = vld [vmem:[#allocation214_spill] sm:$0xff]  ;;  %v23507_v2 = vld [vmem:[#allocation191_spill] sm:$0xff] }
 0x780   : > { %v12760_v3 = vmul.f32 1.442695, %v12756_v30  ;;  %v12797_v24 = vsub.f32 %v23502_v25, %v12791_v46  ;;  %v23504_v55 = vsub.f32 0.0, %v23503_v20  ;;  %v12907_v33 = vsel %vm12906_vm8, %v21054_v12, %v21052_v63 }
 0x781   : > { %v14468_v42 = vpop.eup %14467  ;;  %v13086_v8 = vmul.f32 1.442695, %v13083_v17  ;;  %v23505_v17 = vld [vmem:[#allocation197_spill] sm:$0xff]  ;;  %v23508_v37 = vsub.f32 0.0, %v23507_v2  ;;  %v12913_v59 = vsub.f32 %v23511_v10, %v12907_v33  ;;  %v12965_v12 = vsel %vm23512_vm11, %v21068_v14, %v21065_v52 }
 0x782   : > { %12981 = vrot.lane.b32.xlu0 %v14468_v42, %s14678_s10  ;;  %v12855_v50 = vsub.f32 %v23504_v55, %v12849_v4  ;;  %v12801_v19 = vmul.f32 1.442695, %v12797_v24  ;;  %v12995_v31 = vmul.f32 5.0, %v14468_v42  ;;  %v13022_v42 = vsel %vm9448_vm0, %v21070_v39, %v13020_v44  ;;  %v13075_v5 = vpop.permute.xlu0 %13074  ;;  %v23515_v4 = vld [vmem:[#allocation199_spill] sm:$0xff] }
 0x783   : > { %14471 = vpow2.f32 %v13086_v8  ;;  %v23506_v8 = vsub.f32 0.0, %v23505_v17  ;;  %v12914_v36 = vsub.f32 %v23508_v37, %v12908_v1  ;;  %v12917_v0 = vmul.f32 1.442695, %v12913_v59 }
 0x784   : > { %14473 = vpow2.f32 %v12760_v3  ;;  %v12859_v13 = vmul.f32 1.442695, %v12855_v50  ;;  %v23513_v3 = vld [vmem:[#allocation231_spill] sm:$0xff]  ;;  %v13021_v14 = vsel %vm9448_vm0, %v21072_v53, %v21070_v39  ;;  %v13078_v25 = vsel %vm9280_vm6, %v21077_v32, %v13075_v5  ;;  %vm23518_vm0 = vmmov %vm23483_vm1 }
 0x785   : > { %14475 = vpow2.f32 %v12762_v45  ;;  %v12856_v21 = vsub.f32 %v23506_v8, %v12850_v60  ;;  %v12919_v63 = vmul.f32 1.442695, %v12914_v36  ;;  %v23514_v46 = vsub.f32 0.0, %v23513_v3 }
 0x786   : > { %14477 = vpow2.f32 %v12803_v27  ;;  %v13077_v27 = vpop.permute.xlu1 %13076  ;;  %v13027_v20 = vsub.f32 %v12163_v22, %v13021_v14  ;;  %v13084_v16 = vsub.f32 %v12596_v61, %v13078_v25 }
 0x787   : > { %14479 = vpow2.f32 %v12801_v19  ;;  %v12861_v34 = vmul.f32 1.442695, %v12856_v21  ;;  %v12970_v15 = vsub.f32 %v23514_v46, %v12964_v18  ;;  %v13079_v53 = vsel %vm9280_vm6, %v13075_v5, %v13077_v27  ;;  %vm23517_vm6 = vmmov %vm23483_vm1 }
 0x788   : > { %14481 = vpow2.f32 %v12859_v13  ;;  %v13031_v55 = vmul.f32 1.442695, %v13027_v20  ;;  %v13085_v40 = vsub.f32 %v12597_v38, %v13079_v53  ;;  %v13088_v22 = vmul.f32 1.442695, %v13084_v16 }
 0x789   : > { %v14470_v43 = vpop.eup %14469  ;;  %14483 = vpow2.f32 %v12861_v34  ;;  %v12974_v52 = vmul.f32 1.442695, %v12970_v15  ;;  %v12723_v27 = vsub.f32 %v9667_v26, %v21014_v6 }
 0x78a   : > { %13038 = vrot.lane.b32.xlu1 %v14470_v43, %s14679_s11  ;;  %v13052_v30 = vmul.f32 6.0, %v14470_v43  ;;  %14485 = vpow2.f32 %v12919_v63  ;;  %v13090_v11 = vmul.f32 1.442695, %v13085_v40 }
 0x78b   : > { %14487 = vpow2.f32 %v12917_v0  ;;  %v12727_v35 = vmul.f32 1.442695, %v12723_v27 }
 0x78c   : > { %14489 = vpow2.f32 %v12974_v52 }
 0x78d   : > { %v14472_v7 = vpop.eup %14471 }
 0x78e   : > { %13095 = vrot.lane.b32.xlu0 %v14472_v7, %s14680_s12  ;;  %12828 = vrot.lane.b32.xlu1 %v12822_v54, %s22247_s7  ;;  %v13109_v43 = vmul.f32 7.0, %v14472_v7  ;;  %v14474_v49 = vpop.eup %14473  ;;  %v23516_v54 = vsub.f32 0.0, %v23515_v4  ;;  %v13028_v7 = vsub.f32 %v12164_v28, %v13022_v42 }
 0x78f   : > { %v14476_v47 = vpop.eup %14475 }
 0x790   : > { %v12971_v45 = vsub.f32 %v23516_v54, %v12965_v12  ;;  %v14478_v24 = vpop.eup %14477  ;;  %v13033_v39 = vmul.f32 1.442695, %v13028_v7  ;;  %v12722_v54 = vsub.f32 %v9666_v56, %v21008_v62 }
 0x791   : > { %v14480_v28 = vpop.eup %14479  ;;  %v12824_v17 = vmul.f32 2.0, %v14478_v24 }
 0x792   : > { %12886 = vrot.lane.b32.xlu0 %v12880_v51, %s14676_s0  ;;  %12944 = vrot.lane.b32.xlu1 %v12938_v57, %s14677_s1  ;;  %v12976_v60 = vmul.f32 1.442695, %v12971_v45  ;;  %v14482_v32 = vpop.eup %14481  ;;  %v12823_v21 = vmul.f32 2.0, %v14480_v28  ;;  %v12724_v45 = vsub.f32 %v9668_v41, %v21012_v48  ;;  %v12725_v7 = vmul.f32 1.442695, %v12722_v54 }
 0x793   : > { %v14484_v50 = vpop.eup %14483  ;;  %v12881_v13 = vmul.f32 3.0, %v14482_v32 }
 0x794   : > { %14491 = vpow2.f32 %v12976_v60  ;;  %v14486_v1 = vpop.eup %14485  ;;  %v12882_v33 = vmul.f32 3.0, %v14484_v50 }
 0x795   : > { %14493 = vpow2.f32 %v13033_v39  ;;  %v14488_v61 = vpop.eup %14487  ;;  %v12940_v2 = vmul.f32 4.0, %v14486_v1 }
 0x796   : > { %13001 = vrot.lane.b32.xlu0 %v12995_v31, %s14678_s10  ;;  %13058 = vrot.lane.b32.xlu1 %v13052_v30, %s14679_s11  ;;  %14495 = vpow2.f32 %v13031_v55  ;;  %v14490_v51 = vpop.eup %14489  ;;  %v12939_v37 = vmul.f32 4.0, %v14488_v61 }
 0x797   : > { %14497 = vpow2.f32 %v13088_v22  ;;  %v12996_v36 = vmul.f32 5.0, %v14490_v51 }
 0x798   : > { %14499 = vpow2.f32 %v13090_v11 }
 0x799   : > { %14501 = vpow2.f32 %v12725_v7 }
 0x79a   : > { %13115 = vrot.lane.b32.xlu0 %v13109_v43, %s14680_s12  ;;  %12769 = vrot.lane.b32.xlu1 %v14474_v49, %s22342_s27 }
 0x79e   : > { %12771 = vrot.lane.b32.xlu0 %v14476_v47, %s22342_s27  ;;  %12812 = vrot.lane.b32.xlu1 %v14478_v24, %s22247_s7  ;;  %v14492_v57 = vpop.eup %14491  ;;  %v12729_v47 = vmul.f32 1.442695, %v12724_v45  ;;  %s176_s27 = scalar_lea.vmem [#allocation7], %s14359_s16 }
 0x79f   : > { %v14494_v23 = vpop.eup %14493  ;;  %v12997_v44 = vmul.f32 5.0, %v14492_v57  ;;  %s13182_s23 = sshll.u32 %s176_s27, 4  ;;  %s21230_s23 = int_to_ptr.vmem [resolvable:$true] %s13182_s23 }
 0x7a0   : > { %v14496_v38 = vpop.eup %14495  ;;  %v13054_v18 = vmul.f32 6.0, %v14494_v23  ;;  %14503 = vpow2.f32 %v12729_v47  ;;  %p14578_p10 = scmp.lt.s32.totalorder %s21230_s23, %s14576_s18 }
 0x7a1   : > { %v14498_v19 = vpop.eup %14497  ;;  %v13053_v31 = vmul.f32 6.0, %v14496_v38  ;;  %14505 = vpow2.f32 %v12727_v35 }
 0x7a2   : > { %12810 = vrot.lane.b32.xlu0 %v14480_v28, %s22247_s7  ;;  %12868 = vrot.lane.b32.xlu1 %v14482_v32, %s14676_s0  ;;  %v14500_v8 = vpop.eup %14499  ;;  %v13110_v30 = vmul.f32 7.0, %v14498_v19 }
 0x7a3   : > { %v13111_v34 = vmul.f32 7.0, %v14500_v8  ;;  %v14502_v41 = vpop.eup %14501 }
 0x7a6   : > { %12870 = vrot.lane.b32.xlu0 %v14484_v50, %s14676_s0  ;;  %12928 = vrot.lane.b32.xlu1 %v14486_v1, %s14677_s1 }
 0x7aa   : > { %12926 = vrot.lane.b32.xlu0 %v14488_v61, %s14677_s1  ;;  %12983 = vrot.lane.b32.xlu1 %v14490_v51, %s14678_s10  ;;  %v14504_v28 = vpop.eup %14503 }
 0x7ab   : > { %v14506_v1 = vpop.eup %14505 }
 0x7ac   : > { %v12735_v35 = vmul.f32 0.0, %v14506_v1 }
 0x7ae   : > { %12985 = vrot.lane.b32.xlu0 %v14492_v57, %s14678_s10  ;;  %13042 = vrot.lane.b32.xlu1 %v14494_v23, %s14679_s11 }
 0x7b2   : > { %13040 = vrot.lane.b32.xlu0 %v14496_v38, %s14679_s11  ;;  %13097 = vrot.lane.b32.xlu1 %v14498_v19, %s14680_s12 }
 0x7b6   : > { %13099 = vrot.lane.b32.xlu0 %v14500_v8, %s14680_s12  ;;  %12832 = vrot.lane.b32.xlu1 %v12824_v17, %s22247_s7 }
 0x7ba   : > { %12830 = vrot.lane.b32.xlu0 %v12823_v21, %s22247_s7  ;;  %12888 = vrot.lane.b32.xlu1 %v12881_v13, %s14676_s0  ;;  %s14571_s7 = scalar_lea.vmem %s21230_s23, 48 }
 0x7bb   : > { %p14572_p4 = scmp.ne.s32.totalorder %s21230_s23, %s14571_s7  ;;  %p14579_p13 = scmp.lt.s32.totalorder %s14577_s24, %s14571_s7 }
 0x7bd   : > { %p14573_p6 = pnand %p14572_p4, %p14793_p12  ;;  %p14580_p3 = por %p14579_p13, %p14578_p10 }
 0x7be   : > { %12890 = vrot.lane.b32.xlu0 %v12882_v33, %s14676_s0  ;;  %12948 = vrot.lane.b32.xlu1 %v12940_v2, %s14677_s1 }
 0x7bf   : > { %p14574_p8 = pneg %p14573_p6 }
 0x7c1   : > { %p14581_p7 = pnand %p14580_p3, %p14574_p8 }
 0x7c2   : > { %12946 = vrot.lane.b32.xlu0 %v12939_v37, %s14677_s1  ;;  %13003 = vrot.lane.b32.xlu1 %v12996_v36, %s14678_s10 }
 0x7c6   : > { %13005 = vrot.lane.b32.xlu0 %v12997_v44, %s14678_s10  ;;  %13062 = vrot.lane.b32.xlu1 %v13054_v18, %s14679_s11 }
 0x7ca   : > { %13060 = vrot.lane.b32.xlu0 %v13053_v31, %s14679_s11  ;;  %13117 = vrot.lane.b32.xlu1 %v13110_v30, %s14680_s12  ;;  %v12734_v30 = vmul.f32 0.0, %v14502_v41 }
 0x7ce   : > { %13119 = vrot.lane.b32.xlu0 %v13111_v34, %s14680_s12 }
 0x7dc   : > { %v12768_v29 = vpop.permute.xlu0 %12767 }
 0x7e4   : > { %v12809_v10 = vpop.permute.xlu1 %12808 }
 0x7e8   : > { %v12867_v59 = vpop.permute.xlu0 %12866 }
 0x7f0   : > { %v12925_v63 = vpop.permute.xlu1 %12924 }
 0x7f4   : > { %v12982_v12 = vpop.permute.xlu0 %12981 }
 0x7fc   : > { %v13039_v3 = vpop.permute.xlu1 %13038 }
 0x800   : > { %v21167_v46 = vpop.permute.xlu1 %12828  ;;  %v21169_v15 = vpop.permute.xlu0 %13095 }
 0x804   : > { %v21171_v42 = vpop.permute.xlu1 %12944  ;;  %v21173_v43 = vpop.permute.xlu0 %12886 }
 0x808   : > { %v21175_v49 = vpop.permute.xlu1 %13058  ;;  %v21177_v5 = vpop.permute.xlu0 %13001 }
 0x80c   : > { %v12770_v0 = vpop.permute.xlu1 %12769  ;;  %v21179_v4 = vpop.permute.xlu0 %13115 }
 0x80d   : > { %v12773_v58 = vsel %vm23517_vm6, %v12768_v29, %v12770_v0 }
 0x80e   : > { %v12778_v53 = vadd.f32 %v14502_v41, %v12773_v58  ;;  %v12781_v54 = vadd.f32 %v12773_v58, %v12734_v30 }
 0x810   : > { %v12813_v52 = vpop.permute.xlu1 %12812  ;;  %v12772_v14 = vpop.permute.xlu0 %12771 }
 0x811   : > { %v12780_v32 = vadd.f32 %v14504_v28, %v12772_v14  ;;  %v12774_v55 = vsel %vm23518_vm0, %v12770_v0, %v12772_v14 }
 0x812   : > { %v12779_v51 = vadd.f32 %v14506_v1, %v12774_v55 }
 0x813   : > { %v12821_v22 = vadd.f32 %v12813_v52, %v12780_v32 }
 0x814   : > { %v12869_v25 = vpop.permute.xlu1 %12868  ;;  %v12811_v24 = vpop.permute.xlu0 %12810 }
 0x815   : > { %v12814_v48 = vsel %vm9513_vm15, %v12809_v10, %v12811_v24  ;;  %v12872_v40 = vsel %vm12641_vm3, %v12867_v59, %v12869_v25  ;;  %v12815_v11 = vsel %vm9513_vm15, %v12811_v24, %v12813_v52  ;;  %v12736_v10 = vmul.f32 0.0, %v14504_v28 }
 0x816   : > { %v12819_v9 = vadd.f32 %v12814_v48, %v12778_v53  ;;  %v12820_v8 = vadd.f32 %v12815_v11, %v12779_v51  ;;  %v14685_v51 = vmov 1966171168  }
 0x818   : > { %v12929_v60 = vpop.permute.xlu1 %12928  ;;  %v12871_v20 = vpop.permute.xlu0 %12870  ;;  %v12877_v61 = vadd.f32 %v12872_v40, %v12819_v9 }
 0x819   : > { %v12879_v57 = vadd.f32 %v12871_v20, %v12821_v22  ;;  %v12873_v19 = vsel %vm12641_vm3, %v12869_v25, %v12871_v20 }
 0x81a   : > { %v12878_v13 = vadd.f32 %v12873_v19, %v12820_v8 }
 0x81b   : > { %v12937_v2 = vadd.f32 %v12929_v60, %v12879_v57  ;;  %v13140_v57 = vunpack.c.l.s4 %v14685_v51 }
 0x81c   : > { %v12984_v56 = vpop.permute.xlu1 %12983  ;;  %v12927_v62 = vpop.permute.xlu0 %12926 }
 0x81d   : > { %v12930_v50 = vsel %vm12659_vm5, %v12925_v63, %v12927_v62  ;;  %v12931_v21 = vsel %vm12659_vm5, %v12927_v62, %v12929_v60  ;;  %v12987_v33 = vsel %vm12677_vm13, %v12982_v12, %v12984_v56 }
 0x81e   : > { %v12935_v17 = vadd.f32 %v12930_v50, %v12877_v61  ;;  %v12936_v34 = vadd.f32 %v12931_v21, %v12878_v13 }
 0x820   : > { %v13043_v39 = vpop.permute.xlu1 %13042  ;;  %v12986_v16 = vpop.permute.xlu0 %12985  ;;  %v12992_v31 = vadd.f32 %v12987_v33, %v12935_v17 }
 0x821   : > { %v12988_v18 = vsel %vm12677_vm13, %v12984_v56, %v12986_v16  ;;  %v12994_v29 = vadd.f32 %v12986_v16, %v12937_v2  ;;  %v13141_v2 = vunpack.c.0.s8 %v13140_v57 }
 0x822   : > { %v12993_v12 = vadd.f32 %v12988_v18, %v12936_v34 }
 0x823   : > { %v13051_v24 = vadd.f32 %v13043_v39, %v12994_v29 }
 0x824   : > { %v13098_v26 = vpop.permute.xlu1 %13097  ;;  %v13041_v6 = vpop.permute.xlu0 %13040 }
 0x825   : > { %v13044_v37 = vsel %vm12695_vm14, %v13039_v3, %v13041_v6  ;;  %v13045_v59 = vsel %vm12695_vm14, %v13041_v6, %v13043_v39  ;;  %v12783_v3 = vadd.f32 %v12772_v14, %v12736_v10  ;;  %v13101_v47 = vsel %vm12713_vm12, %v21169_v15, %v13098_v26 }
 0x826   : > { %v13049_v63 = vadd.f32 %v13044_v37, %v12992_v31  ;;  %v13050_v25 = vadd.f32 %v13045_v59, %v12993_v12  ;;  %v12782_v15 = vadd.f32 %v12774_v55, %v12735_v35 }
 0x828   : > { %v12833_v23 = vpop.permute.xlu1 %12832  ;;  %v13100_v38 = vpop.permute.xlu0 %13099  ;;  %v13106_v60 = vadd.f32 %v13101_v47, %v13049_v63 }
 0x829   : > { %v13102_v7 = vsel %vm12713_vm12, %v13098_v26, %v13100_v38  ;;  %v12841_v20 = vadd.f32 %v12833_v23, %v12783_v3  ;;  %v13108_v62 = vadd.f32 %v13100_v38, %v13051_v24 }
 0x82a   : > { %v13107_v56 = vadd.f32 %v13102_v7, %v13050_v25  ;;  %14507 = vrcp.f32 %v13106_v60 }
 0x82b   : > { %14509 = vrcp.f32 %v13108_v62 }
 0x82c   : > { %v12889_v36 = vpop.permute.xlu1 %12888  ;;  %v12831_v44 = vpop.permute.xlu0 %12830  ;;  %14511 = vrcp.f32 %v13107_v56 }
 0x82d   : > { %v12834_v0 = vsel %vm9513_vm15, %v21167_v46, %v12831_v44  ;;  %v12892_v58 = vsel %vm12641_vm3, %v21173_v43, %v12889_v36  ;;  %v12835_v14 = vsel %vm9513_vm15, %v12831_v44, %v12833_v23  ;;  %v13142_v23 = vlaneseq }
 0x82e   : > { %v12839_v27 = vadd.f32 %v12834_v0, %v12781_v54  ;;  %v12840_v53 = vadd.f32 %v12835_v14, %v12782_v15 }
 0x82f   : > { %v13143_v37 = vshrl.u32 %v13142_v23, 7  ;;  %vm13164_vm15 = vcmp.lt.s32.totalorder %v13142_v23, 288 }
 0x830   : > { %v12949_v45 = vpop.permute.xlu1 %12948  ;;  %v12891_v52 = vpop.permute.xlu0 %12890  ;;  %v12897_v28 = vadd.f32 %v12892_v58, %v12839_v27 }
 0x831   : > { %v12899_v48 = vadd.f32 %v12891_v52, %v12841_v20  ;;  %v12893_v39 = vsel %vm12641_vm3, %v12889_v36, %v12891_v52  ;;  %v13144_v10 = vsub.s32 %v13141_v2, %v13143_v37 }
 0x832   : > { %v12898_v40 = vadd.f32 %v12893_v39, %v12840_v53 }
 0x833   : > { %v12957_v43 = vadd.f32 %v12949_v45, %v12899_v48 }
 0x834   : > { %v13004_v41 = vpop.permute.xlu1 %13003  ;;  %v12947_v46 = vpop.permute.xlu0 %12946 }
 0x835   : > { %v12950_v16 = vsel %vm12659_vm5, %v21171_v42, %v12947_v46  ;;  %v12951_v6 = vsel %vm12659_vm5, %v12947_v46, %v12949_v45  ;;  %v13007_v22 = vsel %vm12677_vm13, %v21177_v5, %v13004_v41  ;;  %v14508_v44 = vpop.eup %14507 }
 0x836   : > { %v12955_v32 = vadd.f32 %v12950_v16, %v12897_v28  ;;  %v12956_v50 = vadd.f32 %v12951_v6, %v12898_v40 }
 0x838   : > { %v13063_v9 = vpop.permute.xlu1 %13062  ;;  %v13006_v26 = vpop.permute.xlu0 %13005  ;;  %v13012_v11 = vadd.f32 %v13007_v22, %v12955_v32 }
 0x839   : > { %v13008_v42 = vsel %vm12677_vm13, %v13004_v41, %v13006_v26  ;;  %v13014_v55 = vadd.f32 %v13006_v26, %v12957_v43 }
 0x83a   : > { %v13013_v17 = vadd.f32 %v13008_v42, %v12956_v50 }
 0x83b   : > { %v13071_v21 = vadd.f32 %v13063_v9, %v13014_v55 }
 0x83c   : > { %v13118_v1 = vpop.permute.xlu1 %13117  ;;  %v13061_v61 = vpop.permute.xlu0 %13060 }
 0x83d   : > { %v13064_v38 = vsel %vm12695_vm14, %v21175_v49, %v13061_v61  ;;  %v13065_v19 = vsel %vm12695_vm14, %v13061_v61, %v13063_v9  ;;  %v13121_v5 = vsel %vm12713_vm12, %v21179_v4, %v13118_v1  ;;  %v14510_v49 = vpop.eup %14509 }
 0x83e   : > { %v13069_v8 = vadd.f32 %v13064_v38, %v13012_v11  ;;  %v13070_v13 = vadd.f32 %v13065_v19, %v13013_v17  ;;  %v14512_v34 = vpop.eup %14511 }
 0x840   : > { %v13126_v33 = vadd.f32 %v13121_v5, %v13069_v8  ;;  %v13120_v36 = vpop.permute.xlu0 %13119 }
 0x841   : > { %v13122_v18 = vsel %vm12713_vm12, %v13118_v1, %v13120_v36  ;;  %v13128_v31 = vadd.f32 %v13120_v36, %v13071_v21 }
 0x842   : > { %v13127_v30 = vadd.f32 %v13122_v18, %v13070_v13  ;;  %v13132_v29 = vmul.f32 %v14508_v44, %v13126_v33 }
 0x843   : > { %v13134_v4 = vmul.f32 %v14510_v49, %v13128_v31 }
 0x844   : > { %v13133_v59 = vmul.f32 %v14512_v34, %v13127_v30 }
 0x845   : > { %v13152_v54 = vrot.slane %v13134_v4, %v13144_v10 }
 0x846   : > { %v13138_v63 = vcombine.low %v13132_v29, %v13133_v59 }
 0x848   : > { %v13145_v0 = vrot.slane %v13138_v63, %v13144_v10 }
 0x84a   : > { %v13153_v12 = vcombine.low %v13145_v0, %v13152_v54 }
 0x84c   : > { %v13160_v45 = vrot.slane %v13153_v12, %v13144_v10 }
 0x84e   : > { %13166 = vst.msk [vmem:[%s176_s27] sm:$0x7] %vm13164_vm15, %v13160_v45 }
 0x84f   : > { %14584 = shalt.err (!%p14581_p7)
}
 0x850   : > { %s14585_s22 = scalar_lea.hbm %s21228_s5, 48  ;;  %s14589_s26 = scalar_lea.hbm %s21274_s2, 96 }
 0x851   : > { %p14586_p9 = scmp.ne.s32.totalorder %s21228_s5, %s14585_s22  ;;  %p14590_p5 = scmp.lt.u32.totalorder %s21228_s5, %s21274_s2 }
 0x852   : > { %p14591_p11 = scmp.lt.u32.totalorder %s14589_s26, %s14585_s22  ;;  %p14593_p4 = scmp.lt.u32.totalorder %s14585_s22, %s21228_s5 }
 0x853   : > { %p14587_p2 = pnand %p14586_p9, %p14793_p12 }
 0x854   : > { %p14592_p1 = por %p14591_p11, %p14590_p5 }
 0x855   : > { %p14588_p0 = pneg %p14587_p2 }
 0x856   : > { %p14594_p6 = por %p14593_p4, %p14592_p1 }
 0x858   : > { %p14595_p8 = pnand %p14594_p6, %p14588_p0 }
 0x85a   : > { %14598 = shalt.err (!%p14595_p8)
}
 0x85b   : > { %14367 = dma.vmem_to_hbm [thread:$0]  (%p14793_p12), %s21230_s23, 48, %s21228_s5, %s13168_s6  }
 0x85c PF: > { %s23519_s3 = sld [smem:[#allocation14_spill]]  ;;  %s23520_s0 = sld [smem:[#allocation13_spill]] }
 0x85d   : > { %s13194_s1 = sand.u32 1, %s14629_s9  }
 0x85e   : > { %s13195_s10 = scalar_lea.sflag [#allocation4], %s13194_s1 }
 0x862   : > { %p23521_p10 = scmp.ne.s32.totalorder %s23519_s3, 0  ;;  %p23522_p13 = scmp.ge.s32.totalorder %s23520_s0, 2 }
 0x864   : > { %p14378_p3 = pnand %p23522_p13, %p23521_p10 }
 0x866   : > { %14624 = dma.done.wait (!%p14378_p3), %s13195_s10, 48  }
 0x867   : > { %14626 = vsyncadd (!%p14378_p3), %s13195_s10, 4294967248  ;;  %s23523_s12 = sld [smem:[#allocation15_spill]]  ;;  %s23524_s9 = sld [smem:[#allocation11_spill]] }
 0x868   : > { %s23525_s10 = sld [smem:[#allocation12_spill]]  ;;  %s23526_s11 = sld [smem:[#allocation16_spill]] }
 0x86d   : > { %p16_p7 = scmp.ge.s32.totalorder %s23523_s12, 4  }
 0x86f   :  { %18 = sbr.rel (!%p16_p7) target bundleno = 9 (0x9), region = 77 }
 0x876   :  { %13200 = vsyncpa [#allocation3], 1 }
 0x877   :  { %13202 = vsyncpa [#allocation3 + $0x1], 1 }
 0x878   :  { %13203 = vsyncpa [#allocation6], 1 }
 0x879   :  { %13204 = vsyncpa [#allocation4], 1 }
 0x87a   :  { %13206 = vsyncpa [#allocation4 + $0x1], 1 }

</bundles_post_ra>
